<compile_context>
chip_gen: v7x
topology: tpu7x:2x2x1
jax: 0.10.0
libtpu: 0.0.40
codegen_flags: <defaults>
</compile_context>

<pallas_src>
import jax
import jax.numpy as jnp
import numpy as np
from jax.experimental import pallas as pl
from jax.experimental.pallas import tpu as pltpu

_BIG = 1e30          # marker for "no opposite-class pixel" (>> any real squared distance)
_BIG_THRESH = 1e20   # anything above this means the class plane had no such pixel


# --------------------------------------------------------------------------- tiling heuristics
def _vmem_limit_bytes():
    # Per-generation scoped-VMEM ceiling with headroom below physical VMEM
    # (v5e/v6e: 128 MiB physical, v7x: 64 MiB).  Fallback is safe on every generation.
    try:
        cap = int(pltpu.get_tpu_info().vmem_capacity_bytes)
        return int(max(32 << 20, min(cap - (8 << 20), 100 << 20)))
    except Exception:
        return 56 << 20


def _choose_tbc(BC):
    # Bigger (b, c)-map groups amortize the per-chunk d2 recompute; prefer divisors of BC and
    # keep >= 2 grid steps when possible so the "parallel" axis can use both v7x TensorCores.
    for cand in (32, 16, 8):
        if BC % cand == 0 and BC // cand >= 2:
            return cand
    for cand in (32, 16, 8):
        if BC >= 2 * cand:
            return cand
    return 8


def _choose_src_chunk(N):
    # Largest power-of-two source chunk such that the ~4 live (SC, N) f32 temporaries stay
    # within a few MiB of VMEM, and SC divides N (sublane-aligned, SC >= 8).
    cap = max(8, min(512, (1 << 20) // max(N, 1)))
    for cand in (512, 256, 128, 64, 32, 16, 8):
        if cand <= cap and N % cand == 0:
            return cand
    return N   # ragged/odd pixel counts: single chunk


def _choose_tn(N, C):
    if N % 128 == 0:
        # Only 2 double-buffered f32 input streams (pred, dist) remain after the dist fusion:
        # 2 streams x 2 buffers x C x TN x 4 B, kept well under the per-call VMEM limit.
        cap = max(128, (24 << 20) // (16 * C))
        for cand in (16384, 8192, 4096, 2048, 1024, 512, 256, 128):
            if cand <= cap and N % cand == 0:
                return cand
    return N


# --------------------------------------------------------------------------- stage 1: fused EDT + dist
def _edt_dist_maps(maskS, W, vmem_limit):
    """maskS: (G, N, TBC) f32 source-pixel-major binary masks.  Returns dist (G*TBC, N) f32."""
    G, N, TBC = maskS.shape
    SC = _choose_src_chunk(N)
    n_chunks = N // SC
    w_f = float(W)

    # TODO(synk): replace the O(N^2) brute force with an exact separable (Felzenszwalb) EDT for
    # large H*W; the brute force is exact and VALU-bound at the sizes this kernel targets.
    def edt_dist_kernel(maskS_ref, dist_ref, min1_ref, min0_ref):
        # Running-min scratch persists across grid steps -> reset every step.
        min1_ref[...] = jnp.full((TBC, N), _BIG, dtype=jnp.float32)
        min0_ref[...] = jnp.full((TBC, N), _BIG, dtype=jnp.float32)

        # Target-pixel (lane) coordinates generated in-kernel: no coordinate input streams.
        # Float divide + floor avoids vector integer div/mod (exact for these magnitudes).
        it = jax.lax.broadcasted_iota(jnp.int32, (1, N), 1).astype(jnp.float32)
        ys_t = jnp.floor(it / w_f)                                  # (1, N)
        xs_t = it - ys_t * w_f

        def chunk_body(c, carry):
            c0 = c * SC
            if not isinstance(c0, int):
                c0 = pl.multiple_of(c0, SC)                         # aligned dynamic sublane start
            isrc = (jax.lax.broadcasted_iota(jnp.int32, (SC, 1), 0) + c0).astype(jnp.float32)
            ys_s = jnp.floor(isrc / w_f)                            # (SC, 1)
            xs_s = isrc - ys_s * w_f
            dy = ys_s - ys_t                                        # (SC, N)
            dx = xs_s - xs_t
            d2 = dy * dy + dx * dx                                  # on-the-fly pairwise sq. dists

            # All TBC source-mask columns for this chunk: one dense (SC, TBC) load.
            mtile = maskS_ref[pl.ds(c0, SC), :]

            # Small static map loop (TBC <= 32): keeps every ref index static; the source-pixel
            # chunking already bounds live temporaries to (SC, N), which was the concern with
            # the previous unbounded static unroll.
            for t in range(TBC):
                v = mtile[:, t:t + 1]                               # (SC, 1) source mask, map t
                m1c = jnp.min(d2 + (1.0 - v) * _BIG, axis=0, keepdims=True)   # (1, N)
                m0c = jnp.min(d2 + v * _BIG, axis=0, keepdims=True)
                min1_ref[pl.ds(t, 1), :] = jnp.minimum(min1_ref[pl.ds(t, 1), :], m1c)
                min0_ref[pl.ds(t, 1), :] = jnp.minimum(min0_ref[pl.ds(t, 1), :], m0c)
            return carry

        if n_chunks == 1:
            chunk_body(0, 0)
        else:
            jax.lax.fori_loop(0, n_chunks, chunk_body, 0)

        # Fused dist assembly: sqrt + empty-class guards, ONE dense lane/sublane-aligned store.
        # Same-class pixels already have min-sq-dist 0, so no target-orientation mask is needed;
        # min >= _BIG  <=>  that class has no pixel (matches `if mask.sum() > 0`, and the
        # degenerate all-foreground plane is guarded to 0 as documented).
        m1 = min1_ref[...]
        m0 = min0_ref[...]
        d_a = jnp.where(m1 < _BIG_THRESH, jnp.sqrt(m1), 0.0)        # EDT(mask==0): dist to fg
        d_b = jnp.where(m0 < _BIG_THRESH, jnp.sqrt(m0), 0.0)        # EDT(mask==1): dist to bg
        dist_ref[...] = d_a + d_b

    return pl.pallas_call(
        edt_dist_kernel,
        out_shape=jax.ShapeDtypeStruct((G * TBC, N), jnp.float32),
        grid=(G,),
        in_specs=[pl.BlockSpec((None, N, TBC), lambda g: (g, 0, 0))],
        out_specs=pl.BlockSpec((TBC, N), lambda g: (g, 0)),
        scratch_shapes=[pltpu.VMEM((TBC, N), jnp.float32),
                        pltpu.VMEM((TBC, N), jnp.float32)],
        compiler_params=pltpu.CompilerParams(
            dimension_semantics=("parallel",),
            vmem_limit_bytes=vmem_limit),
    )(maskS)


# --------------------------------------------------------------------------- stage 2: fused loss
def _loss_kernel(pred_ref, dist_ref, out_ref, acc_ref):
    """Per-batch partial sum of softmax(pred, C) * dist; classes on sublanes, pixels on lanes."""
    t = pl.program_id(1)

    @pl.when(t == 0)
    def _init():
        acc_ref[...] = jnp.zeros_like(acc_ref)

    p = pred_ref[...].astype(jnp.float32)                           # (C, TN)
    m = jnp.max(p, axis=0, keepdims=True)
    e = jnp.exp(p - m)
    inv = pl.reciprocal(jnp.sum(e, axis=0, keepdims=True), approx=True)   # EUP, frees VALU slots
    acc_ref[...] += (e * inv) * dist_ref[...]                       # resident VMEM accumulator

    @pl.when(t == pl.num_programs(1) - 1)
    def _finalize():
        s = jnp.sum(acc_ref[...], axis=1, keepdims=True)            # (C, 1) cross-lane (once)
        out_ref[...] = jnp.sum(s, axis=0, keepdims=True)            # (1, 1) cross-sublane (once)


def boundary_loss(pred, target, theta0=3.0, theta=5.0):
    # theta0 / theta are unused by the reference forward pass; kept for API parity.
    del theta0, theta
    B, C, H, W = pred.shape
    N = H * W
    BC = B * C
    vmem_limit = _vmem_limit_bytes()

    # ------------------------------ stage 1: fused EDT + dist maps -> (BC, N)
    TBC = _choose_tbc(BC)
    G = pl.cdiv(BC, TBC)
    BC_pad = G * TBC

    mask2 = target.astype(jnp.float32).reshape(BC, N)
    if BC_pad > BC:
        mask2 = jnp.concatenate(
            [mask2, jnp.zeros((BC_pad - BC, N), jnp.float32)], axis=0)
    # Source-pixel-major view (pixels on sublanes, maps on lanes): the kernel slices
    # (SRC_CHUNK, TBC) tiles directly, with no 128x lane padding of a (TBC, N, 1) block and
    # no in-kernel transpose.  One-time O(BC*N) XLA transpose, negligible vs O(N^2) EDT work.
    maskS = mask2.reshape(G, TBC, N).transpose(0, 2, 1)             # (G, N, TBC)

    dist = _edt_dist_maps(maskS, W, vmem_limit)                     # (BC_pad, N)

    # ------------------------------ stage 2: mean(softmax(pred, C) * dist)
    pred3 = pred.reshape(B, C, N)                                   # natural NCHW, pure reshapes
    dist3 = dist[:BC].reshape(B, C, N)

    TN = _choose_tn(N, C)
    pix_spec = pl.BlockSpec((None, C, TN), lambda b, t: (b, 0, t))
    # NOTE: with B == 1 the "parallel" batch axis has a single step and one v7x TensorCore
    # idles; splitting the pixel axis across cores would recover it (not needed at B >= 2).
    partials = pl.pallas_call(
        _loss_kernel,
        out_shape=jax.ShapeDtypeStruct((B, 1, 1), jnp.float32),
        grid=(B, N // TN),
        in_specs=[pix_spec, pix_spec],
        out_specs=pl.BlockSpec((None, 1, 1), lambda b, t: (b, 0, 0)),
        scratch_shapes=[pltpu.VMEM((C, TN), jnp.float32)],
        compiler_params=pltpu.CompilerParams(
            dimension_semantics=("parallel", "arbitrary"),
            vmem_limit_bytes=vmem_limit),
    )(pred3, dist3)

    return jnp.sum(partials) / float(B * C * H * W)                 # mean done in the wrapper


# --------------------------------------------------------------------------- pure-JAX/numpy reference
def reference_boundary_loss(pred, target):
    B, C, H, W = target.shape
    pred_soft = jax.nn.softmax(pred, axis=1)
    N = H * W
    idx = np.arange(N)
    ys = (idx // W).astype(np.float64)
    xs = (idx % W).astype(np.float64)
    d2 = (ys[:, None] - ys[None, :]) ** 2 + (xs[:, None] - xs[None, :]) ** 2
    tgt = np.asarray(target, dtype=np.float64).reshape(B * C, N)
    dist = np.zeros_like(tgt)
    big = 1e30
    for k in range(B * C):
        m = tgt[k]
        if m.sum() > 0:
            m1 = np.sqrt(np.min(np.where(m[None, :] > 0.5, d2, big), axis=1))
            m0 = np.sqrt(np.min(np.where(m[None, :] > 0.5, big, d2), axis=1))
            da = np.where(m < 0.5, m1, 0.0)
            db = np.where(m > 0.5, m0, 0.0) if (1.0 - m).sum() > 0 else 0.0
            dist[k] = da + db
    dist = jnp.asarray(dist.reshape(B, C, H, W), dtype=jnp.float32)
    return jnp.mean(pred_soft * dist)


if __name__ == "__main__":
    key = jax.random.PRNGKey(0)
    B, C, H, W = 2, 4, 16, 16
    k1, k2 = jax.random.split(key)

    pred = jax.random.normal(k1, (B, C, H, W), dtype=jnp.float32)
    labels = jax.random.randint(k2, (B, H, W), 0, C)
    target = jax.nn.one_hot(labels, C, axis=1, dtype=jnp.float32)   # one-hot [B, C, H, W]

    loss = jax.block_until_ready(boundary_loss(pred, target))
    ref = jax.block_until_ready(reference_boundary_loss(pred, target))

    # Loss-level tolerance: the softmax denominator uses the approximate EUP reciprocal.
    assert jnp.allclose(loss, ref, rtol=1e-3, atol=1e-5), (float(loss), float(ref))

    print("KERNEL_OK")
</pallas_src>

<mosaic_0001>
module attributes {stable_mosaic.version = 11 : i64} {
  func.func @edt_dist_kernel(%arg0: i32, %arg1: memref<1x256x8xf32, #tpu.memory_space<vmem>>, %arg2: memref<8x256xf32, #tpu.memory_space<vmem>>, %arg3: memref<8x256xf32, #tpu.memory_space<vmem>>, %arg4: memref<8x256xf32, #tpu.memory_space<vmem>>) attributes {dimension_semantics = [#tpu.dimension_semantics<parallel>], iteration_bounds = array<i64: 1>, scalar_prefetch = 0 : i64, scratch_operands = 2 : i64, tpu.core_type = #tpu.core_type<tc>, window_params = [{transform_indices = @transform_0, window_bounds = array<i64: 1, 256, 8>}, {transform_indices = @transform_1, window_bounds = array<i64: 8, 256>}]} {
    %cst = arith.constant 1.000000e+30 : f32
    %0 = vector.broadcast %cst : f32 to vector<8x256xf32>
    %c0 = arith.constant 0 : index
    %c0_0 = arith.constant 0 : index
    %1 = vector.load %arg3[%c0, %c0_0] : memref<8x256xf32, #tpu.memory_space<vmem>>, vector<8x256xf32>
    tpu.vector_store %arg3[%c0, %c0_0], %0 {strides = array<i32>} : memref<8x256xf32, #tpu.memory_space<vmem>>, vector<8x256xf32>,
    %cst_1 = arith.constant 1.000000e+30 : f32
    %2 = vector.broadcast %cst_1 : f32 to vector<8x256xf32>
    %c0_2 = arith.constant 0 : index
    %c0_3 = arith.constant 0 : index
    %3 = vector.load %arg4[%c0_2, %c0_3] : memref<8x256xf32, #tpu.memory_space<vmem>>, vector<8x256xf32>
    tpu.vector_store %arg4[%c0_2, %c0_3], %2 {strides = array<i32>} : memref<8x256xf32, #tpu.memory_space<vmem>>, vector<8x256xf32>,
    %4 = tpu.iota {dimensions = array<i32: 1>} : vector<1x256xi32>
    %5 = arith.sitofp %4 : vector<1x256xi32> to vector<1x256xf32>
    %cst_4 = arith.constant 1.600000e+01 : f32
    %6 = vector.broadcast %cst_4 : f32 to vector<1x256xf32>
    %7 = arith.divf %5, %6 : vector<1x256xf32>
    %8 = math.floor %7 : vector<1x256xf32>
    %cst_5 = arith.constant 1.600000e+01 : f32
    %9 = vector.broadcast %cst_5 : f32 to vector<1x256xf32>
    %10 = arith.mulf %8, %9 : vector<1x256xf32>
    %11 = arith.subf %5, %10 : vector<1x256xf32>
    %12 = tpu.iota {dimensions = array<i32: 0>} : vector<256x1xi32>
    %c0_i32 = arith.constant 0 : i32
    %13 = vector.broadcast %c0_i32 : i32 to vector<256x1xi32>
    %14 = arith.addi %12, %13 : vector<256x1xi32>
    %15 = arith.sitofp %14 : vector<256x1xi32> to vector<256x1xf32>
    %cst_6 = arith.constant 1.600000e+01 : f32
    %16 = vector.broadcast %cst_6 : f32 to vector<256x1xf32>
    %17 = arith.divf %15, %16 : vector<256x1xf32>
    %18 = math.floor %17 : vector<256x1xf32>
    %cst_7 = arith.constant 1.600000e+01 : f32
    %19 = vector.broadcast %cst_7 : f32 to vector<256x1xf32>
    %20 = arith.mulf %18, %19 : vector<256x1xf32>
    %21 = arith.subf %15, %20 : vector<256x1xf32>
    %22 = vector.broadcast %18 : vector<256x1xf32> to vector<256x256xf32>
    %23 = vector.broadcast %8 : vector<1x256xf32> to vector<256x256xf32>
    %24 = arith.subf %22, %23 : vector<256x256xf32>
    %25 = vector.broadcast %21 : vector<256x1xf32> to vector<256x256xf32>
    %26 = vector.broadcast %11 : vector<1x256xf32> to vector<256x256xf32>
    %27 = arith.subf %25, %26 : vector<256x256xf32>
    %28 = arith.mulf %24, %24 : vector<256x256xf32>
    %29 = arith.mulf %27, %27 : vector<256x256xf32>
    %30 = arith.addf %28, %29 : vector<256x256xf32>
    %c0_8 = arith.constant 0 : index
    %c0_9 = arith.constant 0 : index
    %c0_10 = arith.constant 0 : index
    %31 = vector.load %arg1[%c0_8, %c0_9, %c0_10] : memref<1x256x8xf32, #tpu.memory_space<vmem>>, vector<1x256x8xf32>
    %32 = vector.shape_cast %31 : vector<1x256x8xf32> to vector<256x8xf32>
    %33 = vector.extract_strided_slice %32 {offsets = [0, 0], sizes = [256, 1], strides = [1, 1]} : vector<256x8xf32> to vector<256x1xf32>
    %cst_11 = arith.constant 1.000000e+00 : f32
    %34 = vector.broadcast %cst_11 : f32 to vector<256x1xf32>
    %35 = arith.subf %34, %33 : vector<256x1xf32>
    %cst_12 = arith.constant 1.000000e+30 : f32
    %36 = vector.broadcast %cst_12 : f32 to vector<256x1xf32>
    %37 = arith.mulf %35, %36 : vector<256x1xf32>
    %38 = vector.broadcast %37 : vector<256x1xf32> to vector<256x256xf32>
    %39 = arith.addf %30, %38 : vector<256x256xf32>
    %cst_13 = arith.constant dense<0x7F800000> : vector<256xf32>
    %40 = vector.multi_reduction <minimumf>, %39, %cst_13 [0] : vector<256x256xf32> to vector<256xf32>
    %41 = vector.shape_cast %40 : vector<256xf32> to vector<1x256xf32>
    %cst_14 = arith.constant 1.000000e+30 : f32
    %42 = vector.broadcast %cst_14 : f32 to vector<256x1xf32>
    %43 = arith.mulf %33, %42 : vector<256x1xf32>
    %44 = vector.broadcast %43 : vector<256x1xf32> to vector<256x256xf32>
    %45 = arith.addf %30, %44 : vector<256x256xf32>
    %cst_15 = arith.constant dense<0x7F800000> : vector<256xf32>
    %46 = vector.multi_reduction <minimumf>, %45, %cst_15 [0] : vector<256x256xf32> to vector<256xf32>
    %47 = vector.shape_cast %46 : vector<256xf32> to vector<1x256xf32>
    %c0_16 = arith.constant 0 : index
    %c0_17 = arith.constant 0 : index
    %48 = vector.load %arg3[%c0_16, %c0_17] : memref<8x256xf32, #tpu.memory_space<vmem>>, vector<1x256xf32>
    %49 = arith.minimumf %48, %41 : vector<1x256xf32>
    %c0_18 = arith.constant 0 : index
    %c0_19 = arith.constant 0 : index
    %50 = vector.load %arg3[%c0_18, %c0_19] : memref<8x256xf32, #tpu.memory_space<vmem>>, vector<1x256xf32>
    tpu.vector_store %arg3[%c0_18, %c0_19], %49 {strides = array<i32>} : memref<8x256xf32, #tpu.memory_space<vmem>>, vector<1x256xf32>,
    %c0_20 = arith.constant 0 : index
    %c0_21 = arith.constant 0 : index
    %51 = vector.load %arg4[%c0_20, %c0_21] : memref<8x256xf32, #tpu.memory_space<vmem>>, vector<1x256xf32>
    %52 = arith.minimumf %51, %47 : vector<1x256xf32>
    %c0_22 = arith.constant 0 : index
    %c0_23 = arith.constant 0 : index
    %53 = vector.load %arg4[%c0_22, %c0_23] : memref<8x256xf32, #tpu.memory_space<vmem>>, vector<1x256xf32>
    tpu.vector_store %arg4[%c0_22, %c0_23], %52 {strides = array<i32>} : memref<8x256xf32, #tpu.memory_space<vmem>>, vector<1x256xf32>,
    %54 = vector.extract_strided_slice %32 {offsets = [0, 1], sizes = [256, 1], strides = [1, 1]} : vector<256x8xf32> to vector<256x1xf32>
    %cst_24 = arith.constant 1.000000e+00 : f32
    %55 = vector.broadcast %cst_24 : f32 to vector<256x1xf32>
    %56 = arith.subf %55, %54 : vector<256x1xf32>
    %cst_25 = arith.constant 1.000000e+30 : f32
    %57 = vector.broadcast %cst_25 : f32 to vector<256x1xf32>
    %58 = arith.mulf %56, %57 : vector<256x1xf32>
    %59 = vector.broadcast %58 : vector<256x1xf32> to vector<256x256xf32>
    %60 = arith.addf %30, %59 : vector<256x256xf32>
    %cst_26 = arith.constant dense<0x7F800000> : vector<256xf32>
    %61 = vector.multi_reduction <minimumf>, %60, %cst_26 [0] : vector<256x256xf32> to vector<256xf32>
    %62 = vector.shape_cast %61 : vector<256xf32> to vector<1x256xf32>
    %cst_27 = arith.constant 1.000000e+30 : f32
    %63 = vector.broadcast %cst_27 : f32 to vector<256x1xf32>
    %64 = arith.mulf %54, %63 : vector<256x1xf32>
    %65 = vector.broadcast %64 : vector<256x1xf32> to vector<256x256xf32>
    %66 = arith.addf %30, %65 : vector<256x256xf32>
    %cst_28 = arith.constant dense<0x7F800000> : vector<256xf32>
    %67 = vector.multi_reduction <minimumf>, %66, %cst_28 [0] : vector<256x256xf32> to vector<256xf32>
    %68 = vector.shape_cast %67 : vector<256xf32> to vector<1x256xf32>
    %c1 = arith.constant 1 : index
    %c0_29 = arith.constant 0 : index
    %69 = vector.load %arg3[%c1, %c0_29] : memref<8x256xf32, #tpu.memory_space<vmem>>, vector<1x256xf32>
    %70 = arith.minimumf %69, %62 : vector<1x256xf32>
    %c1_30 = arith.constant 1 : index
    %c0_31 = arith.constant 0 : index
    %71 = vector.load %arg3[%c1_30, %c0_31] : memref<8x256xf32, #tpu.memory_space<vmem>>, vector<1x256xf32>
    tpu.vector_store %arg3[%c1_30, %c0_31], %70 {strides = array<i32>} : memref<8x256xf32, #tpu.memory_space<vmem>>, vector<1x256xf32>,
    %c1_32 = arith.constant 1 : index
    %c0_33 = arith.constant 0 : index
    %72 = vector.load %arg4[%c1_32, %c0_33] : memref<8x256xf32, #tpu.memory_space<vmem>>, vector<1x256xf32>
    %73 = arith.minimumf %72, %68 : vector<1x256xf32>
    %c1_34 = arith.constant 1 : index
    %c0_35 = arith.constant 0 : index
    %74 = vector.load %arg4[%c1_34, %c0_35] : memref<8x256xf32, #tpu.memory_space<vmem>>, vector<1x256xf32>
    tpu.vector_store %arg4[%c1_34, %c0_35], %73 {strides = array<i32>} : memref<8x256xf32, #tpu.memory_space<vmem>>, vector<1x256xf32>,
    %75 = vector.extract_strided_slice %32 {offsets = [0, 2], sizes = [256, 1], strides = [1, 1]} : vector<256x8xf32> to vector<256x1xf32>
    %cst_36 = arith.constant 1.000000e+00 : f32
    %76 = vector.broadcast %cst_36 : f32 to vector<256x1xf32>
    %77 = arith.subf %76, %75 : vector<256x1xf32>
    %cst_37 = arith.constant 1.000000e+30 : f32
    %78 = vector.broadcast %cst_37 : f32 to vector<256x1xf32>
    %79 = arith.mulf %77, %78 : vector<256x1xf32>
    %80 = vector.broadcast %79 : vector<256x1xf32> to vector<256x256xf32>
    %81 = arith.addf %30, %80 : vector<256x256xf32>
    %cst_38 = arith.constant dense<0x7F800000> : vector<256xf32>
    %82 = vector.multi_reduction <minimumf>, %81, %cst_38 [0] : vector<256x256xf32> to vector<256xf32>
    %83 = vector.shape_cast %82 : vector<256xf32> to vector<1x256xf32>
    %cst_39 = arith.constant 1.000000e+30 : f32
    %84 = vector.broadcast %cst_39 : f32 to vector<256x1xf32>
    %85 = arith.mulf %75, %84 : vector<256x1xf32>
    %86 = vector.broadcast %85 : vector<256x1xf32> to vector<256x256xf32>
    %87 = arith.addf %30, %86 : vector<256x256xf32>
    %cst_40 = arith.constant dense<0x7F800000> : vector<256xf32>
    %88 = vector.multi_reduction <minimumf>, %87, %cst_40 [0] : vector<256x256xf32> to vector<256xf32>
    %89 = vector.shape_cast %88 : vector<256xf32> to vector<1x256xf32>
    %c2 = arith.constant 2 : index
    %c0_41 = arith.constant 0 : index
    %90 = vector.load %arg3[%c2, %c0_41] : memref<8x256xf32, #tpu.memory_space<vmem>>, vector<1x256xf32>
    %91 = arith.minimumf %90, %83 : vector<1x256xf32>
    %c2_42 = arith.constant 2 : index
    %c0_43 = arith.constant 0 : index
    %92 = vector.load %arg3[%c2_42, %c0_43] : memref<8x256xf32, #tpu.memory_space<vmem>>, vector<1x256xf32>
    tpu.vector_store %arg3[%c2_42, %c0_43], %91 {strides = array<i32>} : memref<8x256xf32, #tpu.memory_space<vmem>>, vector<1x256xf32>,
    %c2_44 = arith.constant 2 : index
    %c0_45 = arith.constant 0 : index
    %93 = vector.load %arg4[%c2_44, %c0_45] : memref<8x256xf32, #tpu.memory_space<vmem>>, vector<1x256xf32>
    %94 = arith.minimumf %93, %89 : vector<1x256xf32>
    %c2_46 = arith.constant 2 : index
    %c0_47 = arith.constant 0 : index
    %95 = vector.load %arg4[%c2_46, %c0_47] : memref<8x256xf32, #tpu.memory_space<vmem>>, vector<1x256xf32>
    tpu.vector_store %arg4[%c2_46, %c0_47], %94 {strides = array<i32>} : memref<8x256xf32, #tpu.memory_space<vmem>>, vector<1x256xf32>,
    %96 = vector.extract_strided_slice %32 {offsets = [0, 3], sizes = [256, 1], strides = [1, 1]} : vector<256x8xf32> to vector<256x1xf32>
    %cst_48 = arith.constant 1.000000e+00 : f32
    %97 = vector.broadcast %cst_48 : f32 to vector<256x1xf32>
    %98 = arith.subf %97, %96 : vector<256x1xf32>
    %cst_49 = arith.constant 1.000000e+30 : f32
    %99 = vector.broadcast %cst_49 : f32 to vector<256x1xf32>
    %100 = arith.mulf %98, %99 : vector<256x1xf32>
    %101 = vector.broadcast %100 : vector<256x1xf32> to vector<256x256xf32>
    %102 = arith.addf %30, %101 : vector<256x256xf32>
    %cst_50 = arith.constant dense<0x7F800000> : vector<256xf32>
    %103 = vector.multi_reduction <minimumf>, %102, %cst_50 [0] : vector<256x256xf32> to vector<256xf32>
    %104 = vector.shape_cast %103 : vector<256xf32> to vector<1x256xf32>
    %cst_51 = arith.constant 1.000000e+30 : f32
    %105 = vector.broadcast %cst_51 : f32 to vector<256x1xf32>
    %106 = arith.mulf %96, %105 : vector<256x1xf32>
    %107 = vector.broadcast %106 : vector<256x1xf32> to vector<256x256xf32>
    %108 = arith.addf %30, %107 : vector<256x256xf32>
    %cst_52 = arith.constant dense<0x7F800000> : vector<256xf32>
    %109 = vector.multi_reduction <minimumf>, %108, %cst_52 [0] : vector<256x256xf32> to vector<256xf32>
    %110 = vector.shape_cast %109 : vector<256xf32> to vector<1x256xf32>
    %c3 = arith.constant 3 : index
    %c0_53 = arith.constant 0 : index
    %111 = vector.load %arg3[%c3, %c0_53] : memref<8x256xf32, #tpu.memory_space<vmem>>, vector<1x256xf32>
    %112 = arith.minimumf %111, %104 : vector<1x256xf32>
    %c3_54 = arith.constant 3 : index
    %c0_55 = arith.constant 0 : index
    %113 = vector.load %arg3[%c3_54, %c0_55] : memref<8x256xf32, #tpu.memory_space<vmem>>, vector<1x256xf32>
    tpu.vector_store %arg3[%c3_54, %c0_55], %112 {strides = array<i32>} : memref<8x256xf32, #tpu.memory_space<vmem>>, vector<1x256xf32>,
    %c3_56 = arith.constant 3 : index
    %c0_57 = arith.constant 0 : index
    %114 = vector.load %arg4[%c3_56, %c0_57] : memref<8x256xf32, #tpu.memory_space<vmem>>, vector<1x256xf32>
    %115 = arith.minimumf %114, %110 : vector<1x256xf32>
    %c3_58 = arith.constant 3 : index
    %c0_59 = arith.constant 0 : index
    %116 = vector.load %arg4[%c3_58, %c0_59] : memref<8x256xf32, #tpu.memory_space<vmem>>, vector<1x256xf32>
    tpu.vector_store %arg4[%c3_58, %c0_59], %115 {strides = array<i32>} : memref<8x256xf32, #tpu.memory_space<vmem>>, vector<1x256xf32>,
    %117 = vector.extract_strided_slice %32 {offsets = [0, 4], sizes = [256, 1], strides = [1, 1]} : vector<256x8xf32> to vector<256x1xf32>
    %cst_60 = arith.constant 1.000000e+00 : f32
    %118 = vector.broadcast %cst_60 : f32 to vector<256x1xf32>
    %119 = arith.subf %118, %117 : vector<256x1xf32>
    %cst_61 = arith.constant 1.000000e+30 : f32
    %120 = vector.broadcast %cst_61 : f32 to vector<256x1xf32>
    %121 = arith.mulf %119, %120 : vector<256x1xf32>
    %122 = vector.broadcast %121 : vector<256x1xf32> to vector<256x256xf32>
    %123 = arith.addf %30, %122 : vector<256x256xf32>
    %cst_62 = arith.constant dense<0x7F800000> : vector<256xf32>
    %124 = vector.multi_reduction <minimumf>, %123, %cst_62 [0] : vector<256x256xf32> to vector<256xf32>
    %125 = vector.shape_cast %124 : vector<256xf32> to vector<1x256xf32>
    %cst_63 = arith.constant 1.000000e+30 : f32
    %126 = vector.broadcast %cst_63 : f32 to vector<256x1xf32>
    %127 = arith.mulf %117, %126 : vector<256x1xf32>
    %128 = vector.broadcast %127 : vector<256x1xf32> to vector<256x256xf32>
    %129 = arith.addf %30, %128 : vector<256x256xf32>
    %cst_64 = arith.constant dense<0x7F800000> : vector<256xf32>
    %130 = vector.multi_reduction <minimumf>, %129, %cst_64 [0] : vector<256x256xf32> to vector<256xf32>
    %131 = vector.shape_cast %130 : vector<256xf32> to vector<1x256xf32>
    %c4 = arith.constant 4 : index
    %c0_65 = arith.constant 0 : index
    %132 = vector.load %arg3[%c4, %c0_65] : memref<8x256xf32, #tpu.memory_space<vmem>>, vector<1x256xf32>
    %133 = arith.minimumf %132, %125 : vector<1x256xf32>
    %c4_66 = arith.constant 4 : index
    %c0_67 = arith.constant 0 : index
    %134 = vector.load %arg3[%c4_66, %c0_67] : memref<8x256xf32, #tpu.memory_space<vmem>>, vector<1x256xf32>
    tpu.vector_store %arg3[%c4_66, %c0_67], %133 {strides = array<i32>} : memref<8x256xf32, #tpu.memory_space<vmem>>, vector<1x256xf32>,
    %c4_68 = arith.constant 4 : index
    %c0_69 = arith.constant 0 : index
    %135 = vector.load %arg4[%c4_68, %c0_69] : memref<8x256xf32, #tpu.memory_space<vmem>>, vector<1x256xf32>
    %136 = arith.minimumf %135, %131 : vector<1x256xf32>
    %c4_70 = arith.constant 4 : index
    %c0_71 = arith.constant 0 : index
    %137 = vector.load %arg4[%c4_70, %c0_71] : memref<8x256xf32, #tpu.memory_space<vmem>>, vector<1x256xf32>
    tpu.vector_store %arg4[%c4_70, %c0_71], %136 {strides = array<i32>} : memref<8x256xf32, #tpu.memory_space<vmem>>, vector<1x256xf32>,
    %138 = vector.extract_strided_slice %32 {offsets = [0, 5], sizes = [256, 1], strides = [1, 1]} : vector<256x8xf32> to vector<256x1xf32>
    %cst_72 = arith.constant 1.000000e+00 : f32
    %139 = vector.broadcast %cst_72 : f32 to vector<256x1xf32>
    %140 = arith.subf %139, %138 : vector<256x1xf32>
    %cst_73 = arith.constant 1.000000e+30 : f32
    %141 = vector.broadcast %cst_73 : f32 to vector<256x1xf32>
    %142 = arith.mulf %140, %141 : vector<256x1xf32>
    %143 = vector.broadcast %142 : vector<256x1xf32> to vector<256x256xf32>
    %144 = arith.addf %30, %143 : vector<256x256xf32>
    %cst_74 = arith.constant dense<0x7F800000> : vector<256xf32>
    %145 = vector.multi_reduction <minimumf>, %144, %cst_74 [0] : vector<256x256xf32> to vector<256xf32>
    %146 = vector.shape_cast %145 : vector<256xf32> to vector<1x256xf32>
    %cst_75 = arith.constant 1.000000e+30 : f32
    %147 = vector.broadcast %cst_75 : f32 to vector<256x1xf32>
    %148 = arith.mulf %138, %147 : vector<256x1xf32>
    %149 = vector.broadcast %148 : vector<256x1xf32> to vector<256x256xf32>
    %150 = arith.addf %30, %149 : vector<256x256xf32>
    %cst_76 = arith.constant dense<0x7F800000> : vector<256xf32>
    %151 = vector.multi_reduction <minimumf>, %150, %cst_76 [0] : vector<256x256xf32> to vector<256xf32>
    %152 = vector.shape_cast %151 : vector<256xf32> to vector<1x256xf32>
    %c5 = arith.constant 5 : index
    %c0_77 = arith.constant 0 : index
    %153 = vector.load %arg3[%c5, %c0_77] : memref<8x256xf32, #tpu.memory_space<vmem>>, vector<1x256xf32>
    %154 = arith.minimumf %153, %146 : vector<1x256xf32>
    %c5_78 = arith.constant 5 : index
    %c0_79 = arith.constant 0 : index
    %155 = vector.load %arg3[%c5_78, %c0_79] : memref<8x256xf32, #tpu.memory_space<vmem>>, vector<1x256xf32>
    tpu.vector_store %arg3[%c5_78, %c0_79], %154 {strides = array<i32>} : memref<8x256xf32, #tpu.memory_space<vmem>>, vector<1x256xf32>,
    %c5_80 = arith.constant 5 : index
    %c0_81 = arith.constant 0 : index
    %156 = vector.load %arg4[%c5_80, %c0_81] : memref<8x256xf32, #tpu.memory_space<vmem>>, vector<1x256xf32>
    %157 = arith.minimumf %156, %152 : vector<1x256xf32>
    %c5_82 = arith.constant 5 : index
    %c0_83 = arith.constant 0 : index
    %158 = vector.load %arg4[%c5_82, %c0_83] : memref<8x256xf32, #tpu.memory_space<vmem>>, vector<1x256xf32>
    tpu.vector_store %arg4[%c5_82, %c0_83], %157 {strides = array<i32>} : memref<8x256xf32, #tpu.memory_space<vmem>>, vector<1x256xf32>,
    %159 = vector.extract_strided_slice %32 {offsets = [0, 6], sizes = [256, 1], strides = [1, 1]} : vector<256x8xf32> to vector<256x1xf32>
    %cst_84 = arith.constant 1.000000e+00 : f32
    %160 = vector.broadcast %cst_84 : f32 to vector<256x1xf32>
    %161 = arith.subf %160, %159 : vector<256x1xf32>
    %cst_85 = arith.constant 1.000000e+30 : f32
    %162 = vector.broadcast %cst_85 : f32 to vector<256x1xf32>
    %163 = arith.mulf %161, %162 : vector<256x1xf32>
    %164 = vector.broadcast %163 : vector<256x1xf32> to vector<256x256xf32>
    %165 = arith.addf %30, %164 : vector<256x256xf32>
    %cst_86 = arith.constant dense<0x7F800000> : vector<256xf32>
    %166 = vector.multi_reduction <minimumf>, %165, %cst_86 [0] : vector<256x256xf32> to vector<256xf32>
    %167 = vector.shape_cast %166 : vector<256xf32> to vector<1x256xf32>
    %cst_87 = arith.constant 1.000000e+30 : f32
    %168 = vector.broadcast %cst_87 : f32 to vector<256x1xf32>
    %169 = arith.mulf %159, %168 : vector<256x1xf32>
    %170 = vector.broadcast %169 : vector<256x1xf32> to vector<256x256xf32>
    %171 = arith.addf %30, %170 : vector<256x256xf32>
    %cst_88 = arith.constant dense<0x7F800000> : vector<256xf32>
    %172 = vector.multi_reduction <minimumf>, %171, %cst_88 [0] : vector<256x256xf32> to vector<256xf32>
    %173 = vector.shape_cast %172 : vector<256xf32> to vector<1x256xf32>
    %c6 = arith.constant 6 : index
    %c0_89 = arith.constant 0 : index
    %174 = vector.load %arg3[%c6, %c0_89] : memref<8x256xf32, #tpu.memory_space<vmem>>, vector<1x256xf32>
    %175 = arith.minimumf %174, %167 : vector<1x256xf32>
    %c6_90 = arith.constant 6 : index
    %c0_91 = arith.constant 0 : index
    %176 = vector.load %arg3[%c6_90, %c0_91] : memref<8x256xf32, #tpu.memory_space<vmem>>, vector<1x256xf32>
    tpu.vector_store %arg3[%c6_90, %c0_91], %175 {strides = array<i32>} : memref<8x256xf32, #tpu.memory_space<vmem>>, vector<1x256xf32>,
    %c6_92 = arith.constant 6 : index
    %c0_93 = arith.constant 0 : index
    %177 = vector.load %arg4[%c6_92, %c0_93] : memref<8x256xf32, #tpu.memory_space<vmem>>, vector<1x256xf32>
    %178 = arith.minimumf %177, %173 : vector<1x256xf32>
    %c6_94 = arith.constant 6 : index
    %c0_95 = arith.constant 0 : index
    %179 = vector.load %arg4[%c6_94, %c0_95] : memref<8x256xf32, #tpu.memory_space<vmem>>, vector<1x256xf32>
    tpu.vector_store %arg4[%c6_94, %c0_95], %178 {strides = array<i32>} : memref<8x256xf32, #tpu.memory_space<vmem>>, vector<1x256xf32>,
    %180 = vector.extract_strided_slice %32 {offsets = [0, 7], sizes = [256, 1], strides = [1, 1]} : vector<256x8xf32> to vector<256x1xf32>
    %cst_96 = arith.constant 1.000000e+00 : f32
    %181 = vector.broadcast %cst_96 : f32 to vector<256x1xf32>
    %182 = arith.subf %181, %180 : vector<256x1xf32>
    %cst_97 = arith.constant 1.000000e+30 : f32
    %183 = vector.broadcast %cst_97 : f32 to vector<256x1xf32>
    %184 = arith.mulf %182, %183 : vector<256x1xf32>
    %185 = vector.broadcast %184 : vector<256x1xf32> to vector<256x256xf32>
    %186 = arith.addf %30, %185 : vector<256x256xf32>
    %cst_98 = arith.constant dense<0x7F800000> : vector<256xf32>
    %187 = vector.multi_reduction <minimumf>, %186, %cst_98 [0] : vector<256x256xf32> to vector<256xf32>
    %188 = vector.shape_cast %187 : vector<256xf32> to vector<1x256xf32>
    %cst_99 = arith.constant 1.000000e+30 : f32
    %189 = vector.broadcast %cst_99 : f32 to vector<256x1xf32>
    %190 = arith.mulf %180, %189 : vector<256x1xf32>
    %191 = vector.broadcast %190 : vector<256x1xf32> to vector<256x256xf32>
    %192 = arith.addf %30, %191 : vector<256x256xf32>
    %cst_100 = arith.constant dense<0x7F800000> : vector<256xf32>
    %193 = vector.multi_reduction <minimumf>, %192, %cst_100 [0] : vector<256x256xf32> to vector<256xf32>
    %194 = vector.shape_cast %193 : vector<256xf32> to vector<1x256xf32>
    %c7 = arith.constant 7 : index
    %c0_101 = arith.constant 0 : index
    %195 = vector.load %arg3[%c7, %c0_101] : memref<8x256xf32, #tpu.memory_space<vmem>>, vector<1x256xf32>
    %196 = arith.minimumf %195, %188 : vector<1x256xf32>
    %c7_102 = arith.constant 7 : index
    %c0_103 = arith.constant 0 : index
    %197 = vector.load %arg3[%c7_102, %c0_103] : memref<8x256xf32, #tpu.memory_space<vmem>>, vector<1x256xf32>
    tpu.vector_store %arg3[%c7_102, %c0_103], %196 {strides = array<i32>} : memref<8x256xf32, #tpu.memory_space<vmem>>, vector<1x256xf32>,
    %c7_104 = arith.constant 7 : index
    %c0_105 = arith.constant 0 : index
    %198 = vector.load %arg4[%c7_104, %c0_105] : memref<8x256xf32, #tpu.memory_space<vmem>>, vector<1x256xf32>
    %199 = arith.minimumf %198, %194 : vector<1x256xf32>
    %c7_106 = arith.constant 7 : index
    %c0_107 = arith.constant 0 : index
    %200 = vector.load %arg4[%c7_106, %c0_107] : memref<8x256xf32, #tpu.memory_space<vmem>>, vector<1x256xf32>
    tpu.vector_store %arg4[%c7_106, %c0_107], %199 {strides = array<i32>} : memref<8x256xf32, #tpu.memory_space<vmem>>, vector<1x256xf32>,
    %c0_108 = arith.constant 0 : index
    %c0_109 = arith.constant 0 : index
    %201 = vector.load %arg3[%c0_108, %c0_109] : memref<8x256xf32, #tpu.memory_space<vmem>>, vector<8x256xf32>
    %c0_110 = arith.constant 0 : index
    %c0_111 = arith.constant 0 : index
    %202 = vector.load %arg4[%c0_110, %c0_111] : memref<8x256xf32, #tpu.memory_space<vmem>>, vector<8x256xf32>
    %cst_112 = arith.constant 1.000000e+20 : f32
    %203 = vector.broadcast %cst_112 : f32 to vector<8x256xf32>
    %204 = arith.cmpf olt, %201, %203 : vector<8x256xf32>
    %205 = math.sqrt %201 : vector<8x256xf32>
    %cst_113 = arith.constant 0.000000e+00 : f32
    %206 = vector.broadcast %cst_113 : f32 to vector<8x256xf32>
    %207 = arith.select %204, %205, %206 : vector<8x256xi1>, vector<8x256xf32>
    %cst_114 = arith.constant 1.000000e+20 : f32
    %208 = vector.broadcast %cst_114 : f32 to vector<8x256xf32>
    %209 = arith.cmpf olt, %202, %208 : vector<8x256xf32>
    %210 = math.sqrt %202 : vector<8x256xf32>
    %cst_115 = arith.constant 0.000000e+00 : f32
    %211 = vector.broadcast %cst_115 : f32 to vector<8x256xf32>
    %212 = arith.select %209, %210, %211 : vector<8x256xi1>, vector<8x256xf32>
    %213 = arith.addf %207, %212 : vector<8x256xf32>
    %c0_116 = arith.constant 0 : index
    %c0_117 = arith.constant 0 : index
    %214 = vector.load %arg2[%c0_116, %c0_117] : memref<8x256xf32, #tpu.memory_space<vmem>>, vector<8x256xf32>
    tpu.vector_store %arg2[%c0_116, %c0_117], %213 {strides = array<i32>} : memref<8x256xf32, #tpu.memory_space<vmem>>, vector<8x256xf32>,
    return
  }
  func.func @transform_0(%arg0: i32) -> (i32, i32, i32) {
    %c0_i32 = arith.constant 0 : i32
    %c0_i32_0 = arith.constant 0 : i32
    %c0_i32_1 = arith.constant 0 : i32
    return %arg0, %c0_i32, %c0_i32_0 : i32, i32, i32
  }
  func.func @transform_1(%arg0: i32) -> (i32, i32) {
    %c0_i32 = arith.constant 0 : i32
    %c0_i32_0 = arith.constant 0 : i32
    return %arg0, %c0_i32 : i32, i32
  }
}

</mosaic_0001>

<bundles_post_ra>
// kernel: tpu_custom_call.1
= control target key start
LH: loop header
LB: loop body
LE: loop exit
PB: predicated region body
PF: predicated region fallthrough
CT: control target
= control target key end

     0   :  { %v5475_v3 = vmov 0   ;;  %v8726_v57 = vlaneseq  ;;  %s8724_s0 = inlined_call_operand.vmem [shape: f32[1,256,8], index: 0, kind: input, shape index: {}]   ;;  %s8725_s1 = inlined_call_operand.hbm [shape: f32[8,256], index: 1, kind: output, shape index: {}]  }
   0x1   :  { %v5499_v0 = vld [vmem:[%s8724_s0 + $0x10] sm:$0xff]  ;;  %v5504_v1 = vld [vmem:[%s8724_s0] sm:$0xff]  ;;  %v5509_v2 = vld [vmem:[%s8724_s0 + $0x18] sm:$0xff]  ;;  %5428 = vset.pattern.permute.xlu1 %v5475_v3  ;;  %5427 = vset.pattern.permute.xlu0 %v5475_v3 }
   0x2   :  { %v574_v4 = vsub.f32 1.0, %v5499_v0  ;;  %v572_v5 = vsub.f32 1.0, %v5504_v1  ;;  %v575_v6 = vsub.f32 1.0, %v5509_v2  ;;  %v5517_v7 = vld [vmem:[%s8724_s0 + $0x8] sm:$0xff]  ;;  %v5528_v10 = vld [vmem:[%s8724_s0 + $0x20] sm:$0xff]  ;;  %v5545_v17 = vld [vmem:[%s8724_s0 + $0x38] sm:$0xff] }
   0x3   :  { %v573_v8 = vsub.f32 1.0, %v5517_v7  ;;  %v5523_v9 = vld [vmem:[%s8724_s0 + $0x28] sm:$0xff]  ;;  %v576_v16 = vsub.f32 1.0, %v5528_v10  ;;  %v5550_v18 = vld [vmem:[%s8724_s0 + $0x30] sm:$0xff]  ;;  %v579_v22 = vsub.f32 1.0, %v5545_v17  ;;  %v5568_v24 = vld [vmem:[%s8724_s0 + $0x40] sm:$0xff] }
   0x4   :  { %v5530_v11 = vmul.f32 1e+30, %v574_v4  ;;  %v5532_v12 = vmul.f32 1e+30, %v572_v5  ;;  %v5536_v13 = vmul.f32 1e+30, %v575_v6 }
   0x5   :  { %v5538_v14 = vmul.f32 1e+30, %v573_v8  ;;  %v577_v15 = vsub.f32 1.0, %v5523_v9  ;;  %v5555_v19 = vld [vmem:[%s8724_s0 + $0x48] sm:$0xff]  ;;  %v5561_v21 = vmul.f32 1e+30, %v576_v16 }
   0x6   :  { %9062 = vst [vmem:[#allocation7_spill] sm:$0xff] %v5530_v11  ;;  %9063 = vst [vmem:[#allocation8_spill] sm:$0xff] %v5532_v12  ;;  %648 = vperm.xlu1 %5428, %v5530_v11   ;;  %638 = vperm.xlu0 %5427, %v5532_v12   ;;  %v578_v23 = vsub.f32 1.0, %v5550_v18  ;;  %v581_v25 = vsub.f32 1.0, %v5555_v19  ;;  %v5573_v26 = vmul.f32 1e+30, %v579_v22 }
   0x7   :  { %9064 = vst [vmem:[#allocation9_spill] sm:$0xff] %v5536_v13  ;;  %9065 = vst [vmem:[#allocation10_spill] sm:$0xff] %v5538_v14  ;;  %v5559_v20 = vmul.f32 1e+30, %v577_v15  ;;  %v580_v28 = vsub.f32 1.0, %v5568_v24  ;;  %v5581_v29 = vld [vmem:[%s8724_s0 + $0x58] sm:$0xff] }
   0x8   :  { %9067 = vst [vmem:[#allocation12_spill] sm:$0xff] %v5561_v21  ;;  %9068 = vst [vmem:[#allocation13_spill] sm:$0xff] %v5573_v26  ;;  %v5575_v27 = vmul.f32 1e+30, %v578_v23  ;;  %v5586_v30 = vld [vmem:[%s8724_s0 + $0x50] sm:$0xff]  ;;  %v583_v31 = vsub.f32 1.0, %v5581_v29 }
   0x9   :  { %9066 = vst [vmem:[#allocation11_spill] sm:$0xff] %v5559_v20  ;;  %v5591_v32 = vmul.f32 1e+30, %v581_v25  ;;  %v5593_v33 = vmul.f32 1e+30, %v580_v28  ;;  %v582_v34 = vsub.f32 1.0, %v5586_v30 }
   0xa   :  { %653 = vperm.xlu1 %5428, %v5536_v13   ;;  %643 = vperm.xlu0 %5427, %v5538_v14   ;;  %9069 = vst [vmem:[#allocation14_spill] sm:$0xff] %v5575_v27  ;;  %v5599_v35 = vld [vmem:[%s8724_s0 + $0x68] sm:$0xff]  ;;  %v5604_v36 = vld [vmem:[%s8724_s0 + $0x60] sm:$0xff]  ;;  %v5609_v37 = vld [vmem:[%s8724_s0 + $0x78] sm:$0xff]  ;;  %v5616_v39 = vmul.f32 1e+30, %v583_v31 }
   0xb   :  { %9070 = vst [vmem:[#allocation15_spill] sm:$0xff] %v5591_v32  ;;  %9071 = vst [vmem:[#allocation16_spill] sm:$0xff] %v5593_v33  ;;  %v5614_v38 = vld [vmem:[%s8724_s0 + $0x70] sm:$0xff]  ;;  %v585_v40 = vsub.f32 1.0, %v5599_v35  ;;  %v5622_v41 = vld [vmem:[%s8724_s0 + $0x88] sm:$0xff]  ;;  %v584_v43 = vsub.f32 1.0, %v5604_v36 }
   0xc   :  { %9072 = vst [vmem:[#allocation17_spill] sm:$0xff] %v5616_v39  ;;  %v5626_v42 = vmul.f32 1e+30, %v582_v34  ;;  %v587_v44 = vsub.f32 1.0, %v5609_v37  ;;  %v5633_v45 = vld [vmem:[%s8724_s0 + $0x80] sm:$0xff]  ;;  %v5638_v46 = vld [vmem:[%s8724_s0 + $0x98] sm:$0xff] }
   0xd   :  { %v586_v47 = vsub.f32 1.0, %v5614_v38  ;;  %v5644_v48 = vld [vmem:[%s8724_s0 + $0x90] sm:$0xff]  ;;  %v589_v49 = vsub.f32 1.0, %v5622_v41  ;;  %v5650_v50 = vld [vmem:[%s8724_s0 + $0xa8] sm:$0xff]  ;;  %v5655_v51 = vld [vmem:[%s8724_s0 + $0xa0] sm:$0xff]  ;;  %v588_v53 = vsub.f32 1.0, %v5633_v45 }
   0xe   :  { %663 = vperm.xlu1 %5428, %v5559_v20   ;;  %658 = vperm.xlu0 %5427, %v5561_v21   ;;  %9073 = vst [vmem:[#allocation18_spill] sm:$0xff] %v5626_v42  ;;  %v5657_v52 = vmul.f32 1e+30, %v585_v40  ;;  %v591_v54 = vsub.f32 1.0, %v5638_v46  ;;  %v5664_v55 = vld [vmem:[%s8724_s0 + $0xb8] sm:$0xff]  ;;  %v5669_v56 = vld [vmem:[%s8724_s0 + $0xb0] sm:$0xff] }
   0xf   :  { %v5673_v58 = vmul.f32 1e+30, %v584_v43  ;;  %v5675_v59 = vmul.f32 1e+30, %v587_v44  ;;  %v590_v60 = vsub.f32 1.0, %v5644_v48  ;;  %v5681_v61 = vld [vmem:[%s8724_s0 + $0xc8] sm:$0xff] }
  0x10   :  { %9074 = vst [vmem:[#allocation19_spill] sm:$0xff] %v5657_v52  ;;  %v5683_v62 = vmul.f32 1e+30, %v586_v47  ;;  %v593_v63 = vsub.f32 1.0, %v5650_v50  ;;  %v592_v3 = vsub.f32 1.0, %v5655_v51  ;;  %v5690_v4 = vld [vmem:[%s8724_s0 + $0xc0] sm:$0xff] }
  0x11   :  { %9075 = vst [vmem:[#allocation20_spill] sm:$0xff] %v5673_v58  ;;  %9076 = vst [vmem:[#allocation21_spill] sm:$0xff] %v5675_v59  ;;  %v5692_v5 = vmul.f32 1e+30, %v589_v49  ;;  %v595_v6 = vsub.f32 1.0, %v5664_v55  ;;  %v594_v8 = vsub.f32 1.0, %v5669_v56 }
  0x12   :  { %673 = vperm.xlu1 %5428, %v5573_v26   ;;  %668 = vperm.xlu0 %5427, %v5575_v27   ;;  %9077 = vst [vmem:[#allocation22_spill] sm:$0xff] %v5683_v62  ;;  %v5699_v15 = vld [vmem:[%s8724_s0 + $0xd8] sm:$0xff]  ;;  %v5704_v16 = vld [vmem:[%s8724_s0 + $0xd0] sm:$0xff]  ;;  %v5706_v22 = vmul.f32 1e+30, %v588_v53  ;;  %v597_v25 = vsub.f32 1.0, %v5681_v61 }
  0x13   :  { %9078 = vst [vmem:[#allocation23_spill] sm:$0xff] %v5692_v5  ;;  %v5708_v23 = vmul.f32 1e+30, %v591_v54  ;;  %v5712_v28 = vand.u32 127, %v8726_v57  ;;  %v5716_v31 = vmul.f32 1e+30, %v590_v60 }
  0x14   :  { %9079 = vst [vmem:[#allocation24_spill] sm:$0xff] %v5706_v22  ;;  %v596_v34 = vsub.f32 1.0, %v5690_v4  ;;  %v5722_v40 = vld [vmem:[%s8724_s0 + $0xe8] sm:$0xff]  ;;  %v5727_v43 = vld [vmem:[%s8724_s0 + $0xe0] sm:$0xff]  ;;  %v5729_v44 = vmul.f32 1e+30, %v593_v63 }
  0x15   :  { %9080 = vst [vmem:[#allocation25_spill] sm:$0xff] %v5708_v23  ;;  %9081 = vst [vmem:[#allocation26_spill] sm:$0xff] %v5716_v31  ;;  %v5731_v47 = vmul.f32 1e+30, %v592_v3  ;;  %v599_v49 = vsub.f32 1.0, %v5699_v15  ;;  %v598_v53 = vsub.f32 1.0, %v5704_v16 }
  0x16   :  { %683 = vperm.xlu1 %5428, %v5591_v32   ;;  %678 = vperm.xlu0 %5427, %v5593_v33   ;;  %9082 = vst [vmem:[#allocation27_spill] sm:$0xff] %v5729_v44  ;;  %v5735_v54 = vmul.f32 1e+30, %v595_v6  ;;  %v5737_v60 = vmul.f32 1e+30, %v594_v8  ;;  %v5742_v57 = vld [vmem:[%s8724_s0 + $0xf8] sm:$0xff] }
  0x17   :  { %9083 = vst [vmem:[#allocation28_spill] sm:$0xff] %v5731_v47  ;;  %v601_v63 = vsub.f32 1.0, %v5722_v40  ;;  %v600_v3 = vsub.f32 1.0, %v5727_v43  ;;  %v5754_v6 = vadd.s32 128, %v5712_v28  ;;  %v5758_v8 = vmul.f32 1e+30, %v596_v34 }
  0x18   :  { %9084 = vst [vmem:[#allocation29_spill] sm:$0xff] %v5735_v54  ;;  %9085 = vst [vmem:[#allocation30_spill] sm:$0xff] %v5737_v60 }
  0x19   :  { %9087 = vst [vmem:[#allocation32_spill] sm:$0xff] %v5758_v8 }
  0x1a   :  { %693 = vperm.xlu1 %5428, %v5616_v39   ;;  %688 = vperm.xlu0 %5427, %v5626_v42  }
  0x1e   :  { %703 = vperm.xlu1 %5428, %v5657_v52   ;;  %698 = vperm.xlu0 %5427, %v5673_v58   ;;  %v5744_v52 = vmul.f32 1e+30, %v597_v25  ;;  %v5751_v58 = vld [vmem:[%s8724_s0 + $0xf0] sm:$0xff]  ;;  %v9088_v25 = vlaneseq }
  0x20   :  { %9086 = vst [vmem:[#allocation31_spill] sm:$0xff] %v5744_v52  ;;  %v5761_v39 = vshrl.u32 %v9088_v25, 7 }
  0x22   :  { %713 = vperm.xlu1 %5428, %v5675_v59   ;;  %708 = vperm.xlu0 %5427, %v5683_v62  }
  0x23   :  { %6 = vsyncpa [#allocation5], 0  ;;  %v5763_v42 = vmul.f32 1e+30, %v599_v49  ;;  %v5765_v32 = vmul.f32 1e+30, %v598_v53 }
  0x24   :  { %v603_v33 = vsub.f32 1.0, %v5742_v57  ;;  %v602_v27 = vsub.f32 1.0, %v5751_v58  ;;  %v5771_v59 = vadd.s32 16, %v5761_v39  ;;  %v5775_v62 = vadd.s32 24, %v5761_v39  ;;  %s5485_s0 = smov [#allocation4]  }
  0x25   :  { %9089 = vst [vmem:[#allocation33_spill] sm:$0xff] %v5763_v42  ;;  %9090 = vst [vmem:[#allocation34_spill] sm:$0xff] %v5765_v32  ;;  %v5777_v25 = vmul.f32 1e+30, %v601_v63  ;;  %v5779_v49 = vmul.f32 1e+30, %v600_v3  ;;  %v9102_v63 = vcvt.s32.f32 %v5761_v39 }
  0x26   :  { %v5782_v53 = vmul.f32 1e+30, %v5517_v7  ;;  %723 = vperm.xlu1 %5428, %v5692_v5   ;;  %718 = vperm.xlu0 %5427, %v5706_v22   ;;  %v5788_v26 = vmul.f32 1e+30, %v5504_v1  ;;  %v5791_v34 = vmul.f32 1e+30, %v5509_v2  ;;  %v9101_v2 = vcvt.s32.f32 %v5712_v28 }
  0x27   :  { %9091 = vst [vmem:[#allocation35_spill] sm:$0xff] %v5777_v25  ;;  %9092 = vst [vmem:[#allocation36_spill] sm:$0xff] %v5779_v49  ;;  %v5795_v21 = vmul.f32 1e+30, %v603_v33  ;;  %v5798_v7 = vmul.f32 1e+30, %v5499_v0 }
  0x28   :  { %9093 = vst [vmem:[#allocation37_spill] sm:$0xff] %v5782_v53  ;;  %9094 = vst [vmem:[#allocation38_spill] sm:$0xff] %v5788_v26  ;;  %v5801_v20 = vmul.f32 1e+30, %v5523_v9  ;;  %v5803_v5 = vmul.f32 1e+30, %v602_v27  ;;  %v9105_v9 = vcvt.s32.f32 %v5754_v6  ;;  %v9106_v27 = vcvt.s32.f32 %v5771_v59 }
  0x29   :  { %9095 = vst [vmem:[#allocation39_spill] sm:$0xff] %v5791_v34  ;;  %9096 = vst [vmem:[#allocation40_spill] sm:$0xff] %v5795_v21  ;;  %v5806_v1 = vmul.f32 1e+30, %v5528_v10  ;;  %v19_v22 = vmul.f32 0.0625, %v9101_v2  ;;  %v92_v13 = vmul.f32 0.0625, %v9102_v63 }
  0x2a   :  { %9097 = vst [vmem:[#allocation41_spill] sm:$0xff] %v5798_v7  ;;  %9098 = vst [vmem:[#allocation42_spill] sm:$0xff] %v5801_v20  ;;  %v5813_v33 = vmul.f32 1e+30, %v5545_v17  ;;  %v5816_v0 = vmul.f32 1e+30, %v5550_v18  ;;  %733 = vperm.xlu1 %5428, %v5708_v23   ;;  %728 = vperm.xlu0 %5427, %v5716_v31   ;;  %v9109_v17 = vcvt.s32.f32 %v5775_v62 }
  0x2b   :  { %9099 = vst [vmem:[#allocation43_spill] sm:$0xff] %v5803_v5  ;;  %9100 = vst [vmem:[#allocation44_spill] sm:$0xff] %v5806_v1  ;;  %v20_v3 = vmul.f32 0.0625, %v9105_v9  ;;  %v94_v11 = vmul.f32 0.0625, %v9106_v27  ;;  %v5825_v10 = vmul.f32 1e+30, %v5555_v19  ;;  %v5850_v31 = vfloor.f32 %v19_v22 }
  0x2c   :  { %9103 = vst [vmem:[#allocation45_spill] sm:$0xff] %v5813_v33  ;;  %9104 = vst [vmem:[#allocation46_spill] sm:$0xff] %v5816_v0  ;;  %v5828_v63 = vmul.f32 1e+30, %v5568_v24  ;;  %v95_v18 = vmul.f32 0.0625, %v9109_v17  ;;  %v5833_v2 = vadd.s32 8, %v5761_v39  ;;  %v124_v17 = vfloor.f32 %v92_v13 }
  0x2d   :  { %9107 = vst [vmem:[#allocation47_spill] sm:$0xff] %v5825_v10  ;;  %v5836_v9 = vmul.f32 1e+30, %v5581_v29  ;;  %v5839_v27 = vmul.f32 1e+30, %v5586_v30  ;;  %v5842_v23 = vadd.s32 40, %v5761_v39  ;;  %v5858_v30 = vfloor.f32 %v20_v3 }
  0x2e   :  { %9108 = vst [vmem:[#allocation48_spill] sm:$0xff] %v5828_v63  ;;  %v5845_v19 = vmul.f32 1e+30, %v5599_v35  ;;  %v5848_v24 = vmul.f32 1e+30, %v5604_v36  ;;  %v126_v14 = vfloor.f32 %v94_v11  ;;  %743 = vperm.xlu1 %5428, %v5729_v44   ;;  %738 = vperm.xlu0 %5427, %v5731_v47   ;;  %v127_v36 = vfloor.f32 %v95_v18  ;;  %s5408_s12 = sshll.u32 %s5485_s0, 4  ;;  %s5409_s12 = int_to_ptr.vmem [resolvable:$true] %s5408_s12 }
  0x2f   :  { %9110 = vst [vmem:[#allocation49_spill] sm:$0xff] %v5836_v9  ;;  %9111 = vst [vmem:[#allocation50_spill] sm:$0xff] %v5839_v27  ;;  %v5853_v12 = vmul.f32 1e+30, %v5609_v37  ;;  %v5856_v29 = vmul.f32 1e+30, %v5614_v38  ;;  %v9125_v3 = vcvt.s32.f32 %v5833_v2  ;;  %p5456_p1 = scmp.lt.s32.totalorder %s5409_s12, %s5409_s12 }
  0x30   :  { %9112 = vst [vmem:[#allocation51_spill] sm:$0xff] %v5845_v19  ;;  %9113 = vst [vmem:[#allocation52_spill] sm:$0xff] %v5848_v24  ;;  %v5863_v35 = vmul.f32 1e+30, %v5622_v41  ;;  %v5867_v13 = vadd.s32 32, %v5761_v39  ;;  %v23_v22 = vmul.f32 16.0, %v5850_v31 }
  0x31   :  { %9114 = vst [vmem:[#allocation53_spill] sm:$0xff] %v5853_v12  ;;  %9115 = vst [vmem:[#allocation54_spill] sm:$0xff] %v5856_v29  ;;  %v5870_v37 = vmul.f32 1e+30, %v5633_v45  ;;  %v5873_v38 = vmul.f32 1e+30, %v5638_v46 }
  0x32   :  { %9116 = vst [vmem:[#allocation55_spill] sm:$0xff] %v5863_v35  ;;  %v5876_v11 = vmul.f32 1e+30, %v5644_v48  ;;  %v5880_v41 = vmul.f32 1e+30, %v5650_v50  ;;  %v156_v44 = vmul.f32 16.0, %v124_v17  ;;  %753 = vperm.xlu1 %5428, %v5735_v54   ;;  %748 = vperm.xlu0 %5427, %v5737_v60  }
  0x33   :  { %9117 = vst [vmem:[#allocation56_spill] sm:$0xff] %v5870_v37  ;;  %9118 = vst [vmem:[#allocation57_spill] sm:$0xff] %v5873_v38  ;;  %v5883_v18 = vmul.f32 1e+30, %v5655_v51  ;;  %v5887_v45 = vmul.f32 1e+30, %v5664_v55  ;;  %v220_v55 = vsub.f32 %v124_v17, %v5850_v31 }
  0x34   :  { %9119 = vst [vmem:[#allocation58_spill] sm:$0xff] %v5876_v11  ;;  %9120 = vst [vmem:[#allocation59_spill] sm:$0xff] %v5880_v41  ;;  %v5890_v46 = vmul.f32 1e+30, %v5669_v56  ;;  %v24_v48 = vmul.f32 16.0, %v5858_v30  ;;  %v158_v47 = vmul.f32 16.0, %v126_v14 }
  0x35   :  { %9121 = vst [vmem:[#allocation60_spill] sm:$0xff] %v5883_v18  ;;  %9122 = vst [vmem:[#allocation61_spill] sm:$0xff] %v5887_v45  ;;  %v5896_v50 = vmul.f32 1e+30, %v5681_v61  ;;  %v159_v51 = vmul.f32 16.0, %v127_v36  ;;  %v93_v18 = vmul.f32 0.0625, %v9125_v3  ;;  %v9130_v61 = vcvt.s32.f32 %v5712_v28 }
  0x36   :  { %9123 = vst [vmem:[#allocation62_spill] sm:$0xff] %v5890_v46  ;;  %v5902_v45 = vmul.f32 1e+30, %v5690_v4  ;;  %v5905_v56 = vmul.f32 1e+30, %v5699_v15  ;;  %v9128_v46 = vcvt.s32.f32 %v5842_v23  ;;  %v9131_v3 = vcvt.s32.f32 %v5761_v39  ;;  %763 = vperm.xlu1 %5428, %v5744_v52   ;;  %758 = vperm.xlu0 %5427, %v5758_v8   ;;  %s5451_s13 = scalar_lea.vmem %s5409_s12, 256 }
  0x37   :  { %9124 = vst [vmem:[#allocation63_spill] sm:$0xff] %v5896_v50  ;;  %v5910_v60 = vmul.f32 1e+30, %v5704_v16  ;;  %v5914_v50 = vsub.f32 %v9130_v61, %v23_v22  ;;  %v5920_v4 = vmul.f32 1e+30, %v5722_v40  ;;  %v9133_v15 = vcvt.s32.f32 %v5754_v6  ;;  %p5452_p0 = scmp.ne.s32.totalorder %s5409_s12, %s5451_s13  ;;  %p5457_p2 = scmp.lt.s32.totalorder %s5451_s13, %s5451_s13 }
  0x38   :  { %9126 = vst [vmem:[#allocation64_spill] sm:$0xff] %v5902_v45  ;;  %9127 = vst [vmem:[#allocation65_spill] sm:$0xff] %v5905_v56  ;;  %v97_v54 = vmul.f32 0.0625, %v9128_v46  ;;  %v188_v41 = vsub.f32 %v9131_v3, %v156_v44  ;;  %v9134_v46 = vcvt.s32.f32 %v5771_v59  ;;  %v5932_v28 = vmul.f32 1e+30, %v5727_v43 }
  0x39   :  { %9129 = vst [vmem:[#allocation66_spill] sm:$0xff] %v5910_v60  ;;  %9132 = vst [vmem:[#allocation67_spill] sm:$0xff] %v5920_v4  ;;  %v5924_v56 = vsub.f32 %v9133_v15, %v24_v48  ;;  %v221_v60 = vsub.f32 %v124_v17, %v5858_v30  ;;  %v9136_v44 = vcvt.s32.f32 %v5775_v62  ;;  %v125_v22 = vfloor.f32 %v93_v18  ;;  %p5458_p3 = por %p5457_p2, %p5456_p1 }
  0x3a   :  { %v190_v16 = vsub.f32 %v9134_v46, %v158_v47  ;;  %9135 = vst [vmem:[#allocation68_spill] sm:$0xff] %v5932_v28  ;;  %v9137_v6 = vcvt.s32.f32 %v5867_v13  ;;  %v5939_v61 = vmul.f32 1e+30, %v5742_v57  ;;  %v5942_v59 = vmul.f32 1e+30, %v5751_v58  ;;  %773 = vperm.xlu1 %5428, %v5763_v42   ;;  %768 = vperm.xlu0 %5427, %v5765_v32  }
  0x3b   :  { %v191_v40 = vsub.f32 %v9136_v44, %v159_v51  ;;  %v129_v47 = vfloor.f32 %v97_v54  ;;  %v5945_v17 = vadd.s32 56, %v5761_v39  ;;  %v224_v43 = vsub.f32 %v126_v14, %v5850_v31  ;;  %p5459_p4 = pnand %p5458_p3, %p5452_p0 }
  0x3c   :  { %v96_v48 = vmul.f32 0.0625, %v9137_v6  ;;  %9138 = vst [vmem:[#allocation69_spill] sm:$0xff] %v5939_v61  ;;  %9139 = vst [vmem:[#allocation70_spill] sm:$0xff] %v5942_v59  ;;  %v225_v3 = vsub.f32 %v126_v14, %v5858_v30  ;;  %v284_v62 = vsub.f32 %v188_v41, %v5914_v50  ;;  %v348_v18 = vmul.f32 %v220_v55, %v220_v55 }
  0x3d   :  { %v288_v51 = vsub.f32 %v190_v16, %v5914_v50  ;;  %v285_v15 = vsub.f32 %v188_v41, %v5924_v56  ;;  %v349_v57 = vmul.f32 %v221_v60, %v221_v60  ;;  %v226_v46 = vsub.f32 %v127_v36, %v5850_v31 }
  0x3e   :  { %v289_v58 = vsub.f32 %v190_v16, %v5924_v56  ;;  %v290_v54 = vsub.f32 %v191_v40, %v5914_v50  ;;  %v157_v44 = vmul.f32 16.0, %v125_v22  ;;  %v128_v14 = vfloor.f32 %v96_v48  ;;  %783 = vperm.xlu1 %5428, %v5777_v25   ;;  %778 = vperm.xlu0 %5427, %v5779_v49  }
  0x3f   :  { %v227_v6 = vsub.f32 %v127_v36, %v5858_v30  ;;  %v291_v55 = vsub.f32 %v191_v40, %v5924_v56  ;;  %v5961_v60 = vadd.s32 48, %v5761_v39  ;;  %v352_v41 = vmul.f32 %v224_v43, %v224_v43 }
  0x40   :  { %v353_v8 = vmul.f32 %v225_v3, %v225_v3  ;;  %v412_v42 = vmul.f32 %v284_v62, %v284_v62  ;;  %v5964_v32 = vadd.s32 72, %v5761_v39  ;;  %v416_v16 = vmul.f32 %v288_v51, %v288_v51 }
  0x41   :  { %v413_v59 = vmul.f32 %v285_v15, %v285_v15  ;;  %v354_v61 = vmul.f32 %v226_v46, %v226_v46  ;;  %v161_v28 = vmul.f32 16.0, %v129_v47  ;;  %v417_v36 = vmul.f32 %v289_v58, %v289_v58 }
  0x42   :  { %v418_v40 = vmul.f32 %v290_v54, %v290_v54  ;;  %v160_v48 = vmul.f32 16.0, %v128_v14  ;;  %v8801_v52 = vcvt.s32.f32 %v5961_v60  ;;  %v355_v4 = vmul.f32 %v227_v6, %v227_v6  ;;  %793 = vperm.xlu1 %5428, %v5795_v21   ;;  %788 = vperm.xlu0 %5427, %v5803_v5  }
  0x43   :  { %v419_v43 = vmul.f32 %v291_v55, %v291_v55  ;;  %v9140_v3 = vcvt.s32.f32 %v5833_v2  ;;  %v9141_v45 = vcvt.s32.f32 %v5945_v17  ;;  %v5973_v15 = vadd.f32 %v412_v42, %v348_v18 }
  0x44   :  { %v222_v46 = vsub.f32 %v125_v22, %v5850_v31  ;;  %v223_v25 = vsub.f32 %v125_v22, %v5858_v30  ;;  %v8800_v58 = vcvt.s32.f32 %v5964_v32  ;;  %v5978_v54 = vadd.f32 %v416_v16, %v352_v41 }
  0x45   :  { %v189_v62 = vsub.f32 %v9140_v3, %v157_v44  ;;  %v99_v51 = vmul.f32 0.0625, %v9141_v45  ;;  %9142 = vst [vmem:[#allocation71_spill] sm:$0xff] %v5973_v15  ;;  %v5980_v49 = vadd.f32 %v413_v59, %v349_v57  ;;  %v9145_v6 = vcvt.s32.f32 %v5842_v23 }
  0x46   :  { %9143 = vst [vmem:[#allocation72_spill] sm:$0xff] %v5978_v54  ;;  %v5985_v2 = vadd.s32 64, %v5761_v39  ;;  %v5989_v42 = vadd.f32 %v417_v36, %v353_v8  ;;  %v5991_v45 = vadd.f32 %v418_v40, %v354_v61  ;;  %v9148_v22 = vcvt.s32.f32 %v5867_v13  ;;  %973 = vperm.xlu1 %5428, %v5782_v53   ;;  %968 = vperm.xlu0 %5427, %v5788_v26  }
  0x47   :  { %9144 = vst [vmem:[#allocation73_spill] sm:$0xff] %v5980_v49  ;;  %v193_v55 = vsub.f32 %v9145_v6, %v161_v28  ;;  %v98_v59 = vmul.f32 0.0625, %v8801_v52  ;;  %v5997_v57 = vadd.f32 %v419_v43, %v355_v4  ;;  %v286_v23 = vsub.f32 %v189_v62, %v5914_v50 }
  0x48   :  { %9146 = vst [vmem:[#allocation74_spill] sm:$0xff] %v5989_v42  ;;  %9147 = vst [vmem:[#allocation75_spill] sm:$0xff] %v5991_v45  ;;  %v192_v18 = vsub.f32 %v9148_v22, %v160_v48  ;;  %v287_v28 = vsub.f32 %v189_v62, %v5924_v56  ;;  %v131_v44 = vfloor.f32 %v99_v51  ;;  %v350_v41 = vmul.f32 %v222_v46, %v222_v46 }
  0x49   :  { %9149 = vst [vmem:[#allocation76_spill] sm:$0xff] %v5997_v57  ;;  %v351_v16 = vmul.f32 %v223_v25, %v223_v25  ;;  %v101_v8 = vmul.f32 0.0625, %v8800_v58  ;;  %v6004_v61 = vadd.s32 88, %v5761_v39  ;;  %v230_v13 = vsub.f32 %v129_v47, %v5850_v31 }
  0x4a   :  { %v231_v36 = vsub.f32 %v129_v47, %v5858_v30  ;;  %v294_v4 = vsub.f32 %v193_v55, %v5914_v50  ;;  %v295_v25 = vsub.f32 %v193_v55, %v5924_v56  ;;  %v228_v48 = vsub.f32 %v128_v14, %v5850_v31  ;;  %983 = vperm.xlu1 %5428, %v5791_v34  }
  0x4b   :  { %v292_v43 = vsub.f32 %v192_v18, %v5914_v50  ;;  %v130_v3 = vfloor.f32 %v98_v59  ;;  %v414_v62 = vmul.f32 %v286_v23, %v286_v23  ;;  %v229_v51 = vsub.f32 %v128_v14, %v5858_v30  ;;  %978 = vperm.xlu0 %5427, %v5798_v7  }
  0x4c   :  { %v293_v47 = vsub.f32 %v192_v18, %v5924_v56  ;;  %v163_v46 = vmul.f32 16.0, %v131_v44  ;;  %v415_v6 = vmul.f32 %v287_v28, %v287_v28  ;;  %v133_v22 = vfloor.f32 %v101_v8 }
  0x4d   :  { %v6019_v52 = vadd.s32 80, %v5761_v39  ;;  %v358_v40 = vmul.f32 %v230_v13, %v230_v13  ;;  %v359_v55 = vmul.f32 %v231_v36, %v231_v36  ;;  %v422_v53 = vmul.f32 %v294_v4, %v294_v4 }
  0x4e   :  { %v9150_v26 = vcvt.s32.f32 %v5985_v2  ;;  %v423_v14 = vmul.f32 %v295_v25, %v295_v25  ;;  %v356_v18 = vmul.f32 %v228_v48, %v228_v48  ;;  %v420_v59 = vmul.f32 %v292_v43, %v292_v43  ;;  %993 = vperm.xlu1 %5428, %v5801_v20  }
  0x4f   :  { %v162_v23 = vmul.f32 16.0, %v130_v3  ;;  %v357_v28 = vmul.f32 %v229_v51, %v229_v51  ;;  %v421_v8 = vmul.f32 %v293_v47, %v293_v47  ;;  %v9151_v58 = vcvt.s32.f32 %v5945_v17  ;;  %988 = vperm.xlu0 %5427, %v5806_v1  }
  0x50   :  { %v100_v21 = vmul.f32 0.0625, %v9150_v26  ;;  %v234_v13 = vsub.f32 %v131_v44, %v5850_v31  ;;  %v6028_v36 = vadd.f32 %v414_v62, %v350_v41  ;;  %v165_v4 = vmul.f32 16.0, %v133_v22 }
  0x51   :  { %v195_v5 = vsub.f32 %v9151_v58, %v163_v46  ;;  %v9153_v26 = vcvt.s32.f32 %v6004_v61  ;;  %v8815_v34 = vcvt.s32.f32 %v6019_v52  ;;  %v6033_v7 = vadd.f32 %v415_v6, %v351_v16 }
  0x52   :  { %9152 = vst [vmem:[#allocation77_spill] sm:$0xff] %v6028_v36  ;;  %v6035_v25 = vadd.f32 %v422_v53, %v358_v40  ;;  %v235_v48 = vsub.f32 %v131_v44, %v5858_v30  ;;  %v132_v43 = vfloor.f32 %v100_v21  ;;  %v6040_v17 = vadd.f32 %v423_v14, %v359_v55  ;;  %1003 = vperm.xlu1 %5428, %v5813_v33  }
  0x53   :  { %v103_v57 = vmul.f32 0.0625, %v9153_v26  ;;  %9154 = vst [vmem:[#allocation78_spill] sm:$0xff] %v6033_v7  ;;  %v6042_v58 = vadd.f32 %v420_v59, %v356_v18  ;;  %v9158_v41 = vcvt.s32.f32 %v5961_v60  ;;  %v6046_v51 = vadd.f32 %v421_v8, %v357_v28  ;;  %998 = vperm.xlu0 %5427, %v5816_v0  }
  0x54   :  { %9155 = vst [vmem:[#allocation79_spill] sm:$0xff] %v6035_v25  ;;  %9156 = vst [vmem:[#allocation80_spill] sm:$0xff] %v6040_v17  ;;  %v298_v16 = vsub.f32 %v195_v5, %v5914_v50  ;;  %v362_v53 = vmul.f32 %v234_v13, %v234_v13  ;;  %v6050_v40 = vadd.s32 104, %v5761_v39  ;;  %v299_v21 = vsub.f32 %v195_v5, %v5924_v56 }
  0x55   :  { %9157 = vst [vmem:[#allocation81_spill] sm:$0xff] %v6042_v58  ;;  %v194_v62 = vsub.f32 %v9158_v41, %v162_v23  ;;  %9159 = vst [vmem:[#allocation82_spill] sm:$0xff] %v6046_v51  ;;  %v9160_v44 = vcvt.s32.f32 %v5964_v32  ;;  %v135_v46 = vfloor.f32 %v103_v57  ;;  %v102_v6 = vmul.f32 0.0625, %v8815_v34 }
  0x56   :  { %v363_v55 = vmul.f32 %v235_v48, %v235_v48  ;;  %v232_v60 = vsub.f32 %v130_v3, %v5850_v31  ;;  %v233_v14 = vsub.f32 %v130_v3, %v5858_v30  ;;  %v164_v18 = vmul.f32 16.0, %v132_v43  ;;  %1013 = vperm.xlu1 %5428, %v5825_v10  }
  0x57   :  { %v197_v47 = vsub.f32 %v9160_v44, %v165_v4  ;;  %v296_v59 = vsub.f32 %v194_v62, %v5914_v50  ;;  %v238_v5 = vsub.f32 %v133_v22, %v5850_v31  ;;  %v239_v32 = vsub.f32 %v133_v22, %v5858_v30  ;;  %1008 = vperm.xlu0 %5427, %v5828_v63  }
  0x58   :  { %v6065_v57 = vadd.s32 96, %v5761_v39  ;;  %v426_v23 = vmul.f32 %v298_v16, %v298_v16  ;;  %v297_v28 = vsub.f32 %v194_v62, %v5924_v56  ;;  %v6070_v3 = vadd.s32 120, %v5761_v39 }
  0x59   :  { %v427_v13 = vmul.f32 %v299_v21, %v299_v21  ;;  %v302_v4 = vsub.f32 %v197_v47, %v5914_v50  ;;  %v167_v26 = vmul.f32 16.0, %v135_v46  ;;  %v134_v48 = vfloor.f32 %v102_v6 }
  0x5a   :  { %v360_v41 = vmul.f32 %v232_v60, %v232_v60  ;;  %v361_v44 = vmul.f32 %v233_v14, %v233_v14  ;;  %v303_v22 = vsub.f32 %v197_v47, %v5924_v56  ;;  %v9161_v34 = vcvt.s32.f32 %v5985_v2  ;;  %1023 = vperm.xlu1 %5428, %v5836_v9  }
  0x5b   :  { %v424_v62 = vmul.f32 %v296_v59, %v296_v59  ;;  %v366_v16 = vmul.f32 %v238_v5, %v238_v5  ;;  %v367_v8 = vmul.f32 %v239_v32, %v239_v32  ;;  %v8826_v21 = vcvt.s32.f32 %v6065_v57  ;;  %1018 = vperm.xlu0 %5427, %v5839_v27   ;;  %v9184_v27 = vld [vmem:[#allocation60_spill] sm:$0xff] }
  0x5c   :  { %v196_v33 = vsub.f32 %v9161_v34, %v164_v18  ;;  %v6079_v0 = vadd.f32 %v426_v23, %v362_v53  ;;  %v425_v20 = vmul.f32 %v297_v28, %v297_v28  ;;  %v9163_v6 = vcvt.s32.f32 %v6050_v40 }
  0x5d   :  { %v8827_v47 = vcvt.s32.f32 %v6070_v3  ;;  %v6084_v14 = vadd.f32 %v427_v13, %v363_v55  ;;  %v430_v34 = vmul.f32 %v302_v4, %v302_v4  ;;  %v9165_v2 = vcvt.s32.f32 %v6004_v61 }
  0x5e   :  { %9162 = vst [vmem:[#allocation83_spill] sm:$0xff] %v6079_v0  ;;  %v105_v60 = vmul.f32 0.0625, %v9163_v6  ;;  %v166_v10 = vmul.f32 16.0, %v134_v48  ;;  %v236_v59 = vsub.f32 %v132_v43, %v5850_v31  ;;  %v237_v5 = vsub.f32 %v132_v43, %v5858_v30  ;;  %1033 = vperm.xlu1 %5428, %v5845_v19  }
  0x5f   :  { %9164 = vst [vmem:[#allocation84_spill] sm:$0xff] %v6084_v14  ;;  %v199_v18 = vsub.f32 %v9165_v2, %v167_v26  ;;  %v300_v53 = vsub.f32 %v196_v33, %v5914_v50  ;;  %v6092_v32 = vadd.s32 112, %v5761_v39  ;;  %v6096_v55 = vadd.f32 %v424_v62, %v360_v41  ;;  %1028 = vperm.xlu0 %5427, %v5848_v24  }
  0x60   :  { %v431_v23 = vmul.f32 %v303_v22, %v303_v22  ;;  %v301_v61 = vsub.f32 %v196_v33, %v5924_v56  ;;  %v104_v28 = vmul.f32 0.0625, %v8826_v21  ;;  %v6101_v13 = vadd.f32 %v425_v20, %v361_v44 }
  0x61   :  { %9166 = vst [vmem:[#allocation85_spill] sm:$0xff] %v6096_v55  ;;  %v242_v43 = vsub.f32 %v135_v46, %v5850_v31  ;;  %v137_v4 = vfloor.f32 %v105_v60  ;;  %v107_v26 = vmul.f32 0.0625, %v8827_v47  ;;  %v6106_v6 = vadd.f32 %v430_v34, %v366_v16 }
  0x62   :  { %9167 = vst [vmem:[#allocation86_spill] sm:$0xff] %v6101_v13  ;;  %v243_v2 = vsub.f32 %v135_v46, %v5858_v30  ;;  %v306_v41 = vsub.f32 %v199_v18, %v5914_v50  ;;  %v9169_v22 = vcvt.s32.f32 %v6019_v52  ;;  %v364_v62 = vmul.f32 %v236_v59, %v236_v59  ;;  %1043 = vperm.xlu1 %5428, %v5853_v12  }
  0x63   :  { %9168 = vst [vmem:[#allocation87_spill] sm:$0xff] %v6106_v6  ;;  %v365_v9 = vmul.f32 %v237_v5, %v237_v5  ;;  %v428_v21 = vmul.f32 %v300_v53, %v300_v53  ;;  %v429_v44 = vmul.f32 %v301_v61, %v301_v61  ;;  %v307_v16 = vsub.f32 %v199_v18, %v5924_v56 }
  0x64   :  { %v198_v33 = vsub.f32 %v9169_v22, %v166_v10  ;;  %v136_v60 = vfloor.f32 %v104_v28  ;;  %v6117_v46 = vadd.s32 136, %v5761_v39  ;;  %v6119_v34 = vadd.f32 %v431_v23, %v367_v8  ;;  %1038 = vperm.xlu0 %5427, %v5856_v29  }
  0x65   :  { %v370_v52 = vmul.f32 %v242_v43, %v242_v43  ;;  %v169_v10 = vmul.f32 16.0, %v137_v4  ;;  %v139_v59 = vfloor.f32 %v107_v26  ;;  %v371_v5 = vmul.f32 %v243_v2, %v243_v2 }
  0x66   :  { %9170 = vst [vmem:[#allocation88_spill] sm:$0xff] %v6119_v34  ;;  %v434_v53 = vmul.f32 %v306_v41, %v306_v41  ;;  %v240_v22 = vsub.f32 %v134_v48, %v5850_v31  ;;  %v304_v47 = vsub.f32 %v198_v33, %v5914_v50  ;;  %v241_v20 = vsub.f32 %v134_v48, %v5858_v30 }
  0x67   :  { %v305_v61 = vsub.f32 %v198_v33, %v5924_v56  ;;  %v9171_v18 = vcvt.s32.f32 %v6092_v32  ;;  %v6130_v8 = vadd.f32 %v428_v21, %v364_v62  ;;  %v6132_v23 = vadd.f32 %v429_v44, %v365_v9  ;;  %1053 = vperm.xlu1 %5428, %v5863_v35  }
  0x68   :  { %v435_v43 = vmul.f32 %v307_v16, %v307_v16  ;;  %v168_v26 = vmul.f32 16.0, %v136_v60  ;;  %v9174_v2 = vcvt.s32.f32 %v6050_v40  ;;  %v246_v41 = vsub.f32 %v137_v4, %v5850_v31  ;;  %1048 = vperm.xlu0 %5427, %v5870_v37   ;;  %v9183_v37 = vld [vmem:[#allocation59_spill] sm:$0xff] }
  0x69   :  { %v106_v28 = vmul.f32 0.0625, %v9171_v18  ;;  %9172 = vst [vmem:[#allocation89_spill] sm:$0xff] %v6130_v8  ;;  %9173 = vst [vmem:[#allocation90_spill] sm:$0xff] %v6132_v23  ;;  %v171_v33 = vmul.f32 16.0, %v139_v59  ;;  %v6138_v18 = vadd.s32 128, %v5761_v39  ;;  %v6140_v19 = vadd.f32 %v434_v53, %v370_v52 }
  0x6a   :  { %v201_v48 = vsub.f32 %v9174_v2, %v169_v10  ;;  %v368_v12 = vmul.f32 %v240_v22, %v240_v22  ;;  %v432_v24 = vmul.f32 %v304_v47, %v304_v47  ;;  %v247_v21 = vsub.f32 %v137_v4, %v5858_v30 }
  0x6b   :  { %9175 = vst [vmem:[#allocation91_spill] sm:$0xff] %v6140_v19  ;;  %v369_v62 = vmul.f32 %v241_v20, %v241_v20  ;;  %v433_v9 = vmul.f32 %v305_v61, %v305_v61  ;;  %v138_v44 = vfloor.f32 %v106_v28  ;;  %v9176_v16 = vcvt.s32.f32 %v6117_v46  ;;  %1063 = vperm.xlu1 %5428, %v5873_v38   ;;  %v9218_v19 = vld [vmem:[#allocation10_spill] sm:$0xff] }
  0x6c   :  { %v6147_v40 = vadd.f32 %v435_v43, %v371_v5  ;;  %v9178_v10 = vcvt.s32.f32 %v6065_v57  ;;  %v244_v53 = vsub.f32 %v136_v60, %v5850_v31  ;;  %v6153_v47 = vadd.s32 152, %v5761_v39  ;;  %1058 = vperm.xlu0 %5427, %v5876_v11  }
  0x6d   :  { %v109_v29 = vmul.f32 0.0625, %v9176_v16  ;;  %v310_v4 = vsub.f32 %v201_v48, %v5914_v50  ;;  %v374_v20 = vmul.f32 %v246_v41, %v246_v41  ;;  %v9179_v22 = vcvt.s32.f32 %v6070_v3 }
  0x6e   :  { %9177 = vst [vmem:[#allocation92_spill] sm:$0xff] %v6147_v40  ;;  %v200_v52 = vsub.f32 %v9178_v10, %v168_v26  ;;  %v8850_v28 = vcvt.s32.f32 %v6138_v18  ;;  %v6159_v2 = vadd.f32 %v432_v24, %v368_v12  ;;  %v311_v5 = vsub.f32 %v201_v48, %v5924_v56 }
  0x6f   :  { %v203_v61 = vsub.f32 %v9179_v22, %v171_v33  ;;  %v375_v43 = vmul.f32 %v247_v21, %v247_v21  ;;  %v245_v57 = vsub.f32 %v136_v60, %v5858_v30  ;;  %v6163_v26 = vadd.f32 %v433_v9, %v369_v62  ;;  %1073 = vperm.xlu1 %5428, %v9183_v37  }
  0x70   :  { %9180 = vst [vmem:[#allocation93_spill] sm:$0xff] %v6159_v2  ;;  %v170_v16 = vmul.f32 16.0, %v138_v44  ;;  %v141_v10 = vfloor.f32 %v109_v29  ;;  %v6166_v35 = vadd.s32 144, %v5761_v39  ;;  %v308_v3 = vsub.f32 %v200_v52, %v5914_v50  ;;  %1068 = vperm.xlu0 %5427, %v9184_v27  }
  0x71   :  { %9181 = vst [vmem:[#allocation94_spill] sm:$0xff] %v6163_v26  ;;  %v309_v12 = vsub.f32 %v200_v52, %v5924_v56  ;;  %v6174_v48 = vadd.s32 168, %v5761_v39  ;;  %v438_v60 = vmul.f32 %v310_v4, %v310_v4  ;;  %v250_v41 = vsub.f32 %v139_v59, %v5850_v31 }
  0x72   :  { %v314_v29 = vsub.f32 %v203_v61, %v5914_v50  ;;  %v108_v33 = vmul.f32 0.0625, %v8850_v28  ;;  %v439_v21 = vmul.f32 %v311_v5, %v311_v5  ;;  %v372_v62 = vmul.f32 %v244_v53, %v244_v53 }
  0x73   :  { %v251_v9 = vsub.f32 %v139_v59, %v5858_v30  ;;  %v315_v22 = vsub.f32 %v203_v61, %v5924_v56  ;;  %v373_v52 = vmul.f32 %v245_v57, %v245_v57  ;;  %v9182_v24 = vcvt.s32.f32 %v6092_v32 }
  0x74   :  { %v173_v11 = vmul.f32 16.0, %v141_v10  ;;  %v436_v63 = vmul.f32 %v308_v3, %v308_v3  ;;  %v437_v1 = vmul.f32 %v309_v12, %v309_v12  ;;  %v9185_v5 = vcvt.s32.f32 %v6153_v47 }
  0x75   :  { %v202_v38 = vsub.f32 %v9182_v24, %v170_v16  ;;  %v6190_v28 = vadd.f32 %v438_v60, %v374_v20  ;;  %v378_v61 = vmul.f32 %v250_v41, %v250_v41  ;;  %v442_v57 = vmul.f32 %v314_v29, %v314_v29  ;;  %v9190_v60 = vld [vmem:[#allocation61_spill] sm:$0xff]  ;;  %v9191_v41 = vld [vmem:[#allocation62_spill] sm:$0xff] }
  0x76   :  { %v111_v53 = vmul.f32 0.0625, %v9185_v5  ;;  %v140_v32 = vfloor.f32 %v108_v33  ;;  %v6192_v16 = vadd.f32 %v439_v21, %v375_v43  ;;  %v379_v24 = vmul.f32 %v251_v9, %v251_v9  ;;  %1083 = vperm.xlu1 %5428, %v9190_v60   ;;  %1078 = vperm.xlu0 %5427, %v9191_v41  }
  0x77   :  { %9186 = vst [vmem:[#allocation95_spill] sm:$0xff] %v6190_v28  ;;  %v443_v4 = vmul.f32 %v315_v22, %v315_v22  ;;  %v248_v37 = vsub.f32 %v138_v44, %v5850_v31  ;;  %v249_v27 = vsub.f32 %v138_v44, %v5858_v30  ;;  %v312_v3 = vsub.f32 %v202_v38, %v5914_v50 }
  0x78   :  { %9187 = vst [vmem:[#allocation96_spill] sm:$0xff] %v6192_v16  ;;  %v9188_v12 = vcvt.s32.f32 %v6117_v46  ;;  %v9189_v59 = vcvt.s32.f32 %v6166_v35  ;;  %v6203_v43 = vadd.f32 %v436_v63, %v372_v62  ;;  %v6205_v29 = vadd.f32 %v437_v1, %v373_v52 }
  0x79   :  { %v143_v33 = vfloor.f32 %v111_v53  ;;  %v9194_v21 = vcvt.s32.f32 %v6174_v48  ;;  %v6209_v9 = vadd.f32 %v442_v57, %v378_v61  ;;  %v313_v46 = vsub.f32 %v202_v38, %v5924_v56  ;;  %v9198_v61 = vld [vmem:[#allocation64_spill] sm:$0xff] }
  0x7a   :  { %v205_v5 = vsub.f32 %v9188_v12, %v173_v11  ;;  %v110_v20 = vmul.f32 0.0625, %v9189_v59  ;;  %9192 = vst [vmem:[#allocation97_spill] sm:$0xff] %v6203_v43  ;;  %9193 = vst [vmem:[#allocation98_spill] sm:$0xff] %v6205_v29  ;;  %v254_v11 = vsub.f32 %v141_v10, %v5850_v31  ;;  %v172_v22 = vmul.f32 16.0, %v140_v32  ;;  %1088 = vperm.xlu0 %5427, %v9198_v61  }
  0x7b   :  { %v113_v44 = vmul.f32 0.0625, %v9194_v21  ;;  %9195 = vst [vmem:[#allocation99_spill] sm:$0xff] %v6209_v9  ;;  %v6213_v59 = vadd.f32 %v443_v4, %v379_v24  ;;  %v376_v12 = vmul.f32 %v248_v37, %v248_v37  ;;  %v255_v60 = vsub.f32 %v141_v10, %v5858_v30  ;;  %v9197_v21 = vld [vmem:[#allocation63_spill] sm:$0xff] }
  0x7c   :  { %v252_v63 = vsub.f32 %v140_v32, %v5850_v31  ;;  %v377_v1 = vmul.f32 %v249_v27, %v249_v27  ;;  %v440_v62 = vmul.f32 %v312_v3, %v312_v3  ;;  %v318_v52 = vsub.f32 %v205_v5, %v5914_v50  ;;  %1093 = vperm.xlu1 %5428, %v9197_v21  }
  0x7d   :  { %9196 = vst [vmem:[#allocation100_spill] sm:$0xff] %v6213_v59  ;;  %v142_v53 = vfloor.f32 %v110_v20  ;;  %v319_v38 = vsub.f32 %v205_v5, %v5924_v56  ;;  %v175_v57 = vmul.f32 16.0, %v143_v33  ;;  %v145_v41 = vfloor.f32 %v113_v44 }
  0x7e   :  { %v6222_v4 = vadd.s32 160, %v5761_v39  ;;  %v441_v37 = vmul.f32 %v313_v46, %v313_v46  ;;  %v382_v10 = vmul.f32 %v254_v11, %v254_v11  ;;  %v9199_v24 = vcvt.s32.f32 %v6138_v18  ;;  %v9200_v11 = vld [vmem:[#allocation65_spill] sm:$0xff]  ;;  %v9201_v18 = vld [vmem:[#allocation66_spill] sm:$0xff] }
  0x7f   :  { %v6227_v3 = vadd.s32 184, %v5761_v39  ;;  %v383_v20 = vmul.f32 %v255_v60, %v255_v60  ;;  %v253_v21 = vsub.f32 %v140_v32, %v5858_v30  ;;  %v6230_v59 = vmul.f32 %v252_v63, %v252_v63  ;;  %1098 = vperm.xlu0 %5427, %v9201_v18   ;;  %v9208_v18 = vld [vmem:[#allocation67_spill] sm:$0xff] }
  0x80   :  { %v204_v27 = vsub.f32 %v9199_v24, %v172_v22  ;;  %v6233_v5 = vadd.s32 176, %v5761_v39  ;;  %v446_v44 = vmul.f32 %v318_v52, %v318_v52  ;;  %v174_v61 = vmul.f32 16.0, %v142_v53  ;;  %1103 = vperm.xlu1 %5428, %v9200_v11  }
  0x81   :  { %v8855_v9 = vcvt.s32.f32 %v6222_v4  ;;  %v6239_v22 = vadd.f32 %v440_v62, %v376_v12  ;;  %v447_v60 = vmul.f32 %v319_v38, %v319_v38  ;;  %v9203_v32 = vcvt.s32.f32 %v6153_v47 }
  0x82   :  { %v177_v24 = vmul.f32 16.0, %v145_v41  ;;  %v6243_v29 = vadd.f32 %v441_v37, %v377_v1  ;;  %v316_v52 = vsub.f32 %v204_v27, %v5914_v50  ;;  %v6249_v46 = vadd.s32 200, %v5761_v39 }
  0x83   :  { %9202 = vst [vmem:[#allocation101_spill] sm:$0xff] %v6239_v22  ;;  %v207_v63 = vsub.f32 %v9203_v32, %v175_v57  ;;  %v112_v43 = vmul.f32 0.0625, %v8855_v9  ;;  %v317_v11 = vsub.f32 %v204_v27, %v5924_v56  ;;  %v258_v12 = vsub.f32 %v143_v33, %v5850_v31 }
  0x84   :  { %9204 = vst [vmem:[#allocation102_spill] sm:$0xff] %v6243_v29  ;;  %v259_v62 = vsub.f32 %v143_v33, %v5858_v30  ;;  %v6255_v38 = vadd.f32 %v446_v44, %v382_v10  ;;  %v381_v1 = vmul.f32 %v253_v21, %v253_v21  ;;  %v9206_v57 = vcvt.s32.f32 %v6166_v35  ;;  %1113 = vperm.xlu1 %5428, %v9208_v18   ;;  %v9209_v29 = vld [vmem:[#allocation68_spill] sm:$0xff] }
  0x85   :  { %v9207_v32 = vcvt.s32.f32 %v6227_v3  ;;  %1108 = vperm.xlu0 %5427, %v9209_v29   ;;  %v6263_v27 = vadd.f32 %v447_v60, %v383_v20  ;;  %v322_v22 = vsub.f32 %v207_v63, %v5914_v50  ;;  %v9211_v33 = vcvt.s32.f32 %v6174_v48  ;;  %v6292_v16 = vpop.permute.xlu0 %638 }
  0x86   :  { %9205 = vst [vmem:[#allocation103_spill] sm:$0xff] %v6255_v38  ;;  %v206_v37 = vsub.f32 %v9206_v57, %v174_v61  ;;  %v144_v10 = vfloor.f32 %v112_v43  ;;  %v444_v44 = vmul.f32 %v316_v52, %v316_v52  ;;  %v323_v21 = vsub.f32 %v207_v63, %v5924_v56  ;;  %v9214_v63 = vld [vmem:[#allocation70_spill] sm:$0xff] }
  0x87   :  { %v115_v9 = vmul.f32 0.0625, %v9207_v32  ;;  %9210 = vst [vmem:[#allocation104_spill] sm:$0xff] %v6263_v27  ;;  %v209_v47 = vsub.f32 %v9211_v33, %v177_v24  ;;  %v256_v35 = vsub.f32 %v142_v53, %v5850_v31  ;;  %v445_v57 = vmul.f32 %v317_v11, %v317_v11  ;;  %v9213_v24 = vld [vmem:[#allocation69_spill] sm:$0xff] }
  0x88   :  { %v386_v32 = vmul.f32 %v258_v12, %v258_v12  ;;  %v387_v18 = vmul.f32 %v259_v62, %v259_v62  ;;  %v9212_v29 = vcvt.s32.f32 %v6233_v5  ;;  %v257_v60 = vsub.f32 %v142_v53, %v5858_v30  ;;  %1123 = vperm.xlu1 %5428, %v9213_v24  }
  0x89   :  { %v320_v27 = vsub.f32 %v206_v37, %v5914_v50  ;;  %v321_v48 = vsub.f32 %v206_v37, %v5924_v56  ;;  %v147_v43 = vfloor.f32 %v115_v9  ;;  %1118 = vperm.xlu0 %5427, %v9214_v63   ;;  %v450_v52 = vmul.f32 %v322_v22, %v322_v22  ;;  %v6290_v63 = vpop.permute.xlu1 %648 }
  0x8a   :  { %v114_v20 = vmul.f32 0.0625, %v9212_v29  ;;  %v262_v33 = vsub.f32 %v145_v41, %v5850_v31  ;;  %v326_v11 = vsub.f32 %v209_v47, %v5914_v50  ;;  %v176_v12 = vmul.f32 16.0, %v144_v10 }
  0x8b   :  { %v451_v62 = vmul.f32 %v323_v21, %v323_v21  ;;  %v384_v61 = vmul.f32 %v256_v35, %v256_v35  ;;  %v9215_v29 = vcvt.s32.f32 %v6249_v46  ;;  %v6283_v38 = vadd.s32 192, %v5761_v39 }
  0x8c   :  { %v263_v9 = vsub.f32 %v145_v41, %v5858_v30  ;;  %v327_v37 = vsub.f32 %v209_v47, %v5924_v56  ;;  %v146_v24 = vfloor.f32 %v114_v20  ;;  %v6288_v22 = vadd.s32 216, %v5761_v39 }
  0x8d   :  { %v117_v53 = vmul.f32 0.0625, %v9215_v29  ;;  %v385_v21 = vmul.f32 %v257_v60, %v257_v60  ;;  %v448_v35 = vmul.f32 %v320_v27, %v320_v27  ;;  %v449_v28 = vmul.f32 %v321_v48, %v321_v48  ;;  %v9221_v48 = vld [vmem:[#allocation8_spill] sm:$0xff] }
  0x8e   :  { %v179_v26 = vmul.f32 16.0, %v147_v43  ;;  %v5476_v29 = vmov 1   ;;  %v6295_v2 = vadd.f32 %v444_v44, %v6230_v59  ;;  %v390_v41 = vmul.f32 %v262_v33, %v262_v33 }
  0x8f   :  { %5430 = vset.pattern.permute.xlu1 %v5476_v29  ;;  %v454_v40 = vmul.f32 %v326_v11, %v326_v11  ;;  %v9217_v47 = vcvt.s32.f32 %v6222_v4  ;;  %5429 = vset.pattern.permute.xlu0 %v5476_v29  ;;  %v6300_v23 = vadd.f32 %v445_v57, %v381_v1  ;;  %v6302_v8 = vadd.f32 %v450_v52, %v386_v32  ;;  %v654_v4 = vpop.permute.xlu1 %653  ;;  %v9227_v11 = vld [vmem:[#allocation7_spill] sm:$0xff] }
  0x90   :  { %9216 = vst [vmem:[#allocation105_spill] sm:$0xff] %v6295_v2  ;;  %1317 = vperm.xlu1 %5430, %v9218_v19   ;;  %v6304_v27 = vfloor.f32 %v117_v53  ;;  %v8868_v60 = vcvt.s32.f32 %v6283_v38  ;;  %1313 = vperm.xlu0 %5429, %v9221_v48   ;;  %v391_v59 = vmul.f32 %v263_v9, %v263_v9  ;;  %v455_v44 = vmul.f32 %v327_v37, %v327_v37 }
  0x91   :  { %v208_v20 = vsub.f32 %v9217_v47, %v176_v12  ;;  %9219 = vst [vmem:[#allocation106_spill] sm:$0xff] %v6300_v23  ;;  %9220 = vst [vmem:[#allocation107_spill] sm:$0xff] %v6302_v8  ;;  %v178_v33 = vmul.f32 16.0, %v146_v24  ;;  %v644_v12 = vpop.permute.xlu0 %643  ;;  %v6309_v29 = vadd.f32 %v451_v62, %v387_v18  ;;  %v6311_v47 = vadd.f32 %v448_v35, %v384_v61 }
  0x92   :  { %v6313_v1 = vadd.f32 %v449_v28, %v385_v21  ;;  %v9225_v57 = vcvt.s32.f32 %v6227_v3  ;;  %v6317_v52 = vadd.f32 %v454_v40, %v390_v41  ;;  %v260_v53 = vsub.f32 %v144_v10, %v5850_v31 }
  0x93   :  { %9222 = vst [vmem:[#allocation108_spill] sm:$0xff] %v6309_v29  ;;  %9223 = vst [vmem:[#allocation109_spill] sm:$0xff] %v6311_v47  ;;  %v261_v9 = vsub.f32 %v144_v10, %v5858_v30  ;;  %v324_v37 = vsub.f32 %v208_v20, %v5914_v50  ;;  %v325_v18 = vsub.f32 %v208_v20, %v5924_v56  ;;  %v181_v28 = vmul.f32 16.0, %v6304_v27  ;;  %v664_v20 = vpop.permute.xlu1 %663 }
  0x94   :  { %9224 = vst [vmem:[#allocation110_spill] sm:$0xff] %v6313_v1  ;;  %v211_v32 = vsub.f32 %v9225_v57, %v179_v26  ;;  %9226 = vst [vmem:[#allocation111_spill] sm:$0xff] %v6317_v52  ;;  %1321 = vperm.xlu1 %5430, %v9227_v11   ;;  %v266_v61 = vsub.f32 %v147_v43, %v5850_v31  ;;  %v116_v3 = vmul.f32 0.0625, %v8868_v60  ;;  %v9228_v26 = vld [vmem:[#allocation9_spill] sm:$0xff]  ;;  %v9230_v10 = vcvt.s32.f32 %v6233_v5 }
  0x95   :  { %1325 = vperm.xlu0 %5429, %v9228_v26   ;;  %v6329_v40 = vadd.f32 %v455_v44, %v391_v59  ;;  %v267_v62 = vsub.f32 %v147_v43, %v5858_v30  ;;  %v9231_v35 = vcvt.s32.f32 %v6288_v22  ;;  %v6336_v57 = vpop.permute.xlu0 %658  ;;  %v264_v60 = vsub.f32 %v146_v24, %v5850_v31 }
  0x96   :  { %v210_v21 = vsub.f32 %v9230_v10, %v178_v33  ;;  %v330_v11 = vsub.f32 %v211_v32, %v5914_v50  ;;  %v331_v19 = vsub.f32 %v211_v32, %v5924_v56  ;;  %v6342_v59 = vadd.s32 208, %v5761_v39  ;;  %v9232_v33 = vld [vmem:[#allocation12_spill] sm:$0xff]  ;;  %v9234_v32 = vld [vmem:[#allocation11_spill] sm:$0xff] }
  0x97   :  { %9229 = vst [vmem:[#allocation112_spill] sm:$0xff] %v6329_v40  ;;  %v119_v41 = vmul.f32 0.0625, %v9231_v35  ;;  %v388_v44 = vmul.f32 %v260_v53, %v260_v53  ;;  %v389_v43 = vmul.f32 %v261_v9, %v261_v9  ;;  %v452_v26 = vmul.f32 %v324_v37, %v324_v37 }
  0x98   :  { %v6345_v5 = vadd.s32 232, %v5761_v39  ;;  %1329 = vperm.xlu1 %5430, %v9232_v33   ;;  %v453_v10 = vmul.f32 %v325_v18, %v325_v18  ;;  %v394_v35 = vmul.f32 %v266_v61, %v266_v61  ;;  %v9233_v48 = vcvt.s32.f32 %v6249_v46  ;;  %v674_v18 = vpop.permute.xlu1 %673 }
  0x99   :  { %v6350_v52 = vfloor.f32 %v116_v3  ;;  %1333 = vperm.xlu0 %5429, %v9234_v32   ;;  %v395_v1 = vmul.f32 %v267_v62, %v267_v62  ;;  %v265_v47 = vsub.f32 %v146_v24, %v5858_v30  ;;  %v328_v53 = vsub.f32 %v210_v21, %v5914_v50  ;;  %v6360_v61 = vpop.permute.xlu0 %668  ;;  %v9236_v32 = vld [vmem:[#allocation14_spill] sm:$0xff] }
  0x9a   :  { %v213_v40 = vsub.f32 %v9233_v48, %v181_v28  ;;  %v329_v9 = vsub.f32 %v210_v21, %v5924_v56  ;;  %v6358_v37 = vadd.f32 %v6290_v63, %v5978_v54  ;;  %v458_v46 = vmul.f32 %v330_v11, %v330_v11 }
  0x9b   :  { %v459_v48 = vmul.f32 %v331_v19, %v331_v19  ;;  %v392_v28 = vmul.f32 %v264_v60, %v264_v60  ;;  %v801_v3 = vadd.f32 %v6290_v63, %v5989_v42  ;;  %v796_v24 = vadd.f32 %v6292_v16, %v5973_v15  ;;  %v9238_v42 = vld [vmem:[#allocation13_spill] sm:$0xff] }
  0x9c   :  { %v797_v62 = vadd.f32 %v6292_v16, %v5980_v49  ;;  %v6368_v21 = vadd.f32 %v452_v26, %v388_v44  ;;  %1337 = vperm.xlu1 %5430, %v9236_v32   ;;  %v6371_v33 = vadd.f32 %v453_v10, %v389_v43  ;;  %v270_v11 = vsub.f32 %v6304_v27, %v5850_v31  ;;  %v9239_v26 = vld [vmem:[#allocation76_spill] sm:$0xff]  ;;  %v6382_v10 = vpop.permute.xlu1 %683 }
  0x9d   :  { %v334_v19 = vsub.f32 %v213_v40, %v5914_v50  ;;  %v180_v60 = vmul.f32 16.0, %v6350_v52  ;;  %v802_v63 = vadd.f32 %v654_v4, %v5991_v45  ;;  %1341 = vperm.xlu0 %5429, %v9238_v42   ;;  %v393_v15 = vmul.f32 %v265_v47, %v265_v47  ;;  %v6384_v49 = vpop.permute.xlu0 %678 }
  0x9e   :  { %9235 = vst [vmem:[#allocation113_spill] sm:$0xff] %v6368_v21  ;;  %9237 = vst [vmem:[#allocation114_spill] sm:$0xff] %v6371_v33  ;;  %v456_v54 = vmul.f32 %v328_v53, %v328_v53  ;;  %v457_v16 = vmul.f32 %v329_v9, %v329_v9  ;;  %v803_v44 = vadd.f32 %v654_v4, %v9239_v26  ;;  %v6386_v33 = vfloor.f32 %v119_v41  ;;  %v9241_v9 = vld [vmem:[#allocation16_spill] sm:$0xff]  ;;  %v9243_v26 = vld [vmem:[#allocation15_spill] sm:$0xff] }
  0x9f   :  { %v798_v32 = vadd.f32 %v644_v12, %v6028_v36  ;;  %v799_v43 = vadd.f32 %v644_v12, %v6033_v7  ;;  %v860_v21 = vmin.f32 %v796_v24, %v6358_v37  ;;  %v6389_v45 = vadd.f32 %v458_v46, %v394_v35 }
  0xa0   :  { %v271_v47 = vsub.f32 %v6304_v27, %v5858_v30  ;;  %v335_v53 = vsub.f32 %v213_v40, %v5924_v56  ;;  %v897_v4 = vmin.f32 %v797_v62, %v801_v3  ;;  %1345 = vperm.xlu1 %5430, %v9241_v9   ;;  %v398_v42 = vmul.f32 %v270_v11, %v270_v11  ;;  %v694_v24 = vpop.permute.xlu1 %693 }
  0xa1   :  { %9240 = vst [vmem:[#allocation115_spill] sm:$0xff] %v6389_v45  ;;  %v462_v12 = vmul.f32 %v334_v19, %v334_v19  ;;  %v9242_v7 = vcvt.s32.f32 %v6283_v38  ;;  %v806_v41 = vadd.f32 %v664_v20, %v6035_v25  ;;  %1349 = vperm.xlu0 %5429, %v9243_v26   ;;  %v6399_v37 = vadd.f32 %v459_v48, %v395_v1  ;;  %v6406_v62 = vpop.permute.xlu0 %688 }
  0xa2   :  { %v6401_v35 = vadd.f32 %v456_v54, %v392_v28  ;;  %v6403_v46 = vadd.f32 %v457_v16, %v393_v15  ;;  %v861_v27 = vmin.f32 %v798_v32, %v802_v63  ;;  %v898_v40 = vmin.f32 %v799_v43, %v803_v44  ;;  %v9247_v28 = vld [vmem:[#allocation18_spill] sm:$0xff]  ;;  %v9249_v63 = vld [vmem:[#allocation17_spill] sm:$0xff] }
  0xa3   :  { %v212_v36 = vsub.f32 %v9242_v7, %v180_v60  ;;  %9244 = vst [vmem:[#allocation116_spill] sm:$0xff] %v6399_v37  ;;  %v807_v3 = vadd.f32 %v664_v20, %v6040_v17  ;;  %v183_v38 = vmul.f32 16.0, %v6386_v33  ;;  %v804_v7 = vadd.f32 %v6336_v57, %v6042_v58 }
  0xa4   :  { %9245 = vst [vmem:[#allocation117_spill] sm:$0xff] %v6401_v35  ;;  %9246 = vst [vmem:[#allocation118_spill] sm:$0xff] %v6403_v46  ;;  %v805_v1 = vadd.f32 %v6336_v57, %v6046_v51  ;;  %v399_v48 = vmul.f32 %v271_v47, %v271_v47  ;;  %v463_v54 = vmul.f32 %v335_v53, %v335_v53  ;;  %1353 = vperm.xlu1 %5430, %v9247_v28   ;;  %v704_v47 = vpop.permute.xlu1 %703 }
  0xa5   :  { %v6414_v15 = vadd.f32 %v462_v12, %v398_v42  ;;  %v268_v20 = vsub.f32 %v6350_v52, %v5850_v31  ;;  %v332_v32 = vsub.f32 %v212_v36, %v5914_v50  ;;  %v863_v19 = vmin.f32 %v861_v27, %v806_v41  ;;  %1357 = vperm.xlu0 %5429, %v9249_v63   ;;  %v6428_v53 = vpop.permute.xlu0 %698 }
  0xa6   :  { %v810_v60 = vadd.f32 %v674_v18, %v6079_v0  ;;  %v269_v57 = vsub.f32 %v6350_v52, %v5858_v30  ;;  %v333_v16 = vsub.f32 %v212_v36, %v5924_v56  ;;  %v900_v44 = vmin.f32 %v898_v40, %v807_v3  ;;  %v9252_v40 = vld [vmem:[#allocation20_spill] sm:$0xff] }
  0xa7   :  { %9248 = vst [vmem:[#allocation119_spill] sm:$0xff] %v6414_v15  ;;  %v811_v42 = vadd.f32 %v674_v18, %v6084_v14  ;;  %v808_v43 = vadd.f32 %v6360_v61, %v6096_v55  ;;  %v9250_v12 = vcvt.s32.f32 %v6288_v22  ;;  %v862_v27 = vmin.f32 %v860_v21, %v804_v7  ;;  %v9254_v21 = vld [vmem:[#allocation19_spill] sm:$0xff]  ;;  %v9270_v55 = vld [vmem:[#allocation97_spill] sm:$0xff] }
  0xa8   :  { %v899_v11 = vmin.f32 %v897_v4, %v805_v1  ;;  %v809_v63 = vadd.f32 %v6360_v61, %v6101_v13  ;;  %v9251_v52 = vcvt.s32.f32 %v6342_v59  ;;  %1361 = vperm.xlu1 %5430, %v9252_v40   ;;  %v6437_v18 = vadd.f32 %v463_v54, %v399_v48  ;;  %v714_v1 = vpop.permute.xlu1 %713  ;;  %v9266_v13 = vld [vmem:[#allocation95_spill] sm:$0xff] }
  0xa9   :  { %v215_v41 = vsub.f32 %v9250_v12, %v183_v38  ;;  %v396_v3 = vmul.f32 %v268_v20, %v268_v20  ;;  %v460_v26 = vmul.f32 %v332_v32, %v332_v32  ;;  %v8889_v28 = vcvt.s32.f32 %v6345_v5  ;;  %1365 = vperm.xlu0 %5429, %v9254_v21   ;;  %v6443_v12 = vpop.permute.xlu0 %708 }
  0xaa   :  { %v118_v36 = vmul.f32 0.0625, %v9251_v52  ;;  %9253 = vst [vmem:[#allocation120_spill] sm:$0xff] %v6437_v18  ;;  %v865_v9 = vmin.f32 %v863_v19, %v810_v60  ;;  %v814_v22 = vadd.f32 %v6382_v10, %v6106_v6  ;;  %v397_v4 = vmul.f32 %v269_v57, %v269_v57  ;;  %v9255_v19 = vld [vmem:[#allocation89_spill] sm:$0xff]  ;;  %v9256_v57 = vld [vmem:[#allocation90_spill] sm:$0xff] }
  0xab   :  { %v461_v38 = vmul.f32 %v333_v16, %v333_v16  ;;  %v902_v61 = vmin.f32 %v900_v44, %v811_v42  ;;  %v864_v7 = vmin.f32 %v862_v27, %v808_v43  ;;  %v274_v48 = vsub.f32 %v6386_v33, %v5850_v31  ;;  %v9257_v44 = vld [vmem:[#allocation22_spill] sm:$0xff]  ;;  %v9259_v27 = vld [vmem:[#allocation21_spill] sm:$0xff] }
  0xac   :  { %v338_v54 = vsub.f32 %v215_v41, %v5914_v50  ;;  %v901_v20 = vmin.f32 %v899_v11, %v809_v63  ;;  %v815_v32 = vadd.f32 %v6382_v10, %v6119_v34  ;;  %v812_v60 = vadd.f32 %v6384_v49, %v9255_v19  ;;  %1369 = vperm.xlu1 %5430, %v9257_v44   ;;  %v724_v40 = vpop.permute.xlu1 %723 }
  0xad   :  { %v150_v52 = vfloor.f32 %v118_v36  ;;  %v813_v16 = vadd.f32 %v6384_v49, %v9256_v57  ;;  %v6455_v42 = vadd.f32 %v460_v26, %v396_v3  ;;  %v275_v43 = vsub.f32 %v6386_v33, %v5858_v30  ;;  %1373 = vperm.xlu0 %5429, %v9259_v27   ;;  %v9261_v49 = vld [vmem:[#allocation91_spill] sm:$0xff]  ;;  %v9262_v26 = vld [vmem:[#allocation92_spill] sm:$0xff]  ;;  %v6470_v57 = vpop.permute.xlu0 %718 }
  0xae   :  { %v121_v11 = vmul.f32 0.0625, %v8889_v28  ;;  %v867_v63 = vmin.f32 %v865_v9, %v814_v22  ;;  %v6462_v10 = vadd.f32 %v461_v38, %v397_v4  ;;  %v339_v36 = vsub.f32 %v215_v41, %v5924_v56  ;;  %v9263_v22 = vld [vmem:[#allocation93_spill] sm:$0xff]  ;;  %v9264_v41 = vld [vmem:[#allocation24_spill] sm:$0xff] }
  0xaf   :  { %9258 = vst [vmem:[#allocation121_spill] sm:$0xff] %v6455_v42  ;;  %v6466_v21 = vadd.s32 224, %v5761_v39  ;;  %v818_v44 = vadd.f32 %v694_v24, %v9261_v49  ;;  %v819_v3 = vadd.f32 %v694_v24, %v9262_v26  ;;  %v402_v33 = vmul.f32 %v274_v48, %v274_v48  ;;  %v9265_v24 = vld [vmem:[#allocation94_spill] sm:$0xff] }
  0xb0   :  { %9260 = vst [vmem:[#allocation122_spill] sm:$0xff] %v6462_v10  ;;  %v466_v19 = vmul.f32 %v338_v54, %v338_v54  ;;  %v904_v28 = vmin.f32 %v902_v61, %v815_v32  ;;  %v866_v9 = vmin.f32 %v864_v7, %v812_v60  ;;  %v816_v4 = vadd.f32 %v6406_v62, %v9263_v22  ;;  %v9267_v54 = vld [vmem:[#allocation23_spill] sm:$0xff]  ;;  %v9273_v7 = vld [vmem:[#allocation26_spill] sm:$0xff] }
  0xb1   :  { %v182_v38 = vmul.f32 16.0, %v150_v52  ;;  %v903_v27 = vmin.f32 %v901_v20, %v813_v16  ;;  %1377 = vperm.xlu1 %5430, %v9264_v41   ;;  %v403_v34 = vmul.f32 %v275_v43, %v275_v43  ;;  %v153_v6 = vfloor.f32 %v121_v11  ;;  %1381 = vperm.xlu0 %5429, %v9267_v54   ;;  %v9268_v20 = vld [vmem:[#allocation96_spill] sm:$0xff]  ;;  %v734_v41 = vpop.permute.xlu1 %733  ;;  %v6484_v43 = vpop.permute.xlu0 %728 }
  0xb2   :  { %v6476_v49 = vadd.s32 248, %v5761_v39  ;;  %v817_v26 = vadd.f32 %v6406_v62, %v9265_v24  ;;  %v822_v48 = vadd.f32 %v704_v47, %v9266_v13  ;;  %v467_v61 = vmul.f32 %v339_v36, %v339_v36  ;;  %v9271_v24 = vld [vmem:[#allocation98_spill] sm:$0xff] }
  0xb3   :  { %v869_v32 = vmin.f32 %v867_v63, %v818_v44  ;;  %v906_v60 = vmin.f32 %v904_v28, %v819_v3  ;;  %v823_v16 = vadd.f32 %v704_v47, %v9268_v20  ;;  %v6486_v11 = vadd.f32 %v466_v19, %v402_v33  ;;  %v9274_v33 = vld [vmem:[#allocation25_spill] sm:$0xff] }
  0xb4   :  { %v868_v22 = vmin.f32 %v866_v9, %v816_v4  ;;  %v820_v62 = vadd.f32 %v6428_v53, %v9270_v55  ;;  %v821_v13 = vadd.f32 %v6428_v53, %v9271_v24  ;;  %v9272_v36 = vcvt.s32.f32 %v6342_v59  ;;  %v9279_v55 = vld [vmem:[#allocation101_spill] sm:$0xff] }
  0xb5   :  { %9269 = vst [vmem:[#allocation123_spill] sm:$0xff] %v6486_v11  ;;  %1385 = vperm.xlu1 %5430, %v9273_v7   ;;  %v272_v28 = vsub.f32 %v150_v52, %v5850_v31  ;;  %v273_v47 = vsub.f32 %v150_v52, %v5858_v30  ;;  %v185_v44 = vmul.f32 16.0, %v153_v6  ;;  %v905_v63 = vmin.f32 %v903_v27, %v817_v26  ;;  %v9278_v7 = vld [vmem:[#allocation100_spill] sm:$0xff]  ;;  %v744_v20 = vpop.permute.xlu1 %743  ;;  %v739_v14 = vpop.permute.xlu0 %738  ;;  %v9280_v26 = vld [vmem:[#allocation102_spill] sm:$0xff] }
  0xb6   :  { %v214_v54 = vsub.f32 %v9272_v36, %v182_v38  ;;  %v871_v3 = vmin.f32 %v869_v32, %v822_v48  ;;  %1389 = vperm.xlu0 %5429, %v9274_v33   ;;  %v6499_v9 = vadd.f32 %v467_v61, %v403_v34  ;;  %v9276_v53 = vcvt.s32.f32 %v6466_v21  ;;  %v9277_v38 = vld [vmem:[#allocation99_spill] sm:$0xff]  ;;  %v9281_v61 = vld [vmem:[#allocation28_spill] sm:$0xff] }
  0xb7   :  { %v908_v59 = vmin.f32 %v906_v60, %v823_v16  ;;  %v826_v36 = vadd.f32 %v714_v1, %v9277_v38  ;;  %v827_v24 = vadd.f32 %v714_v1, %v9278_v7  ;;  %v824_v52 = vadd.f32 %v6443_v12, %v9279_v55  ;;  %v9284_v55 = vld [vmem:[#allocation103_spill] sm:$0xff]  ;;  %v9285_v38 = vld [vmem:[#allocation104_spill] sm:$0xff] }
  0xb8   :  { %9275 = vst [vmem:[#allocation124_spill] sm:$0xff] %v6499_v9  ;;  %v120_v4 = vmul.f32 0.0625, %v9276_v53  ;;  %v870_v19 = vmin.f32 %v868_v22, %v820_v62  ;;  %v907_v27 = vmin.f32 %v905_v63, %v821_v13  ;;  %v825_v48 = vadd.f32 %v6443_v12, %v9280_v26  ;;  %v9286_v13 = vld [vmem:[#allocation27_spill] sm:$0xff] }
  0xb9   :  { %v336_v34 = vsub.f32 %v214_v54, %v5914_v50  ;;  %1393 = vperm.xlu1 %5430, %v9281_v61   ;;  %v400_v32 = vmul.f32 %v272_v28, %v272_v28  ;;  %v401_v60 = vmul.f32 %v273_v47, %v273_v47  ;;  %v9282_v16 = vcvt.s32.f32 %v6345_v5  ;;  %v754_v5 = vpop.permute.xlu1 %753  ;;  %v6521_v47 = vpop.permute.xlu0 %748 }
  0xba   :  { %v9283_v1 = vcvt.s32.f32 %v6476_v49  ;;  %v830_v7 = vadd.f32 %v724_v40, %v9284_v55  ;;  %v831_v22 = vadd.f32 %v724_v40, %v9285_v38  ;;  %1397 = vperm.xlu0 %5429, %v9286_v13   ;;  %v337_v12 = vsub.f32 %v214_v54, %v5924_v56  ;;  %v9287_v13 = vld [vmem:[#allocation30_spill] sm:$0xff]  ;;  %v9295_v38 = vld [vmem:[#allocation31_spill] sm:$0xff] }
  0xbb   :  { %v217_v53 = vsub.f32 %v9282_v16, %v185_v44  ;;  %v152_v62 = vfloor.f32 %v120_v4  ;;  %v873_v63 = vmin.f32 %v871_v3, %v826_v36  ;;  %v910_v26 = vmin.f32 %v908_v59, %v827_v24  ;;  %v9288_v36 = vld [vmem:[#allocation29_spill] sm:$0xff] }
  0xbc   :  { %v123_v33 = vmul.f32 0.0625, %v9283_v1  ;;  %v872_v61 = vmin.f32 %v870_v19, %v824_v52  ;;  %v828_v28 = vadd.f32 %v6470_v57, %v6295_v2  ;;  %v909_v44 = vmin.f32 %v907_v27, %v825_v48 }
  0xbd   :  { %v829_v16 = vadd.f32 %v6470_v57, %v6300_v23  ;;  %v464_v1 = vmul.f32 %v336_v34, %v336_v34  ;;  %v278_v40 = vsub.f32 %v153_v6, %v5850_v31  ;;  %1401 = vperm.xlu1 %5430, %v9287_v13   ;;  %v279_v54 = vsub.f32 %v153_v6, %v5858_v30  ;;  %v9289_v23 = vld [vmem:[#allocation109_spill] sm:$0xff]  ;;  %v6535_v6 = vpop.permute.xlu1 %763  ;;  %v6537_v2 = vpop.permute.xlu0 %758 }
  0xbe   :  { %v342_v24 = vsub.f32 %v217_v53, %v5914_v50  ;;  %v343_v19 = vsub.f32 %v217_v53, %v5924_v56  ;;  %v155_v3 = vfloor.f32 %v123_v33  ;;  %v875_v4 = vmin.f32 %v873_v63, %v830_v7  ;;  %1405 = vperm.xlu0 %5429, %v9288_v36   ;;  %v9290_v33 = vld [vmem:[#allocation110_spill] sm:$0xff]  ;;  %v9293_v36 = vld [vmem:[#allocation111_spill] sm:$0xff] }
  0xbf   :  { %v912_v59 = vmin.f32 %v910_v26, %v831_v22  ;;  %v465_v52 = vmul.f32 %v337_v12, %v337_v12  ;;  %v184_v27 = vmul.f32 16.0, %v152_v62  ;;  %v874_v48 = vmin.f32 %v872_v61, %v828_v28  ;;  %v9292_v12 = vld [vmem:[#allocation32_spill] sm:$0xff] }
  0xc0   :  { %v834_v57 = vadd.f32 %v734_v41, %v6302_v8  ;;  %v835_v34 = vadd.f32 %v734_v41, %v6309_v29  ;;  %v832_v13 = vadd.f32 %v6484_v43, %v9289_v23  ;;  %v911_v53 = vmin.f32 %v909_v44, %v829_v16  ;;  %v9294_v23 = vld [vmem:[#allocation112_spill] sm:$0xff] }
  0xc1   :  { %v833_v7 = vadd.f32 %v6484_v43, %v9290_v33  ;;  %v6541_v26 = vadd.f32 %v464_v1, %v400_v32  ;;  %v406_v22 = vmul.f32 %v278_v40, %v278_v40  ;;  %1409 = vperm.xlu1 %5430, %v9292_v12   ;;  %v407_v61 = vmul.f32 %v279_v54, %v279_v54  ;;  %v9298_v40 = vld [vmem:[#allocation113_spill] sm:$0xff]  ;;  %v6552_v54 = vpop.permute.xlu1 %773 }
  0xc2   :  { %v470_v63 = vmul.f32 %v342_v24, %v342_v24  ;;  %v471_v28 = vmul.f32 %v343_v19, %v343_v19  ;;  %v187_v41 = vmul.f32 16.0, %v155_v3  ;;  %v838_v29 = vadd.f32 %v744_v20, %v9293_v36  ;;  %1413 = vperm.xlu0 %5429, %v9295_v38   ;;  %v6554_v24 = vpop.permute.xlu0 %768  ;;  %v9299_v36 = vld [vmem:[#allocation114_spill] sm:$0xff] }
  0xc3   :  { %9291 = vst [vmem:[#allocation125_spill] sm:$0xff] %v6541_v26  ;;  %v839_v8 = vadd.f32 %v744_v20, %v9294_v23  ;;  %v6547_v55 = vadd.f32 %v465_v52, %v401_v60  ;;  %v9297_v44 = vcvt.s32.f32 %v6466_v21  ;;  %v877_v32 = vmin.f32 %v875_v4, %v834_v57  ;;  %v9300_v52 = vld [vmem:[#allocation34_spill] sm:$0xff]  ;;  %v9304_v57 = vld [vmem:[#allocation33_spill] sm:$0xff] }
  0xc4   :  { %v914_v16 = vmin.f32 %v912_v59, %v835_v34  ;;  %v876_v1 = vmin.f32 %v874_v48, %v832_v13  ;;  %v836_v12 = vadd.f32 %v739_v14, %v9298_v40  ;;  %v913_v19 = vmin.f32 %v911_v53, %v833_v7 }
  0xc5   :  { %9296 = vst [vmem:[#allocation126_spill] sm:$0xff] %v6547_v55  ;;  %v216_v43 = vsub.f32 %v9297_v44, %v184_v27  ;;  %v837_v33 = vadd.f32 %v739_v14, %v9299_v36  ;;  %v276_v20 = vsub.f32 %v152_v62, %v5850_v31  ;;  %v277_v60 = vsub.f32 %v152_v62, %v5858_v30  ;;  %v9305_v44 = vld [vmem:[#allocation36_spill] sm:$0xff] }
  0xc6   :  { %1417 = vperm.xlu1 %5430, %v9300_v52   ;;  %v6560_v21 = vadd.f32 %v470_v63, %v406_v22  ;;  %v6562_v4 = vadd.f32 %v471_v28, %v407_v61  ;;  %v9303_v13 = vcvt.s32.f32 %v6476_v49  ;;  %v879_v27 = vmin.f32 %v877_v32, %v838_v29  ;;  %1421 = vperm.xlu0 %5429, %v9304_v57   ;;  %v784_v49 = vpop.permute.xlu1 %783  ;;  %v6571_v61 = vpop.permute.xlu0 %778 }
  0xc7   :  { %v916_v48 = vmin.f32 %v914_v16, %v839_v8  ;;  %v340_v34 = vsub.f32 %v216_v43, %v5914_v50  ;;  %v341_v14 = vsub.f32 %v216_v43, %v5924_v56  ;;  %v5477_v53 = vmov 1e+30  }
  0xc8   :  { %9301 = vst [vmem:[#allocation127_spill] sm:$0xff] %v6560_v21  ;;  %9302 = vst [vmem:[#allocation128_spill] sm:$0xff] %v6562_v4  ;;  %v219_v59 = vsub.f32 %v9303_v13, %v187_v41  ;;  %v878_v62 = vmin.f32 %v876_v1, %v836_v12  ;;  %v842_v7 = vadd.f32 %v754_v5, %v6389_v45  ;;  %v58_v8 = vadd.s32 240, %v5761_v39 }
  0xc9   :  { %9 = vst [vmem:[#allocation2] sm:$0xff] %v5477_v53  ;;  %10 = vst [vmem:[#allocation2 + $0x8] sm:$0xff] %v5477_v53  ;;  %v843_v22 = vadd.f32 %v754_v5, %v6399_v37  ;;  %v915_v29 = vmin.f32 %v913_v19, %v837_v33  ;;  %v404_v63 = vmul.f32 %v276_v20, %v276_v20  ;;  %v9306_v20 = vld [vmem:[#allocation35_spill] sm:$0xff] }
  0xca   :  { %11 = vst [vmem:[#allocation3] sm:$0xff] %v5477_v53  ;;  %12 = vst [vmem:[#allocation3 + $0x8] sm:$0xff] %v5477_v53  ;;  %v405_v28 = vmul.f32 %v277_v60, %v277_v60  ;;  %v282_v41 = vsub.f32 %v155_v3, %v5850_v31  ;;  %1425 = vperm.xlu1 %5430, %v9305_v44   ;;  %v283_v43 = vsub.f32 %v155_v3, %v5858_v30  ;;  %v794_v53 = vpop.permute.xlu1 %793  ;;  %v6586_v57 = vpop.permute.xlu0 %788 }
  0xcb   :  { %v346_v12 = vsub.f32 %v219_v59, %v5914_v50  ;;  %v347_v32 = vsub.f32 %v219_v59, %v5924_v56  ;;  %v90_v16 = vcvt.s32.f32 %v58_v8  ;;  %v840_v5 = vadd.f32 %v6521_v47, %v6401_v35  ;;  %1429 = vperm.xlu0 %5429, %v9306_v20  }
  0xcc   :  { %v841_v1 = vadd.f32 %v6521_v47, %v6403_v46  ;;  %v468_v33 = vmul.f32 %v340_v34, %v340_v34  ;;  %v469_v19 = vmul.f32 %v341_v14, %v341_v14  ;;  %v881_v60 = vmin.f32 %v879_v27, %v842_v7 }
  0xcd   :  { %v918_v13 = vmin.f32 %v916_v48, %v843_v22  ;;  %v846_v3 = vadd.f32 %v6535_v6, %v6414_v15  ;;  %v122_v59 = vmul.f32 0.0625, %v90_v16  ;;  %v847_v8 = vadd.f32 %v6535_v6, %v6437_v18  ;;  %v9307_v22 = vld [vmem:[#allocation43_spill] sm:$0xff]  ;;  %v9310_v6 = vld [vmem:[#allocation40_spill] sm:$0xff] }
  0xce   :  { %v844_v44 = vadd.f32 %v6537_v2, %v6455_v42  ;;  %v845_v47 = vadd.f32 %v6537_v2, %v6462_v10  ;;  %v410_v34 = vmul.f32 %v282_v41, %v282_v41  ;;  %v411_v14 = vmul.f32 %v283_v43, %v283_v43  ;;  %1433 = vperm.xlu1 %5430, %v9307_v22   ;;  %v6602_v41 = vpop.permute.xlu1 %973  ;;  %v6604_v43 = vpop.permute.xlu0 %968 }
  0xcf   :  { %v474_v27 = vmul.f32 %v346_v12, %v346_v12  ;;  %v475_v48 = vmul.f32 %v347_v32, %v347_v32  ;;  %v154_v7 = vfloor.f32 %v122_v59  ;;  %v880_v20 = vmin.f32 %v878_v62, %v840_v5  ;;  %1437 = vperm.xlu0 %5429, %v9310_v6   ;;  %v9336_v6 = vld [vmem:[#allocation52_spill] sm:$0xff] }
  0xd0   :  { %v917_v38 = vmin.f32 %v915_v29, %v841_v1  ;;  %v6595_v52 = vadd.f32 %v468_v33, %v404_v63  ;;  %v6597_v15 = vadd.f32 %v469_v19, %v405_v28  ;;  %v883_v18 = vmin.f32 %v881_v60, %v846_v3  ;;  %v9313_v1 = vld [vmem:[#allocation38_spill] sm:$0xff] }
  0xd1   :  { %v186_v42 = vmul.f32 16.0, %v154_v7  ;;  %v280_v46 = vsub.f32 %v154_v7, %v5850_v31  ;;  %v281_v2 = vsub.f32 %v154_v7, %v5858_v30  ;;  %v920_v12 = vmin.f32 %v918_v13, %v847_v8 }
  0xd2   :  { %9308 = vst [vmem:[#allocation129_spill] sm:$0xff] %v6595_v52  ;;  %9309 = vst [vmem:[#allocation130_spill] sm:$0xff] %v6597_v15  ;;  %v882_v32 = vmin.f32 %v880_v20, %v844_v44  ;;  %v850_v62 = vadd.f32 %v6552_v54, %v6486_v11  ;;  %v851_v29 = vadd.f32 %v6552_v54, %v6499_v9  ;;  %1579 = vperm.xlu1 %5430, %v9313_v1   ;;  %v9314_v20 = vld [vmem:[#allocation37_spill] sm:$0xff]  ;;  %v979_v13 = vpop.permute.xlu0 %978 }
  0xd3   :  { %v919_v63 = vmin.f32 %v917_v38, %v845_v47  ;;  %v6610_v28 = vadd.f32 %v474_v27, %v410_v34  ;;  %v6612_v5 = vadd.f32 %v475_v48, %v411_v14  ;;  %v218_v31 = vsub.f32 %v90_v16, %v186_v42  ;;  %1583 = vperm.xlu0 %5429, %v9314_v20   ;;  %v984_v16 = vpop.permute.xlu1 %983  ;;  %v9315_v14 = vld [vmem:[#allocation41_spill] sm:$0xff]  ;;  %v9316_v27 = vld [vmem:[#allocation39_spill] sm:$0xff] }
  0xd4   :  { %v848_v30 = vadd.f32 %v6554_v24, %v6541_v26  ;;  %v849_v44 = vadd.f32 %v6554_v24, %v6547_v55  ;;  %v854_v33 = vadd.f32 %v784_v49, %v6560_v21  ;;  %v855_v19 = vadd.f32 %v784_v49, %v6562_v4  ;;  %v9335_v20 = vld [vmem:[#allocation73_spill] sm:$0xff] }
  0xd5   :  { %9311 = vst [vmem:[#allocation131_spill] sm:$0xff] %v6610_v28  ;;  %9312 = vst [vmem:[#allocation132_spill] sm:$0xff] %v6612_v5  ;;  %v344_v38 = vsub.f32 %v218_v31, %v5914_v50  ;;  %v345_v54 = vsub.f32 %v218_v31, %v5924_v56  ;;  %v408_v60 = vmul.f32 %v280_v46, %v280_v46 }
  0xd6   :  { %v409_v42 = vmul.f32 %v281_v2, %v281_v2  ;;  %v885_v3 = vmin.f32 %v883_v18, %v850_v62  ;;  %v922_v59 = vmin.f32 %v920_v12, %v851_v29  ;;  %v852_v8 = vadd.f32 %v6571_v61, %v6595_v52  ;;  %1587 = vperm.xlu1 %5430, %v9315_v14  }
  0xd7   :  { %v853_v24 = vadd.f32 %v6571_v61, %v6597_v15  ;;  %v858_v49 = vadd.f32 %v794_v53, %v6610_v28  ;;  %v859_v47 = vadd.f32 %v794_v53, %v6612_v5  ;;  %v472_v34 = vmul.f32 %v344_v38, %v344_v38  ;;  %1591 = vperm.xlu0 %5429, %v9316_v27   ;;  %v994_v12 = vpop.permute.xlu1 %993  ;;  %v989_v61 = vpop.permute.xlu0 %988 }
  0xd8   :  { %v473_v50 = vmul.f32 %v345_v54, %v345_v54  ;;  %v884_v56 = vmin.f32 %v882_v32, %v848_v30  ;;  %v921_v46 = vmin.f32 %v919_v63, %v849_v44  ;;  %v887_v18 = vmin.f32 %v885_v3, %v854_v33  ;;  %v9319_v63 = vld [vmem:[#allocation44_spill] sm:$0xff]  ;;  %v9320_v30 = vld [vmem:[#allocation42_spill] sm:$0xff] }
  0xd9   :  { %v924_v48 = vmin.f32 %v922_v59, %v855_v19  ;;  %v6632_v7 = vadd.f32 %v472_v34, %v408_v60  ;;  %v9321_v3 = vld [vmem:[#allocation46_spill] sm:$0xff]  ;;  %v5478_v59 = vmov 1966171168   ;;  %v1127_v14 = vadd.f32 %v6604_v43, %v9335_v20 }
  0xda   :  { %v6634_v2 = vadd.f32 %v473_v50, %v409_v42  ;;  %v886_v62 = vmin.f32 %v884_v56, %v852_v8  ;;  %v923_v29 = vmin.f32 %v921_v46, %v853_v24  ;;  %v889_v31 = vmin.f32 %v887_v18, %v858_v49  ;;  %1595 = vperm.xlu1 %5430, %v9319_v63   ;;  %v9322_v24 = vld [vmem:[#allocation45_spill] sm:$0xff]  ;;  %v9323_v46 = vld [vmem:[#allocation48_spill] sm:$0xff] }
  0xdb   :  { %9317 = vst [vmem:[#allocation133_spill] sm:$0xff] %v6632_v7  ;;  %v926_v53 = vmin.f32 %v924_v48, %v859_v47  ;;  %v856_v38 = vadd.f32 %v6586_v57, %v6632_v7  ;;  %1599 = vperm.xlu0 %5429, %v9320_v30   ;;  %v1004_v19 = vpop.permute.xlu1 %1003  ;;  %v999_v54 = vpop.permute.xlu0 %998  ;;  %v1269_v8 = vunpack.c.l.s4 %v5478_v59  ;;  %v9324_v48 = vld [vmem:[#allocation47_spill] sm:$0xff]  ;;  %v9331_v30 = vld [vmem:[#allocation74_spill] sm:$0xff]  ;;  %v1134_v22 = vadd.f32 %v989_v61, %v6042_v58 }
  0xdc   :  { %9318 = vst [vmem:[#allocation134_spill] sm:$0xff] %v6634_v2  ;;  %v857_v32 = vadd.f32 %v6586_v57, %v6634_v2  ;;  %v9327_v59 = vld [vmem:[#allocation75_spill] sm:$0xff] }
  0xdd   :  { %v888_v44 = vmin.f32 %v886_v62, %v856_v38  ;;  %v1270_v18 = vunpack.c.0.s8 %v1269_v8 }
  0xde   :  { %v925_v33 = vmin.f32 %v923_v29, %v857_v32  ;;  %1603 = vperm.xlu1 %5430, %v9321_v3   ;;  %v1131_v3 = vadd.f32 %v979_v13, %v9331_v30 }
  0xdf   :  { %v890_v60 = vmin.f32 %v888_v44, %v889_v31  ;;  %1607 = vperm.xlu0 %5429, %v9322_v24   ;;  %v1014_v34 = vpop.permute.xlu1 %1013  ;;  %v1009_v57 = vpop.permute.xlu0 %1008  ;;  %v9325_v44 = vld [vmem:[#allocation50_spill] sm:$0xff]  ;;  %v1132_v24 = vadd.f32 %v984_v16, %v9327_v59  ;;  %v9338_v59 = vld [vmem:[#allocation84_spill] sm:$0xff] }
  0xe0   :  { %v927_v42 = vmin.f32 %v925_v33, %v926_v53  ;;  %v6648_v33 = vsub.s32 %v1270_v18, %v5761_v39  ;;  %v9334_v18 = vld [vmem:[#allocation71_spill] sm:$0xff] }
  0xe1   :  { %v891_v49 = vrot.slane %v890_v60, 4 }
  0xe2   :  { %v928_v47 = vrot.slane %v927_v42, 4  ;;  %1611 = vperm.xlu1 %5430, %v9323_v46   ;;  %9326 = vst [vmem:[#allocation135_spill] sm:$0xff] %v6648_v33 }
  0xe3   :  { %v892_v50 = vmin.f32 %v890_v60, %v891_v49  ;;  %1615 = vperm.xlu0 %5429, %v9324_v48   ;;  %v1024_v31 = vpop.permute.xlu1 %1023  ;;  %v1019_v53 = vpop.permute.xlu0 %1018  ;;  %v9328_v60 = vld [vmem:[#allocation76_spill] sm:$0xff]  ;;  %v9329_v49 = vld [vmem:[#allocation49_spill] sm:$0xff] }
  0xe4   :  { %v929_v56 = vmin.f32 %v927_v42, %v928_v47  ;;  %v1133_v42 = vadd.f32 %v984_v16, %v9328_v60  ;;  %v9330_v48 = vld [vmem:[#allocation72_spill] sm:$0xff]  ;;  %v1136_v16 = vadd.f32 %v994_v12, %v6035_v25 }
  0xe5   :  { %v893_v62 = vrot.slane %v892_v50, 2  ;;  %v1130_v46 = vadd.f32 %v979_v13, %v9330_v48  ;;  %v1137_v13 = vadd.f32 %v994_v12, %v6040_v17  ;;  %v1141_v12 = vadd.f32 %v1004_v19, %v9338_v59  ;;  %v9339_v17 = vld [vmem:[#allocation85_spill] sm:$0xff] }
  0xe6   :  { %v930_v29 = vrot.slane %v929_v56, 2  ;;  %1619 = vperm.xlu1 %5430, %v9325_v44   ;;  %v1126_v44 = vadd.f32 %v6604_v43, %v9334_v18 }
  0xe7   :  { %v894_v38 = vmin.f32 %v892_v50, %v893_v62  ;;  %1623 = vperm.xlu0 %5429, %v9329_v49   ;;  %v1034_v27 = vpop.permute.xlu1 %1033  ;;  %v1029_v50 = vpop.permute.xlu0 %1028 }
  0xe8   :  { %v931_v32 = vmin.f32 %v929_v56, %v930_v29  ;;  %v9332_v56 = vld [vmem:[#allocation77_spill] sm:$0xff]  ;;  %v9333_v29 = vld [vmem:[#allocation78_spill] sm:$0xff] }
  0xe9   :  { %v895_v8 = vrot.slane %v894_v38, 1  ;;  %v1128_v62 = vadd.f32 %v6602_v41, %v9332_v56  ;;  %v1129_v39 = vadd.f32 %v6602_v41, %v9333_v29  ;;  %v1135_v56 = vadd.f32 %v989_v61, %v6046_v51  ;;  %v9337_v29 = vld [vmem:[#allocation51_spill] sm:$0xff]  ;;  %v9355_v51 = vld [vmem:[#allocation56_spill] sm:$0xff] }
  0xea   :  { %v932_v47 = vrot.slane %v931_v32, 1  ;;  %1627 = vperm.xlu1 %5430, %v9336_v6   ;;  %v1140_v41 = vadd.f32 %v1004_v19, %v6079_v0  ;;  %v1138_v6 = vadd.f32 %v999_v54, %v9339_v17  ;;  %v9341_v61 = vlaneseq }
  0xeb   :  { %v896_v49 = vmin.f32 %v894_v38, %v895_v8  ;;  %v1191_v1 = vmin.f32 %v1128_v62, %v1132_v24  ;;  %1631 = vperm.xlu0 %5429, %v9337_v29   ;;  %v1228_v25 = vmin.f32 %v1129_v39, %v1133_v42  ;;  %v1190_v38 = vmin.f32 %v1126_v44, %v1130_v46  ;;  %v1044_v8 = vpop.permute.xlu1 %1043  ;;  %v9340_v24 = vld [vmem:[#allocation86_spill] sm:$0xff]  ;;  %v9346_v44 = vld [vmem:[#allocation87_spill] sm:$0xff]  ;;  %v9348_v39 = vld [vmem:[#allocation88_spill] sm:$0xff] }
  0xec   :  { %v933_v63 = vmin.f32 %v931_v32, %v932_v47  ;;  %v1227_v32 = vmin.f32 %v1127_v14, %v1131_v3  ;;  %v1039_v47 = vpop.permute.xlu0 %1038  ;;  %v1139_v62 = vadd.f32 %v999_v54, %v9340_v24  ;;  %vm6675_vm0 = vcmp.lt.s32.totalorder %v9341_v61, 256  ;;  %v9345_v42 = vld [vmem:[#allocation54_spill] sm:$0xff] }
  0xed   :  { %v1193_v43 = vmin.f32 %v1191_v1, %v1136_v16  ;;  %v9342_v0 = vmov 0  ;;  %v1264_v14 = vld [vmem:[#allocation2] ss:$8 sm:$0x3]  ;;  %v1192_v3 = vmin.f32 %v1190_v38, %v1134_v22  ;;  %v1144_v19 = vadd.f32 %v1014_v34, %v9346_v44  ;;  %v9351_v22 = vld [vmem:[#allocation91_spill] sm:$0xff]  ;;  %v9352_v38 = vld [vmem:[#allocation92_spill] sm:$0xff] }
  0xee   :  { %v1267_v60 = vcombine.low %v896_v49, %v933_v63  ;;  %v9343_v0 = vsel %vm6675_vm0, 4294967295, %v9342_v0  ;;  %v1230_v63 = vmin.f32 %v1228_v25, %v1137_v13  ;;  %1635 = vperm.xlu1 %5430, %v9345_v42   ;;  %v1229_v46 = vmin.f32 %v1227_v32, %v1135_v56  ;;  %v9347_v49 = vld [vmem:[#allocation53_spill] sm:$0xff]  ;;  %v9350_v29 = vld [vmem:[#allocation90_spill] sm:$0xff] }
  0xef   :  { %9344 = vst [vmem:[#allocation136_spill] sm:$0xff] %v9343_v0  ;;  %v1195_v1 = vmin.f32 %v1193_v43, %v1140_v41  ;;  %1639 = vperm.xlu0 %5429, %v9347_v49   ;;  %v9349_v16 = vld [vmem:[#allocation89_spill] sm:$0xff]  ;;  %v1143_v59 = vadd.f32 %v1009_v57, %v9350_v29  ;;  %v1054_v24 = vpop.permute.xlu1 %1053  ;;  %v1194_v42 = vmin.f32 %v1192_v3, %v1138_v6  ;;  %v9354_v44 = vld [vmem:[#allocation94_spill] sm:$0xff] }
  0xf0   :  { %v1274_v58 = vrot.slane %v1267_v60, %v6648_v33  ;;  %v1145_v60 = vadd.f32 %v1014_v34, %v9348_v39  ;;  %v1142_v61 = vadd.f32 %v1009_v57, %v9349_v16  ;;  %v1049_v25 = vpop.permute.xlu0 %1048  ;;  %v1232_v13 = vmin.f32 %v1230_v63, %v1141_v12  ;;  %v9353_v43 = vld [vmem:[#allocation93_spill] sm:$0xff]  ;;  %v9356_v34 = vld [vmem:[#allocation55_spill] sm:$0xff]  ;;  %v9361_v29 = vld [vmem:[#allocation58_spill] sm:$0xff] }
  0xf1   :  { %v1231_v17 = vmin.f32 %v1229_v46, %v1139_v62  ;;  %v1148_v56 = vadd.f32 %v1024_v31, %v9351_v22  ;;  %v1149_v32 = vadd.f32 %v1024_v31, %v9352_v38  ;;  %v1146_v49 = vadd.f32 %v1019_v53, %v9353_v43  ;;  %v9358_v31 = vld [vmem:[#allocation96_spill] sm:$0xff]  ;;  %v9359_v38 = vld [vmem:[#allocation97_spill] sm:$0xff]  ;;  %v9411_v0 = vld [vmem:[#allocation82_spill] sm:$0xff] }
  0xf2   :  { %v1281_v54 = vrot.slane %v1274_v58, %v6648_v33  ;;  %v1147_v58 = vadd.f32 %v1019_v53, %v9354_v44  ;;  %1643 = vperm.xlu1 %5430, %v9355_v51   ;;  %v1197_v57 = vmin.f32 %v1195_v1, %v1144_v19  ;;  %v1234_v12 = vmin.f32 %v1232_v13, %v1145_v60  ;;  %v9360_v53 = vld [vmem:[#allocation98_spill] sm:$0xff]  ;;  %v9362_v1 = vld [vmem:[#allocation99_spill] sm:$0xff] }
  0xf3   :  { %1647 = vperm.xlu0 %5429, %v9356_v34   ;;  %v1196_v6 = vmin.f32 %v1194_v42, %v1142_v61  ;;  %v1233_v62 = vmin.f32 %v1231_v17, %v1143_v59  ;;  %v1064_v63 = vpop.permute.xlu1 %1063  ;;  %v1150_v22 = vadd.f32 %v1029_v50, %v9359_v38  ;;  %v1151_v44 = vadd.f32 %v1029_v50, %v9360_v53  ;;  %v9363_v42 = vld [vmem:[#allocation100_spill] sm:$0xff]  ;;  %v9364_v59 = vld [vmem:[#allocation101_spill] sm:$0xff]  ;;  %v9365_v61 = vld [vmem:[#allocation102_spill] sm:$0xff] }
  0xf4   :  { %v1283_v41 = vmin.f32 %v1264_v14, %v1281_v54  ;;  %v1059_v3 = vpop.permute.xlu0 %1058  ;;  %v9357_v14 = vld [vmem:[#allocation95_spill] sm:$0xff]  ;;  %v1153_v54 = vadd.f32 %v1034_v27, %v9358_v31  ;;  %v1199_v51 = vmin.f32 %v1197_v57, %v1148_v56  ;;  %v1236_v43 = vmin.f32 %v1234_v12, %v1149_v32  ;;  %v9368_v57 = vld [vmem:[#allocation104_spill] sm:$0xff] }
  0xf5   :  { %v1152_v46 = vadd.f32 %v1034_v27, %v9357_v14  ;;  %v1198_v34 = vmin.f32 %v1196_v6, %v1146_v49  ;;  %v1235_v39 = vmin.f32 %v1233_v62, %v1147_v58  ;;  %v1156_v19 = vadd.f32 %v1044_v8, %v9362_v1  ;;  %v9367_v49 = vld [vmem:[#allocation103_spill] sm:$0xff]  ;;  %v9369_v6 = vld [vmem:[#allocation105_spill] sm:$0xff] }
  0xf6   :  { %1288 = vst.msk [vmem:[#allocation2] ss:$8 sm:$0x3] %vm6675_vm0, %v1283_v41  ;;  %1651 = vperm.xlu1 %5430, %v9361_v29   ;;  %v1157_v17 = vadd.f32 %v1044_v8, %v9363_v42  ;;  %v1154_v60 = vadd.f32 %v1039_v47, %v9364_v59  ;;  %v1155_v13 = vadd.f32 %v1039_v47, %v9365_v61  ;;  %v9366_v41 = vld [vmem:[#allocation57_spill] sm:$0xff]  ;;  %v9370_v29 = vld [vmem:[#allocation106_spill] sm:$0xff]  ;;  %v9371_v42 = vld [vmem:[#allocation60_spill] sm:$0xff] }
  0xf7   :  { %1655 = vperm.xlu0 %5429, %v9366_v41   ;;  %v1074_v27 = vpop.permute.xlu1 %1073  ;;  %v1201_v14 = vmin.f32 %v1199_v51, %v1152_v46  ;;  %v1238_v50 = vmin.f32 %v1236_v43, %v1153_v54  ;;  %v1200_v56 = vmin.f32 %v1198_v34, %v1150_v22  ;;  %v1237_v32 = vmin.f32 %v1235_v39, %v1151_v44  ;;  %v9372_v59 = vld [vmem:[#allocation59_spill] sm:$0xff]  ;;  %v9374_v22 = vld [vmem:[#allocation108_spill] sm:$0xff]  ;;  %v9375_v39 = vld [vmem:[#allocation109_spill] sm:$0xff] }
  0xf8   :  { %v1069_v31 = vpop.permute.xlu0 %1068  ;;  %v1160_v58 = vadd.f32 %v1054_v24, %v9367_v49  ;;  %v1161_v12 = vadd.f32 %v1054_v24, %v9368_v57  ;;  %v1158_v62 = vadd.f32 %v1049_v25, %v9369_v6  ;;  %v1159_v8 = vadd.f32 %v1049_v25, %v9370_v29  ;;  %v9373_v51 = vld [vmem:[#allocation107_spill] sm:$0xff]  ;;  %v9376_v46 = vld [vmem:[#allocation110_spill] sm:$0xff] }
  0xf9   :  { %v1203_v1 = vmin.f32 %v1201_v14, %v1156_v19  ;;  %v1240_v47 = vmin.f32 %v1238_v50, %v1157_v17  ;;  %v1202_v61 = vmin.f32 %v1200_v56, %v1154_v60  ;;  %v1239_v41 = vmin.f32 %v1237_v32, %v1155_v13  ;;  %v9377_v14 = vld [vmem:[#allocation62_spill] sm:$0xff]  ;;  %v9378_v19 = vld [vmem:[#allocation111_spill] sm:$0xff]  ;;  %v9379_v50 = vld [vmem:[#allocation61_spill] sm:$0xff] }
  0xfa   :  { %1659 = vperm.xlu1 %5430, %v9371_v42   ;;  %v1164_v43 = vadd.f32 %v1064_v63, %v9373_v51  ;;  %v1165_v44 = vadd.f32 %v1064_v63, %v9374_v22  ;;  %v1162_v34 = vadd.f32 %v1059_v3, %v9375_v39  ;;  %v1163_v24 = vadd.f32 %v1059_v3, %v9376_v46 }
  0xfb   :  { %1663 = vperm.xlu0 %5429, %v9372_v59   ;;  %v1084_v54 = vpop.permute.xlu1 %1083  ;;  %v1205_v49 = vmin.f32 %v1203_v1, %v1160_v58  ;;  %v1242_v25 = vmin.f32 %v1240_v47, %v1161_v12  ;;  %v1204_v29 = vmin.f32 %v1202_v61, %v1158_v62  ;;  %v1241_v42 = vmin.f32 %v1239_v41, %v1159_v8  ;;  %v9380_v62 = vld [vmem:[#allocation118_spill] sm:$0xff]  ;;  %v9381_v8 = vld [vmem:[#allocation64_spill] sm:$0xff] }
  0xfc   :  { %v1079_v57 = vpop.permute.xlu0 %1078  ;;  %v1168_v17 = vadd.f32 %v1074_v27, %v9378_v19  ;;  %v1169_v60 = vadd.f32 %v1074_v27, %v9294_v23  ;;  %v1166_v13 = vadd.f32 %v1069_v31, %v9298_v40  ;;  %v1167_v63 = vadd.f32 %v1069_v31, %v9299_v36 }
  0xfd   :  { %v1207_v56 = vmin.f32 %v1205_v49, %v1164_v43  ;;  %v1244_v3 = vmin.f32 %v1242_v25, %v1165_v44  ;;  %v1206_v32 = vmin.f32 %v1204_v29, %v1162_v34  ;;  %v1243_v59 = vmin.f32 %v1241_v42, %v1163_v24  ;;  %v9382_v49 = vld [vmem:[#allocation63_spill] sm:$0xff]  ;;  %v9384_v43 = vld [vmem:[#allocation120_spill] sm:$0xff]  ;;  %v9385_v34 = vld [vmem:[#allocation121_spill] sm:$0xff] }
  0xfe   :  { %1667 = vperm.xlu1 %5430, %v9377_v14   ;;  %v1172_v61 = vadd.f32 %v1084_v54, %v6389_v45  ;;  %v1173_v41 = vadd.f32 %v1084_v54, %v6399_v37  ;;  %v1170_v12 = vadd.f32 %v1079_v57, %v6401_v35  ;;  %v1171_v27 = vadd.f32 %v1079_v57, %v9380_v62  ;;  %v9383_v29 = vld [vmem:[#allocation119_spill] sm:$0xff] }
  0xff   :  { %1671 = vperm.xlu0 %5429, %v9379_v50   ;;  %v1094_v1 = vpop.permute.xlu1 %1093  ;;  %v1209_v47 = vmin.f32 %v1207_v56, %v1168_v17  ;;  %v1246_v31 = vmin.f32 %v1244_v3, %v1169_v60  ;;  %v1208_v14 = vmin.f32 %v1206_v32, %v1166_v13  ;;  %v1245_v50 = vmin.f32 %v1243_v59, %v1167_v63  ;;  %v9386_v63 = vld [vmem:[#allocation66_spill] sm:$0xff]  ;;  %v9387_v56 = vld [vmem:[#allocation65_spill] sm:$0xff] }
 0x100   :  { %v1089_v58 = vpop.permute.xlu0 %1088  ;;  %v1176_v42 = vadd.f32 %v1094_v1, %v9383_v29  ;;  %v1177_v44 = vadd.f32 %v1094_v1, %v9384_v43 }
 0x101   :  { %v1174_v24 = vadd.f32 %v1089_v58, %v9385_v34  ;;  %v1175_v54 = vadd.f32 %v1089_v58, %v6462_v10  ;;  %v1211_v45 = vmin.f32 %v1209_v47, %v1172_v61  ;;  %v1248_v57 = vmin.f32 %v1246_v31, %v1173_v41 }
 0x102   :  { %1675 = vperm.xlu1 %5430, %v9381_v8   ;;  %v1210_v62 = vmin.f32 %v1208_v14, %v1170_v12  ;;  %v1247_v8 = vmin.f32 %v1245_v50, %v1171_v27 }
 0x103   :  { %1679 = vperm.xlu0 %5429, %v9382_v49   ;;  %v1104_v25 = vpop.permute.xlu1 %1103  ;;  %v1213_v3 = vmin.f32 %v1211_v45, %v1176_v42  ;;  %v1250_v32 = vmin.f32 %v1248_v57, %v1177_v44  ;;  %v9388_v49 = vld [vmem:[#allocation68_spill] sm:$0xff]  ;;  %v9389_v45 = vld [vmem:[#allocation67_spill] sm:$0xff] }
 0x104   :  { %v1099_v37 = vpop.permute.xlu0 %1098  ;;  %v1180_v17 = vadd.f32 %v1104_v25, %v6486_v11  ;;  %v1181_v59 = vadd.f32 %v1104_v25, %v6499_v9  ;;  %v1212_v1 = vmin.f32 %v1210_v62, %v1174_v24  ;;  %v1249_v58 = vmin.f32 %v1247_v8, %v1175_v54 }
 0x105   :  { %v1178_v60 = vadd.f32 %v1099_v37, %v6541_v26  ;;  %v1179_v13 = vadd.f32 %v1099_v37, %v6547_v55 }
 0x106   :  { %1683 = vperm.xlu1 %5430, %v9386_v63   ;;  %v1215_v47 = vmin.f32 %v1213_v3, %v1180_v17  ;;  %v1252_v37 = vmin.f32 %v1250_v32, %v1181_v59  ;;  %v9390_v59 = vld [vmem:[#allocation70_spill] sm:$0xff] }
 0x107   :  { %1687 = vperm.xlu0 %5429, %v9387_v56   ;;  %v1114_v61 = vpop.permute.xlu1 %1113  ;;  %v1214_v31 = vmin.f32 %v1212_v1, %v1178_v60  ;;  %v1251_v25 = vmin.f32 %v1249_v58, %v1179_v13  ;;  %v9391_v1 = vld [vmem:[#allocation69_spill] sm:$0xff] }
 0x108   :  { %v1109_v41 = vpop.permute.xlu0 %1108  ;;  %v1184_v14 = vadd.f32 %v1114_v61, %v6560_v21  ;;  %v1185_v50 = vadd.f32 %v1114_v61, %v6562_v4 }
 0x109   :  { %v1182_v12 = vadd.f32 %v1109_v41, %v6595_v52  ;;  %v1183_v27 = vadd.f32 %v1109_v41, %v6597_v15  ;;  %v9421_v15 = vld [vmem:[#allocation84_spill] sm:$0xff] }
 0x10a   :  { %1691 = vperm.xlu1 %5430, %v9388_v49   ;;  %v1217_v62 = vmin.f32 %v1215_v47, %v1184_v14  ;;  %v1254_v8 = vmin.f32 %v1252_v37, %v1185_v50  ;;  %v9410_v49 = vld [vmem:[#allocation81_spill] sm:$0xff] }
 0x10b   :  { %1695 = vperm.xlu0 %5429, %v9389_v45   ;;  %v1216_v42 = vmin.f32 %v1214_v31, %v1182_v12  ;;  %v1253_v44 = vmin.f32 %v1251_v25, %v1183_v27  ;;  %v1124_v24 = vpop.permute.xlu1 %1123  ;;  %v5479_v27 = vmov 2   ;;  %v9392_v31 = vld [vmem:[#allocation8_spill] sm:$0xff]  ;;  %v9393_v25 = vld [vmem:[#allocation10_spill] sm:$0xff]  ;;  %v9400_v45 = vld [vmem:[#allocation13_spill] sm:$0xff] }
 0x10c   :  { %v1119_v54 = vpop.permute.xlu0 %1118  ;;  %v1188_v57 = vadd.f32 %v1124_v24, %v6610_v28  ;;  %v1189_v61 = vadd.f32 %v1124_v24, %v6612_v5  ;;  %v9417_v28 = vld [vmem:[#allocation85_spill] sm:$0xff] }
 0x10d   :  { %v1186_v41 = vadd.f32 %v1119_v54, %v6632_v7  ;;  %v1187_v17 = vadd.f32 %v1119_v54, %v6634_v2  ;;  %v9418_v2 = vld [vmem:[#allocation86_spill] sm:$0xff] }
 0x10e   :  { %1699 = vperm.xlu1 %5430, %v9390_v59   ;;  %v1219_v60 = vmin.f32 %v1217_v62, %v1188_v57  ;;  %v1256_v13 = vmin.f32 %v1254_v8, %v1189_v61  ;;  %v9394_v57 = vld [vmem:[#allocation7_spill] sm:$0xff]  ;;  %v9395_v61 = vld [vmem:[#allocation12_spill] sm:$0xff] }
 0x10f   :  { %v1218_v3 = vmin.f32 %v1216_v42, %v1186_v41  ;;  %v1255_v32 = vmin.f32 %v1253_v44, %v1187_v17  ;;  %1703 = vperm.xlu0 %5429, %v9391_v1   ;;  %v6748_v50 = vpop.permute.xlu1 %1317  ;;  %v9397_v1 = vld [vmem:[#allocation14_spill] sm:$0xff] }
 0x110   :  { %v1314_v12 = vpop.permute.xlu0 %1313 }
 0x111   :  { %v1220_v58 = vmin.f32 %v1218_v3, %v1219_v60  ;;  %v1257_v14 = vmin.f32 %v1255_v32, %v1256_v13 }
 0x112   :  { %5431 = vset.pattern.permute.xlu1 %v5479_v27 }
 0x113   :  { %v1221_v47 = vrot.slane %v1220_v58, 4  ;;  %v1258_v37 = vrot.slane %v1257_v14, 4  ;;  %5432 = vset.pattern.permute.xlu0 %v5479_v27  ;;  %1891 = vperm.xlu1 %5431, %v9392_v31   ;;  %v1322_v42 = vpop.permute.xlu1 %1321  ;;  %v9396_v27 = vld [vmem:[#allocation9_spill] sm:$0xff]  ;;  %v9398_v31 = vld [vmem:[#allocation11_spill] sm:$0xff] }
 0x114   :  { %1895 = vperm.xlu0 %5432, %v9393_v25   ;;  %v1326_v44 = vpop.permute.xlu0 %1325 }
 0x115   :  { %v1222_v62 = vmin.f32 %v1220_v58, %v1221_v47  ;;  %v1259_v8 = vmin.f32 %v1257_v14, %v1258_v37 }
 0x117   :  { %v1223_v24 = vrot.slane %v1222_v62, 2  ;;  %v1260_v54 = vrot.slane %v1259_v8, 2  ;;  %1899 = vperm.xlu1 %5431, %v9394_v57   ;;  %v1330_v60 = vpop.permute.xlu1 %1329  ;;  %v9399_v57 = vld [vmem:[#allocation16_spill] sm:$0xff] }
 0x118   :  { %1907 = vperm.xlu0 %5432, %v9395_v61   ;;  %v1334_v13 = vpop.permute.xlu0 %1333  ;;  %v1448_v63 = vadd.f32 %v1330_v60, %v9410_v49 }
 0x119   :  { %v1224_v41 = vmin.f32 %v1222_v62, %v1223_v24  ;;  %v1261_v17 = vmin.f32 %v1259_v8, %v1260_v54  ;;  %v1290_v24 = vld [vmem:[#allocation3] ss:$8 sm:$0x3] }
 0x11b   :  { %v1225_v3 = vrot.slane %v1224_v41, 1  ;;  %v1262_v32 = vrot.slane %v1261_v17, 1  ;;  %1903 = vperm.xlu1 %5431, %v9396_v27   ;;  %v1338_v47 = vpop.permute.xlu1 %1337  ;;  %v9401_v27 = vld [vmem:[#allocation18_spill] sm:$0xff] }
 0x11c   :  { %1915 = vperm.xlu0 %5432, %v9397_v1   ;;  %v1342_v37 = vpop.permute.xlu0 %1341  ;;  %v9405_v1 = vld [vmem:[#allocation22_spill] sm:$0xff]  ;;  %v1452_v49 = vadd.f32 %v1338_v47, %v9417_v28  ;;  %v9423_v28 = vld [vmem:[#allocation87_spill] sm:$0xff] }
 0x11d   :  { %v1226_v58 = vmin.f32 %v1224_v41, %v1225_v3  ;;  %v1263_v14 = vmin.f32 %v1261_v17, %v1262_v32  ;;  %v9402_v32 = vld [vmem:[#allocation15_spill] sm:$0xff] }
 0x11f   :  { %v1293_v25 = vcombine.low %v1226_v58, %v1263_v14  ;;  %1911 = vperm.xlu1 %5431, %v9398_v31   ;;  %v1346_v8 = vpop.permute.xlu1 %1345  ;;  %v9403_v58 = vld [vmem:[#allocation20_spill] sm:$0xff]  ;;  %v9408_v31 = vld [vmem:[#allocation75_spill] sm:$0xff] }
 0x120   :  { %1923 = vperm.xlu0 %5432, %v9399_v57   ;;  %v1350_v54 = vpop.permute.xlu0 %1349  ;;  %v9404_v57 = vld [vmem:[#allocation17_spill] sm:$0xff]  ;;  %v1446_v59 = vadd.f32 %v1326_v44, %v9408_v31 }
 0x121   :  { %v1300_v62 = vrot.slane %v1293_v25, %v6648_v33  ;;  %v9416_v31 = vld [vmem:[#allocation21_spill] sm:$0xff] }
 0x123   :  { %v1307_v61 = vrot.slane %v1300_v62, %v6648_v33  ;;  %1919 = vperm.xlu1 %5431, %v9400_v45   ;;  %v1354_v17 = vpop.permute.xlu1 %1353  ;;  %v1449_v33 = vadd.f32 %v1330_v60, %v9411_v0  ;;  %v1453_v60 = vadd.f32 %v1338_v47, %v9418_v2  ;;  %v9419_v0 = vld [vmem:[#allocation26_spill] sm:$0xff]  ;;  %v1458_v47 = vadd.f32 %v1350_v54, %v9423_v28  ;;  %v9424_v2 = vld [vmem:[#allocation88_spill] sm:$0xff] }
 0x124   :  { %1931 = vperm.xlu0 %5432, %v9401_v27   ;;  %v1358_v3 = vpop.permute.xlu0 %1357  ;;  %v9406_v27 = vld [vmem:[#allocation19_spill] sm:$0xff] }
 0x125   :  { %v1309_v41 = vmin.f32 %v1290_v24, %v1307_v61  ;;  %v1440_v61 = vadd.f32 %v1314_v12, %v9334_v18  ;;  %v1441_v24 = vadd.f32 %v1314_v12, %v9335_v20  ;;  %v9412_v18 = vld [vmem:[#allocation77_spill] sm:$0xff]  ;;  %v9413_v20 = vld [vmem:[#allocation78_spill] sm:$0xff] }
 0x126   :  { %v1442_v12 = vadd.f32 %v6748_v50, %v9412_v18  ;;  %v9420_v18 = vld [vmem:[#allocation83_spill] sm:$0xff] }
 0x127   :  { %1310 = vst.msk [vmem:[#allocation3] ss:$8 sm:$0x3] %vm6675_vm0, %v1309_v41  ;;  %1927 = vperm.xlu1 %5431, %v9402_v32   ;;  %v1362_v25 = vpop.permute.xlu1 %1361  ;;  %v1444_v41 = vadd.f32 %v1322_v42, %v9330_v48  ;;  %v1445_v32 = vadd.f32 %v1322_v42, %v9331_v30  ;;  %v1443_v48 = vadd.f32 %v6748_v50, %v9413_v20  ;;  %v9414_v42 = vld [vmem:[#allocation79_spill] sm:$0xff] }
 0x128   :  { %1939 = vperm.xlu0 %5432, %v9403_v58   ;;  %v1366_v14 = vpop.permute.xlu0 %1365  ;;  %v9407_v58 = vld [vmem:[#allocation24_spill] sm:$0xff]  ;;  %v1450_v30 = vadd.f32 %v1334_v13, %v9414_v42  ;;  %v1505_v7 = vmin.f32 %v1442_v12, %v1446_v59  ;;  %v1454_v21 = vadd.f32 %v1342_v37, %v9420_v18  ;;  %v1455_v50 = vadd.f32 %v1342_v37, %v9421_v15  ;;  %v9425_v59 = vld [vmem:[#allocation23_spill] sm:$0xff]  ;;  %v9426_v12 = vld [vmem:[#allocation93_spill] sm:$0xff] }
 0x129   :  { %v1460_v37 = vadd.f32 %v1354_v17, %v9426_v12  ;;  %v9427_v15 = vld [vmem:[#allocation94_spill] sm:$0xff] }
 0x12b   :  { %1935 = vperm.xlu1 %5431, %v9404_v57   ;;  %v1370_v62 = vpop.permute.xlu1 %1369  ;;  %v9409_v57 = vld [vmem:[#allocation76_spill] sm:$0xff] }
 0x12c   :  { %1947 = vperm.xlu0 %5432, %v9405_v1   ;;  %v6768_v45 = vpop.permute.xlu0 %1373  ;;  %v1447_v56 = vadd.f32 %v1326_v44, %v9409_v57  ;;  %v1504_v44 = vmin.f32 %v1440_v61, %v1444_v41  ;;  %v1541_v57 = vmin.f32 %v1441_v24, %v1445_v32  ;;  %v1507_v24 = vmin.f32 %v1505_v7, %v1450_v30  ;;  %v9430_v7 = vld [vmem:[#allocation92_spill] sm:$0xff] }
 0x12e   :  { %v1542_v4 = vmin.f32 %v1443_v48, %v1447_v56  ;;  %v1506_v42 = vmin.f32 %v1504_v44, %v1448_v63  ;;  %v1543_v52 = vmin.f32 %v1541_v57, %v1449_v33  ;;  %v1461_v63 = vadd.f32 %v1354_v17, %v9427_v15  ;;  %v9428_v33 = vld [vmem:[#allocation28_spill] sm:$0xff] }
 0x12f   :  { %1943 = vperm.xlu1 %5431, %v9406_v27   ;;  %v1509_v57 = vmin.f32 %v1507_v24, %v1454_v21  ;;  %v9432_v15 = vld [vmem:[#allocation96_spill] sm:$0xff]  ;;  %v9433_v21 = vld [vmem:[#allocation25_spill] sm:$0xff] }
 0x130   :  { %1955 = vperm.xlu0 %5432, %v9407_v58   ;;  %v1378_v1 = vpop.permute.xlu1 %1377  ;;  %v6780_v27 = vpop.permute.xlu0 %1381  ;;  %v9415_v58 = vld [vmem:[#allocation80_spill] sm:$0xff]  ;;  %v1508_v48 = vmin.f32 %v1506_v42, %v1452_v49  ;;  %v1545_v56 = vmin.f32 %v1543_v52, %v1453_v60  ;;  %v1465_v49 = vadd.f32 %v1362_v25, %v9360_v53 }
 0x131   :  { %v1451_v5 = vadd.f32 %v1334_v13, %v9415_v58  ;;  %v1456_v13 = vadd.f32 %v1346_v8, %v9349_v16  ;;  %v1511_v42 = vmin.f32 %v1509_v57, %v1458_v47 }
 0x133   :  { %1951 = vperm.xlu1 %5431, %v9416_v31   ;;  %v9422_v31 = vld [vmem:[#allocation90_spill] sm:$0xff]  ;;  %v1544_v41 = vmin.f32 %v1542_v4, %v1451_v5  ;;  %v1463_v4 = vadd.f32 %v1358_v3, %v9430_v7  ;;  %v1510_v30 = vmin.f32 %v1508_v48, %v1456_v13 }
 0x134   :  { %1963 = vperm.xlu0 %5432, %v9419_v0   ;;  %v1386_v20 = vpop.permute.xlu1 %1385  ;;  %v1457_v61 = vadd.f32 %v1346_v8, %v9422_v31  ;;  %v1459_v0 = vadd.f32 %v1350_v54, %v9424_v2  ;;  %v9429_v8 = vld [vmem:[#allocation91_spill] sm:$0xff]  ;;  %v1464_v54 = vadd.f32 %v1362_v25, %v9359_v38  ;;  %v9435_v7 = vld [vmem:[#allocation102_spill] sm:$0xff] }
 0x135   :  { %v1390_v32 = vpop.permute.xlu0 %1389  ;;  %v1546_v44 = vmin.f32 %v1544_v41, %v1455_v50  ;;  %v1462_v31 = vadd.f32 %v1358_v3, %v9429_v8  ;;  %v1512_v50 = vmin.f32 %v1510_v30, %v1460_v37  ;;  %v9434_v41 = vld [vmem:[#allocation101_spill] sm:$0xff]  ;;  %v1469_v13 = vadd.f32 %v1370_v62, %v9435_v7  ;;  %v9437_v25 = vld [vmem:[#allocation99_spill] sm:$0xff] }
 0x136   :  { %v1547_v28 = vmin.f32 %v1545_v56, %v1457_v61  ;;  %v1468_v3 = vadd.f32 %v1370_v62, %v9434_v41  ;;  %v9436_v61 = vld [vmem:[#allocation30_spill] sm:$0xff]  ;;  %v1470_v47 = vadd.f32 %v6768_v45, %v9437_v25  ;;  %v1472_v37 = vadd.f32 %v1378_v1, %v9369_v6  ;;  %v9440_v7 = vld [vmem:[#allocation103_spill] sm:$0xff] }
 0x137   :  { %1959 = vperm.xlu1 %5431, %v9425_v59   ;;  %v1548_v60 = vmin.f32 %v1546_v44, %v1459_v0  ;;  %v9431_v59 = vld [vmem:[#allocation95_spill] sm:$0xff]  ;;  %v1513_v48 = vmin.f32 %v1511_v42, %v1462_v31  ;;  %v9438_v0 = vld [vmem:[#allocation100_spill] sm:$0xff]  ;;  %v1474_v31 = vadd.f32 %v6780_v27, %v9440_v7 }
 0x138   :  { %1971 = vperm.xlu0 %5432, %v9428_v33   ;;  %v1394_v5 = vpop.permute.xlu1 %1393  ;;  %v1466_v17 = vadd.f32 %v1366_v14, %v9431_v59  ;;  %v1467_v33 = vadd.f32 %v1366_v14, %v9432_v15  ;;  %v1549_v24 = vmin.f32 %v1547_v28, %v1461_v63  ;;  %v1471_v57 = vadd.f32 %v6768_v45, %v9438_v0  ;;  %v9439_v28 = vld [vmem:[#allocation106_spill] sm:$0xff] }
 0x139   :  { %v1398_v52 = vpop.permute.xlu0 %1397  ;;  %v1550_v56 = vmin.f32 %v1548_v60, %v1463_v4  ;;  %v1514_v14 = vmin.f32 %v1512_v50, %v1464_v54  ;;  %v1473_v63 = vadd.f32 %v1378_v1, %v9439_v28  ;;  %v9441_v4 = vld [vmem:[#allocation104_spill] sm:$0xff]  ;;  %v9442_v60 = vld [vmem:[#allocation27_spill] sm:$0xff]  ;;  %v1476_v54 = vadd.f32 %v1386_v20, %v9375_v39 }
 0x13a   :  { %v1551_v15 = vmin.f32 %v1549_v24, %v1465_v49  ;;  %v1475_v42 = vadd.f32 %v6780_v27, %v9441_v4  ;;  %v1477_v49 = vadd.f32 %v1386_v20, %v9376_v46  ;;  %v9443_v50 = vld [vmem:[#allocation32_spill] sm:$0xff]  ;;  %v1480_v27 = vadd.f32 %v1394_v5, %v9298_v40 }
 0x13b   :  { %1967 = vperm.xlu1 %5431, %v9433_v21   ;;  %v1515_v21 = vmin.f32 %v1513_v48, %v1466_v17  ;;  %v1552_v62 = vmin.f32 %v1550_v56, %v1467_v33  ;;  %v1478_v33 = vadd.f32 %v1390_v32, %v9373_v51  ;;  %v1479_v17 = vadd.f32 %v1390_v32, %v9374_v22 }
 0x13c   :  { %1979 = vperm.xlu0 %5432, %v9436_v61   ;;  %v1402_v44 = vpop.permute.xlu1 %1401  ;;  %v1516_v61 = vmin.f32 %v1514_v14, %v1468_v3  ;;  %v1553_v45 = vmin.f32 %v1551_v15, %v1469_v13  ;;  %v1481_v3 = vadd.f32 %v1394_v5, %v9299_v36  ;;  %v1482_v20 = vadd.f32 %v1398_v52, %v9378_v19  ;;  %v9447_v5 = vld [vmem:[#allocation115_spill] sm:$0xff] }
 0x13d   :  { %v1406_v30 = vpop.permute.xlu0 %1405  ;;  %v1517_v1 = vmin.f32 %v1515_v21, %v1470_v47  ;;  %v1554_v24 = vmin.f32 %v1552_v62, %v1471_v57  ;;  %v9444_v21 = vld [vmem:[#allocation29_spill] sm:$0xff]  ;;  %v1484_v32 = vadd.f32 %v1402_v44, %v6401_v35  ;;  %v9445_v62 = vld [vmem:[#allocation118_spill] sm:$0xff] }
 0x13e   :  { %v1518_v56 = vmin.f32 %v1516_v61, %v1472_v37  ;;  %v1555_v7 = vmin.f32 %v1553_v45, %v1473_v63  ;;  %v1485_v61 = vadd.f32 %v1402_v44, %v9445_v62  ;;  %v9446_v37 = vld [vmem:[#allocation34_spill] sm:$0xff] }
 0x13f   :  { %1975 = vperm.xlu1 %5431, %v9442_v60   ;;  %v1519_v13 = vmin.f32 %v1517_v1, %v1474_v31  ;;  %v1556_v14 = vmin.f32 %v1554_v24, %v1475_v42  ;;  %v1486_v60 = vadd.f32 %v1406_v30, %v9447_v5  ;;  %v9448_v31 = vld [vmem:[#allocation116_spill] sm:$0xff] }
 0x140   :  { %1987 = vperm.xlu0 %5432, %v9443_v50   ;;  %v1410_v48 = vpop.permute.xlu1 %1409  ;;  %v1483_v50 = vadd.f32 %v1398_v52, %v9294_v23  ;;  %v1520_v47 = vmin.f32 %v1518_v56, %v1476_v54  ;;  %v1557_v57 = vmin.f32 %v1555_v7, %v1477_v49  ;;  %v1487_v42 = vadd.f32 %v1406_v30, %v9448_v31  ;;  %v9495_v31 = vld [vmem:[#allocation58_spill] sm:$0xff]  ;;  %v9496_v5 = vld [vmem:[#allocation84_spill] sm:$0xff] }
 0x141   :  { %v1414_v15 = vpop.permute.xlu0 %1413  ;;  %v1521_v63 = vmin.f32 %v1519_v13, %v1478_v33  ;;  %v1558_v45 = vmin.f32 %v1556_v14, %v1479_v17  ;;  %v1488_v52 = vadd.f32 %v1410_v48, %v9385_v34  ;;  %v1489_v54 = vadd.f32 %v1410_v48, %v6462_v10  ;;  %v9449_v33 = vld [vmem:[#allocation31_spill] sm:$0xff]  ;;  %v9493_v34 = vld [vmem:[#allocation85_spill] sm:$0xff] }
 0x142   :  { %v1522_v24 = vmin.f32 %v1520_v47, %v1480_v27  ;;  %v1559_v19 = vmin.f32 %v1557_v57, %v1481_v3  ;;  %v1490_v44 = vadd.f32 %v1414_v15, %v9383_v29  ;;  %v9450_v3 = vld [vmem:[#allocation36_spill] sm:$0xff]  ;;  %v9491_v29 = vld [vmem:[#allocation79_spill] sm:$0xff] }
 0x143   :  { %1983 = vperm.xlu1 %5431, %v9444_v21   ;;  %v1523_v49 = vmin.f32 %v1521_v63, %v1482_v20  ;;  %v1560_v56 = vmin.f32 %v1558_v45, %v1483_v50  ;;  %v9453_v21 = vld [vmem:[#allocation127_spill] sm:$0xff] }
 0x144   :  { %1995 = vperm.xlu0 %5432, %v9446_v37   ;;  %v1491_v37 = vadd.f32 %v1414_v15, %v9384_v43  ;;  %v1524_v17 = vmin.f32 %v1522_v24, %v1484_v32  ;;  %v1561_v13 = vmin.f32 %v1559_v19, %v1485_v61  ;;  %v9451_v15 = vld [vmem:[#allocation129_spill] sm:$0xff] }
 0x145   :  { %v1418_v1 = vpop.permute.xlu1 %1417  ;;  %v1422_v7 = vpop.permute.xlu0 %1421  ;;  %v1525_v14 = vmin.f32 %v1523_v49, %v1486_v60  ;;  %v1562_v47 = vmin.f32 %v1560_v56, %v1487_v42  ;;  %v9455_v60 = vld [vmem:[#allocation33_spill] sm:$0xff]  ;;  %v9456_v56 = vld [vmem:[#allocation43_spill] sm:$0xff] }
 0x146   :  { %v1492_v30 = vadd.f32 %v1418_v1, %v6541_v26  ;;  %v1493_v27 = vadd.f32 %v1418_v1, %v6547_v55  ;;  %v1494_v48 = vadd.f32 %v1422_v7, %v6486_v11  ;;  %v1495_v50 = vadd.f32 %v1422_v7, %v6499_v9  ;;  %v9454_v55 = vld [vmem:[#allocation128_spill] sm:$0xff]  ;;  %v9487_v9 = vld [vmem:[#allocation81_spill] sm:$0xff]  ;;  %v9488_v26 = vld [vmem:[#allocation82_spill] sm:$0xff] }
 0x147   :  { %1991 = vperm.xlu1 %5431, %v9449_v33   ;;  %v1526_v57 = vmin.f32 %v1524_v17, %v1488_v52  ;;  %v1563_v63 = vmin.f32 %v1561_v13, %v1489_v54  ;;  %v9452_v33 = vld [vmem:[#allocation130_spill] sm:$0xff]  ;;  %v1527_v61 = vmin.f32 %v1525_v14, %v1490_v44  ;;  %v1564_v24 = vmin.f32 %v1562_v47, %v1491_v37 }
 0x148   :  { %2003 = vperm.xlu0 %5432, %v9450_v3  }
 0x149   :  { %v1426_v20 = vpop.permute.xlu1 %1425  ;;  %v1528_v42 = vmin.f32 %v1526_v57, %v1492_v30  ;;  %v1565_v49 = vmin.f32 %v1563_v63, %v1493_v27  ;;  %v1529_v7 = vmin.f32 %v1527_v61, %v1494_v48  ;;  %v1566_v52 = vmin.f32 %v1564_v24, %v1495_v50  ;;  %v9461_v30 = vld [vmem:[#allocation35_spill] sm:$0xff]  ;;  %v9462_v48 = vld [vmem:[#allocation38_spill] sm:$0xff] }
 0x14a   :  { %v1496_v45 = vadd.f32 %v1426_v20, %v9451_v15  ;;  %v1497_v32 = vadd.f32 %v1426_v20, %v9452_v33  ;;  %v1430_v19 = vpop.permute.xlu0 %1429  ;;  %v9457_v15 = vld [vmem:[#allocation133_spill] sm:$0xff]  ;;  %v9458_v33 = vld [vmem:[#allocation134_spill] sm:$0xff] }
 0x14b   :  { %v1498_v1 = vadd.f32 %v1430_v19, %v9453_v21  ;;  %v1499_v3 = vadd.f32 %v1430_v19, %v9454_v55  ;;  %1999 = vperm.xlu1 %5431, %v9455_v60   ;;  %v9459_v21 = vld [vmem:[#allocation131_spill] sm:$0xff]  ;;  %v9460_v55 = vld [vmem:[#allocation132_spill] sm:$0xff] }
 0x14c   :  { %2011 = vperm.xlu0 %5432, %v9456_v56   ;;  %v1530_v17 = vmin.f32 %v1528_v42, %v1496_v45  ;;  %v1567_v13 = vmin.f32 %v1565_v49, %v1497_v32  ;;  %v9463_v42 = vld [vmem:[#allocation40_spill] sm:$0xff] }
 0x14d   :  { %v1434_v54 = vpop.permute.xlu1 %1433  ;;  %v1531_v14 = vmin.f32 %v1529_v7, %v1498_v1  ;;  %v1568_v47 = vmin.f32 %v1566_v52, %v1499_v3  ;;  %v9464_v1 = vld [vmem:[#allocation41_spill] sm:$0xff] }
 0x14e   :  { %v1500_v20 = vadd.f32 %v1434_v54, %v9457_v15  ;;  %v1501_v44 = vadd.f32 %v1434_v54, %v9458_v33  ;;  %v1438_v37 = vpop.permute.xlu0 %1437 }
 0x14f   :  { %v1502_v19 = vadd.f32 %v1438_v37, %v9459_v21  ;;  %v1503_v60 = vadd.f32 %v1438_v37, %v9460_v55  ;;  %2007 = vperm.xlu1 %5431, %v9461_v30  }
 0x150   :  { %v1532_v27 = vmin.f32 %v1530_v17, %v1500_v20  ;;  %v1569_v57 = vmin.f32 %v1567_v13, %v1501_v44  ;;  %2157 = vperm.xlu0 %5432, %v9462_v48   ;;  %v9465_v17 = vld [vmem:[#allocation37_spill] sm:$0xff]  ;;  %v9466_v13 = vld [vmem:[#allocation44_spill] sm:$0xff] }
 0x151   :  { %v1533_v50 = vmin.f32 %v1531_v14, %v1502_v19  ;;  %v1570_v63 = vmin.f32 %v1568_v47, %v1503_v60  ;;  %v1580_v45 = vpop.permute.xlu1 %1579 }
 0x152   :  { %v1584_v32 = vpop.permute.xlu0 %1583 }
 0x153   :  { %v1534_v61 = vmin.f32 %v1532_v27, %v1533_v50  ;;  %v1571_v24 = vmin.f32 %v1569_v57, %v1570_v63  ;;  %2015 = vperm.xlu1 %5431, %v9463_v42   ;;  %v9467_v27 = vld [vmem:[#allocation39_spill] sm:$0xff]  ;;  %v9468_v57 = vld [vmem:[#allocation46_spill] sm:$0xff] }
 0x154   :  { %2165 = vperm.xlu0 %5432, %v9464_v1   ;;  %v9471_v42 = vld [vmem:[#allocation135_spill] sm:$0xff] }
 0x155   :  { %v1535_v3 = vrot.slane %v1534_v61, 4  ;;  %v1572_v49 = vrot.slane %v1571_v24, 4  ;;  %v1588_v7 = vpop.permute.xlu1 %1587 }
 0x156   :  { %v1592_v52 = vpop.permute.xlu0 %1591 }
 0x157   :  { %v1536_v54 = vmin.f32 %v1534_v61, %v1535_v3  ;;  %v1573_v37 = vmin.f32 %v1571_v24, %v1572_v49  ;;  %2161 = vperm.xlu1 %5431, %v9465_v17   ;;  %v9469_v3 = vld [vmem:[#allocation42_spill] sm:$0xff]  ;;  %v9470_v49 = vld [vmem:[#allocation48_spill] sm:$0xff] }
 0x158   :  { %2173 = vperm.xlu0 %5432, %v9466_v13  }
 0x159   :  { %v1537_v20 = vrot.slane %v1536_v54, 2  ;;  %v1574_v60 = vrot.slane %v1573_v37, 2  ;;  %v1596_v44 = vpop.permute.xlu1 %1595 }
 0x15a   :  { %v1600_v14 = vpop.permute.xlu0 %1599  ;;  %v1714_v11 = vadd.f32 %v1596_v44, %v9487_v9 }
 0x15b   :  { %v1538_v47 = vmin.f32 %v1536_v54, %v1537_v20  ;;  %v1575_v19 = vmin.f32 %v1573_v37, %v1574_v60  ;;  %2169 = vperm.xlu1 %5431, %v9467_v27   ;;  %v9472_v37 = vld [vmem:[#allocation45_spill] sm:$0xff]  ;;  %v9473_v60 = vld [vmem:[#allocation50_spill] sm:$0xff] }
 0x15c   :  { %2181 = vperm.xlu0 %5432, %v9468_v57   ;;  %v1845_v20 = vld [vmem:[#allocation2 + $0x1] ss:$8 sm:$0x3] }
 0x15d   :  { %v1539_v50 = vrot.slane %v1538_v47, 1  ;;  %v1576_v63 = vrot.slane %v1575_v19, 1  ;;  %v1604_v1 = vpop.permute.xlu1 %1603 }
 0x15e   :  { %v1608_v48 = vpop.permute.xlu0 %1607 }
 0x15f   :  { %v1540_v61 = vmin.f32 %v1538_v47, %v1539_v50  ;;  %v1577_v24 = vmin.f32 %v1575_v19, %v1576_v63  ;;  %2177 = vperm.xlu1 %5431, %v9469_v3   ;;  %v9474_v19 = vld [vmem:[#allocation47_spill] sm:$0xff]  ;;  %v9475_v50 = vld [vmem:[#allocation52_spill] sm:$0xff] }
 0x160   :  { %2189 = vperm.xlu0 %5432, %v9470_v49   ;;  %v9478_v49 = vld [vmem:[#allocation54_spill] sm:$0xff]  ;;  %v9480_v3 = vld [vmem:[#allocation72_spill] sm:$0xff] }
 0x161   :  { %v1848_v13 = vcombine.low %v1540_v61, %v1577_v24  ;;  %v1612_v56 = vpop.permute.xlu1 %1611 }
 0x162   :  { %v1616_v17 = vpop.permute.xlu0 %1615 }
 0x163   :  { %v1855_v54 = vrot.slane %v1848_v13, %v9471_v42  ;;  %2185 = vperm.xlu1 %5431, %v9472_v37   ;;  %v9477_v13 = vld [vmem:[#allocation49_spill] sm:$0xff] }
 0x164   :  { %2197 = vperm.xlu0 %5432, %v9473_v60  }
 0x165   :  { %v1862_v57 = vrot.slane %v1855_v54, %v9471_v42  ;;  %v1620_v27 = vpop.permute.xlu1 %1619  ;;  %v9479_v54 = vld [vmem:[#allocation51_spill] sm:$0xff]  ;;  %v9482_v42 = vld [vmem:[#allocation56_spill] sm:$0xff] }
 0x166   :  { %v1624_v30 = vpop.permute.xlu0 %1623 }
 0x167   :  { %v1864_v47 = vmin.f32 %v1845_v20, %v1862_v57  ;;  %2193 = vperm.xlu1 %5431, %v9474_v19   ;;  %v1710_v57 = vadd.f32 %v1588_v7, %v9480_v3  ;;  %v9481_v20 = vld [vmem:[#allocation74_spill] sm:$0xff]  ;;  %v9489_v3 = vld [vmem:[#allocation77_spill] sm:$0xff] }
 0x168   :  { %2205 = vperm.xlu0 %5432, %v9475_v50   ;;  %v1711_v19 = vadd.f32 %v1588_v7, %v9481_v20  ;;  %v9483_v50 = vld [vmem:[#allocation75_spill] sm:$0xff]  ;;  %v1708_v7 = vadd.f32 %v1584_v32, %v9489_v3  ;;  %v9490_v20 = vld [vmem:[#allocation78_spill] sm:$0xff]  ;;  %v1720_v3 = vadd.f32 %v1608_v48, %v9420_v18 }
 0x169   :  { %1865 = vst.msk [vmem:[#allocation2 + $0x1] ss:$8 sm:$0x3] %vm6675_vm0, %v1864_v47  ;;  %v1628_v61 = vpop.permute.xlu1 %1627  ;;  %v1712_v63 = vadd.f32 %v1592_v52, %v9483_v50  ;;  %v9484_v47 = vld [vmem:[#allocation76_spill] sm:$0xff]  ;;  %v1716_v50 = vadd.f32 %v1600_v14, %v9491_v29 }
 0x16a   :  { %v1632_v24 = vpop.permute.xlu0 %1631  ;;  %v1713_v55 = vadd.f32 %v1592_v52, %v9484_v47  ;;  %v1717_v52 = vadd.f32 %v1600_v14, %v9415_v58  ;;  %v9492_v47 = vld [vmem:[#allocation53_spill] sm:$0xff]  ;;  %v1722_v14 = vadd.f32 %v1612_v56, %v9349_v16 }
 0x16b   :  { %2201 = vperm.xlu1 %5431, %v9477_v13   ;;  %v9485_v13 = vld [vmem:[#allocation71_spill] sm:$0xff] }
 0x16c   :  { %2213 = vperm.xlu0 %5432, %v9478_v49   ;;  %v1706_v33 = vadd.f32 %v1580_v45, %v9485_v13  ;;  %v9486_v49 = vld [vmem:[#allocation73_spill] sm:$0xff] }
 0x16d   :  { %v1636_v37 = vpop.permute.xlu1 %1635  ;;  %v1707_v15 = vadd.f32 %v1580_v45, %v9486_v49  ;;  %v1718_v45 = vadd.f32 %v1604_v1, %v9493_v34  ;;  %v9494_v49 = vld [vmem:[#allocation86_spill] sm:$0xff]  ;;  %v9498_v34 = vld [vmem:[#allocation87_spill] sm:$0xff] }
 0x16e   :  { %v6878_v60 = vpop.permute.xlu0 %1639  ;;  %v1770_v10 = vmin.f32 %v1706_v33, %v1710_v57  ;;  %v1719_v9 = vadd.f32 %v1604_v1, %v9494_v49  ;;  %v1724_v1 = vadd.f32 %v1616_v17, %v9498_v34 }
 0x16f   :  { %2209 = vperm.xlu1 %5431, %v9479_v54   ;;  %v1715_v54 = vadd.f32 %v1596_v44, %v9488_v26  ;;  %v1807_v13 = vmin.f32 %v1707_v15, %v1711_v19  ;;  %v1771_v44 = vmin.f32 %v1708_v7, %v1712_v63  ;;  %v9499_v63 = vld [vmem:[#allocation55_spill] sm:$0xff]  ;;  %v9500_v7 = vld [vmem:[#allocation94_spill] sm:$0xff] }
 0x170   :  { %2221 = vperm.xlu0 %5432, %v9482_v42   ;;  %v1709_v42 = vadd.f32 %v1584_v32, %v9490_v20  ;;  %v1721_v32 = vadd.f32 %v1608_v48, %v9496_v5  ;;  %v1772_v29 = vmin.f32 %v1770_v10, %v1714_v11  ;;  %v1726_v48 = vadd.f32 %v1620_v27, %v9426_v12  ;;  %v9501_v11 = vld [vmem:[#allocation60_spill] sm:$0xff] }
 0x171   :  { %v6886_v21 = vpop.permute.xlu1 %1643  ;;  %v1809_v62 = vmin.f32 %v1807_v13, %v1715_v54  ;;  %v1773_v19 = vmin.f32 %v1771_v44, %v1716_v50  ;;  %v1727_v10 = vadd.f32 %v1620_v27, %v9500_v7  ;;  %v9502_v50 = vld [vmem:[#allocation92_spill] sm:$0xff]  ;;  %v1732_v27 = vadd.f32 %v1632_v24, %v9431_v59 }
 0x172   :  { %v6892_v43 = vpop.permute.xlu0 %1647  ;;  %v1808_v26 = vmin.f32 %v1709_v42, %v1713_v55  ;;  %v1774_v55 = vmin.f32 %v1772_v29, %v1718_v45  ;;  %v1731_v29 = vadd.f32 %v1628_v61, %v9360_v53 }
 0x173   :  { %2217 = vperm.xlu1 %5431, %v9492_v47   ;;  %v9497_v47 = vld [vmem:[#allocation90_spill] sm:$0xff]  ;;  %v1811_v42 = vmin.f32 %v1809_v62, %v1719_v9  ;;  %v1775_v13 = vmin.f32 %v1773_v19, %v1720_v3  ;;  %v9504_v3 = vld [vmem:[#allocation57_spill] sm:$0xff] }
 0x174   :  { %2229 = vperm.xlu0 %5432, %v9495_v31   ;;  %v1723_v33 = vadd.f32 %v1612_v56, %v9497_v47  ;;  %v1810_v57 = vmin.f32 %v1808_v26, %v1717_v52  ;;  %v1725_v31 = vadd.f32 %v1616_v17, %v9424_v2  ;;  %v1728_v56 = vadd.f32 %v1624_v30, %v9429_v8 }
 0x175   :  { %v1652_v20 = vpop.permute.xlu1 %1651  ;;  %v1729_v26 = vadd.f32 %v1624_v30, %v9502_v50  ;;  %v1776_v44 = vmin.f32 %v1774_v55, %v1722_v14  ;;  %v1730_v17 = vadd.f32 %v1628_v61, %v9359_v38  ;;  %v1777_v62 = vmin.f32 %v1775_v13, %v1724_v1 }
 0x176   :  { %v1656_v15 = vpop.permute.xlu0 %1655  ;;  %v1812_v54 = vmin.f32 %v1810_v57, %v1721_v32  ;;  %v1813_v34 = vmin.f32 %v1811_v42, %v1723_v33  ;;  %v1734_v30 = vadd.f32 %v1636_v37, %v9434_v41  ;;  %v9505_v57 = vld [vmem:[#allocation102_spill] sm:$0xff]  ;;  %v1736_v61 = vadd.f32 %v6878_v60, %v9437_v25 }
 0x177   :  { %2225 = vperm.xlu1 %5431, %v9499_v63   ;;  %v9503_v63 = vld [vmem:[#allocation96_spill] sm:$0xff]  ;;  %v1778_v32 = vmin.f32 %v1776_v44, %v1726_v48  ;;  %v1735_v14 = vadd.f32 %v1636_v37, %v9505_v57  ;;  %v9506_v33 = vld [vmem:[#allocation62_spill] sm:$0xff]  ;;  %v1779_v55 = vmin.f32 %v1777_v62, %v1728_v56  ;;  %v1739_v48 = vadd.f32 %v6886_v21, %v9439_v28  ;;  %v9507_v56 = vld [vmem:[#allocation103_spill] sm:$0xff] }
 0x178   :  { %2237 = vperm.xlu0 %5432, %v9501_v11   ;;  %v1814_v45 = vmin.f32 %v1812_v54, %v1725_v31  ;;  %v1733_v11 = vadd.f32 %v1632_v24, %v9503_v63  ;;  %v1815_v19 = vmin.f32 %v1813_v34, %v1727_v10  ;;  %v1737_v31 = vadd.f32 %v6878_v60, %v9438_v0  ;;  %v9508_v62 = vld [vmem:[#allocation59_spill] sm:$0xff] }
 0x179   :  { %v1660_v52 = vpop.permute.xlu1 %1659  ;;  %v1780_v24 = vmin.f32 %v1778_v32, %v1730_v17  ;;  %v1738_v34 = vadd.f32 %v6886_v21, %v9369_v6  ;;  %v1781_v10 = vmin.f32 %v1779_v55, %v1732_v27  ;;  %v1741_v44 = vadd.f32 %v6892_v43, %v9441_v4  ;;  %v9509_v32 = vld [vmem:[#allocation64_spill] sm:$0xff] }
 0x17a   :  { %v1664_v9 = vpop.permute.xlu0 %1663  ;;  %v1816_v42 = vmin.f32 %v1814_v45, %v1729_v26  ;;  %v1817_v13 = vmin.f32 %v1815_v19, %v1731_v29  ;;  %v1740_v26 = vadd.f32 %v6892_v43, %v9507_v56  ;;  %v1742_v29 = vadd.f32 %v1652_v20, %v9375_v39 }
 0x17b   :  { %2233 = vperm.xlu1 %5431, %v9504_v3   ;;  %v1782_v60 = vmin.f32 %v1780_v24, %v1734_v30  ;;  %v1743_v45 = vadd.f32 %v1652_v20, %v9376_v46  ;;  %v1783_v21 = vmin.f32 %v1781_v10, %v1736_v61  ;;  %v1745_v27 = vadd.f32 %v1656_v15, %v9374_v22  ;;  %v9511_v61 = vld [vmem:[#allocation61_spill] sm:$0xff]  ;;  %v9568_v22 = vld [vmem:[#allocation79_spill] sm:$0xff] }
 0x17c   :  { %2245 = vperm.xlu0 %5432, %v9506_v33   ;;  %v1818_v54 = vmin.f32 %v1816_v42, %v1733_v11  ;;  %v1819_v17 = vmin.f32 %v1817_v13, %v1735_v14  ;;  %v1744_v11 = vadd.f32 %v1656_v15, %v9373_v51  ;;  %v1746_v43 = vadd.f32 %v1660_v52, %v9298_v40 }
 0x17d   :  { %v1668_v1 = vpop.permute.xlu1 %1667  ;;  %v1784_v42 = vmin.f32 %v1782_v60, %v1738_v34  ;;  %v1747_v30 = vadd.f32 %v1660_v52, %v9299_v36  ;;  %v1785_v24 = vmin.f32 %v1783_v21, %v1740_v26  ;;  %v9514_v52 = vld [vmem:[#allocation115_spill] sm:$0xff]  ;;  %v9515_v26 = vld [vmem:[#allocation116_spill] sm:$0xff] }
 0x17e   :  { %v1672_v37 = vpop.permute.xlu0 %1671  ;;  %v1820_v19 = vmin.f32 %v1818_v54, %v1737_v31  ;;  %v1821_v33 = vmin.f32 %v1819_v17, %v1739_v48  ;;  %v1750_v15 = vadd.f32 %v1668_v1, %v6401_v35  ;;  %v9512_v54 = vld [vmem:[#allocation118_spill] sm:$0xff]  ;;  %v9518_v35 = vld [vmem:[#allocation119_spill] sm:$0xff] }
 0x17f   :  { %2241 = vperm.xlu1 %5431, %v9508_v62   ;;  %v9510_v62 = vld [vmem:[#allocation111_spill] sm:$0xff]  ;;  %v1786_v31 = vmin.f32 %v1784_v42, %v1742_v29  ;;  %v1751_v34 = vadd.f32 %v1668_v1, %v9512_v54  ;;  %v9513_v48 = vld [vmem:[#allocation66_spill] sm:$0xff]  ;;  %v1787_v60 = vmin.f32 %v1785_v24, %v1744_v11  ;;  %v1752_v3 = vadd.f32 %v1672_v37, %v9514_v52  ;;  %v9519_v54 = vld [vmem:[#allocation120_spill] sm:$0xff] }
 0x180   :  { %2253 = vperm.xlu0 %5432, %v9509_v32   ;;  %v1822_v13 = vmin.f32 %v1820_v19, %v1741_v44  ;;  %v1748_v20 = vadd.f32 %v1664_v9, %v9510_v62  ;;  %v1749_v32 = vadd.f32 %v1664_v9, %v9294_v23  ;;  %v1823_v10 = vmin.f32 %v1821_v33, %v1743_v45  ;;  %v9516_v9 = vld [vmem:[#allocation121_spill] sm:$0xff]  ;;  %v9520_v11 = vld [vmem:[#allocation63_spill] sm:$0xff] }
 0x181   :  { %v1676_v55 = vpop.permute.xlu1 %1675  ;;  %v1753_v44 = vadd.f32 %v1672_v37, %v9515_v26  ;;  %v1788_v19 = vmin.f32 %v1786_v31, %v1746_v43  ;;  %v9522_v26 = vld [vmem:[#allocation126_spill] sm:$0xff] }
 0x182   :  { %v1680_v14 = vpop.permute.xlu0 %1679  ;;  %v1824_v17 = vmin.f32 %v1822_v13, %v1745_v27  ;;  %v1825_v62 = vmin.f32 %v1823_v10, %v1747_v30  ;;  %v1754_v23 = vadd.f32 %v1676_v55, %v9516_v9  ;;  %v1789_v45 = vmin.f32 %v1787_v60, %v1748_v20  ;;  %v9521_v13 = vld [vmem:[#allocation125_spill] sm:$0xff]  ;;  %v9523_v30 = vld [vmem:[#allocation68_spill] sm:$0xff] }
 0x183   :  { %2249 = vperm.xlu1 %5431, %v9511_v61   ;;  %v9517_v61 = vld [vmem:[#allocation122_spill] sm:$0xff]  ;;  %v1756_v1 = vadd.f32 %v1680_v14, %v9518_v35  ;;  %v1790_v27 = vmin.f32 %v1788_v19, %v1750_v15  ;;  %v9525_v20 = vld [vmem:[#allocation124_spill] sm:$0xff] }
 0x184   :  { %2261 = vperm.xlu0 %5432, %v9513_v48   ;;  %v1755_v29 = vadd.f32 %v1676_v55, %v9517_v61  ;;  %v1826_v42 = vmin.f32 %v1824_v17, %v1749_v32  ;;  %v1757_v48 = vadd.f32 %v1680_v14, %v9519_v54  ;;  %v1827_v24 = vmin.f32 %v1825_v62, %v1751_v34  ;;  %v9524_v55 = vld [vmem:[#allocation123_spill] sm:$0xff]  ;;  %v9526_v14 = vld [vmem:[#allocation129_spill] sm:$0xff] }
 0x185   :  { %v1684_v21 = vpop.permute.xlu1 %1683  ;;  %v1791_v31 = vmin.f32 %v1789_v45, %v1752_v3  ;;  %v1792_v17 = vmin.f32 %v1790_v27, %v1754_v23  ;;  %v9530_v3 = vld [vmem:[#allocation65_spill] sm:$0xff] }
 0x186   :  { %v1688_v33 = vpop.permute.xlu0 %1687  ;;  %v1758_v37 = vadd.f32 %v1684_v21, %v9521_v13  ;;  %v1759_v43 = vadd.f32 %v1684_v21, %v9522_v26  ;;  %v1828_v10 = vmin.f32 %v1826_v42, %v1753_v44  ;;  %v1829_v35 = vmin.f32 %v1827_v24, %v1755_v29  ;;  %v9528_v13 = vld [vmem:[#allocation127_spill] sm:$0xff]  ;;  %v9529_v26 = vld [vmem:[#allocation128_spill] sm:$0xff]  ;;  %v9531_v42 = vld [vmem:[#allocation70_spill] sm:$0xff] }
 0x187   :  { %2257 = vperm.xlu1 %5431, %v9520_v11   ;;  %v1760_v61 = vadd.f32 %v1688_v33, %v9524_v55  ;;  %v1761_v32 = vadd.f32 %v1688_v33, %v9525_v20  ;;  %v9527_v11 = vld [vmem:[#allocation130_spill] sm:$0xff]  ;;  %v1793_v34 = vmin.f32 %v1791_v31, %v1756_v1 }
 0x188   :  { %2269 = vperm.xlu0 %5432, %v9523_v30   ;;  %v1830_v19 = vmin.f32 %v1828_v10, %v1757_v48  ;;  %v1794_v44 = vmin.f32 %v1792_v17, %v1758_v37  ;;  %v1831_v45 = vmin.f32 %v1829_v35, %v1759_v43  ;;  %v9536_v37 = vld [vmem:[#allocation67_spill] sm:$0xff]  ;;  %v9537_v17 = vld [vmem:[#allocation8_spill] sm:$0xff]  ;;  %v9561_v55 = vld [vmem:[#allocation82_spill] sm:$0xff] }
 0x189   :  { %v1692_v60 = vpop.permute.xlu1 %1691  ;;  %v1795_v33 = vmin.f32 %v1793_v34, %v1760_v61  ;;  %v5480_v61 = vmov 3  }
 0x18a   :  { %v1762_v54 = vadd.f32 %v1692_v60, %v9526_v14  ;;  %v1763_v15 = vadd.f32 %v1692_v60, %v9527_v11  ;;  %v1696_v62 = vpop.permute.xlu0 %1695  ;;  %v1832_v23 = vmin.f32 %v1830_v19, %v1761_v32  ;;  %v9532_v14 = vld [vmem:[#allocation133_spill] sm:$0xff]  ;;  %v9533_v11 = vld [vmem:[#allocation134_spill] sm:$0xff] }
 0x18b   :  { %v1764_v21 = vadd.f32 %v1696_v62, %v9528_v13  ;;  %v1765_v30 = vadd.f32 %v1696_v62, %v9529_v26  ;;  %2265 = vperm.xlu1 %5431, %v9530_v3   ;;  %v9534_v13 = vld [vmem:[#allocation131_spill] sm:$0xff]  ;;  %v9535_v26 = vld [vmem:[#allocation132_spill] sm:$0xff] }
 0x18c   :  { %2277 = vperm.xlu0 %5432, %v9531_v42   ;;  %v1796_v27 = vmin.f32 %v1794_v44, %v1762_v54  ;;  %v1833_v24 = vmin.f32 %v1831_v45, %v1763_v15  ;;  %v9545_v42 = vld [vmem:[#allocation15_spill] sm:$0xff] }
 0x18d   :  { %v1700_v29 = vpop.permute.xlu1 %1699  ;;  %v1797_v31 = vmin.f32 %v1795_v33, %v1764_v21  ;;  %v1834_v10 = vmin.f32 %v1832_v23, %v1765_v30  ;;  %v9538_v21 = vld [vmem:[#allocation69_spill] sm:$0xff] }
 0x18e   :  { %v1766_v60 = vadd.f32 %v1700_v29, %v9532_v14  ;;  %v1767_v1 = vadd.f32 %v1700_v29, %v9533_v11  ;;  %v1704_v48 = vpop.permute.xlu0 %1703  ;;  %v9539_v33 = vld [vmem:[#allocation9_spill] sm:$0xff] }
 0x18f   :  { %v1768_v62 = vadd.f32 %v1704_v48, %v9534_v13  ;;  %v1769_v3 = vadd.f32 %v1704_v48, %v9535_v26  ;;  %2273 = vperm.xlu1 %5431, %v9536_v37   ;;  %v9541_v48 = vld [vmem:[#allocation11_spill] sm:$0xff]  ;;  %v9560_v14 = vld [vmem:[#allocation81_spill] sm:$0xff] }
 0x190   :  { %v1798_v35 = vmin.f32 %v1796_v27, %v1766_v60  ;;  %v1835_v43 = vmin.f32 %v1833_v24, %v1767_v1  ;;  %5433 = vset.pattern.permute.xlu0 %v5480_v61  ;;  %v9540_v60 = vld [vmem:[#allocation10_spill] sm:$0xff] }
 0x191   :  { %v1799_v32 = vmin.f32 %v1797_v31, %v1768_v62  ;;  %v1836_v54 = vmin.f32 %v1834_v10, %v1769_v3  ;;  %2469 = vperm.xlu0 %5433, %v9537_v17  }
 0x192   :  { %v1892_v15 = vpop.permute.xlu1 %1891 }
 0x193   :  { %v1800_v34 = vmin.f32 %v1798_v35, %v1799_v32  ;;  %v1837_v19 = vmin.f32 %v1835_v43, %v1836_v54  ;;  %v1896_v44 = vpop.permute.xlu0 %1895  ;;  %2281 = vperm.xlu1 %5431, %v9538_v21   ;;  %v9542_v43 = vld [vmem:[#allocation7_spill] sm:$0xff]  ;;  %v9548_v21 = vld [vmem:[#allocation17_spill] sm:$0xff] }
 0x195   :  { %v1801_v30 = vrot.slane %v1800_v34, 4  ;;  %v1838_v45 = vrot.slane %v1837_v19, 4  ;;  %2481 = vperm.xlu0 %5433, %v9539_v33   ;;  %v9543_v33 = vld [vmem:[#allocation13_spill] sm:$0xff] }
 0x196   :  { %v1900_v23 = vpop.permute.xlu1 %1899 }
 0x197   :  { %v1802_v29 = vmin.f32 %v1800_v34, %v1801_v30  ;;  %v1839_v27 = vmin.f32 %v1837_v19, %v1838_v45  ;;  %v1908_v24 = vpop.permute.xlu0 %1907  ;;  %5434 = vset.pattern.permute.xlu1 %v5480_v61  ;;  %v9544_v45 = vld [vmem:[#allocation12_spill] sm:$0xff] }
 0x198   :  { %2473 = vperm.xlu1 %5434, %v9540_v60   ;;  %v9546_v60 = vld [vmem:[#allocation135_spill] sm:$0xff]  ;;  %v2026_v20 = vadd.f32 %v1908_v24, %v9560_v14  ;;  %v2027_v9 = vadd.f32 %v1908_v24, %v9561_v55 }
 0x199   :  { %v1803_v3 = vrot.slane %v1802_v29, 2  ;;  %v1840_v1 = vrot.slane %v1839_v27, 2  ;;  %2489 = vperm.xlu0 %5433, %v9541_v48  }
 0x19a   :  { %v1904_v31 = vpop.permute.xlu1 %1903 }
 0x19b   :  { %v1804_v10 = vmin.f32 %v1802_v29, %v1803_v3  ;;  %v1841_v62 = vmin.f32 %v1839_v27, %v1840_v1  ;;  %v1916_v35 = vpop.permute.xlu0 %1915  ;;  %v1868_v3 = vld [vmem:[#allocation3 + $0x1] ss:$8 sm:$0x3]  ;;  %v9547_v1 = vld [vmem:[#allocation14_spill] sm:$0xff] }
 0x19c   :  { %2477 = vperm.xlu1 %5434, %v9542_v43  }
 0x19d   :  { %v1805_v32 = vrot.slane %v1804_v10, 1  ;;  %v1842_v54 = vrot.slane %v1841_v62, 1  ;;  %2497 = vperm.xlu0 %5433, %v9543_v33  }
 0x19e   :  { %v1912_v34 = vpop.permute.xlu1 %1911 }
 0x19f   :  { %v1806_v19 = vmin.f32 %v1804_v10, %v1805_v32  ;;  %v1843_v30 = vmin.f32 %v1841_v62, %v1842_v54  ;;  %v1924_v61 = vpop.permute.xlu0 %1923  ;;  %v9549_v32 = vld [vmem:[#allocation16_spill] sm:$0xff]  ;;  %v9557_v54 = vld [vmem:[#allocation23_spill] sm:$0xff] }
 0x1a0   :  { %2485 = vperm.xlu1 %5434, %v9544_v45   ;;  %v9555_v45 = vld [vmem:[#allocation74_spill] sm:$0xff] }
 0x1a1   :  { %v1871_v17 = vcombine.low %v1806_v19, %v1843_v30  ;;  %2505 = vperm.xlu0 %5433, %v9545_v42   ;;  %v9551_v19 = vld [vmem:[#allocation19_spill] sm:$0xff]  ;;  %v9552_v42 = vld [vmem:[#allocation18_spill] sm:$0xff]  ;;  %v2023_v37 = vadd.f32 %v1900_v23, %v9555_v45 }
 0x1a2   :  { %v1920_v48 = vpop.permute.xlu1 %1919 }
 0x1a3   :  { %v1878_v29 = vrot.slane %v1871_v17, %v9546_v60  ;;  %v1932_v27 = vpop.permute.xlu0 %1931 }
 0x1a4   :  { %2493 = vperm.xlu1 %5434, %v9547_v1   ;;  %v9553_v1 = vld [vmem:[#allocation21_spill] sm:$0xff] }
 0x1a5   :  { %v1885_v43 = vrot.slane %v1878_v29, %v9546_v60  ;;  %2513 = vperm.xlu0 %5433, %v9548_v21   ;;  %v9559_v60 = vld [vmem:[#allocation73_spill] sm:$0xff] }
 0x1a6   :  { %v1928_v33 = vpop.permute.xlu1 %1927  ;;  %v2019_v26 = vadd.f32 %v1892_v15, %v9559_v60 }
 0x1a7   :  { %v1887_v10 = vmin.f32 %v1868_v3, %v1885_v43  ;;  %v6984_v62 = vpop.permute.xlu0 %1939  ;;  %v9554_v43 = vld [vmem:[#allocation72_spill] sm:$0xff] }
 0x1a8   :  { %2501 = vperm.xlu1 %5434, %v9549_v32   ;;  %v2022_v3 = vadd.f32 %v1900_v23, %v9554_v43  ;;  %v9556_v32 = vld [vmem:[#allocation20_spill] sm:$0xff]  ;;  %v9562_v43 = vld [vmem:[#allocation22_spill] sm:$0xff]  ;;  %v9563_v23 = vld [vmem:[#allocation77_spill] sm:$0xff] }
 0x1a9   :  { %1888 = vst.msk [vmem:[#allocation3 + $0x1] ss:$8 sm:$0x3] %vm6675_vm0, %v1887_v10  ;;  %2521 = vperm.xlu0 %5433, %v9551_v19   ;;  %v9558_v10 = vld [vmem:[#allocation71_spill] sm:$0xff]  ;;  %v2020_v45 = vadd.f32 %v1896_v44, %v9563_v23  ;;  %v2031_v23 = vadd.f32 %v1916_v35, %v9494_v49 }
 0x1aa   :  { %v1936_v17 = vpop.permute.xlu1 %1935  ;;  %v2018_v19 = vadd.f32 %v1892_v15, %v9558_v10  ;;  %v9566_v10 = vld [vmem:[#allocation76_spill] sm:$0xff]  ;;  %v9567_v15 = vld [vmem:[#allocation25_spill] sm:$0xff] }
 0x1ab   :  { %v6990_v30 = vpop.permute.xlu0 %1947  ;;  %v2025_v40 = vadd.f32 %v1904_v31, %v9566_v10  ;;  %v9571_v10 = vld [vmem:[#allocation27_spill] sm:$0xff] }
 0x1ac   :  { %2509 = vperm.xlu1 %5434, %v9552_v42   ;;  %v2082_v42 = vmin.f32 %v2018_v19, %v2022_v3  ;;  %v2028_v19 = vadd.f32 %v1912_v34, %v9568_v22 }
 0x1ad   :  { %2529 = vperm.xlu0 %5433, %v9553_v1   ;;  %v2119_v1 = vmin.f32 %v2019_v26, %v2023_v37  ;;  %v2029_v26 = vadd.f32 %v1912_v34, %v9415_v58  ;;  %v2034_v34 = vadd.f32 %v1924_v61, %v9349_v16  ;;  %v2035_v58 = vadd.f32 %v1924_v61, %v9497_v47 }
 0x1ae   :  { %v1944_v29 = vpop.permute.xlu1 %1943  ;;  %v2084_v24 = vmin.f32 %v2082_v42, %v2026_v20  ;;  %v2040_v61 = vadd.f32 %v1936_v17, %v9429_v8 }
 0x1af   :  { %v6994_v21 = vpop.permute.xlu0 %1955  ;;  %v2121_v3 = vmin.f32 %v2119_v1, %v2027_v9  ;;  %v9572_v1 = vld [vmem:[#allocation87_spill] sm:$0xff] }
 0x1b0   :  { %2517 = vperm.xlu1 %5434, %v9556_v32   ;;  %v9564_v32 = vld [vmem:[#allocation78_spill] sm:$0xff] }
 0x1b1   :  { %2537 = vperm.xlu0 %5433, %v9557_v54   ;;  %v2021_v52 = vadd.f32 %v1896_v44, %v9564_v32  ;;  %v9565_v54 = vld [vmem:[#allocation75_spill] sm:$0xff]  ;;  %v9570_v44 = vld [vmem:[#allocation24_spill] sm:$0xff] }
 0x1b2   :  { %v1952_v13 = vpop.permute.xlu1 %1951  ;;  %v2024_v36 = vadd.f32 %v1904_v31, %v9565_v54  ;;  %v2032_v31 = vadd.f32 %v1920_v48, %v9420_v18 }
 0x1b3   :  { %v7002_v11 = vpop.permute.xlu0 %1963  ;;  %v2120_v14 = vmin.f32 %v2021_v52, %v2025_v40  ;;  %v2123_v40 = vmin.f32 %v2121_v3, %v2031_v23  ;;  %v2038_v52 = vadd.f32 %v1932_v27, %v9426_v12  ;;  %v2043_v23 = vadd.f32 %v6984_v62, %v9360_v53 }
 0x1b4   :  { %2525 = vperm.xlu1 %5434, %v9562_v43   ;;  %v9569_v43 = vld [vmem:[#allocation85_spill] sm:$0xff]  ;;  %v2083_v32 = vmin.f32 %v2020_v45, %v2024_v36  ;;  %v9573_v45 = vld [vmem:[#allocation26_spill] sm:$0xff]  ;;  %v2044_v3 = vadd.f32 %v1944_v29, %v9431_v59 }
 0x1b5   :  { %2545 = vperm.xlu0 %5433, %v9567_v15   ;;  %v2030_v55 = vadd.f32 %v1916_v35, %v9569_v43  ;;  %v2033_v15 = vadd.f32 %v1920_v48, %v9496_v5  ;;  %v2122_v42 = vmin.f32 %v2120_v14, %v2029_v26  ;;  %v2036_v43 = vadd.f32 %v1928_v33, %v9572_v1 }
 0x1b6   :  { %v1960_v60 = vpop.permute.xlu1 %1959  ;;  %v2085_v9 = vmin.f32 %v2083_v32, %v2028_v19  ;;  %v2037_v35 = vadd.f32 %v1928_v33, %v9424_v2  ;;  %v2039_v48 = vadd.f32 %v1932_v27, %v9500_v7  ;;  %v2041_v14 = vadd.f32 %v1936_v17, %v9502_v50  ;;  %v9574_v32 = vld [vmem:[#allocation29_spill] sm:$0xff] }
 0x1b7   :  { %v7014_v37 = vpop.permute.xlu0 %1971  ;;  %v2086_v36 = vmin.f32 %v2084_v24, %v2030_v55  ;;  %v2124_v16 = vmin.f32 %v2122_v42, %v2033_v15  ;;  %v2125_v33 = vmin.f32 %v2123_v40, %v2035_v58  ;;  %v2042_v55 = vadd.f32 %v6984_v62, %v9359_v38  ;;  %v9575_v42 = vld [vmem:[#allocation28_spill] sm:$0xff] }
 0x1b8   :  { %2533 = vperm.xlu1 %5434, %v9570_v44   ;;  %v2045_v15 = vadd.f32 %v1944_v29, %v9503_v63  ;;  %v2047_v58 = vadd.f32 %v6990_v30, %v9505_v57  ;;  %v2050_v40 = vadd.f32 %v6994_v21, %v9369_v6 }
 0x1b9   :  { %2553 = vperm.xlu0 %5433, %v9571_v10   ;;  %v2087_v10 = vmin.f32 %v2085_v9, %v2032_v31  ;;  %v2088_v19 = vmin.f32 %v2086_v36, %v2034_v34  ;;  %v2126_v24 = vmin.f32 %v2124_v16, %v2037_v35  ;;  %v2127_v17 = vmin.f32 %v2125_v33, %v2039_v48 }
 0x1ba   :  { %v1968_v20 = vpop.permute.xlu1 %1967  ;;  %v2046_v34 = vadd.f32 %v6990_v30, %v9434_v41  ;;  %v2049_v16 = vadd.f32 %v1952_v13, %v9438_v0 }
 0x1bb   :  { %v7026_v44 = vpop.permute.xlu0 %1979  ;;  %v2089_v27 = vmin.f32 %v2087_v10, %v2036_v43  ;;  %v2090_v9 = vmin.f32 %v2088_v19, %v2038_v52  ;;  %v2128_v62 = vmin.f32 %v2126_v24, %v2041_v14  ;;  %v2048_v43 = vadd.f32 %v1952_v13, %v9437_v25  ;;  %v9576_v10 = vld [vmem:[#allocation31_spill] sm:$0xff]  ;;  %v9577_v24 = vld [vmem:[#allocation30_spill] sm:$0xff] }
 0x1bc   :  { %2541 = vperm.xlu1 %5434, %v9573_v45   ;;  %v2129_v35 = vmin.f32 %v2127_v17, %v2043_v23  ;;  %v2051_v52 = vadd.f32 %v6994_v21, %v9439_v28  ;;  %v2053_v14 = vadd.f32 %v1960_v60, %v9441_v4  ;;  %v2055_v23 = vadd.f32 %v7002_v11, %v9376_v46  ;;  %v9584_v45 = vld [vmem:[#allocation117_spill] sm:$0xff] }
 0x1bd   :  { %2561 = vperm.xlu0 %5433, %v9574_v32   ;;  %v2091_v36 = vmin.f32 %v2089_v27, %v2040_v61  ;;  %v2092_v29 = vmin.f32 %v2090_v9, %v2042_v55  ;;  %v2130_v19 = vmin.f32 %v2128_v62, %v2045_v15  ;;  %v2052_v61 = vadd.f32 %v1960_v60, %v9507_v56  ;;  %v9578_v15 = vld [vmem:[#allocation108_spill] sm:$0xff] }
 0x1be   :  { %v1976_v26 = vpop.permute.xlu1 %1975  ;;  %v2131_v13 = vmin.f32 %v2129_v35, %v2047_v58  ;;  %v2054_v55 = vadd.f32 %v7002_v11, %v9375_v39  ;;  %v2057_v17 = vadd.f32 %v1968_v20, %v9578_v15 }
 0x1bf   :  { %v1988_v31 = vpop.permute.xlu0 %1987  ;;  %v2093_v30 = vmin.f32 %v2091_v36, %v2044_v3  ;;  %v2094_v27 = vmin.f32 %v2092_v29, %v2046_v34  ;;  %v2132_v21 = vmin.f32 %v2130_v19, %v2049_v16  ;;  %v2056_v3 = vadd.f32 %v1968_v20, %v9373_v51  ;;  %v9579_v36 = vld [vmem:[#allocation33_spill] sm:$0xff]  ;;  %v9581_v29 = vld [vmem:[#allocation114_spill] sm:$0xff]  ;;  %v9583_v16 = vld [vmem:[#allocation112_spill] sm:$0xff] }
 0x1c0   :  { %2549 = vperm.xlu1 %5434, %v9575_v42   ;;  %v2133_v62 = vmin.f32 %v2131_v13, %v2051_v52  ;;  %v9580_v34 = vld [vmem:[#allocation113_spill] sm:$0xff]  ;;  %v2059_v35 = vadd.f32 %v7014_v37, %v9581_v29  ;;  %v9585_v52 = vld [vmem:[#allocation118_spill] sm:$0xff]  ;;  %v9586_v13 = vld [vmem:[#allocation32_spill] sm:$0xff] }
 0x1c1   :  { %2569 = vperm.xlu0 %5433, %v9576_v10   ;;  %v2095_v9 = vmin.f32 %v2093_v30, %v2048_v43  ;;  %v2096_v60 = vmin.f32 %v2094_v27, %v2050_v40  ;;  %v2058_v58 = vadd.f32 %v7014_v37, %v9580_v34  ;;  %v2134_v32 = vmin.f32 %v2132_v21, %v2053_v14  ;;  %v9587_v29 = vld [vmem:[#allocation115_spill] sm:$0xff]  ;;  %v9588_v14 = vld [vmem:[#allocation116_spill] sm:$0xff]  ;;  %v9641_v51 = vld [vmem:[#allocation85_spill] sm:$0xff] }
 0x1c2   :  { %v1984_v48 = vpop.permute.xlu1 %1983  ;;  %v2061_v30 = vadd.f32 %v1976_v26, %v9583_v16  ;;  %v2135_v20 = vmin.f32 %v2133_v62, %v2055_v23  ;;  %v2062_v40 = vadd.f32 %v7026_v44, %v9584_v45  ;;  %v2063_v27 = vadd.f32 %v7026_v44, %v9585_v52  ;;  %v9589_v21 = vld [vmem:[#allocation35_spill] sm:$0xff] }
 0x1c3   :  { %v1996_v33 = vpop.permute.xlu0 %1995  ;;  %v2097_v11 = vmin.f32 %v2095_v9, %v2052_v61  ;;  %v2098_v42 = vmin.f32 %v2096_v60, %v2054_v55  ;;  %v2136_v37 = vmin.f32 %v2134_v32, %v2057_v17  ;;  %v2064_v61 = vadd.f32 %v1984_v48, %v9587_v29  ;;  %v9590_v55 = vld [vmem:[#allocation121_spill] sm:$0xff]  ;;  %v9591_v60 = vld [vmem:[#allocation122_spill] sm:$0xff]  ;;  %v9592_v44 = vld [vmem:[#allocation119_spill] sm:$0xff] }
 0x1c4   :  { %2557 = vperm.xlu1 %5434, %v9577_v24   ;;  %v9582_v24 = vld [vmem:[#allocation111_spill] sm:$0xff]  ;;  %v2065_v9 = vadd.f32 %v1984_v48, %v9588_v14  ;;  %v2137_v16 = vmin.f32 %v2135_v20, %v2059_v35  ;;  %v2066_v23 = vadd.f32 %v1988_v31, %v9590_v55  ;;  %v2067_v62 = vadd.f32 %v1988_v31, %v9591_v60  ;;  %v9594_v29 = vld [vmem:[#allocation125_spill] sm:$0xff]  ;;  %v9595_v14 = vld [vmem:[#allocation126_spill] sm:$0xff] }
 0x1c5   :  { %2577 = vperm.xlu0 %5433, %v9579_v36   ;;  %v2060_v43 = vadd.f32 %v1976_v26, %v9582_v24  ;;  %v2099_v36 = vmin.f32 %v2097_v11, %v2056_v3  ;;  %v2100_v26 = vmin.f32 %v2098_v42, %v2058_v58  ;;  %v2138_v34 = vmin.f32 %v2136_v37, %v2061_v30  ;;  %v9596_v42 = vld [vmem:[#allocation34_spill] sm:$0xff]  ;;  %v9597_v20 = vld [vmem:[#allocation123_spill] sm:$0xff]  ;;  %v9598_v60 = vld [vmem:[#allocation124_spill] sm:$0xff] }
 0x1c6   :  { %v1992_v10 = vpop.permute.xlu1 %1991  ;;  %v2139_v11 = vmin.f32 %v2137_v16, %v2063_v27  ;;  %v2070_v48 = vadd.f32 %v1996_v33, %v9594_v29 }
 0x1c7   :  { %v2004_v19 = vpop.permute.xlu0 %2003  ;;  %v2101_v24 = vmin.f32 %v2099_v36, %v2060_v43  ;;  %v2068_v52 = vadd.f32 %v1992_v10, %v9592_v44  ;;  %v2102_v17 = vmin.f32 %v2100_v26, %v2062_v40  ;;  %v2140_v35 = vmin.f32 %v2138_v34, %v2065_v9  ;;  %v9599_v43 = vld [vmem:[#allocation40_spill] sm:$0xff]  ;;  %v9601_v40 = vld [vmem:[#allocation130_spill] sm:$0xff] }
 0x1c8   :  { %2565 = vperm.xlu1 %5434, %v9586_v13   ;;  %v9593_v13 = vld [vmem:[#allocation120_spill] sm:$0xff]  ;;  %v2141_v37 = vmin.f32 %v2139_v11, %v2067_v62  ;;  %v2075_v16 = vadd.f32 %v2004_v19, %v9601_v40  ;;  %v9605_v62 = vld [vmem:[#allocation133_spill] sm:$0xff]  ;;  %v9606_v11 = vld [vmem:[#allocation134_spill] sm:$0xff] }
 0x1c9   :  { %2585 = vperm.xlu0 %5433, %v9589_v21   ;;  %v2069_v3 = vadd.f32 %v1992_v10, %v9593_v13  ;;  %v2071_v21 = vadd.f32 %v1996_v33, %v9595_v14  ;;  %v2103_v58 = vmin.f32 %v2101_v24, %v2064_v61  ;;  %v2104_v30 = vmin.f32 %v2102_v17, %v2066_v23  ;;  %v9600_v10 = vld [vmem:[#allocation129_spill] sm:$0xff]  ;;  %v9602_v33 = vld [vmem:[#allocation127_spill] sm:$0xff]  ;;  %v9609_v40 = vld [vmem:[#allocation132_spill] sm:$0xff] }
 0x1ca   :  { %v2000_v45 = vpop.permute.xlu1 %1999  ;;  %v2074_v13 = vadd.f32 %v2004_v19, %v9600_v10  ;;  %v9607_v19 = vld [vmem:[#allocation37_spill] sm:$0xff] }
 0x1cb   :  { %v2012_v32 = vpop.permute.xlu0 %2011  ;;  %v2072_v31 = vadd.f32 %v2000_v45, %v9597_v20  ;;  %v2073_v36 = vadd.f32 %v2000_v45, %v9598_v60  ;;  %v2105_v26 = vmin.f32 %v2103_v58, %v2068_v52  ;;  %v2142_v29 = vmin.f32 %v2140_v35, %v2069_v3  ;;  %v9604_v45 = vld [vmem:[#allocation36_spill] sm:$0xff]  ;;  %v9636_v20 = vld [vmem:[#allocation82_spill] sm:$0xff] }
 0x1cc   :  { %2573 = vperm.xlu1 %5434, %v9596_v42   ;;  %v9603_v42 = vld [vmem:[#allocation128_spill] sm:$0xff]  ;;  %v2106_v61 = vmin.f32 %v2104_v30, %v2070_v48  ;;  %v2143_v9 = vmin.f32 %v2141_v37, %v2071_v21  ;;  %v2078_v17 = vadd.f32 %v2012_v32, %v9605_v62  ;;  %v2079_v10 = vadd.f32 %v2012_v32, %v9606_v11  ;;  %v9610_v30 = vld [vmem:[#allocation43_spill] sm:$0xff]  ;;  %v9635_v62 = vld [vmem:[#allocation81_spill] sm:$0xff] }
 0x1cd   :  { %2593 = vperm.xlu0 %5433, %v9599_v43   ;;  %v2107_v43 = vmin.f32 %v2105_v26, %v2072_v31  ;;  %v2144_v23 = vmin.f32 %v2142_v29, %v2073_v36  ;;  %v9611_v26 = vld [vmem:[#allocation39_spill] sm:$0xff] }
 0x1ce   :  { %v2008_v27 = vpop.permute.xlu1 %2007  ;;  %v2108_v52 = vmin.f32 %v2106_v61, %v2074_v13  ;;  %v2145_v3 = vmin.f32 %v2143_v9, %v2075_v16  ;;  %v9612_v61 = vld [vmem:[#allocation38_spill] sm:$0xff] }
 0x1cf   :  { %v2076_v14 = vadd.f32 %v2008_v27, %v9602_v33  ;;  %v2077_v24 = vadd.f32 %v2008_v27, %v9603_v42  ;;  %v7090_v34 = vpop.permute.xlu0 %2157  ;;  %v9608_v27 = vld [vmem:[#allocation131_spill] sm:$0xff] }
 0x1d0   :  { %2581 = vperm.xlu1 %5434, %v9604_v45   ;;  %v2110_v31 = vmin.f32 %v2108_v52, %v2078_v17  ;;  %v2147_v29 = vmin.f32 %v2145_v3, %v2079_v10  ;;  %v9614_v17 = vld [vmem:[#allocation41_spill] sm:$0xff]  ;;  %v9629_v45 = vld [vmem:[#allocation74_spill] sm:$0xff] }
 0x1d1   :  { %2739 = vperm.xlu0 %5433, %v9607_v19   ;;  %v2109_v35 = vmin.f32 %v2107_v43, %v2076_v14  ;;  %v2146_v33 = vmin.f32 %v2144_v23, %v2077_v24  ;;  %v9613_v24 = vld [vmem:[#allocation42_spill] sm:$0xff] }
 0x1d2   :  { %v2016_v58 = vpop.permute.xlu1 %2015 }
 0x1d3   :  { %v2080_v42 = vadd.f32 %v2016_v58, %v9608_v27  ;;  %v2081_v48 = vadd.f32 %v2016_v58, %v9609_v40  ;;  %v2166_v21 = vpop.permute.xlu0 %2165  ;;  %v9632_v40 = vld [vmem:[#allocation57_spill] sm:$0xff]  ;;  %v9633_v27 = vld [vmem:[#allocation71_spill] sm:$0xff] }
 0x1d4   :  { %2589 = vperm.xlu1 %5434, %v9610_v30  }
 0x1d5   :  { %v2111_v36 = vmin.f32 %v2109_v35, %v2080_v42  ;;  %v2148_v37 = vmin.f32 %v2146_v33, %v2081_v48  ;;  %2747 = vperm.xlu0 %5433, %v9611_v26   ;;  %v9615_v33 = vld [vmem:[#allocation45_spill] sm:$0xff] }
 0x1d6   :  { %v2162_v32 = vpop.permute.xlu1 %2161 }
 0x1d7   :  { %v2112_v19 = vmin.f32 %v2110_v31, %v2111_v36  ;;  %v2149_v13 = vmin.f32 %v2147_v29, %v2148_v37  ;;  %v2174_v16 = vpop.permute.xlu0 %2173  ;;  %v9616_v31 = vld [vmem:[#allocation44_spill] sm:$0xff]  ;;  %v9617_v37 = vld [vmem:[#allocation47_spill] sm:$0xff] }
 0x1d8   :  { %2735 = vperm.xlu1 %5434, %v9612_v61   ;;  %v9620_v61 = vld [vmem:[#allocation135_spill] sm:$0xff]  ;;  %v2292_v60 = vadd.f32 %v2174_v16, %v9635_v62 }
 0x1d9   :  { %v2113_v14 = vrot.slane %v2112_v19, 4  ;;  %v2150_v43 = vrot.slane %v2149_v13, 4  ;;  %2755 = vperm.xlu0 %5433, %v9613_v24  }
 0x1da   :  { %v2170_v9 = vpop.permute.xlu1 %2169 }
 0x1db   :  { %v2114_v23 = vmin.f32 %v2112_v19, %v2113_v14  ;;  %v2151_v58 = vmin.f32 %v2149_v13, %v2150_v43  ;;  %v2182_v30 = vpop.permute.xlu0 %2181  ;;  %v9618_v43 = vld [vmem:[#allocation46_spill] sm:$0xff] }
 0x1dc   :  { %2743 = vperm.xlu1 %5434, %v9614_v17   ;;  %v9619_v17 = vld [vmem:[#allocation49_spill] sm:$0xff]  ;;  %v2297_v62 = vadd.f32 %v2182_v30, %v9494_v49 }
 0x1dd   :  { %v2115_v42 = vrot.slane %v2114_v23, 2  ;;  %v2152_v10 = vrot.slane %v2151_v58, 2  ;;  %2763 = vperm.xlu0 %5433, %v9615_v33  }
 0x1de   :  { %v2178_v52 = vpop.permute.xlu1 %2177 }
 0x1df   :  { %v2116_v3 = vmin.f32 %v2114_v23, %v2115_v42  ;;  %v2153_v35 = vmin.f32 %v2151_v58, %v2152_v10  ;;  %v2190_v48 = vpop.permute.xlu0 %2189  ;;  %v2423_v42 = vld [vmem:[#allocation2 + $0x2] ss:$8 sm:$0x3]  ;;  %v9621_v10 = vld [vmem:[#allocation48_spill] sm:$0xff] }
 0x1e0   :  { %2751 = vperm.xlu1 %5434, %v9616_v31  }
 0x1e1   :  { %v2117_v29 = vrot.slane %v2116_v3, 1  ;;  %v2154_v36 = vrot.slane %v2153_v35, 1  ;;  %2771 = vperm.xlu0 %5433, %v9617_v37   ;;  %v9622_v37 = vld [vmem:[#allocation51_spill] sm:$0xff] }
 0x1e2   :  { %v2186_v24 = vpop.permute.xlu1 %2185 }
 0x1e3   :  { %v2118_v19 = vmin.f32 %v2116_v3, %v2117_v29  ;;  %v2155_v13 = vmin.f32 %v2153_v35, %v2154_v36  ;;  %v2198_v14 = vpop.permute.xlu0 %2197  ;;  %v9623_v36 = vld [vmem:[#allocation50_spill] sm:$0xff] }
 0x1e4   :  { %2759 = vperm.xlu1 %5434, %v9618_v43   ;;  %v9626_v43 = vld [vmem:[#allocation52_spill] sm:$0xff] }
 0x1e5   :  { %v2426_v26 = vcombine.low %v2118_v19, %v2155_v13  ;;  %2779 = vperm.xlu0 %5433, %v9619_v17   ;;  %v9625_v13 = vld [vmem:[#allocation53_spill] sm:$0xff] }
 0x1e6   :  { %v2194_v33 = vpop.permute.xlu1 %2193 }
 0x1e7   :  { %v2433_v23 = vrot.slane %v2426_v26, %v9620_v61  ;;  %v7109_v58 = vpop.permute.xlu0 %2205 }
 0x1e8   :  { %2767 = vperm.xlu1 %5434, %v9621_v10   ;;  %v9627_v10 = vld [vmem:[#allocation55_spill] sm:$0xff] }
 0x1e9   :  { %v2440_v31 = vrot.slane %v2433_v23, %v9620_v61  ;;  %2787 = vperm.xlu0 %5433, %v9622_v37   ;;  %v9630_v61 = vld [vmem:[#allocation54_spill] sm:$0xff] }
 0x1ea   :  { %v2202_v3 = vpop.permute.xlu1 %2201 }
 0x1eb   :  { %v2442_v35 = vmin.f32 %v2423_v42, %v2440_v31  ;;  %v7114_v29 = vpop.permute.xlu0 %2213  ;;  %v9628_v31 = vld [vmem:[#allocation72_spill] sm:$0xff] }
 0x1ec   :  { %2775 = vperm.xlu1 %5434, %v9623_v36   ;;  %v2288_v42 = vadd.f32 %v2166_v21, %v9628_v31  ;;  %v2289_v36 = vadd.f32 %v2166_v21, %v9629_v45  ;;  %v2293_v31 = vadd.f32 %v2174_v16, %v9636_v20  ;;  %v9637_v21 = vld [vmem:[#allocation77_spill] sm:$0xff]  ;;  %v9638_v45 = vld [vmem:[#allocation78_spill] sm:$0xff] }
 0x1ed   :  { %2443 = vst.msk [vmem:[#allocation2 + $0x2] ss:$8 sm:$0x3] %vm6675_vm0, %v2442_v35  ;;  %2795 = vperm.xlu0 %5433, %v9625_v13   ;;  %v2290_v35 = vadd.f32 %v2170_v9, %v9565_v54  ;;  %v9631_v13 = vld [vmem:[#allocation76_spill] sm:$0xff]  ;;  %v2287_v54 = vadd.f32 %v2162_v32, %v9638_v45  ;;  %v9643_v45 = vld [vmem:[#allocation59_spill] sm:$0xff] }
 0x1ee   :  { %v2210_v26 = vpop.permute.xlu1 %2209  ;;  %v2291_v19 = vadd.f32 %v2170_v9, %v9631_v13  ;;  %v2294_v9 = vadd.f32 %v2178_v52, %v9568_v22  ;;  %v9639_v13 = vld [vmem:[#allocation80_spill] sm:$0xff] }
 0x1ef   :  { %v7120_v17 = vpop.permute.xlu0 %2221 }
 0x1f0   :  { %2783 = vperm.xlu1 %5434, %v9626_v43   ;;  %v2284_v43 = vadd.f32 %v7090_v34, %v9633_v27  ;;  %v2386_v20 = vmin.f32 %v2287_v54, %v2291_v19 }
 0x1f1   :  { %2803 = vperm.xlu0 %5433, %v9627_v10   ;;  %v9634_v10 = vld [vmem:[#allocation73_spill] sm:$0xff] }
 0x1f2   :  { %v7124_v23 = vpop.permute.xlu1 %2217  ;;  %v2285_v11 = vadd.f32 %v7090_v34, %v9634_v10  ;;  %v2348_v27 = vmin.f32 %v2284_v43, %v2288_v42  ;;  %v2296_v34 = vadd.f32 %v2182_v30, %v9641_v51  ;;  %v9642_v10 = vld [vmem:[#allocation56_spill] sm:$0xff]  ;;  %v2302_v30 = vadd.f32 %v2194_v33, %v9572_v1 }
 0x1f3   :  { %v7126_v37 = vpop.permute.xlu0 %2229 }
 0x1f4   :  { %2791 = vperm.xlu1 %5434, %v9630_v61   ;;  %v2286_v61 = vadd.f32 %v2162_v32, %v9637_v21  ;;  %v2385_v15 = vmin.f32 %v2285_v11, %v2289_v36  ;;  %v2298_v21 = vadd.f32 %v2186_v24, %v9420_v18  ;;  %v2299_v32 = vadd.f32 %v2186_v24, %v9496_v5 }
 0x1f5   :  { %2811 = vperm.xlu0 %5433, %v9632_v40   ;;  %v2295_v40 = vadd.f32 %v2178_v52, %v9639_v13  ;;  %v2350_v22 = vmin.f32 %v2348_v27, %v2292_v60  ;;  %v9644_v13 = vld [vmem:[#allocation89_spill] sm:$0xff]  ;;  %v2301_v11 = vadd.f32 %v2190_v48, %v9497_v47  ;;  %v2304_v24 = vadd.f32 %v2198_v14, %v9426_v12 }
 0x1f6   :  { %v7140_v44 = vpop.permute.xlu1 %2225  ;;  %v2349_v16 = vmin.f32 %v2286_v61, %v2290_v35  ;;  %v2387_v52 = vmin.f32 %v2385_v15, %v2293_v31  ;;  %v2303_v61 = vadd.f32 %v2194_v33, %v9424_v2  ;;  %v2305_v60 = vadd.f32 %v2198_v14, %v9500_v7  ;;  %v9645_v15 = vld [vmem:[#allocation58_spill] sm:$0xff] }
 0x1f7   :  { %v7146_v55 = vpop.permute.xlu0 %2237  ;;  %v2388_v42 = vmin.f32 %v2386_v20, %v2295_v40  ;;  %v2352_v19 = vmin.f32 %v2350_v22, %v2296_v34  ;;  %v2307_v20 = vadd.f32 %v2202_v3, %v9502_v50  ;;  %v9646_v40 = vld [vmem:[#allocation61_spill] sm:$0xff]  ;;  %v2308_v22 = vadd.f32 %v7109_v58, %v9359_v38 }
 0x1f8   :  { %9640 = vst [vmem:[#allocation91_spill] sm:$0xff] %v7146_v55  ;;  %2799 = vperm.xlu1 %5434, %v9642_v10   ;;  %v2300_v55 = vadd.f32 %v2190_v48, %v9644_v13  ;;  %v2351_v36 = vmin.f32 %v2349_v16, %v2294_v9  ;;  %v2389_v35 = vmin.f32 %v2387_v52, %v2297_v62  ;;  %v9658_v10 = vld [vmem:[#allocation117_spill] sm:$0xff] }
 0x1f9   :  { %2819 = vperm.xlu0 %5433, %v9643_v45   ;;  %v2390_v31 = vmin.f32 %v2388_v42, %v2299_v32  ;;  %v2306_v48 = vadd.f32 %v2202_v3, %v9429_v8  ;;  %v2309_v62 = vadd.f32 %v7109_v58, %v9360_v53  ;;  %v2311_v32 = vadd.f32 %v2210_v26, %v9503_v63  ;;  %v9647_v42 = vld [vmem:[#allocation60_spill] sm:$0xff] }
 0x1fa   :  { %v2234_v43 = vpop.permute.xlu1 %2233  ;;  %v2353_v27 = vmin.f32 %v2351_v36, %v2298_v21  ;;  %v2354_v9 = vmin.f32 %v2352_v19, %v2300_v55  ;;  %v2391_v33 = vmin.f32 %v2389_v35, %v2301_v11  ;;  %v2310_v21 = vadd.f32 %v2210_v26, %v9431_v59  ;;  %v9648_v26 = vld [vmem:[#allocation63_spill] sm:$0xff] }
 0x1fb   :  { %v7158_v54 = vpop.permute.xlu0 %2245  ;;  %v2392_v16 = vmin.f32 %v2390_v31, %v2303_v61  ;;  %v2312_v55 = vadd.f32 %v7114_v29, %v9434_v41  ;;  %v2313_v11 = vadd.f32 %v7114_v29, %v9505_v57  ;;  %v2315_v61 = vadd.f32 %v7124_v23, %v9438_v0 }
 0x1fc   :  { %2807 = vperm.xlu1 %5434, %v9645_v15   ;;  %v2355_v14 = vmin.f32 %v2353_v27, %v2302_v30  ;;  %v2356_v36 = vmin.f32 %v2354_v9, %v2304_v24  ;;  %v2393_v3 = vmin.f32 %v2391_v33, %v2305_v60  ;;  %v2314_v30 = vadd.f32 %v7124_v23, %v9437_v25 }
 0x1fd   :  { %2827 = vperm.xlu0 %5433, %v9646_v40   ;;  %v2394_v58 = vmin.f32 %v2392_v16, %v2307_v20  ;;  %v2316_v60 = vadd.f32 %v7120_v17, %v9369_v6  ;;  %v2317_v29 = vadd.f32 %v7120_v17, %v9439_v28  ;;  %v2318_v20 = vadd.f32 %v7140_v44, %v9507_v56  ;;  %v9649_v16 = vld [vmem:[#allocation62_spill] sm:$0xff] }
 0x1fe   :  { %v2242_v34 = vpop.permute.xlu1 %2241  ;;  %v2357_v19 = vmin.f32 %v2355_v14, %v2306_v48  ;;  %v2358_v35 = vmin.f32 %v2356_v36, %v2308_v22  ;;  %v2395_v24 = vmin.f32 %v2393_v3, %v2309_v62  ;;  %v2319_v9 = vadd.f32 %v7140_v44, %v9441_v4  ;;  %v9651_v3 = vld [vmem:[#allocation108_spill] sm:$0xff] }
 0x1ff   :  { %v2254_v52 = vpop.permute.xlu0 %2253  ;;  %v2396_v48 = vmin.f32 %v2394_v58, %v2311_v32  ;;  %v2320_v22 = vadd.f32 %v7126_v37, %v9375_v39  ;;  %v2321_v62 = vadd.f32 %v7126_v37, %v9376_v46  ;;  %v9650_v32 = vld [vmem:[#allocation107_spill] sm:$0xff]  ;;  %v9652_v58 = vld [vmem:[#allocation65_spill] sm:$0xff] }
 0x200   :  { %2815 = vperm.xlu1 %5434, %v9647_v42   ;;  %v2359_v31 = vmin.f32 %v2357_v19, %v2310_v21  ;;  %v2360_v33 = vmin.f32 %v2358_v35, %v2312_v55  ;;  %v2397_v14 = vmin.f32 %v2395_v24, %v2313_v11  ;;  %v2322_v36 = vadd.f32 %v2234_v43, %v9650_v32  ;;  %v9653_v55 = vld [vmem:[#allocation113_spill] sm:$0xff]  ;;  %v9654_v11 = vld [vmem:[#allocation91_spill] sm:$0xff]  ;;  %v9655_v24 = vld [vmem:[#allocation114_spill] sm:$0xff] }
 0x201   :  { %2835 = vperm.xlu0 %5433, %v9648_v26   ;;  %v2398_v21 = vmin.f32 %v2396_v48, %v2315_v61  ;;  %v2323_v19 = vadd.f32 %v2234_v43, %v9651_v3  ;;  %v2324_v35 = vadd.f32 %v9654_v11, %v9653_v55  ;;  %v2325_v40 = vadd.f32 %v9654_v11, %v9655_v24  ;;  %v9657_v61 = vld [vmem:[#allocation112_spill] sm:$0xff]  ;;  %v9661_v24 = vld [vmem:[#allocation115_spill] sm:$0xff] }
 0x202   :  { %v2250_v27 = vpop.permute.xlu1 %2249  ;;  %v2361_v17 = vmin.f32 %v2359_v31, %v2314_v30  ;;  %v2362_v44 = vmin.f32 %v2360_v33, %v2316_v60  ;;  %v2399_v26 = vmin.f32 %v2397_v14, %v2317_v29  ;;  %v2327_v31 = vadd.f32 %v2242_v34, %v9657_v61  ;;  %v9659_v29 = vld [vmem:[#allocation118_spill] sm:$0xff]  ;;  %v9660_v14 = vld [vmem:[#allocation64_spill] sm:$0xff] }
 0x203   :  { %v2262_v23 = vpop.permute.xlu0 %2261  ;;  %v2400_v42 = vmin.f32 %v2398_v21, %v2319_v9  ;;  %v2328_v60 = vadd.f32 %v7158_v54, %v9658_v10  ;;  %v2329_v33 = vadd.f32 %v7158_v54, %v9659_v29  ;;  %v9662_v9 = vld [vmem:[#allocation116_spill] sm:$0xff]  ;;  %v9663_v21 = vld [vmem:[#allocation67_spill] sm:$0xff] }
 0x204   :  { %2823 = vperm.xlu1 %5434, %v9649_v16   ;;  %v2363_v37 = vmin.f32 %v2361_v17, %v2318_v20  ;;  %v9656_v16 = vld [vmem:[#allocation111_spill] sm:$0xff]  ;;  %v2364_v15 = vmin.f32 %v2362_v44, %v2320_v22  ;;  %v2401_v43 = vmin.f32 %v2399_v26, %v2321_v62  ;;  %v2330_v20 = vadd.f32 %v2250_v27, %v9661_v24  ;;  %v9664_v22 = vld [vmem:[#allocation121_spill] sm:$0xff]  ;;  %v9665_v62 = vld [vmem:[#allocation122_spill] sm:$0xff] }
 0x205   :  { %2843 = vperm.xlu0 %5433, %v9652_v58   ;;  %v2326_v30 = vadd.f32 %v2242_v34, %v9656_v16  ;;  %v2402_v11 = vmin.f32 %v2400_v42, %v2323_v19  ;;  %v2331_v17 = vadd.f32 %v2250_v27, %v9662_v9  ;;  %v2332_v26 = vadd.f32 %v2254_v52, %v9664_v22  ;;  %v9666_v54 = vld [vmem:[#allocation119_spill] sm:$0xff]  ;;  %v9668_v24 = vld [vmem:[#allocation125_spill] sm:$0xff]  ;;  %v9669_v9 = vld [vmem:[#allocation126_spill] sm:$0xff] }
 0x206   :  { %v2258_v45 = vpop.permute.xlu1 %2257  ;;  %v2365_v58 = vmin.f32 %v2363_v37, %v2322_v36  ;;  %v2366_v34 = vmin.f32 %v2364_v15, %v2324_v35  ;;  %v2403_v55 = vmin.f32 %v2401_v43, %v2325_v40  ;;  %v2333_v44 = vadd.f32 %v2254_v52, %v9665_v62  ;;  %v9670_v15 = vld [vmem:[#allocation66_spill] sm:$0xff]  ;;  %v9671_v43 = vld [vmem:[#allocation123_spill] sm:$0xff]  ;;  %v9672_v62 = vld [vmem:[#allocation124_spill] sm:$0xff] }
 0x207   :  { %v2270_v48 = vpop.permute.xlu0 %2269  ;;  %v2404_v16 = vmin.f32 %v2402_v11, %v2327_v31  ;;  %v2334_v29 = vadd.f32 %v2258_v45, %v9666_v54  ;;  %v2336_v27 = vadd.f32 %v2262_v23, %v9668_v24  ;;  %v9713_v54 = vld [vmem:[#allocation28_spill] sm:$0xff] }
 0x208   :  { %2831 = vperm.xlu1 %5434, %v9660_v14   ;;  %v2367_v61 = vmin.f32 %v2365_v58, %v2326_v30  ;;  %v9667_v14 = vld [vmem:[#allocation120_spill] sm:$0xff]  ;;  %v2368_v19 = vmin.f32 %v2366_v34, %v2328_v60  ;;  %v2405_v37 = vmin.f32 %v2403_v55, %v2329_v33  ;;  %v9673_v30 = vld [vmem:[#allocation69_spill] sm:$0xff]  ;;  %v9675_v60 = vld [vmem:[#allocation130_spill] sm:$0xff] }
 0x209   :  { %2851 = vperm.xlu0 %5433, %v9663_v21   ;;  %v2335_v36 = vadd.f32 %v2258_v45, %v9667_v14  ;;  %v2337_v21 = vadd.f32 %v2262_v23, %v9669_v9  ;;  %v2406_v35 = vmin.f32 %v2404_v16, %v2331_v17  ;;  %v9674_v45 = vld [vmem:[#allocation129_spill] sm:$0xff]  ;;  %v2341_v55 = vadd.f32 %v2270_v48, %v9675_v60  ;;  %v9676_v23 = vld [vmem:[#allocation127_spill] sm:$0xff] }
 0x20a   :  { %v2266_v10 = vpop.permute.xlu1 %2265  ;;  %v2369_v40 = vmin.f32 %v2367_v61, %v2330_v20  ;;  %v2370_v31 = vmin.f32 %v2368_v19, %v2332_v26  ;;  %v2407_v11 = vmin.f32 %v2405_v37, %v2333_v44  ;;  %v2340_v22 = vadd.f32 %v2270_v48, %v9674_v45  ;;  %v9679_v44 = vld [vmem:[#allocation133_spill] sm:$0xff]  ;;  %v9680_v37 = vld [vmem:[#allocation134_spill] sm:$0xff] }
 0x20b   :  { %v2278_v42 = vpop.permute.xlu0 %2277  ;;  %v2338_v52 = vadd.f32 %v2266_v10, %v9671_v43  ;;  %v2339_v58 = vadd.f32 %v2266_v10, %v9672_v62  ;;  %v2408_v24 = vmin.f32 %v2406_v35, %v2335_v36  ;;  %v9678_v10 = vld [vmem:[#allocation68_spill] sm:$0xff]  ;;  %v5481_v48 = vmov 4  }
 0x20c   :  { %2839 = vperm.xlu1 %5434, %v9670_v15   ;;  %v2371_v34 = vmin.f32 %v2369_v40, %v2334_v29  ;;  %v9677_v15 = vld [vmem:[#allocation128_spill] sm:$0xff]  ;;  %v2372_v16 = vmin.f32 %v2370_v31, %v2336_v27  ;;  %v2409_v20 = vmin.f32 %v2407_v11, %v2337_v21  ;;  %v2344_v19 = vadd.f32 %v2278_v42, %v9679_v44  ;;  %v9681_v40 = vld [vmem:[#allocation10_spill] sm:$0xff]  ;;  %v9682_v21 = vld [vmem:[#allocation131_spill] sm:$0xff] }
 0x20d   :  { %2859 = vperm.xlu0 %5433, %v9673_v30   ;;  %v2410_v26 = vmin.f32 %v2408_v24, %v2339_v58  ;;  %v2345_v45 = vadd.f32 %v2278_v42, %v9680_v37  ;;  %v9683_v11 = vld [vmem:[#allocation132_spill] sm:$0xff]  ;;  %v9702_v44 = vld [vmem:[#allocation77_spill] sm:$0xff] }
 0x20e   :  { %v2274_v33 = vpop.permute.xlu1 %2273  ;;  %v2373_v30 = vmin.f32 %v2371_v34, %v2338_v52  ;;  %v2374_v29 = vmin.f32 %v2372_v16, %v2340_v22  ;;  %v2411_v36 = vmin.f32 %v2409_v20, %v2341_v55  ;;  %v9684_v52 = vld [vmem:[#allocation70_spill] sm:$0xff]  ;;  %v9685_v37 = vld [vmem:[#allocation12_spill] sm:$0xff] }
 0x20f   :  { %v2342_v9 = vadd.f32 %v2274_v33, %v9676_v23  ;;  %v2343_v61 = vadd.f32 %v2274_v33, %v9677_v15  ;;  %v9706_v15 = vld [vmem:[#allocation79_spill] sm:$0xff]  ;;  %v9707_v62 = vld [vmem:[#allocation80_spill] sm:$0xff] }
 0x210   :  { %v7226_v17 = vpop.permute.xlu0 %2469  ;;  %2847 = vperm.xlu1 %5434, %v9678_v10   ;;  %v2376_v24 = vmin.f32 %v2374_v29, %v2344_v19  ;;  %v2413_v58 = vmin.f32 %v2411_v36, %v2345_v45  ;;  %v9689_v36 = vld [vmem:[#allocation16_spill] sm:$0xff] }
 0x211   :  { %5436 = vset.pattern.permute.xlu0 %v5481_v48  ;;  %v2375_v33 = vmin.f32 %v2373_v30, %v2342_v9  ;;  %v2412_v27 = vmin.f32 %v2410_v26, %v2343_v61  ;;  %v9686_v61 = vld [vmem:[#allocation8_spill] sm:$0xff]  ;;  %v9687_v26 = vld [vmem:[#allocation14_spill] sm:$0xff] }
 0x212   :  { %3051 = vperm.xlu0 %5436, %v9681_v40   ;;  %v2282_v35 = vpop.permute.xlu1 %2281 }
 0x213   :  { %v2346_v31 = vadd.f32 %v2282_v35, %v9682_v21  ;;  %v2347_v60 = vadd.f32 %v2282_v35, %v9683_v11  ;;  %v9704_v11 = vld [vmem:[#allocation17_spill] sm:$0xff]  ;;  %v9705_v21 = vld [vmem:[#allocation26_spill] sm:$0xff] }
 0x214   :  { %v2482_v10 = vpop.permute.xlu0 %2481  ;;  %2855 = vperm.xlu1 %5434, %v9684_v52  }
 0x215   :  { %v2377_v34 = vmin.f32 %v2375_v33, %v2346_v31  ;;  %v2414_v42 = vmin.f32 %v2412_v27, %v2347_v60  ;;  %v9688_v60 = vld [vmem:[#allocation7_spill] sm:$0xff] }
 0x216   :  { %3063 = vperm.xlu0 %5436, %v9685_v37   ;;  %v9692_v37 = vld [vmem:[#allocation11_spill] sm:$0xff] }
 0x217   :  { %v2378_v22 = vmin.f32 %v2376_v24, %v2377_v34  ;;  %v2415_v55 = vmin.f32 %v2413_v58, %v2414_v42  ;;  %v2474_v16 = vpop.permute.xlu1 %2473  ;;  %v9690_v34 = vld [vmem:[#allocation9_spill] sm:$0xff]  ;;  %v9691_v42 = vld [vmem:[#allocation18_spill] sm:$0xff] }
 0x218   :  { %v2490_v20 = vpop.permute.xlu0 %2489  ;;  %5435 = vset.pattern.permute.xlu1 %v5481_v48 }
 0x219   :  { %v2379_v9 = vrot.slane %v2378_v22, 4  ;;  %v2416_v30 = vrot.slane %v2415_v55, 4  ;;  %3047 = vperm.xlu1 %5435, %v9686_v61   ;;  %v2606_v23 = vadd.f32 %v2490_v20, %v9706_v15  ;;  %v2607_v43 = vadd.f32 %v2490_v20, %v9707_v62 }
 0x21a   :  { %3071 = vperm.xlu0 %5436, %v9687_v26  }
 0x21b   :  { %v2380_v35 = vmin.f32 %v2378_v22, %v2379_v9  ;;  %v2417_v40 = vmin.f32 %v2415_v55, %v2416_v30  ;;  %v2478_v52 = vpop.permute.xlu1 %2477 }
 0x21c   :  { %v2498_v19 = vpop.permute.xlu0 %2497 }
 0x21d   :  { %v2381_v45 = vrot.slane %v2380_v35, 2  ;;  %v2418_v29 = vrot.slane %v2417_v40, 2  ;;  %3055 = vperm.xlu1 %5435, %v9688_v60   ;;  %v9693_v60 = vld [vmem:[#allocation20_spill] sm:$0xff]  ;;  %v2611_v46 = vadd.f32 %v2498_v19, %v9496_v5 }
 0x21e   :  { %3079 = vperm.xlu0 %5436, %v9689_v36   ;;  %v9694_v36 = vld [vmem:[#allocation135_spill] sm:$0xff] }
 0x21f   :  { %v2382_v33 = vmin.f32 %v2380_v35, %v2381_v45  ;;  %v2419_v27 = vmin.f32 %v2417_v40, %v2418_v29  ;;  %v2486_v31 = vpop.permute.xlu1 %2485  ;;  %v2446_v45 = vld [vmem:[#allocation3 + $0x2] ss:$8 sm:$0x3] }
 0x220   :  { %v2506_v48 = vpop.permute.xlu0 %2505 }
 0x221   :  { %v2383_v24 = vrot.slane %v2382_v33, 1  ;;  %v2420_v58 = vrot.slane %v2419_v27, 1  ;;  %3059 = vperm.xlu1 %5435, %v9690_v34   ;;  %v9695_v34 = vld [vmem:[#allocation13_spill] sm:$0xff] }
 0x222   :  { %3087 = vperm.xlu0 %5436, %v9691_v42   ;;  %v9696_v42 = vld [vmem:[#allocation22_spill] sm:$0xff] }
 0x223   :  { %v2384_v22 = vmin.f32 %v2382_v33, %v2383_v24  ;;  %v2421_v55 = vmin.f32 %v2419_v27, %v2420_v58  ;;  %v2494_v9 = vpop.permute.xlu1 %2493 }
 0x224   :  { %v2514_v30 = vpop.permute.xlu0 %2513 }
 0x225   :  { %v2449_v26 = vcombine.low %v2384_v22, %v2421_v55  ;;  %3067 = vperm.xlu1 %5435, %v9692_v37   ;;  %v9698_v22 = vld [vmem:[#allocation15_spill] sm:$0xff] }
 0x226   :  { %3095 = vperm.xlu0 %5436, %v9693_v60   ;;  %v9700_v37 = vld [vmem:[#allocation75_spill] sm:$0xff] }
 0x227   :  { %v2456_v35 = vrot.slane %v2449_v26, %v9694_v36  ;;  %v2502_v40 = vpop.permute.xlu1 %2501  ;;  %v9699_v26 = vld [vmem:[#allocation24_spill] sm:$0xff] }
 0x228   :  { %v7245_v29 = vpop.permute.xlu0 %2521 }
 0x229   :  { %v2463_v61 = vrot.slane %v2456_v35, %v9694_v36  ;;  %3075 = vperm.xlu1 %5435, %v9695_v34   ;;  %v2602_v35 = vadd.f32 %v2482_v10, %v9700_v37  ;;  %v9701_v36 = vld [vmem:[#allocation76_spill] sm:$0xff]  ;;  %v9708_v37 = vld [vmem:[#allocation19_spill] sm:$0xff] }
 0x22a   :  { %3103 = vperm.xlu0 %5436, %v9696_v42   ;;  %v2603_v34 = vadd.f32 %v2482_v10, %v9701_v36  ;;  %v2598_v42 = vadd.f32 %v2474_v16, %v9702_v44  ;;  %v9709_v10 = vld [vmem:[#allocation71_spill] sm:$0xff]  ;;  %v9710_v36 = vld [vmem:[#allocation73_spill] sm:$0xff] }
 0x22b   :  { %v2465_v33 = vmin.f32 %v2446_v45, %v2463_v61  ;;  %v2510_v27 = vpop.permute.xlu1 %2509  ;;  %v9703_v61 = vld [vmem:[#allocation78_spill] sm:$0xff]  ;;  %v2596_v44 = vadd.f32 %v7226_v17, %v9709_v10  ;;  %v2610_v10 = vadd.f32 %v2498_v19, %v9420_v18  ;;  %v2613_v19 = vadd.f32 %v2502_v40, %v9497_v47 }
 0x22c   :  { %v7250_v24 = vpop.permute.xlu0 %2529  ;;  %v2599_v45 = vadd.f32 %v2474_v16, %v9703_v61  ;;  %v2597_v16 = vadd.f32 %v7226_v17, %v9710_v36  ;;  %v9716_v17 = vld [vmem:[#allocation21_spill] sm:$0xff] }
 0x22d   :  { %2466 = vst.msk [vmem:[#allocation3 + $0x2] ss:$8 sm:$0x3] %vm6675_vm0, %v2465_v33  ;;  %3083 = vperm.xlu1 %5435, %v9698_v22   ;;  %v2661_v22 = vmin.f32 %v2598_v42, %v2602_v35 }
 0x22e   :  { %3111 = vperm.xlu0 %5436, %v9699_v26   ;;  %v2698_v26 = vmin.f32 %v2599_v45, %v2603_v34  ;;  %v9714_v34 = vld [vmem:[#allocation81_spill] sm:$0xff]  ;;  %v9715_v45 = vld [vmem:[#allocation82_spill] sm:$0xff] }
 0x22f   :  { %v2518_v55 = vpop.permute.xlu1 %2517  ;;  %v2604_v35 = vadd.f32 %v2486_v31, %v9714_v34  ;;  %v2605_v15 = vadd.f32 %v2486_v31, %v9715_v45  ;;  %v2614_v31 = vadd.f32 %v2506_v48, %v9572_v1  ;;  %v2615_v45 = vadd.f32 %v2506_v48, %v9424_v2 }
 0x230   :  { %v7256_v60 = vpop.permute.xlu0 %2537  ;;  %v2700_v62 = vmin.f32 %v2698_v26, %v2607_v43  ;;  %v2612_v26 = vadd.f32 %v2502_v40, %v9644_v13  ;;  %v2616_v48 = vadd.f32 %v2510_v27, %v9426_v12 }
 0x231   :  { %3091 = vperm.xlu1 %5435, %v9704_v11   ;;  %v9711_v11 = vld [vmem:[#allocation72_spill] sm:$0xff] }
 0x232   :  { %3119 = vperm.xlu0 %5436, %v9705_v21   ;;  %v2600_v61 = vadd.f32 %v2478_v52, %v9711_v11  ;;  %v9712_v21 = vld [vmem:[#allocation74_spill] sm:$0xff] }
 0x233   :  { %v2526_v33 = vpop.permute.xlu1 %2525  ;;  %v2601_v14 = vadd.f32 %v2478_v52, %v9712_v21  ;;  %v2608_v52 = vadd.f32 %v2494_v9, %v9641_v51  ;;  %v9717_v21 = vld [vmem:[#allocation30_spill] sm:$0xff] }
 0x234   :  { %v7264_v58 = vpop.permute.xlu0 %2545  ;;  %v2660_v36 = vmin.f32 %v2596_v44, %v2600_v61  ;;  %v2702_v44 = vmin.f32 %v2700_v62, %v2611_v46  ;;  %v2618_v61 = vadd.f32 %v2514_v30, %v9429_v8  ;;  %v2623_v46 = vadd.f32 %v7245_v29, %v9503_v63 }
 0x235   :  { %3099 = vperm.xlu1 %5435, %v9708_v37   ;;  %v2663_v37 = vmin.f32 %v2661_v22, %v2606_v23  ;;  %v2697_v11 = vmin.f32 %v2597_v16, %v2601_v14  ;;  %v9718_v16 = vld [vmem:[#allocation23_spill] sm:$0xff] }
 0x236   :  { %3127 = vperm.xlu0 %5436, %v9713_v54   ;;  %v2609_v54 = vadd.f32 %v2494_v9, %v9494_v49  ;;  %v2662_v43 = vmin.f32 %v2660_v36, %v2604_v35  ;;  %v2619_v9 = vadd.f32 %v2514_v30, %v9502_v50  ;;  %v2704_v40 = vmin.f32 %v2702_v44, %v2615_v45 }
 0x237   :  { %v2534_v42 = vpop.permute.xlu1 %2533  ;;  %v2699_v22 = vmin.f32 %v2697_v11, %v2605_v15  ;;  %v2665_v14 = vmin.f32 %v2663_v37, %v2610_v10  ;;  %v2617_v15 = vadd.f32 %v2510_v27, %v9500_v7  ;;  %v9719_v11 = vld [vmem:[#allocation32_spill] sm:$0xff]  ;;  %v2622_v37 = vadd.f32 %v7245_v29, %v9431_v59 }
 0x238   :  { %v7278_v20 = vpop.permute.xlu0 %2553  ;;  %v2620_v35 = vadd.f32 %v2518_v55, %v9359_v38  ;;  %v2706_v27 = vmin.f32 %v2704_v40, %v2619_v9  ;;  %v2627_v45 = vadd.f32 %v7250_v24, %v9438_v0  ;;  %v2630_v44 = vadd.f32 %v7256_v60, %v9507_v56 }
 0x239   :  { %3107 = vperm.xlu1 %5435, %v9716_v17   ;;  %v2701_v1 = vmin.f32 %v2699_v22, %v2609_v54  ;;  %v2667_v36 = vmin.f32 %v2665_v14, %v2614_v31  ;;  %v2621_v54 = vadd.f32 %v2518_v55, %v9360_v53  ;;  %v2626_v31 = vadd.f32 %v7250_v24, %v9437_v25  ;;  %v9720_v22 = vld [vmem:[#allocation25_spill] sm:$0xff] }
 0x23a   :  { %3135 = vperm.xlu0 %5436, %v9717_v21   ;;  %v2664_v21 = vmin.f32 %v2662_v43, %v2608_v52 }
 0x23b   :  { %v2542_v23 = vpop.permute.xlu1 %2541  ;;  %v2703_v10 = vmin.f32 %v2701_v1, %v2613_v19  ;;  %v2669_v43 = vmin.f32 %v2667_v36, %v2618_v61  ;;  %v2625_v1 = vadd.f32 %v2526_v33, %v9505_v57  ;;  %v2708_v19 = vmin.f32 %v2706_v27, %v2623_v46 }
 0x23c   :  { %v7290_v17 = vpop.permute.xlu0 %2561  ;;  %v2666_v30 = vmin.f32 %v2664_v21, %v2612_v26  ;;  %v2624_v21 = vadd.f32 %v2526_v33, %v9434_v41  ;;  %v9721_v26 = vld [vmem:[#allocation34_spill] sm:$0xff]  ;;  %v2631_v61 = vadd.f32 %v7256_v60, %v9441_v4  ;;  %v2635_v46 = vadd.f32 %v7264_v58, %v9651_v3 }
 0x23d   :  { %3115 = vperm.xlu1 %5435, %v9718_v16   ;;  %v2705_v29 = vmin.f32 %v2703_v10, %v2617_v15  ;;  %v2671_v55 = vmin.f32 %v2669_v43, %v2622_v37  ;;  %v2629_v15 = vadd.f32 %v2534_v42, %v9439_v28  ;;  %v2710_v33 = vmin.f32 %v2708_v19, %v2627_v45  ;;  %v9722_v10 = vld [vmem:[#allocation27_spill] sm:$0xff] }
 0x23e   :  { %3143 = vperm.xlu0 %5436, %v9719_v11   ;;  %v2668_v14 = vmin.f32 %v2666_v30, %v2616_v48  ;;  %v2628_v48 = vadd.f32 %v2534_v42, %v9369_v6  ;;  %v2634_v37 = vadd.f32 %v7264_v58, %v9650_v32  ;;  %v9729_v16 = vld [vmem:[#allocation115_spill] sm:$0xff] }
 0x23f   :  { %v2550_v62 = vpop.permute.xlu1 %2549  ;;  %v2707_v36 = vmin.f32 %v2705_v29, %v2621_v54  ;;  %v2673_v30 = vmin.f32 %v2671_v55, %v2626_v31  ;;  %v9723_v54 = vld [vmem:[#allocation110_spill] sm:$0xff]  ;;  %v2712_v29 = vmin.f32 %v2710_v33, %v2631_v61  ;;  %v9725_v31 = vld [vmem:[#allocation111_spill] sm:$0xff]  ;;  %v9726_v55 = vld [vmem:[#allocation112_spill] sm:$0xff] }
 0x240   :  { %v2570_v52 = vpop.permute.xlu0 %2569  ;;  %v2670_v24 = vmin.f32 %v2668_v14, %v2620_v35  ;;  %v2632_v35 = vadd.f32 %v2542_v23, %v9375_v39  ;;  %v2633_v27 = vadd.f32 %v2542_v23, %v9723_v54  ;;  %v9724_v14 = vld [vmem:[#allocation36_spill] sm:$0xff]  ;;  %v2638_v45 = vadd.f32 %v7278_v20, %v9725_v31  ;;  %v9731_v33 = vld [vmem:[#allocation29_spill] sm:$0xff] }
 0x241   :  { %3123 = vperm.xlu1 %5435, %v9720_v22   ;;  %v2709_v60 = vmin.f32 %v2707_v36, %v2625_v1  ;;  %v2675_v42 = vmin.f32 %v2673_v30, %v2630_v44  ;;  %v2639_v19 = vadd.f32 %v7278_v20, %v9726_v55  ;;  %v9728_v1 = vld [vmem:[#allocation114_spill] sm:$0xff]  ;;  %v2714_v23 = vmin.f32 %v2712_v29, %v2635_v46  ;;  %v9730_v61 = vld [vmem:[#allocation116_spill] sm:$0xff]  ;;  %v9732_v55 = vld [vmem:[#allocation117_spill] sm:$0xff] }
 0x242   :  { %3151 = vperm.xlu0 %5436, %v9721_v26   ;;  %v2672_v43 = vmin.f32 %v2670_v24, %v2624_v21  ;;  %v2637_v24 = vadd.f32 %v2550_v62, %v9728_v1  ;;  %v2642_v44 = vadd.f32 %v7290_v17, %v9729_v16  ;;  %v2643_v30 = vadd.f32 %v7290_v17, %v9730_v61  ;;  %v9737_v17 = vld [vmem:[#allocation121_spill] sm:$0xff] }
 0x243   :  { %v2558_v9 = vpop.permute.xlu1 %2557  ;;  %v2711_v11 = vmin.f32 %v2709_v60, %v2629_v15  ;;  %v2677_v22 = vmin.f32 %v2675_v42, %v2634_v37  ;;  %v9733_v15 = vld [vmem:[#allocation118_spill] sm:$0xff]  ;;  %v9734_v60 = vld [vmem:[#allocation43_spill] sm:$0xff]  ;;  %v2716_v1 = vmin.f32 %v2714_v23, %v2639_v19  ;;  %v9736_v42 = vld [vmem:[#allocation120_spill] sm:$0xff] }
 0x244   :  { %v2578_v40 = vpop.permute.xlu0 %2577  ;;  %v2674_v58 = vmin.f32 %v2672_v43, %v2628_v48  ;;  %v2640_v48 = vadd.f32 %v2558_v9, %v9732_v55  ;;  %v2641_v43 = vadd.f32 %v2558_v9, %v9733_v15  ;;  %v9735_v37 = vld [vmem:[#allocation119_spill] sm:$0xff]  ;;  %v2647_v29 = vadd.f32 %v2570_v52, %v9736_v42  ;;  %v9740_v15 = vld [vmem:[#allocation124_spill] sm:$0xff]  ;;  %v9742_v23 = vld [vmem:[#allocation125_spill] sm:$0xff] }
 0x245   :  { %3131 = vperm.xlu1 %5435, %v9722_v10   ;;  %v9727_v10 = vld [vmem:[#allocation113_spill] sm:$0xff]  ;;  %v2713_v20 = vmin.f32 %v2711_v11, %v2633_v27  ;;  %v2646_v46 = vadd.f32 %v2570_v52, %v9735_v37  ;;  %v9739_v55 = vld [vmem:[#allocation123_spill] sm:$0xff]  ;;  %v9743_v42 = vld [vmem:[#allocation126_spill] sm:$0xff] }
 0x246   :  { %3159 = vperm.xlu0 %5436, %v9724_v14   ;;  %v2636_v21 = vadd.f32 %v2550_v62, %v9727_v10  ;;  %v2676_v14 = vmin.f32 %v2674_v58, %v2632_v35  ;;  %v2679_v62 = vmin.f32 %v2677_v22, %v2638_v45  ;;  %v2718_v58 = vmin.f32 %v2716_v1, %v2643_v30  ;;  %v9741_v22 = vld [vmem:[#allocation31_spill] sm:$0xff] }
 0x247   :  { %v2566_v26 = vpop.permute.xlu1 %2565  ;;  %v2715_v31 = vmin.f32 %v2713_v20, %v2637_v24  ;;  %v2650_v9 = vadd.f32 %v2578_v40, %v9739_v55 }
 0x248   :  { %v2586_v36 = vpop.permute.xlu0 %2585  ;;  %v2678_v10 = vmin.f32 %v2676_v14, %v2636_v21  ;;  %v2644_v61 = vadd.f32 %v2566_v26, %v9737_v17  ;;  %v2681_v27 = vmin.f32 %v2679_v62, %v2642_v44  ;;  %v9744_v21 = vld [vmem:[#allocation38_spill] sm:$0xff]  ;;  %v2720_v20 = vmin.f32 %v2718_v58, %v2647_v29  ;;  %v9746_v44 = vld [vmem:[#allocation128_spill] sm:$0xff]  ;;  %v9750_v29 = vld [vmem:[#allocation131_spill] sm:$0xff] }
 0x249   :  { %3139 = vperm.xlu1 %5435, %v9731_v33   ;;  %v9738_v33 = vld [vmem:[#allocation122_spill] sm:$0xff]  ;;  %v2717_v19 = vmin.f32 %v2715_v31, %v2641_v43  ;;  %v2655_v1 = vadd.f32 %v2586_v36, %v9746_v44  ;;  %v9751_v58 = vld [vmem:[#allocation132_spill] sm:$0xff] }
 0x24a   :  { %3167 = vperm.xlu0 %5436, %v9734_v60   ;;  %v2645_v35 = vadd.f32 %v2566_v26, %v9738_v33  ;;  %v2651_v60 = vadd.f32 %v2578_v40, %v9740_v15  ;;  %v2680_v45 = vmin.f32 %v2678_v10, %v2640_v48  ;;  %v2683_v24 = vmin.f32 %v2681_v27, %v2646_v46  ;;  %v9745_v26 = vld [vmem:[#allocation127_spill] sm:$0xff]  ;;  %v9747_v40 = vld [vmem:[#allocation129_spill] sm:$0xff]  ;;  %v9754_v44 = vld [vmem:[#allocation134_spill] sm:$0xff] }
 0x24b   :  { %v2574_v16 = vpop.permute.xlu1 %2573  ;;  %v2654_v33 = vadd.f32 %v2586_v36, %v9745_v26  ;;  %v9752_v36 = vld [vmem:[#allocation41_spill] sm:$0xff]  ;;  %v9782_v17 = vld [vmem:[#allocation80_spill] sm:$0xff] }
 0x24c   :  { %v2594_v11 = vpop.permute.xlu0 %2593  ;;  %v2648_v52 = vadd.f32 %v2574_v16, %v9742_v23  ;;  %v2649_v14 = vadd.f32 %v2574_v16, %v9743_v42  ;;  %v2682_v62 = vmin.f32 %v2680_v45, %v2644_v61  ;;  %v2719_v55 = vmin.f32 %v2717_v19, %v2645_v35  ;;  %v9749_v16 = vld [vmem:[#allocation33_spill] sm:$0xff]  ;;  %v9781_v42 = vld [vmem:[#allocation79_spill] sm:$0xff] }
 0x24d   :  { %3147 = vperm.xlu1 %5435, %v9741_v22   ;;  %v9748_v22 = vld [vmem:[#allocation130_spill] sm:$0xff]  ;;  %v2685_v48 = vmin.f32 %v2683_v24, %v2650_v9  ;;  %v2722_v43 = vmin.f32 %v2720_v20, %v2651_v60  ;;  %v2658_v27 = vadd.f32 %v2594_v11, %v9750_v29  ;;  %v2659_v26 = vadd.f32 %v2594_v11, %v9751_v58  ;;  %v9755_v24 = vld [vmem:[#allocation35_spill] sm:$0xff]  ;;  %v9779_v58 = vld [vmem:[#allocation77_spill] sm:$0xff] }
 0x24e   :  { %3313 = vperm.xlu0 %5436, %v9744_v21   ;;  %v2684_v21 = vmin.f32 %v2682_v62, %v2648_v52  ;;  %v2721_v46 = vmin.f32 %v2719_v55, %v2649_v14  ;;  %v9756_v62 = vld [vmem:[#allocation44_spill] sm:$0xff] }
 0x24f   :  { %v2582_v30 = vpop.permute.xlu1 %2581  ;;  %v2687_v61 = vmin.f32 %v2685_v48, %v2654_v33  ;;  %v2724_v35 = vmin.f32 %v2722_v43, %v2655_v1  ;;  %v9757_v48 = vld [vmem:[#allocation40_spill] sm:$0xff] }
 0x250   :  { %v2652_v15 = vadd.f32 %v2582_v30, %v9747_v40  ;;  %v2653_v10 = vadd.f32 %v2582_v30, %v9748_v22  ;;  %v7354_v31 = vpop.permute.xlu0 %2739  ;;  %v9753_v30 = vld [vmem:[#allocation133_spill] sm:$0xff] }
 0x251   :  { %3155 = vperm.xlu1 %5435, %v9749_v16   ;;  %v2689_v52 = vmin.f32 %v2687_v61, %v2658_v27  ;;  %v2726_v55 = vmin.f32 %v2724_v35, %v2659_v26  ;;  %v9759_v27 = vld [vmem:[#allocation37_spill] sm:$0xff]  ;;  %v9774_v16 = vld [vmem:[#allocation76_spill] sm:$0xff] }
 0x252   :  { %3321 = vperm.xlu0 %5436, %v9752_v36   ;;  %v2686_v19 = vmin.f32 %v2684_v21, %v2652_v15  ;;  %v2723_v40 = vmin.f32 %v2721_v46, %v2653_v10  ;;  %v9758_v10 = vld [vmem:[#allocation46_spill] sm:$0xff] }
 0x253   :  { %v2590_v45 = vpop.permute.xlu1 %2589 }
 0x254   :  { %v2656_v22 = vadd.f32 %v2590_v45, %v9753_v30  ;;  %v2657_v9 = vadd.f32 %v2590_v45, %v9754_v44  ;;  %v2748_v60 = vpop.permute.xlu0 %2747  ;;  %v9778_v30 = vld [vmem:[#allocation60_spill] sm:$0xff] }
 0x255   :  { %3163 = vperm.xlu1 %5435, %v9755_v24  }
 0x256   :  { %v2688_v14 = vmin.f32 %v2686_v19, %v2656_v22  ;;  %v2725_v20 = vmin.f32 %v2723_v40, %v2657_v9  ;;  %3329 = vperm.xlu0 %5436, %v9756_v62   ;;  %v9760_v40 = vld [vmem:[#allocation48_spill] sm:$0xff] }
 0x257   :  { %v2736_v11 = vpop.permute.xlu1 %2735 }
 0x258   :  { %v2690_v36 = vmin.f32 %v2688_v14, %v2689_v52  ;;  %v2727_v33 = vmin.f32 %v2725_v20, %v2726_v55  ;;  %v2756_v1 = vpop.permute.xlu0 %2755  ;;  %v9761_v52 = vld [vmem:[#allocation39_spill] sm:$0xff]  ;;  %v9762_v20 = vld [vmem:[#allocation50_spill] sm:$0xff] }
 0x259   :  { %3171 = vperm.xlu1 %5435, %v9757_v48   ;;  %v9765_v48 = vld [vmem:[#allocation135_spill] sm:$0xff]  ;;  %v2872_v23 = vadd.f32 %v2756_v1, %v9781_v42 }
 0x25a   :  { %v2691_v15 = vrot.slane %v2690_v36, 4  ;;  %v2728_v21 = vrot.slane %v2727_v33, 4  ;;  %3337 = vperm.xlu0 %5436, %v9758_v10  }
 0x25b   :  { %v2744_v43 = vpop.permute.xlu1 %2743 }
 0x25c   :  { %v2692_v46 = vmin.f32 %v2690_v36, %v2691_v15  ;;  %v2729_v45 = vmin.f32 %v2727_v33, %v2728_v21  ;;  %v2764_v24 = vpop.permute.xlu0 %2763  ;;  %v9763_v21 = vld [vmem:[#allocation42_spill] sm:$0xff] }
 0x25d   :  { %3317 = vperm.xlu1 %5435, %v9759_v27   ;;  %v9764_v27 = vld [vmem:[#allocation52_spill] sm:$0xff]  ;;  %v2877_v42 = vadd.f32 %v2764_v24, %v9496_v5 }
 0x25e   :  { %v2693_v22 = vrot.slane %v2692_v46, 2  ;;  %v2730_v26 = vrot.slane %v2729_v45, 2  ;;  %3345 = vperm.xlu0 %5436, %v9760_v40  }
 0x25f   :  { %v2752_v61 = vpop.permute.xlu1 %2751 }
 0x260   :  { %v2694_v35 = vmin.f32 %v2692_v46, %v2693_v22  ;;  %v2731_v19 = vmin.f32 %v2729_v45, %v2730_v26  ;;  %v2772_v9 = vpop.permute.xlu0 %2771  ;;  %v3001_v22 = vld [vmem:[#allocation2 + $0x3] ss:$8 sm:$0x3] }
 0x261   :  { %3325 = vperm.xlu1 %5435, %v9761_v52   ;;  %v9766_v26 = vld [vmem:[#allocation45_spill] sm:$0xff] }
 0x262   :  { %v2695_v55 = vrot.slane %v2694_v35, 1  ;;  %v2732_v14 = vrot.slane %v2731_v19, 1  ;;  %3353 = vperm.xlu0 %5436, %v9762_v20   ;;  %v9767_v20 = vld [vmem:[#allocation54_spill] sm:$0xff] }
 0x263   :  { %v2760_v10 = vpop.permute.xlu1 %2759 }
 0x264   :  { %v2696_v36 = vmin.f32 %v2694_v35, %v2695_v55  ;;  %v2733_v33 = vmin.f32 %v2731_v19, %v2732_v14  ;;  %v2780_v15 = vpop.permute.xlu0 %2779  ;;  %v9768_v14 = vld [vmem:[#allocation47_spill] sm:$0xff] }
 0x265   :  { %3333 = vperm.xlu1 %5435, %v9763_v21   ;;  %v9771_v21 = vld [vmem:[#allocation49_spill] sm:$0xff] }
 0x266   :  { %v3004_v62 = vcombine.low %v2696_v36, %v2733_v33  ;;  %3361 = vperm.xlu0 %5436, %v9764_v27   ;;  %v9770_v33 = vld [vmem:[#allocation56_spill] sm:$0xff] }
 0x267   :  { %v2768_v40 = vpop.permute.xlu1 %2767 }
 0x268   :  { %v3011_v46 = vrot.slane %v3004_v62, %v9765_v48  ;;  %v7373_v45 = vpop.permute.xlu0 %2787 }
 0x269   :  { %3341 = vperm.xlu1 %5435, %v9766_v26   ;;  %v9772_v26 = vld [vmem:[#allocation58_spill] sm:$0xff] }
 0x26a   :  { %v3018_v52 = vrot.slane %v3011_v46, %v9765_v48  ;;  %3369 = vperm.xlu0 %5436, %v9767_v20   ;;  %v9775_v48 = vld [vmem:[#allocation51_spill] sm:$0xff] }
 0x26b   :  { %v2776_v35 = vpop.permute.xlu1 %2775 }
 0x26c   :  { %v3020_v19 = vmin.f32 %v3001_v22, %v3018_v52  ;;  %v7378_v55 = vpop.permute.xlu0 %2795  ;;  %v9773_v52 = vld [vmem:[#allocation75_spill] sm:$0xff] }
 0x26d   :  { %3349 = vperm.xlu1 %5435, %v9768_v14   ;;  %v2868_v22 = vadd.f32 %v2748_v60, %v9773_v52  ;;  %v2869_v14 = vadd.f32 %v2748_v60, %v9774_v16  ;;  %v2873_v52 = vadd.f32 %v2756_v1, %v9782_v17  ;;  %v9783_v60 = vld [vmem:[#allocation71_spill] sm:$0xff]  ;;  %v9784_v16 = vld [vmem:[#allocation73_spill] sm:$0xff] }
 0x26e   :  { %3021 = vst.msk [vmem:[#allocation2 + $0x3] ss:$8 sm:$0x3] %vm6675_vm0, %v3020_v19  ;;  %3377 = vperm.xlu0 %5436, %v9770_v33   ;;  %v9776_v19 = vld [vmem:[#allocation72_spill] sm:$0xff]  ;;  %v9777_v33 = vld [vmem:[#allocation74_spill] sm:$0xff] }
 0x26f   :  { %v2784_v62 = vpop.permute.xlu1 %2783  ;;  %v2866_v36 = vadd.f32 %v2744_v43, %v9776_v19  ;;  %v2867_v44 = vadd.f32 %v2744_v43, %v9777_v33  ;;  %v2863_v19 = vadd.f32 %v2736_v11, %v9784_v16  ;;  %v2870_v43 = vadd.f32 %v2752_v61, %v9714_v34  ;;  %v9785_v33 = vld [vmem:[#allocation82_spill] sm:$0xff] }
 0x270   :  { %v7384_v27 = vpop.permute.xlu0 %2803  ;;  %v9788_v16 = vld [vmem:[#allocation62_spill] sm:$0xff] }
 0x271   :  { %3357 = vperm.xlu1 %5435, %v9771_v21   ;;  %v2864_v21 = vadd.f32 %v7354_v31, %v9779_v58  ;;  %v2963_v17 = vmin.f32 %v2863_v19, %v2867_v44 }
 0x272   :  { %3385 = vperm.xlu0 %5436, %v9772_v26   ;;  %v9780_v26 = vld [vmem:[#allocation78_spill] sm:$0xff] }
 0x273   :  { %v7388_v46 = vpop.permute.xlu1 %2791  ;;  %v2865_v29 = vadd.f32 %v7354_v31, %v9780_v26  ;;  %v2927_v58 = vmin.f32 %v2864_v21, %v2868_v22  ;;  %v2876_v31 = vadd.f32 %v2764_v24, %v9420_v18  ;;  %v9787_v26 = vld [vmem:[#allocation53_spill] sm:$0xff]  ;;  %v2878_v24 = vadd.f32 %v2768_v40, %v9644_v13 }
 0x274   :  { %v7390_v20 = vpop.permute.xlu0 %2811 }
 0x275   :  { %3365 = vperm.xlu1 %5435, %v9775_v48   ;;  %v2862_v48 = vadd.f32 %v2736_v11, %v9783_v60  ;;  %v2964_v39 = vmin.f32 %v2865_v29, %v2869_v14  ;;  %v2874_v60 = vadd.f32 %v2760_v10, %v9641_v51  ;;  %v2875_v11 = vadd.f32 %v2760_v10, %v9494_v49 }
 0x276   :  { %3393 = vperm.xlu0 %5436, %v9778_v30   ;;  %v2871_v30 = vadd.f32 %v2752_v61, %v9785_v33  ;;  %v2929_v34 = vmin.f32 %v2927_v58, %v2872_v23  ;;  %v9789_v33 = vld [vmem:[#allocation87_spill] sm:$0xff]  ;;  %v2881_v29 = vadd.f32 %v2772_v9, %v9424_v2  ;;  %v2884_v10 = vadd.f32 %v2780_v15, %v9429_v8 }
 0x277   :  { %v7404_v37 = vpop.permute.xlu1 %2799  ;;  %v2926_v1 = vmin.f32 %v2862_v48, %v2866_v36  ;;  %v2966_v61 = vmin.f32 %v2964_v39, %v2873_v52  ;;  %v2879_v48 = vadd.f32 %v2768_v40, %v9497_v47  ;;  %v2885_v23 = vadd.f32 %v2780_v15, %v9502_v50  ;;  %v9790_v39 = vld [vmem:[#allocation55_spill] sm:$0xff] }
 0x278   :  { %v7410_v54 = vpop.permute.xlu0 %2819  ;;  %v2965_v22 = vmin.f32 %v2963_v17, %v2871_v30  ;;  %v2931_v36 = vmin.f32 %v2929_v34, %v2876_v31  ;;  %v2883_v17 = vadd.f32 %v2776_v35, %v9500_v7  ;;  %v9791_v30 = vld [vmem:[#allocation64_spill] sm:$0xff]  ;;  %v2888_v34 = vadd.f32 %v7373_v45, %v9431_v59 }
 0x279   :  { %9786 = vst [vmem:[#allocation101_spill] sm:$0xff] %v7410_v54  ;;  %3373 = vperm.xlu1 %5435, %v9787_v26   ;;  %v2880_v54 = vadd.f32 %v2772_v9, %v9789_v33  ;;  %v2928_v14 = vmin.f32 %v2926_v1, %v2870_v43  ;;  %v2968_v19 = vmin.f32 %v2966_v61, %v2877_v42  ;;  %v9803_v26 = vld [vmem:[#allocation115_spill] sm:$0xff] }
 0x27a   :  { %3401 = vperm.xlu0 %5436, %v9788_v16   ;;  %v2967_v52 = vmin.f32 %v2965_v22, %v2875_v11  ;;  %v2882_v9 = vadd.f32 %v2776_v35, %v9426_v12  ;;  %v2889_v42 = vadd.f32 %v7373_v45, %v9503_v63  ;;  %v2887_v11 = vadd.f32 %v2784_v62, %v9360_v53  ;;  %v9792_v22 = vld [vmem:[#allocation57_spill] sm:$0xff] }
 0x27b   :  { %v2808_v21 = vpop.permute.xlu1 %2807  ;;  %v2930_v58 = vmin.f32 %v2928_v14, %v2874_v60  ;;  %v2933_v43 = vmin.f32 %v2931_v36, %v2880_v54  ;;  %v2970_v40 = vmin.f32 %v2968_v19, %v2881_v29  ;;  %v2886_v60 = vadd.f32 %v2784_v62, %v9359_v38  ;;  %v9793_v62 = vld [vmem:[#allocation66_spill] sm:$0xff] }
 0x27c   :  { %v7422_v44 = vpop.permute.xlu0 %2827  ;;  %v2969_v1 = vmin.f32 %v2967_v52, %v2879_v48  ;;  %v2892_v54 = vadd.f32 %v7378_v55, %v9437_v25  ;;  %v2893_v29 = vadd.f32 %v7378_v55, %v9438_v0  ;;  %v2891_v48 = vadd.f32 %v7388_v46, %v9505_v57 }
 0x27d   :  { %3381 = vperm.xlu1 %5435, %v9790_v39   ;;  %v2932_v15 = vmin.f32 %v2930_v58, %v2878_v24  ;;  %v2935_v14 = vmin.f32 %v2933_v43, %v2884_v10  ;;  %v2972_v35 = vmin.f32 %v2970_v40, %v2885_v23  ;;  %v2890_v24 = vadd.f32 %v7388_v46, %v9434_v41 }
 0x27e   :  { %3409 = vperm.xlu0 %5436, %v9791_v30   ;;  %v2971_v45 = vmin.f32 %v2969_v1, %v2883_v17  ;;  %v2896_v23 = vadd.f32 %v7384_v27, %v9507_v56  ;;  %v2897_v55 = vadd.f32 %v7384_v27, %v9441_v4  ;;  %v2894_v17 = vadd.f32 %v7404_v37, %v9369_v6  ;;  %v9794_v1 = vld [vmem:[#allocation59_spill] sm:$0xff] }
 0x27f   :  { %v2816_v31 = vpop.permute.xlu1 %2815  ;;  %v2934_v36 = vmin.f32 %v2932_v15, %v2882_v9  ;;  %v2937_v19 = vmin.f32 %v2935_v14, %v2888_v34  ;;  %v2974_v10 = vmin.f32 %v2972_v35, %v2889_v42  ;;  %v2895_v43 = vadd.f32 %v7404_v37, %v9439_v28  ;;  %v9796_v35 = vld [vmem:[#allocation110_spill] sm:$0xff] }
 0x280   :  { %v2836_v61 = vpop.permute.xlu0 %2835  ;;  %v2973_v9 = vmin.f32 %v2971_v45, %v2887_v11  ;;  %v2900_v34 = vadd.f32 %v7390_v20, %v9650_v32  ;;  %v2901_v42 = vadd.f32 %v7390_v20, %v9651_v3  ;;  %v9795_v11 = vld [vmem:[#allocation109_spill] sm:$0xff]  ;;  %v9797_v45 = vld [vmem:[#allocation68_spill] sm:$0xff] }
 0x281   :  { %3389 = vperm.xlu1 %5435, %v9792_v22   ;;  %v2936_v52 = vmin.f32 %v2934_v36, %v2886_v60  ;;  %v2939_v40 = vmin.f32 %v2937_v19, %v2892_v54  ;;  %v2976_v15 = vmin.f32 %v2974_v10, %v2893_v29  ;;  %v2898_v14 = vadd.f32 %v2808_v21, %v9795_v11  ;;  %v9798_v54 = vld [vmem:[#allocation111_spill] sm:$0xff]  ;;  %v9799_v29 = vld [vmem:[#allocation101_spill] sm:$0xff]  ;;  %v9800_v10 = vld [vmem:[#allocation112_spill] sm:$0xff] }
 0x282   :  { %3417 = vperm.xlu0 %5436, %v9793_v62   ;;  %v2975_v60 = vmin.f32 %v2973_v9, %v2891_v48  ;;  %v2899_v36 = vadd.f32 %v2808_v21, %v9796_v35  ;;  %v2904_v19 = vadd.f32 %v9799_v29, %v9798_v54  ;;  %v2905_v30 = vadd.f32 %v9799_v29, %v9800_v10  ;;  %v9802_v48 = vld [vmem:[#allocation114_spill] sm:$0xff]  ;;  %v9806_v10 = vld [vmem:[#allocation117_spill] sm:$0xff] }
 0x283   :  { %v2824_v58 = vpop.permute.xlu1 %2823  ;;  %v2938_v27 = vmin.f32 %v2936_v52, %v2890_v24  ;;  %v2941_v37 = vmin.f32 %v2939_v40, %v2896_v23  ;;  %v2978_v62 = vmin.f32 %v2976_v15, %v2897_v55  ;;  %v2903_v52 = vadd.f32 %v2816_v31, %v9802_v48  ;;  %v9804_v55 = vld [vmem:[#allocation116_spill] sm:$0xff]  ;;  %v9805_v15 = vld [vmem:[#allocation61_spill] sm:$0xff] }
 0x284   :  { %v2844_v46 = vpop.permute.xlu0 %2843  ;;  %v2977_v22 = vmin.f32 %v2975_v60, %v2895_v43  ;;  %v2908_v23 = vadd.f32 %v7422_v44, %v9803_v26  ;;  %v2909_v40 = vadd.f32 %v7422_v44, %v9804_v55  ;;  %v9807_v43 = vld [vmem:[#allocation118_spill] sm:$0xff]  ;;  %v9811_v44 = vld [vmem:[#allocation121_spill] sm:$0xff] }
 0x285   :  { %3397 = vperm.xlu1 %5435, %v9794_v1   ;;  %v2940_v20 = vmin.f32 %v2938_v27, %v2894_v17  ;;  %v9801_v1 = vld [vmem:[#allocation113_spill] sm:$0xff]  ;;  %v2943_v39 = vmin.f32 %v2941_v37, %v2900_v34  ;;  %v2980_v21 = vmin.f32 %v2978_v62, %v2901_v42  ;;  %v2906_v17 = vadd.f32 %v2824_v58, %v9806_v10  ;;  %v9808_v60 = vld [vmem:[#allocation70_spill] sm:$0xff]  ;;  %v9809_v34 = vld [vmem:[#allocation119_spill] sm:$0xff] }
 0x286   :  { %3425 = vperm.xlu0 %5436, %v9797_v45   ;;  %v2902_v24 = vadd.f32 %v2816_v31, %v9801_v1  ;;  %v2979_v29 = vmin.f32 %v2977_v22, %v2899_v36  ;;  %v2907_v27 = vadd.f32 %v2824_v58, %v9807_v43  ;;  %v2912_v62 = vadd.f32 %v2836_v61, %v9809_v34  ;;  %v9810_v42 = vld [vmem:[#allocation120_spill] sm:$0xff]  ;;  %v9813_v10 = vld [vmem:[#allocation123_spill] sm:$0xff] }
 0x287   :  { %v2832_v16 = vpop.permute.xlu1 %2831  ;;  %v2942_v45 = vmin.f32 %v2940_v20, %v2898_v14  ;;  %v2945_v31 = vmin.f32 %v2943_v39, %v2904_v19  ;;  %v2982_v54 = vmin.f32 %v2980_v21, %v2905_v30  ;;  %v2913_v37 = vadd.f32 %v2836_v61, %v9810_v42  ;;  %v9814_v43 = vld [vmem:[#allocation124_spill] sm:$0xff]  ;;  %v9815_v39 = vld [vmem:[#allocation63_spill] sm:$0xff]  ;;  %v9816_v21 = vld [vmem:[#allocation125_spill] sm:$0xff] }
 0x288   :  { %v2852_v9 = vpop.permute.xlu0 %2851  ;;  %v2981_v1 = vmin.f32 %v2979_v29, %v2903_v52  ;;  %v2910_v55 = vadd.f32 %v2832_v16, %v9811_v44  ;;  %v2916_v58 = vadd.f32 %v2844_v46, %v9813_v10  ;;  %v9817_v42 = vld [vmem:[#allocation126_spill] sm:$0xff] }
 0x289   :  { %3405 = vperm.xlu1 %5435, %v9805_v15   ;;  %v2944_v48 = vmin.f32 %v2942_v45, %v2902_v24  ;;  %v9812_v15 = vld [vmem:[#allocation122_spill] sm:$0xff]  ;;  %v2947_v36 = vmin.f32 %v2945_v31, %v2908_v23  ;;  %v2984_v20 = vmin.f32 %v2982_v54, %v2909_v40  ;;  %v5482_v24 = vmov 5   ;;  %v9819_v23 = vld [vmem:[#allocation128_spill] sm:$0xff] }
 0x28a   :  { %3433 = vperm.xlu0 %5436, %v9808_v60   ;;  %v2911_v14 = vadd.f32 %v2832_v16, %v9812_v15  ;;  %v2917_v60 = vadd.f32 %v2844_v46, %v9814_v43  ;;  %v2983_v19 = vmin.f32 %v2981_v1, %v2907_v27  ;;  %v9818_v16 = vld [vmem:[#allocation127_spill] sm:$0xff]  ;;  %v2921_v54 = vadd.f32 %v2852_v9, %v9819_v23  ;;  %v9820_v40 = vld [vmem:[#allocation8_spill] sm:$0xff]  ;;  %v9822_v1 = vld [vmem:[#allocation130_spill] sm:$0xff] }
 0x28b   :  { %v2840_v26 = vpop.permute.xlu1 %2839  ;;  %v2946_v30 = vmin.f32 %v2944_v48, %v2906_v17  ;;  %v2949_v52 = vmin.f32 %v2947_v36, %v2912_v62  ;;  %v2986_v29 = vmin.f32 %v2984_v20, %v2913_v37  ;;  %v2920_v34 = vadd.f32 %v2852_v9, %v9818_v16  ;;  %v9824_v36 = vld [vmem:[#allocation131_spill] sm:$0xff]  ;;  %v9825_v9 = vld [vmem:[#allocation132_spill] sm:$0xff] }
 0x28c   :  { %v2860_v22 = vpop.permute.xlu0 %2859  ;;  %v2914_v61 = vadd.f32 %v2840_v26, %v9816_v21  ;;  %v2915_v45 = vadd.f32 %v2840_v26, %v9817_v42  ;;  %v2985_v43 = vmin.f32 %v2983_v19, %v2911_v14  ;;  %v9823_v42 = vld [vmem:[#allocation65_spill] sm:$0xff] }
 0x28d   :  { %3413 = vperm.xlu1 %5435, %v9815_v39   ;;  %v2948_v46 = vmin.f32 %v2946_v30, %v2910_v55  ;;  %v9821_v39 = vld [vmem:[#allocation129_spill] sm:$0xff]  ;;  %v2951_v27 = vmin.f32 %v2949_v52, %v2916_v58  ;;  %v2988_v10 = vmin.f32 %v2986_v29, %v2917_v60  ;;  %v2924_v20 = vadd.f32 %v2860_v22, %v9824_v36  ;;  %v9828_v60 = vld [vmem:[#allocation134_spill] sm:$0xff] }
 0x28e   :  { %5437 = vset.pattern.permute.xlu0 %v5482_v24  ;;  %v2987_v37 = vmin.f32 %v2985_v43, %v2915_v45  ;;  %v2925_v23 = vadd.f32 %v2860_v22, %v9825_v9  ;;  %v9826_v55 = vld [vmem:[#allocation9_spill] sm:$0xff] }
 0x28f   :  { %3625 = vperm.xlu0 %5437, %v9820_v40   ;;  %v2848_v31 = vpop.permute.xlu1 %2847  ;;  %v2950_v62 = vmin.f32 %v2948_v46, %v2914_v61  ;;  %v2953_v40 = vmin.f32 %v2951_v27, %v2920_v34  ;;  %v2990_v16 = vmin.f32 %v2988_v10, %v2921_v54  ;;  %v9831_v27 = vld [vmem:[#allocation69_spill] sm:$0xff] }
 0x290   :  { %v2918_v48 = vadd.f32 %v2848_v31, %v9821_v39  ;;  %v2919_v17 = vadd.f32 %v2848_v31, %v9822_v1  ;;  %v9827_v31 = vld [vmem:[#allocation133_spill] sm:$0xff]  ;;  %v9829_v1 = vld [vmem:[#allocation67_spill] sm:$0xff]  ;;  %v9853_v39 = vld [vmem:[#allocation20_spill] sm:$0xff] }
 0x291   :  { %v7490_v26 = vpop.permute.xlu0 %3051  ;;  %3421 = vperm.xlu1 %5435, %v9823_v42   ;;  %v2955_v61 = vmin.f32 %v2953_v40, %v2924_v20  ;;  %v2992_v43 = vmin.f32 %v2990_v16, %v2925_v23  ;;  %v9830_v42 = vld [vmem:[#allocation11_spill] sm:$0xff]  ;;  %v9833_v40 = vld [vmem:[#allocation10_spill] sm:$0xff] }
 0x292   :  { %v2952_v30 = vmin.f32 %v2950_v62, %v2918_v48  ;;  %v2989_v19 = vmin.f32 %v2987_v37, %v2919_v17  ;;  %v9832_v62 = vld [vmem:[#allocation13_spill] sm:$0xff]  ;;  %v9834_v20 = vld [vmem:[#allocation15_spill] sm:$0xff] }
 0x293   :  { %3637 = vperm.xlu0 %5437, %v9826_v55   ;;  %v2856_v14 = vpop.permute.xlu1 %2855 }
 0x294   :  { %v2922_v58 = vadd.f32 %v2856_v14, %v9827_v31  ;;  %v2923_v52 = vadd.f32 %v2856_v14, %v9828_v60  ;;  %v9850_v60 = vld [vmem:[#allocation82_spill] sm:$0xff] }
 0x295   :  { %v3064_v29 = vpop.permute.xlu0 %3063  ;;  %3429 = vperm.xlu1 %5435, %v9829_v1  }
 0x296   :  { %v2954_v45 = vmin.f32 %v2952_v30, %v2922_v58  ;;  %v2991_v46 = vmin.f32 %v2989_v19, %v2923_v52 }
 0x297   :  { %3645 = vperm.xlu0 %5437, %v9830_v42  }
 0x298   :  { %v2956_v34 = vmin.f32 %v2954_v45, %v2955_v61  ;;  %v2993_v10 = vmin.f32 %v2991_v46, %v2992_v43  ;;  %v3048_v22 = vpop.permute.xlu1 %3047  ;;  %v9835_v45 = vld [vmem:[#allocation7_spill] sm:$0xff]  ;;  %v9836_v46 = vld [vmem:[#allocation17_spill] sm:$0xff] }
 0x299   :  { %v3072_v54 = vpop.permute.xlu0 %3071  ;;  %3437 = vperm.xlu1 %5435, %v9831_v27   ;;  %v9846_v27 = vld [vmem:[#allocation23_spill] sm:$0xff] }
 0x29a   :  { %v2957_v48 = vrot.slane %v2956_v34, 4  ;;  %v2994_v17 = vrot.slane %v2993_v10, 4 }
 0x29b   :  { %3653 = vperm.xlu0 %5437, %v9832_v62   ;;  %v9837_v62 = vld [vmem:[#allocation12_spill] sm:$0xff] }
 0x29c   :  { %v2958_v37 = vmin.f32 %v2956_v34, %v2957_v48  ;;  %v2995_v14 = vmin.f32 %v2993_v10, %v2994_v17  ;;  %v3056_v55 = vpop.permute.xlu1 %3055 }
 0x29d   :  { %v3080_v1 = vpop.permute.xlu0 %3079  ;;  %5438 = vset.pattern.permute.xlu1 %v5482_v24 }
 0x29e   :  { %v2959_v16 = vrot.slane %v2958_v37, 2  ;;  %v2996_v23 = vrot.slane %v2995_v14, 2  ;;  %3629 = vperm.xlu1 %5438, %v9833_v40   ;;  %v9840_v40 = vld [vmem:[#allocation14_spill] sm:$0xff] }
 0x29f   :  { %3661 = vperm.xlu0 %5437, %v9834_v20   ;;  %v9838_v20 = vld [vmem:[#allocation19_spill] sm:$0xff] }
 0x2a0   :  { %v2960_v30 = vmin.f32 %v2958_v37, %v2959_v16  ;;  %v2997_v19 = vmin.f32 %v2995_v14, %v2996_v23  ;;  %v3060_v58 = vpop.permute.xlu1 %3059  ;;  %v9839_v37 = vld [vmem:[#allocation135_spill] sm:$0xff] }
 0x2a1   :  { %v7504_v52 = vpop.permute.xlu0 %3087  ;;  %v3024_v23 = vld [vmem:[#allocation3 + $0x3] ss:$8 sm:$0x3] }
 0x2a2   :  { %v2961_v61 = vrot.slane %v2960_v30, 1  ;;  %v2998_v43 = vrot.slane %v2997_v19, 1  ;;  %3633 = vperm.xlu1 %5438, %v9835_v45  }
 0x2a3   :  { %3669 = vperm.xlu0 %5437, %v9836_v46  }
 0x2a4   :  { %v2962_v34 = vmin.f32 %v2960_v30, %v2961_v61  ;;  %v2999_v10 = vmin.f32 %v2997_v19, %v2998_v43  ;;  %v3068_v24 = vpop.permute.xlu1 %3067  ;;  %v9841_v30 = vld [vmem:[#allocation21_spill] sm:$0xff] }
 0x2a5   :  { %v7508_v48 = vpop.permute.xlu0 %3095 }
 0x2a6   :  { %v3027_v17 = vcombine.low %v2962_v34, %v2999_v10  ;;  %3641 = vperm.xlu1 %5438, %v9837_v62   ;;  %v9843_v10 = vld [vmem:[#allocation72_spill] sm:$0xff]  ;;  %v3183_v34 = vadd.f32 %v3064_v29, %v9850_v60 }
 0x2a7   :  { %3677 = vperm.xlu0 %5437, %v9838_v20   ;;  %v3178_v20 = vadd.f32 %v3056_v55, %v9843_v10  ;;  %v9845_v62 = vld [vmem:[#allocation16_spill] sm:$0xff]  ;;  %v9851_v10 = vld [vmem:[#allocation18_spill] sm:$0xff] }
 0x2a8   :  { %v3034_v14 = vrot.slane %v3027_v17, %v9839_v37  ;;  %v3076_v16 = vpop.permute.xlu1 %3075  ;;  %v9844_v17 = vld [vmem:[#allocation74_spill] sm:$0xff] }
 0x2a9   :  { %v7513_v42 = vpop.permute.xlu0 %3103  ;;  %v3179_v46 = vadd.f32 %v3056_v55, %v9844_v17  ;;  %v9852_v55 = vld [vmem:[#allocation25_spill] sm:$0xff] }
 0x2aa   :  { %v3041_v45 = vrot.slane %v3034_v14, %v9839_v37  ;;  %3649 = vperm.xlu1 %5438, %v9840_v40   ;;  %v9847_v14 = vld [vmem:[#allocation71_spill] sm:$0xff]  ;;  %v9848_v40 = vld [vmem:[#allocation73_spill] sm:$0xff] }
 0x2ab   :  { %3685 = vperm.xlu0 %5437, %v9841_v30   ;;  %v3174_v37 = vadd.f32 %v3048_v22, %v9847_v14  ;;  %v3175_v9 = vadd.f32 %v3048_v22, %v9848_v40  ;;  %v3187_v22 = vadd.f32 %v3072_v54, %v9494_v49  ;;  %v9860_v49 = vld [vmem:[#allocation29_spill] sm:$0xff] }
 0x2ac   :  { %v3043_v19 = vmin.f32 %v3024_v23, %v3041_v45  ;;  %v3084_v61 = vpop.permute.xlu1 %3083  ;;  %v9849_v23 = vld [vmem:[#allocation81_spill] sm:$0xff] }
 0x2ad   :  { %v7518_v43 = vpop.permute.xlu0 %3111  ;;  %v3182_v36 = vadd.f32 %v3064_v29, %v9849_v23  ;;  %v3275_v31 = vmin.f32 %v3175_v9, %v3179_v46  ;;  %v9854_v23 = vld [vmem:[#allocation27_spill] sm:$0xff]  ;;  %v3190_v9 = vadd.f32 %v3080_v1, %v9644_v13  ;;  %v3191_v46 = vadd.f32 %v3080_v1, %v9497_v47  ;;  %v9862_v1 = vld [vmem:[#allocation80_spill] sm:$0xff] }
 0x2ae   :  { %3044 = vst.msk [vmem:[#allocation3 + $0x3] ss:$8 sm:$0x3] %vm6675_vm0, %v3043_v19  ;;  %3657 = vperm.xlu1 %5438, %v9845_v62   ;;  %v3238_v19 = vmin.f32 %v3174_v37, %v3178_v20  ;;  %v9861_v13 = vld [vmem:[#allocation79_spill] sm:$0xff]  ;;  %v9863_v47 = vld [vmem:[#allocation24_spill] sm:$0xff] }
 0x2af   :  { %3693 = vperm.xlu0 %5437, %v9846_v27   ;;  %v3186_v27 = vadd.f32 %v3072_v54, %v9641_v51  ;;  %v3277_v14 = vmin.f32 %v3275_v31, %v3183_v34  ;;  %v9856_v51 = vld [vmem:[#allocation77_spill] sm:$0xff]  ;;  %v9858_v34 = vld [vmem:[#allocation75_spill] sm:$0xff]  ;;  %v3184_v21 = vadd.f32 %v3068_v24, %v9861_v13  ;;  %v3189_v13 = vadd.f32 %v3076_v16, %v9496_v5 }
 0x2b0   :  { %v3092_v30 = vpop.permute.xlu1 %3091  ;;  %v3240_v40 = vmin.f32 %v3238_v19, %v3182_v36  ;;  %v3176_v54 = vadd.f32 %v7490_v26, %v9856_v51  ;;  %v9857_v36 = vld [vmem:[#allocation78_spill] sm:$0xff]  ;;  %v3180_v19 = vadd.f32 %v3060_v58, %v9858_v34  ;;  %v9864_v51 = vld [vmem:[#allocation31_spill] sm:$0xff] }
 0x2b1   :  { %v7528_v45 = vpop.permute.xlu0 %3119  ;;  %v3177_v31 = vadd.f32 %v7490_v26, %v9857_v36  ;;  %v3195_v26 = vadd.f32 %v7504_v52, %v9500_v7 }
 0x2b2   :  { %3665 = vperm.xlu1 %5438, %v9851_v10   ;;  %v3242_v37 = vmin.f32 %v3240_v40, %v3186_v27  ;;  %v9855_v10 = vld [vmem:[#allocation22_spill] sm:$0xff]  ;;  %v3185_v27 = vadd.f32 %v3068_v24, %v9862_v1 }
 0x2b3   :  { %3701 = vperm.xlu0 %5437, %v9852_v55   ;;  %v3279_v55 = vmin.f32 %v3277_v14, %v3187_v22 }
 0x2b4   :  { %v3100_v62 = vpop.permute.xlu1 %3099  ;;  %v3244_v14 = vmin.f32 %v3242_v37, %v3190_v9 }
 0x2b5   :  { %v7534_v17 = vpop.permute.xlu0 %3127  ;;  %v3281_v22 = vmin.f32 %v3279_v55, %v3191_v46  ;;  %v3192_v55 = vadd.f32 %v3084_v61, %v9789_v33  ;;  %v3193_v46 = vadd.f32 %v3084_v61, %v9424_v2 }
 0x2b6   :  { %3673 = vperm.xlu1 %5438, %v9853_v39  }
 0x2b7   :  { %3709 = vperm.xlu0 %5437, %v9854_v23   ;;  %v9859_v23 = vld [vmem:[#allocation76_spill] sm:$0xff]  ;;  %v3283_v7 = vmin.f32 %v3281_v22, %v3195_v26  ;;  %v3201_v22 = vadd.f32 %v3100_v62, %v9503_v63 }
 0x2b8   :  { %v3108_v29 = vpop.permute.xlu1 %3107  ;;  %v3181_v39 = vadd.f32 %v3060_v58, %v9859_v23  ;;  %v3239_v58 = vmin.f32 %v3176_v54, %v3180_v19  ;;  %v3199_v54 = vadd.f32 %v7508_v48, %v9360_v53 }
 0x2b9   :  { %v7540_v20 = vpop.permute.xlu0 %3135 }
 0x2ba   :  { %3681 = vperm.xlu1 %5438, %v9855_v10   ;;  %v3194_v10 = vadd.f32 %v7504_v52, %v9426_v12  ;;  %v3276_v36 = vmin.f32 %v3177_v31, %v3181_v39  ;;  %v3241_v1 = vmin.f32 %v3239_v58, %v3184_v21  ;;  %v3198_v39 = vadd.f32 %v7508_v48, %v9359_v38 }
 0x2bb   :  { %3717 = vperm.xlu0 %5437, %v9860_v49   ;;  %v3188_v49 = vadd.f32 %v3076_v16, %v9420_v18  ;;  %v9865_v16 = vld [vmem:[#allocation26_spill] sm:$0xff]  ;;  %v3196_v21 = vadd.f32 %v3092_v30, %v9429_v8 }
 0x2bc   :  { %v3116_v60 = vpop.permute.xlu1 %3115  ;;  %v3278_v9 = vmin.f32 %v3276_v36, %v3185_v27  ;;  %v3246_v52 = vmin.f32 %v3244_v14, %v3194_v10  ;;  %v3197_v36 = vadd.f32 %v3092_v30, %v9502_v50  ;;  %v9866_v27 = vld [vmem:[#allocation33_spill] sm:$0xff]  ;;  %v3200_v14 = vadd.f32 %v3100_v62, %v9431_v59  ;;  %v9867_v30 = vld [vmem:[#allocation28_spill] sm:$0xff] }
 0x2bd   :  { %v7554_v40 = vpop.permute.xlu0 %3143  ;;  %v3243_v31 = vmin.f32 %v3241_v1, %v3188_v49  ;;  %v3202_v49 = vadd.f32 %v7513_v42, %v9434_v41  ;;  %v3206_v62 = vadd.f32 %v7518_v43, %v9369_v6 }
 0x2be   :  { %3689 = vperm.xlu1 %5438, %v9863_v47   ;;  %v3280_v19 = vmin.f32 %v3278_v9, %v3189_v13  ;;  %v3248_v48 = vmin.f32 %v3246_v52, %v3198_v39  ;;  %v3203_v13 = vadd.f32 %v7513_v42, %v9505_v57  ;;  %v3208_v42 = vadd.f32 %v3116_v60, %v9507_v56 }
 0x2bf   :  { %3725 = vperm.xlu0 %5437, %v9864_v51   ;;  %v3245_v58 = vmin.f32 %v3243_v31, %v3192_v55  ;;  %v3285_v51 = vmin.f32 %v3283_v7, %v3199_v54  ;;  %v3204_v55 = vadd.f32 %v3108_v29, %v9437_v25  ;;  %v9868_v31 = vld [vmem:[#allocation35_spill] sm:$0xff]  ;;  %v3207_v7 = vadd.f32 %v7518_v43, %v9439_v28 }
 0x2c0   :  { %v3124_v24 = vpop.permute.xlu1 %3123  ;;  %v3282_v10 = vmin.f32 %v3280_v19, %v3193_v46  ;;  %v3205_v46 = vadd.f32 %v3108_v29, %v9438_v0  ;;  %v3209_v19 = vadd.f32 %v3116_v60, %v9441_v4  ;;  %v3210_v29 = vadd.f32 %v7528_v45, %v9795_v11 }
 0x2c1   :  { %v7566_v37 = vpop.permute.xlu0 %3151  ;;  %v3247_v1 = vmin.f32 %v3245_v58, %v3196_v21  ;;  %v3287_v58 = vmin.f32 %v3285_v51, %v3203_v13 }
 0x2c2   :  { %3697 = vperm.xlu1 %5438, %v9865_v16   ;;  %v3284_v9 = vmin.f32 %v3282_v10, %v3197_v36  ;;  %v3250_v36 = vmin.f32 %v3248_v48, %v3202_v49  ;;  %v3211_v10 = vadd.f32 %v7528_v45, %v9796_v35  ;;  %v9871_v48 = vld [vmem:[#allocation113_spill] sm:$0xff]  ;;  %v9872_v49 = vld [vmem:[#allocation114_spill] sm:$0xff] }
 0x2c3   :  { %3733 = vperm.xlu0 %5437, %v9866_v27   ;;  %v3249_v39 = vmin.f32 %v3247_v1, %v3200_v14  ;;  %v3212_v14 = vadd.f32 %v3124_v24, %v9650_v32  ;;  %v9870_v1 = vld [vmem:[#allocation40_spill] sm:$0xff]  ;;  %v3214_v51 = vadd.f32 %v7534_v17, %v9871_v48  ;;  %v3215_v13 = vadd.f32 %v7534_v17, %v9872_v49 }
 0x2c4   :  { %v3132_v61 = vpop.permute.xlu1 %3131  ;;  %v3286_v54 = vmin.f32 %v3284_v9, %v3201_v22  ;;  %v3213_v22 = vadd.f32 %v3124_v24, %v9651_v3  ;;  %v3252_v60 = vmin.f32 %v3250_v36, %v3206_v62  ;;  %v3289_v9 = vmin.f32 %v3287_v58, %v3207_v7  ;;  %v9876_v7 = vld [vmem:[#allocation118_spill] sm:$0xff]  ;;  %v9877_v58 = vld [vmem:[#allocation32_spill] sm:$0xff] }
 0x2c5   :  { %v7578_v26 = vpop.permute.xlu0 %3159  ;;  %v3251_v43 = vmin.f32 %v3249_v39, %v3204_v55  ;;  %v3219_v36 = vadd.f32 %v7540_v20, %v9876_v7 }
 0x2c6   :  { %3705 = vperm.xlu1 %5438, %v9867_v30   ;;  %v3288_v27 = vmin.f32 %v3286_v54, %v3205_v46  ;;  %v9874_v46 = vld [vmem:[#allocation112_spill] sm:$0xff]  ;;  %v3254_v24 = vmin.f32 %v3252_v60, %v3210_v29  ;;  %v3291_v47 = vmin.f32 %v3289_v9, %v3211_v10  ;;  %v3222_v29 = vadd.f32 %v7554_v40, %v9811_v44  ;;  %v9928_v44 = vld [vmem:[#allocation78_spill] sm:$0xff] }
 0x2c7   :  { %3741 = vperm.xlu0 %5437, %v9868_v31   ;;  %v9869_v31 = vld [vmem:[#allocation30_spill] sm:$0xff]  ;;  %v3253_v45 = vmin.f32 %v3251_v43, %v3208_v42  ;;  %v3217_v39 = vadd.f32 %v3132_v61, %v9874_v46  ;;  %v9878_v42 = vld [vmem:[#allocation115_spill] sm:$0xff]  ;;  %v3223_v10 = vadd.f32 %v7554_v40, %v9812_v15 }
 0x2c8   :  { %v3140_v52 = vpop.permute.xlu1 %3139  ;;  %v3290_v16 = vmin.f32 %v3288_v27, %v3209_v19  ;;  %v9879_v19 = vld [vmem:[#allocation116_spill] sm:$0xff]  ;;  %v3293_v46 = vmin.f32 %v3291_v47, %v3215_v13 }
 0x2c9   :  { %v7594_v21 = vpop.permute.xlu0 %3167  ;;  %v3255_v17 = vmin.f32 %v3253_v45, %v3212_v14  ;;  %v3220_v27 = vadd.f32 %v3140_v52, %v9878_v42  ;;  %v3221_v43 = vadd.f32 %v3140_v52, %v9879_v19  ;;  %v9930_v42 = vld [vmem:[#allocation80_spill] sm:$0xff] }
 0x2ca   :  { %3713 = vperm.xlu1 %5438, %v9869_v31   ;;  %v9873_v31 = vld [vmem:[#allocation111_spill] sm:$0xff]  ;;  %v3292_v49 = vmin.f32 %v3290_v16, %v3213_v22  ;;  %v9882_v16 = vld [vmem:[#allocation120_spill] sm:$0xff]  ;;  %v3295_v19 = vmin.f32 %v3293_v46, %v3219_v36  ;;  %v9890_v36 = vld [vmem:[#allocation130_spill] sm:$0xff] }
 0x2cb   :  { %3749 = vperm.xlu0 %5437, %v9870_v1   ;;  %v3216_v55 = vadd.f32 %v3132_v61, %v9873_v31  ;;  %v9875_v1 = vld [vmem:[#allocation117_spill] sm:$0xff]  ;;  %v3256_v61 = vmin.f32 %v3254_v24, %v3214_v51  ;;  %v9884_v51 = vld [vmem:[#allocation126_spill] sm:$0xff] }
 0x2cc   :  { %v3148_v30 = vpop.permute.xlu1 %3147  ;;  %v3218_v62 = vadd.f32 %v7540_v20, %v9875_v1  ;;  %v9880_v31 = vld [vmem:[#allocation37_spill] sm:$0xff]  ;;  %v3294_v9 = vmin.f32 %v3292_v49, %v3217_v39  ;;  %v3227_v13 = vadd.f32 %v7566_v37, %v9884_v51  ;;  %v9885_v24 = vld [vmem:[#allocation34_spill] sm:$0xff]  ;;  %v9887_v39 = vld [vmem:[#allocation124_spill] sm:$0xff] }
 0x2cd   :  { %v7610_v54 = vpop.permute.xlu0 %3313  ;;  %v3257_v20 = vmin.f32 %v3255_v17, %v3216_v55  ;;  %v3225_v22 = vadd.f32 %v3148_v30, %v9882_v16  ;;  %v9886_v55 = vld [vmem:[#allocation123_spill] sm:$0xff]  ;;  %v3297_v16 = vmin.f32 %v3295_v19, %v3223_v10  ;;  %v9894_v19 = vld [vmem:[#allocation133_spill] sm:$0xff]  ;;  %v9895_v10 = vld [vmem:[#allocation134_spill] sm:$0xff] }
 0x2ce   :  { %3721 = vperm.xlu1 %5438, %v9877_v58   ;;  %v9881_v58 = vld [vmem:[#allocation119_spill] sm:$0xff]  ;;  %v3258_v52 = vmin.f32 %v3256_v61, %v3218_v62  ;;  %v3296_v15 = vmin.f32 %v3294_v9, %v3221_v43  ;;  %v9889_v62 = vld [vmem:[#allocation129_spill] sm:$0xff]  ;;  %v3231_v61 = vadd.f32 %v7578_v26, %v9890_v36  ;;  %v9892_v43 = vld [vmem:[#allocation128_spill] sm:$0xff] }
 0x2cf   :  { %3895 = vperm.xlu0 %5437, %v9880_v31   ;;  %v3224_v14 = vadd.f32 %v3148_v30, %v9881_v58  ;;  %v9883_v31 = vld [vmem:[#allocation125_spill] sm:$0xff]  ;;  %v3259_v40 = vmin.f32 %v3257_v20, %v3220_v27  ;;  %v9888_v58 = vld [vmem:[#allocation39_spill] sm:$0xff]  ;;  %v3230_v46 = vadd.f32 %v7578_v26, %v9889_v62  ;;  %v9932_v1 = vld [vmem:[#allocation86_spill] sm:$0xff] }
 0x2d0   :  { %v3156_v60 = vpop.permute.xlu1 %3155  ;;  %v3226_v47 = vadd.f32 %v7566_v37, %v9883_v31  ;;  %v3260_v30 = vmin.f32 %v3258_v52, %v3222_v29  ;;  %v3298_v51 = vmin.f32 %v3296_v15, %v3225_v22  ;;  %v3234_v29 = vadd.f32 %v7594_v21, %v9894_v19 }
 0x2d1   :  { %v7626_v45 = vpop.permute.xlu0 %3321  ;;  %v3228_v49 = vadd.f32 %v3156_v60, %v9886_v55  ;;  %v3229_v17 = vadd.f32 %v3156_v60, %v9887_v39  ;;  %v3261_v37 = vmin.f32 %v3259_v40, %v3224_v14  ;;  %v3299_v39 = vmin.f32 %v3297_v16, %v3227_v13  ;;  %v9896_v14 = vld [vmem:[#allocation42_spill] sm:$0xff]  ;;  %v9898_v16 = vld [vmem:[#allocation132_spill] sm:$0xff] }
 0x2d2   :  { %3729 = vperm.xlu1 %5438, %v9885_v24   ;;  %v9891_v24 = vld [vmem:[#allocation127_spill] sm:$0xff]  ;;  %v3262_v60 = vmin.f32 %v3260_v30, %v3226_v47  ;;  %v3235_v52 = vadd.f32 %v7594_v21, %v9895_v10  ;;  %v9925_v10 = vld [vmem:[#allocation81_spill] sm:$0xff]  ;;  %v9926_v55 = vld [vmem:[#allocation82_spill] sm:$0xff] }
 0x2d3   :  { %3903 = vperm.xlu0 %5437, %v9888_v58   ;;  %v9893_v58 = vld [vmem:[#allocation36_spill] sm:$0xff]  ;;  %v3263_v26 = vmin.f32 %v3261_v37, %v3228_v49  ;;  %v3300_v36 = vmin.f32 %v3298_v51, %v3229_v17  ;;  %v3301_v22 = vmin.f32 %v3299_v39, %v3231_v61  ;;  %v9900_v51 = vld [vmem:[#allocation45_spill] sm:$0xff] }
 0x2d4   :  { %v3164_v31 = vpop.permute.xlu1 %3163  ;;  %v3264_v15 = vmin.f32 %v3262_v60, %v3230_v46 }
 0x2d5   :  { %v3232_v27 = vadd.f32 %v3164_v31, %v9891_v24  ;;  %v3233_v20 = vadd.f32 %v3164_v31, %v9892_v43  ;;  %v7642_v9 = vpop.permute.xlu0 %3329  ;;  %v9897_v24 = vld [vmem:[#allocation131_spill] sm:$0xff]  ;;  %v3303_v62 = vmin.f32 %v3301_v22, %v3235_v52  ;;  %v9903_v52 = vld [vmem:[#allocation41_spill] sm:$0xff] }
 0x2d6   :  { %3737 = vperm.xlu1 %5438, %v9893_v58   ;;  %v9899_v58 = vld [vmem:[#allocation43_spill] sm:$0xff]  ;;  %v3266_v19 = vmin.f32 %v3264_v15, %v3234_v29  ;;  %v9904_v22 = vld [vmem:[#allocation49_spill] sm:$0xff] }
 0x2d7   :  { %3911 = vperm.xlu0 %5437, %v9896_v14   ;;  %v3265_v31 = vmin.f32 %v3263_v26, %v3232_v27  ;;  %v3302_v43 = vmin.f32 %v3300_v36, %v3233_v20  ;;  %v9901_v36 = vld [vmem:[#allocation38_spill] sm:$0xff]  ;;  %v9902_v20 = vld [vmem:[#allocation47_spill] sm:$0xff] }
 0x2d8   :  { %v3172_v40 = vpop.permute.xlu1 %3171 }
 0x2d9   :  { %v3236_v47 = vadd.f32 %v3172_v40, %v9897_v24  ;;  %v3237_v13 = vadd.f32 %v3172_v40, %v9898_v16  ;;  %v7652_v30 = vpop.permute.xlu0 %3337  ;;  %v9924_v16 = vld [vmem:[#allocation73_spill] sm:$0xff] }
 0x2da   :  { %3745 = vperm.xlu1 %5438, %v9899_v58   ;;  %v3441_v24 = vadd.f32 %v7610_v54, %v9924_v16  ;;  %v9931_v16 = vld [vmem:[#allocation85_spill] sm:$0xff] }
 0x2db   :  { %v3267_v21 = vmin.f32 %v3265_v31, %v3236_v47  ;;  %v3304_v49 = vmin.f32 %v3302_v43, %v3237_v13  ;;  %3919 = vperm.xlu0 %5437, %v9900_v51   ;;  %v9905_v13 = vld [vmem:[#allocation44_spill] sm:$0xff]  ;;  %v9907_v51 = vld [vmem:[#allocation46_spill] sm:$0xff] }
 0x2dc   :  { %v3318_v17 = vpop.permute.xlu1 %3317 }
 0x2dd   :  { %v3268_v46 = vmin.f32 %v3266_v19, %v3267_v21  ;;  %v3305_v39 = vmin.f32 %v3303_v62, %v3304_v49  ;;  %v7656_v61 = vpop.permute.xlu0 %3345 }
 0x2de   :  { %3891 = vperm.xlu1 %5438, %v9901_v36   ;;  %v9911_v36 = vld [vmem:[#allocation55_spill] sm:$0xff] }
 0x2df   :  { %v3269_v37 = vrot.slane %v3268_v46, 4  ;;  %v3306_v27 = vrot.slane %v3305_v39, 4  ;;  %3927 = vperm.xlu0 %5437, %v9902_v20   ;;  %v9906_v20 = vld [vmem:[#allocation51_spill] sm:$0xff] }
 0x2e0   :  { %v3326_v60 = vpop.permute.xlu1 %3325 }
 0x2e1   :  { %v3270_v26 = vmin.f32 %v3268_v46, %v3269_v37  ;;  %v3307_v40 = vmin.f32 %v3305_v39, %v3306_v27  ;;  %v7660_v29 = vpop.permute.xlu0 %3353 }
 0x2e2   :  { %3899 = vperm.xlu1 %5438, %v9903_v52   ;;  %v9910_v52 = vld [vmem:[#allocation48_spill] sm:$0xff] }
 0x2e3   :  { %v3271_v43 = vrot.slane %v3270_v26, 2  ;;  %v3308_v15 = vrot.slane %v3307_v40, 2  ;;  %3935 = vperm.xlu0 %5437, %v9904_v22   ;;  %v9908_v22 = vld [vmem:[#allocation53_spill] sm:$0xff] }
 0x2e4   :  { %v3334_v62 = vpop.permute.xlu1 %3333 }
 0x2e5   :  { %v3272_v19 = vmin.f32 %v3270_v26, %v3271_v43  ;;  %v3309_v31 = vmin.f32 %v3307_v40, %v3308_v15  ;;  %v7664_v47 = vpop.permute.xlu0 %3361  ;;  %v9909_v40 = vld [vmem:[#allocation135_spill] sm:$0xff]  ;;  %v3451_v7 = vadd.f32 %v3334_v62, %v9930_v42 }
 0x2e6   :  { %3907 = vperm.xlu1 %5438, %v9905_v13   ;;  %v3579_v13 = vld [vmem:[#allocation2 + $0x4] ss:$8 sm:$0x3] }
 0x2e7   :  { %v3273_v21 = vrot.slane %v3272_v19, 1  ;;  %v3310_v49 = vrot.slane %v3309_v31, 1  ;;  %3943 = vperm.xlu0 %5437, %v9906_v20  }
 0x2e8   :  { %v3342_v46 = vpop.permute.xlu1 %3341 }
 0x2e9   :  { %v3274_v39 = vmin.f32 %v3272_v19, %v3273_v21  ;;  %v3311_v37 = vmin.f32 %v3309_v31, %v3310_v49  ;;  %v7668_v27 = vpop.permute.xlu0 %3369  ;;  %v9912_v49 = vld [vmem:[#allocation50_spill] sm:$0xff] }
 0x2ea   :  { %3915 = vperm.xlu1 %5438, %v9907_v51   ;;  %v9916_v51 = vld [vmem:[#allocation52_spill] sm:$0xff] }
 0x2eb   :  { %v3582_v14 = vcombine.low %v3274_v39, %v3311_v37  ;;  %3951 = vperm.xlu0 %5437, %v9908_v22   ;;  %v9914_v37 = vld [vmem:[#allocation57_spill] sm:$0xff]  ;;  %v3447_v39 = vadd.f32 %v3326_v60, %v9859_v23  ;;  %v9929_v23 = vld [vmem:[#allocation79_spill] sm:$0xff] }
 0x2ec   :  { %v3350_v26 = vpop.permute.xlu1 %3349 }
 0x2ed   :  { %v3589_v43 = vrot.slane %v3582_v14, %v9909_v40  ;;  %v7673_v15 = vpop.permute.xlu0 %3377 }
 0x2ee   :  { %3923 = vperm.xlu1 %5438, %v9910_v52   ;;  %v9917_v52 = vld [vmem:[#allocation59_spill] sm:$0xff] }
 0x2ef   :  { %v3596_v20 = vrot.slane %v3589_v43, %v9909_v40  ;;  %3959 = vperm.xlu0 %5437, %v9911_v36   ;;  %v9922_v40 = vld [vmem:[#allocation61_spill] sm:$0xff] }
 0x2f0   :  { %v3358_v19 = vpop.permute.xlu1 %3357 }
 0x2f1   :  { %v3598_v31 = vmin.f32 %v3579_v13, %v3596_v20  ;;  %v7678_v21 = vpop.permute.xlu0 %3385  ;;  %v9919_v20 = vld [vmem:[#allocation72_spill] sm:$0xff] }
 0x2f2   :  { %3931 = vperm.xlu1 %5438, %v9912_v49   ;;  %v3444_v13 = vadd.f32 %v7626_v45, %v9919_v20  ;;  %v9920_v49 = vld [vmem:[#allocation74_spill] sm:$0xff]  ;;  %v3448_v20 = vadd.f32 %v7642_v9, %v9925_v10  ;;  %v3452_v10 = vadd.f32 %v7652_v30, %v9931_v16 }
 0x2f3   :  { %3599 = vst.msk [vmem:[#allocation2 + $0x4] ss:$8 sm:$0x3] %vm6675_vm0, %v3598_v31  ;;  %3967 = vperm.xlu0 %5437, %v9914_v37   ;;  %v3445_v58 = vadd.f32 %v7626_v45, %v9920_v49  ;;  %v9921_v31 = vld [vmem:[#allocation54_spill] sm:$0xff]  ;;  %v3446_v37 = vadd.f32 %v3326_v60, %v9858_v34  ;;  %v3449_v45 = vadd.f32 %v7642_v9, %v9926_v55  ;;  %v9933_v55 = vld [vmem:[#allocation56_spill] sm:$0xff] }
 0x2f4   :  { %v3366_v14 = vpop.permute.xlu1 %3365  ;;  %v3443_v60 = vadd.f32 %v3318_v17, %v9928_v44  ;;  %v3453_v9 = vadd.f32 %v7652_v30, %v9932_v1  ;;  %v9934_v44 = vld [vmem:[#allocation63_spill] sm:$0xff] }
 0x2f5   :  { %v7684_v22 = vpop.permute.xlu0 %3393 }
 0x2f6   :  { %9915 = vst [vmem:[#allocation99_spill] sm:$0xff] %v7684_v22  ;;  %3939 = vperm.xlu1 %5438, %v9916_v51   ;;  %v9923_v51 = vld [vmem:[#allocation71_spill] sm:$0xff] }
 0x2f7   :  { %3975 = vperm.xlu0 %5437, %v9917_v52   ;;  %v3440_v52 = vadd.f32 %v7610_v54, %v9923_v51  ;;  %v3541_v54 = vmin.f32 %v3441_v24, %v3445_v58  ;;  %v9936_v24 = vld [vmem:[#allocation90_spill] sm:$0xff] }
 0x2f8   :  { %v7688_v43 = vpop.permute.xlu1 %3373 }
 0x2f9   :  { %v7690_v36 = vpop.permute.xlu0 %3401  ;;  %v3543_v42 = vmin.f32 %v3541_v54, %v3449_v45  ;;  %v9938_v54 = vld [vmem:[#allocation58_spill] sm:$0xff] }
 0x2fa   :  { %9918 = vst [vmem:[#allocation100_spill] sm:$0xff] %v7690_v36  ;;  %3947 = vperm.xlu1 %5438, %v9921_v31   ;;  %v9927_v31 = vld [vmem:[#allocation77_spill] sm:$0xff]  ;;  %v3504_v36 = vmin.f32 %v3440_v52, %v3444_v13  ;;  %v3457_v13 = vadd.f32 %v7656_v61, %v9936_v24 }
 0x2fb   :  { %3983 = vperm.xlu0 %5437, %v9922_v40   ;;  %v3442_v34 = vadd.f32 %v3318_v17, %v9927_v31  ;;  %v3450_v40 = vadd.f32 %v3334_v62, %v9929_v23  ;;  %v3542_v31 = vmin.f32 %v3443_v60, %v3447_v39  ;;  %v3454_v17 = vadd.f32 %v3342_v46, %v9420_v18  ;;  %v9935_v52 = vld [vmem:[#allocation89_spill] sm:$0xff] }
 0x2fc   :  { %v7708_v49 = vpop.permute.xlu1 %3381  ;;  %v3455_v23 = vadd.f32 %v3342_v46, %v9496_v5  ;;  %v3506_v62 = vmin.f32 %v3504_v36, %v3448_v20  ;;  %v3456_v58 = vadd.f32 %v7656_v61, %v9935_v52  ;;  %v3459_v39 = vadd.f32 %v3350_v26, %v9424_v2  ;;  %v9937_v20 = vld [vmem:[#allocation94_spill] sm:$0xff] }
 0x2fd   :  { %v7714_v51 = vpop.permute.xlu0 %3409  ;;  %v3505_v22 = vmin.f32 %v3442_v34, %v3446_v37  ;;  %v3544_v1 = vmin.f32 %v3542_v31, %v3451_v7  ;;  %v3458_v34 = vadd.f32 %v3350_v26, %v9789_v33  ;;  %v3545_v60 = vmin.f32 %v3543_v42, %v3453_v9 }
 0x2fe   :  { %3955 = vperm.xlu1 %5438, %v9933_v55   ;;  %v3508_v46 = vmin.f32 %v3506_v62, %v3452_v10  ;;  %v3460_v36 = vadd.f32 %v7660_v29, %v9426_v12  ;;  %v3461_v45 = vadd.f32 %v7660_v29, %v9937_v20  ;;  %v3462_v7 = vadd.f32 %v3358_v19, %v9429_v8 }
 0x2ff   :  { %3991 = vperm.xlu0 %5437, %v9934_v44   ;;  %v3507_v30 = vmin.f32 %v3505_v22, %v3450_v40  ;;  %v3546_v44 = vmin.f32 %v3544_v1, %v3455_v23  ;;  %v3463_v22 = vadd.f32 %v3358_v19, %v9502_v50  ;;  %v9939_v40 = vld [vmem:[#allocation65_spill] sm:$0xff]  ;;  %v3547_v31 = vmin.f32 %v3545_v60, %v3457_v13 }
 0x300   :  { %v3390_v16 = vpop.permute.xlu1 %3389  ;;  %v3510_v26 = vmin.f32 %v3508_v46, %v3456_v58  ;;  %v3464_v42 = vadd.f32 %v7664_v47, %v9359_v38  ;;  %v3465_v10 = vadd.f32 %v7664_v47, %v9360_v53  ;;  %v3467_v23 = vadd.f32 %v3366_v14, %v9503_v63  ;;  %v9940_v46 = vld [vmem:[#allocation60_spill] sm:$0xff] }
 0x301   :  { %v7730_v37 = vpop.permute.xlu0 %3417  ;;  %v3509_v61 = vmin.f32 %v3507_v30, %v3454_v17  ;;  %v3548_v62 = vmin.f32 %v3546_v44, %v3459_v39  ;;  %v3466_v17 = vadd.f32 %v3366_v14, %v9431_v59  ;;  %v3549_v30 = vmin.f32 %v3547_v31, %v3461_v45 }
 0x302   :  { %3963 = vperm.xlu1 %5438, %v9938_v54   ;;  %v3512_v19 = vmin.f32 %v3510_v26, %v3460_v36  ;;  %v3468_v58 = vadd.f32 %v7668_v27, %v9434_v41  ;;  %v3469_v13 = vadd.f32 %v7668_v27, %v9505_v57  ;;  %v3470_v44 = vadd.f32 %v7688_v43, %v9437_v25  ;;  %v9949_v54 = vld [vmem:[#allocation100_spill] sm:$0xff] }
 0x303   :  { %3999 = vperm.xlu0 %5437, %v9939_v40   ;;  %v3511_v29 = vmin.f32 %v3509_v61, %v3458_v34  ;;  %v3550_v60 = vmin.f32 %v3548_v62, %v3463_v22  ;;  %v3471_v14 = vadd.f32 %v7688_v43, %v9438_v0  ;;  %v9941_v34 = vld [vmem:[#allocation67_spill] sm:$0xff]  ;;  %v3551_v36 = vmin.f32 %v3549_v30, %v3465_v10 }
 0x304   :  { %v3398_v9 = vpop.permute.xlu1 %3397  ;;  %v3514_v39 = vmin.f32 %v3512_v19, %v3464_v42  ;;  %v3472_v45 = vadd.f32 %v7673_v15, %v9369_v6  ;;  %v3473_v27 = vadd.f32 %v7673_v15, %v9439_v28  ;;  %v3474_v22 = vadd.f32 %v7708_v49, %v9507_v56  ;;  %v9942_v15 = vld [vmem:[#allocation62_spill] sm:$0xff] }
 0x305   :  { %v7746_v1 = vpop.permute.xlu0 %3425  ;;  %v3513_v47 = vmin.f32 %v3511_v29, %v3462_v7  ;;  %v3552_v7 = vmin.f32 %v3550_v60, %v3467_v23  ;;  %v3475_v31 = vadd.f32 %v7708_v49, %v9441_v4  ;;  %v3553_v42 = vmin.f32 %v3551_v36, %v3469_v13 }
 0x306   :  { %3971 = vperm.xlu1 %5438, %v9940_v46   ;;  %v3516_v29 = vmin.f32 %v3514_v39, %v3468_v58  ;;  %v3476_v10 = vadd.f32 %v7678_v21, %v9795_v11  ;;  %v3477_v62 = vadd.f32 %v7678_v21, %v9796_v35  ;;  %v3478_v19 = vadd.f32 %v3390_v16, %v9650_v32  ;;  %v9944_v58 = vld [vmem:[#allocation99_spill] sm:$0xff]  ;;  %v9945_v39 = vld [vmem:[#allocation114_spill] sm:$0xff] }
 0x307   :  { %4007 = vperm.xlu0 %5437, %v9941_v34   ;;  %v3515_v26 = vmin.f32 %v3513_v47, %v3466_v17  ;;  %v3554_v23 = vmin.f32 %v3552_v7, %v3471_v14  ;;  %v3479_v30 = vadd.f32 %v3390_v16, %v9651_v3  ;;  %v9943_v47 = vld [vmem:[#allocation69_spill] sm:$0xff]  ;;  %v3555_v60 = vmin.f32 %v3553_v42, %v3473_v27  ;;  %v9947_v14 = vld [vmem:[#allocation112_spill] sm:$0xff] }
 0x308   :  { %v3406_v61 = vpop.permute.xlu1 %3405  ;;  %v3518_v49 = vmin.f32 %v3516_v29, %v3472_v45  ;;  %v3480_v13 = vadd.f32 %v9944_v58, %v9871_v48  ;;  %v3481_v36 = vadd.f32 %v9944_v58, %v9945_v39  ;;  %v9948_v16 = vld [vmem:[#allocation117_spill] sm:$0xff]  ;;  %v9950_v45 = vld [vmem:[#allocation118_spill] sm:$0xff]  ;;  %v9951_v42 = vld [vmem:[#allocation64_spill] sm:$0xff]  ;;  %v5483_v39 = vmov 6  }
 0x309   :  { %v7766_v43 = vpop.permute.xlu0 %3433  ;;  %v3517_v17 = vmin.f32 %v3515_v26, %v3470_v44  ;;  %v3556_v40 = vmin.f32 %v3554_v23, %v3475_v31  ;;  %v3483_v26 = vadd.f32 %v3398_v9, %v9947_v14  ;;  %v3557_v46 = vmin.f32 %v3555_v60, %v3477_v62  ;;  %v9954_v62 = vld [vmem:[#allocation121_spill] sm:$0xff]  ;;  %v9955_v60 = vld [vmem:[#allocation122_spill] sm:$0xff] }
 0x30a   :  { %3979 = vperm.xlu1 %5438, %v9942_v15   ;;  %v9946_v15 = vld [vmem:[#allocation111_spill] sm:$0xff]  ;;  %v3520_v7 = vmin.f32 %v3518_v49, %v3476_v10  ;;  %v3485_v27 = vadd.f32 %v9949_v54, %v9950_v45  ;;  %v3488_v49 = vadd.f32 %v7714_v51, %v9954_v62  ;;  %v9956_v45 = vld [vmem:[#allocation10_spill] sm:$0xff]  ;;  %v9959_v48 = vld [vmem:[#allocation125_spill] sm:$0xff] }
 0x30b   :  { %4015 = vperm.xlu0 %5437, %v9943_v47   ;;  %v3519_v21 = vmin.f32 %v3517_v17, %v3474_v22  ;;  %v3482_v44 = vadd.f32 %v3398_v9, %v9946_v15  ;;  %v3484_v47 = vadd.f32 %v9949_v54, %v9948_v16  ;;  %v3558_v55 = vmin.f32 %v3556_v40, %v3479_v30  ;;  %v9952_v22 = vld [vmem:[#allocation115_spill] sm:$0xff]  ;;  %v9953_v17 = vld [vmem:[#allocation116_spill] sm:$0xff] }
 0x30c   :  { %v3414_v34 = vpop.permute.xlu1 %3413  ;;  %v3486_v31 = vadd.f32 %v3406_v61, %v9952_v22  ;;  %v3487_v23 = vadd.f32 %v3406_v61, %v9953_v17  ;;  %v3522_v9 = vmin.f32 %v3520_v7, %v3480_v13  ;;  %v3559_v10 = vmin.f32 %v3557_v46, %v3481_v36  ;;  %v9957_v40 = vld [vmem:[#allocation119_spill] sm:$0xff]  ;;  %v9960_v13 = vld [vmem:[#allocation126_spill] sm:$0xff] }
 0x30d   :  { %v3521_v58 = vmin.f32 %v3519_v21, %v3478_v19  ;;  %v3489_v54 = vadd.f32 %v7714_v51, %v9955_v60  ;;  %v3560_v19 = vmin.f32 %v3558_v55, %v3483_v26  ;;  %v3490_v30 = vadd.f32 %v3414_v34, %v9957_v40  ;;  %v9958_v21 = vld [vmem:[#allocation120_spill] sm:$0xff]  ;;  %v9961_v51 = vld [vmem:[#allocation66_spill] sm:$0xff] }
 0x30e   :  { %v7786_v29 = vpop.permute.xlu0 %3625  ;;  %3987 = vperm.xlu1 %5438, %v9951_v42   ;;  %v3491_v22 = vadd.f32 %v3414_v34, %v9958_v21  ;;  %v3524_v61 = vmin.f32 %v3522_v9, %v3484_v47  ;;  %v3561_v17 = vmin.f32 %v3559_v10, %v3485_v27  ;;  %v3492_v46 = vadd.f32 %v7730_v37, %v9959_v48  ;;  %v9963_v26 = vld [vmem:[#allocation124_spill] sm:$0xff]  ;;  %v9964_v47 = vld [vmem:[#allocation129_spill] sm:$0xff]  ;;  %v9965_v9 = vld [vmem:[#allocation130_spill] sm:$0xff] }
 0x30f   :  { %5440 = vset.pattern.permute.xlu0 %v5483_v39  ;;  %v3523_v42 = vmin.f32 %v3521_v58, %v3482_v44  ;;  %v3493_v36 = vadd.f32 %v7730_v37, %v9960_v13  ;;  %v3562_v60 = vmin.f32 %v3560_v19, %v3487_v23  ;;  %v9962_v44 = vld [vmem:[#allocation123_spill] sm:$0xff]  ;;  %v3496_v27 = vadd.f32 %v7746_v1, %v9964_v47  ;;  %v9966_v48 = vld [vmem:[#allocation12_spill] sm:$0xff] }
 0x310   :  { %4207 = vperm.xlu0 %5440, %v9956_v45   ;;  %v3422_v16 = vpop.permute.xlu1 %3421  ;;  %v3526_v62 = vmin.f32 %v3524_v61, %v3488_v49  ;;  %v3563_v34 = vmin.f32 %v3561_v17, %v3489_v54  ;;  %v3497_v10 = vadd.f32 %v7746_v1, %v9965_v9  ;;  %v9969_v17 = vld [vmem:[#allocation68_spill] sm:$0xff]  ;;  %v9970_v49 = vld [vmem:[#allocation133_spill] sm:$0xff]  ;;  %v9971_v61 = vld [vmem:[#allocation134_spill] sm:$0xff] }
 0x311   :  { %v3525_v45 = vmin.f32 %v3523_v42, %v3486_v31  ;;  %v3494_v55 = vadd.f32 %v3422_v16, %v9962_v44  ;;  %v3495_v58 = vadd.f32 %v3422_v16, %v9963_v26  ;;  %v3564_v21 = vmin.f32 %v3562_v60, %v3491_v22  ;;  %v9968_v31 = vld [vmem:[#allocation128_spill] sm:$0xff]  ;;  %v9972_v60 = vld [vmem:[#allocation14_spill] sm:$0xff] }
 0x312   :  { %v7802_v7 = vpop.permute.xlu0 %3637  ;;  %3995 = vperm.xlu1 %5438, %v9961_v51   ;;  %v9967_v51 = vld [vmem:[#allocation127_spill] sm:$0xff]  ;;  %v3528_v19 = vmin.f32 %v3526_v62, %v3492_v46  ;;  %v3565_v44 = vmin.f32 %v3563_v34, %v3493_v36  ;;  %v3500_v54 = vadd.f32 %v7766_v43, %v9970_v49  ;;  %v3501_v1 = vadd.f32 %v7766_v43, %v9971_v61  ;;  %v9974_v34 = vld [vmem:[#allocation132_spill] sm:$0xff] }
 0x313   :  { %v3527_v13 = vmin.f32 %v3525_v45, %v3490_v30  ;;  %v3566_v9 = vmin.f32 %v3564_v21, %v3495_v58  ;;  %v9973_v46 = vld [vmem:[#allocation131_spill] sm:$0xff]  ;;  %v9976_v21 = vld [vmem:[#allocation16_spill] sm:$0xff] }
 0x314   :  { %4219 = vperm.xlu0 %5440, %v9966_v48   ;;  %v3430_v37 = vpop.permute.xlu1 %3429  ;;  %v3530_v45 = vmin.f32 %v3528_v19, %v3496_v27  ;;  %v3567_v22 = vmin.f32 %v3565_v44, %v3497_v10  ;;  %v9977_v10 = vld [vmem:[#allocation8_spill] sm:$0xff] }
 0x315   :  { %v3498_v42 = vadd.f32 %v3430_v37, %v9967_v51  ;;  %v3499_v23 = vadd.f32 %v3430_v37, %v9968_v31  ;;  %v3529_v48 = vmin.f32 %v3527_v13, %v3494_v55  ;;  %v9975_v31 = vld [vmem:[#allocation70_spill] sm:$0xff] }
 0x316   :  { %v7814_v16 = vpop.permute.xlu0 %3645  ;;  %4003 = vperm.xlu1 %5438, %v9969_v17   ;;  %v3532_v49 = vmin.f32 %v3530_v45, %v3500_v54  ;;  %v3569_v51 = vmin.f32 %v3567_v22, %v3501_v1  ;;  %v9979_v45 = vld [vmem:[#allocation7_spill] sm:$0xff] }
 0x317   :  { %v3531_v37 = vmin.f32 %v3529_v48, %v3498_v42  ;;  %v3568_v62 = vmin.f32 %v3566_v9, %v3499_v23  ;;  %v9978_v42 = vld [vmem:[#allocation18_spill] sm:$0xff] }
 0x318   :  { %4227 = vperm.xlu0 %5440, %v9972_v60   ;;  %v3438_v30 = vpop.permute.xlu1 %3437 }
 0x319   :  { %v3502_v36 = vadd.f32 %v3438_v30, %v9973_v46  ;;  %v3503_v47 = vadd.f32 %v3438_v30, %v9974_v34  ;;  %v9993_v34 = vld [vmem:[#allocation80_spill] sm:$0xff] }
 0x31a   :  { %v7824_v17 = vpop.permute.xlu0 %3653  ;;  %4011 = vperm.xlu1 %5438, %v9975_v31  }
 0x31b   :  { %v3533_v43 = vmin.f32 %v3531_v37, %v3502_v36  ;;  %v3570_v13 = vmin.f32 %v3568_v62, %v3503_v47 }
 0x31c   :  { %4235 = vperm.xlu0 %5440, %v9976_v21   ;;  %v9983_v21 = vld [vmem:[#allocation11_spill] sm:$0xff] }
 0x31d   :  { %v3534_v44 = vmin.f32 %v3532_v49, %v3533_v43  ;;  %v3571_v55 = vmin.f32 %v3569_v51, %v3570_v13  ;;  %v3630_v58 = vpop.permute.xlu1 %3629  ;;  %v9980_v49 = vld [vmem:[#allocation20_spill] sm:$0xff]  ;;  %v9981_v43 = vld [vmem:[#allocation9_spill] sm:$0xff]  ;;  %v9982_v13 = vld [vmem:[#allocation22_spill] sm:$0xff] }
 0x31e   :  { %v3662_v27 = vpop.permute.xlu0 %3661  ;;  %5439 = vset.pattern.permute.xlu1 %v5483_v39 }
 0x31f   :  { %v3535_v48 = vrot.slane %v3534_v44, 4  ;;  %v3572_v9 = vrot.slane %v3571_v55, 4  ;;  %4203 = vperm.xlu1 %5439, %v9977_v10  }
 0x320   :  { %4243 = vperm.xlu0 %5440, %v9978_v42  }
 0x321   :  { %v3536_v23 = vmin.f32 %v3534_v44, %v3535_v48  ;;  %v3573_v19 = vmin.f32 %v3571_v55, %v3572_v9  ;;  %v3634_v30 = vpop.permute.xlu1 %3633 }
 0x322   :  { %v7830_v54 = vpop.permute.xlu0 %3669 }
 0x323   :  { %v3537_v1 = vrot.slane %v3536_v23, 2  ;;  %v3574_v47 = vrot.slane %v3573_v19, 2  ;;  %4211 = vperm.xlu1 %5439, %v9979_v45   ;;  %v3602_v45 = vld [vmem:[#allocation3 + $0x4] ss:$8 sm:$0x3] }
 0x324   :  { %4251 = vperm.xlu0 %5440, %v9980_v49   ;;  %v9984_v49 = vld [vmem:[#allocation24_spill] sm:$0xff] }
 0x325   :  { %v3538_v51 = vmin.f32 %v3536_v23, %v3537_v1  ;;  %v3575_v22 = vmin.f32 %v3573_v19, %v3574_v47  ;;  %v3642_v39 = vpop.permute.xlu1 %3641  ;;  %v9985_v23 = vld [vmem:[#allocation135_spill] sm:$0xff] }
 0x326   :  { %v7834_v37 = vpop.permute.xlu0 %3677  ;;  %v9986_v47 = vld [vmem:[#allocation75_spill] sm:$0xff] }
 0x327   :  { %v3539_v62 = vrot.slane %v3538_v51, 1  ;;  %v3576_v36 = vrot.slane %v3575_v22, 1  ;;  %4215 = vperm.xlu1 %5439, %v9981_v43   ;;  %v3758_v60 = vadd.f32 %v7802_v7, %v9986_v47  ;;  %v9992_v47 = vld [vmem:[#allocation79_spill] sm:$0xff] }
 0x328   :  { %4259 = vperm.xlu0 %5440, %v9982_v13   ;;  %v9987_v13 = vld [vmem:[#allocation76_spill] sm:$0xff]  ;;  %v3762_v61 = vadd.f32 %v7814_v16, %v9992_v47  ;;  %v3767_v47 = vadd.f32 %v7824_v17, %v9496_v5 }
 0x329   :  { %v3540_v44 = vmin.f32 %v3538_v51, %v3539_v62  ;;  %v3577_v55 = vmin.f32 %v3575_v22, %v3576_v36  ;;  %v3650_v48 = vpop.permute.xlu1 %3649  ;;  %v3759_v51 = vadd.f32 %v7802_v7, %v9987_v13  ;;  %v9988_v62 = vld [vmem:[#allocation77_spill] sm:$0xff]  ;;  %v3763_v7 = vadd.f32 %v7814_v16, %v9993_v34  ;;  %v9999_v13 = vld [vmem:[#allocation19_spill] sm:$0xff]  ;;  %v10004_v5 = vld [vmem:[#allocation32_spill] sm:$0xff] }
 0x32a   :  { %v7838_v9 = vpop.permute.xlu0 %3685  ;;  %v3754_v36 = vadd.f32 %v3630_v58, %v9988_v62  ;;  %v9997_v34 = vld [vmem:[#allocation17_spill] sm:$0xff] }
 0x32b   :  { %v3605_v42 = vcombine.low %v3540_v44, %v3577_v55  ;;  %4223 = vperm.xlu1 %5439, %v9983_v21   ;;  %v9989_v44 = vld [vmem:[#allocation78_spill] sm:$0xff]  ;;  %v9990_v21 = vld [vmem:[#allocation13_spill] sm:$0xff] }
 0x32c   :  { %4267 = vperm.xlu0 %5440, %v9984_v49   ;;  %v3755_v55 = vadd.f32 %v3630_v58, %v9989_v44  ;;  %v9991_v49 = vld [vmem:[#allocation26_spill] sm:$0xff]  ;;  %v9995_v58 = vld [vmem:[#allocation15_spill] sm:$0xff] }
 0x32d   :  { %v3612_v19 = vrot.slane %v3605_v42, %v9985_v23  ;;  %v3658_v1 = vpop.permute.xlu1 %3657 }
 0x32e   :  { %v7845_v43 = vpop.permute.xlu0 %3693  ;;  %v3854_v62 = vmin.f32 %v3755_v55, %v3759_v51  ;;  %v3771_v55 = vadd.f32 %v3662_v27, %v9424_v2  ;;  %v10007_v2 = vld [vmem:[#allocation21_spill] sm:$0xff] }
 0x32f   :  { %v3619_v22 = vrot.slane %v3612_v19, %v9985_v23  ;;  %4231 = vperm.xlu1 %5439, %v9990_v21   ;;  %v3817_v19 = vmin.f32 %v3754_v36, %v3758_v60  ;;  %v9996_v21 = vld [vmem:[#allocation28_spill] sm:$0xff]  ;;  %v3770_v36 = vadd.f32 %v3662_v27, %v9789_v33  ;;  %v10005_v33 = vld [vmem:[#allocation81_spill] sm:$0xff]  ;;  %v10006_v27 = vld [vmem:[#allocation82_spill] sm:$0xff] }
 0x330   :  { %4275 = vperm.xlu0 %5440, %v9991_v49   ;;  %v3856_v16 = vmin.f32 %v3854_v62, %v3763_v7  ;;  %v10002_v7 = vld [vmem:[#allocation72_spill] sm:$0xff]  ;;  %v3760_v46 = vadd.f32 %v3642_v39, %v10005_v33 }
 0x331   :  { %v3621_v42 = vmin.f32 %v3602_v45, %v3619_v22  ;;  %v3666_v10 = vpop.permute.xlu1 %3665  ;;  %v3766_v22 = vadd.f32 %v7824_v17, %v9420_v18  ;;  %v3819_v44 = vmin.f32 %v3817_v19, %v3762_v61  ;;  %v10000_v18 = vld [vmem:[#allocation71_spill] sm:$0xff]  ;;  %v10001_v61 = vld [vmem:[#allocation73_spill] sm:$0xff]  ;;  %v3756_v19 = vadd.f32 %v3634_v30, %v10002_v7  ;;  %v10010_v7 = vld [vmem:[#allocation34_spill] sm:$0xff] }
 0x332   :  { %v7854_v31 = vpop.permute.xlu0 %3701  ;;  %v3752_v17 = vadd.f32 %v7786_v29, %v10000_v18  ;;  %v3753_v62 = vadd.f32 %v7786_v29, %v10001_v61  ;;  %v3775_v29 = vadd.f32 %v7830_v54, %v9502_v50 }
 0x333   :  { %3622 = vst.msk [vmem:[#allocation3 + $0x4] ss:$8 sm:$0x3] %vm6675_vm0, %v3621_v42  ;;  %4239 = vperm.xlu1 %5439, %v9995_v58   ;;  %v9998_v42 = vld [vmem:[#allocation30_spill] sm:$0xff]  ;;  %v3858_v58 = vmin.f32 %v3856_v16, %v3767_v47 }
 0x334   :  { %4283 = vperm.xlu0 %5440, %v9996_v21   ;;  %v3821_v21 = vmin.f32 %v3819_v44, %v3766_v22  ;;  %v3761_v44 = vadd.f32 %v3642_v39, %v10006_v27 }
 0x335   :  { %v3674_v49 = vpop.permute.xlu1 %3673  ;;  %v3860_v16 = vmin.f32 %v3858_v58, %v3771_v55  ;;  %v3768_v58 = vadd.f32 %v3658_v1, %v9935_v52 }
 0x336   :  { %v7864_v45 = vpop.permute.xlu0 %3709  ;;  %v3823_v22 = vmin.f32 %v3821_v21, %v3770_v36  ;;  %v3769_v36 = vadd.f32 %v3658_v1, %v9936_v24  ;;  %v3779_v1 = vadd.f32 %v7834_v37, %v9503_v63 }
 0x337   :  { %4247 = vperm.xlu1 %5439, %v9997_v34   ;;  %v3862_v50 = vmin.f32 %v3860_v16, %v3775_v29  ;;  %v3783_v29 = vadd.f32 %v7838_v9, %v9438_v0 }
 0x338   :  { %4291 = vperm.xlu0 %5440, %v9998_v42   ;;  %v10003_v42 = vld [vmem:[#allocation74_spill] sm:$0xff] }
 0x339   :  { %v3682_v60 = vpop.permute.xlu1 %3681  ;;  %v3757_v34 = vadd.f32 %v3634_v30, %v10003_v42  ;;  %v3816_v30 = vmin.f32 %v3752_v17, %v3756_v19  ;;  %v10009_v42 = vld [vmem:[#allocation86_spill] sm:$0xff]  ;;  %v10012_v19 = vld [vmem:[#allocation36_spill] sm:$0xff]  ;;  %v3864_v16 = vmin.f32 %v3862_v50, %v3779_v1  ;;  %v3787_v50 = vadd.f32 %v7845_v43, %v9441_v4 }
 0x33a   :  { %v7872_v51 = vpop.permute.xlu0 %3717  ;;  %v3765_v33 = vadd.f32 %v3650_v48, %v10009_v42 }
 0x33b   :  { %4255 = vperm.xlu1 %5439, %v9999_v13   ;;  %v3774_v13 = vadd.f32 %v7830_v54, %v9429_v8  ;;  %v3853_v61 = vmin.f32 %v3753_v62, %v3757_v34  ;;  %v3818_v27 = vmin.f32 %v3816_v30, %v3760_v46  ;;  %v3772_v62 = vadd.f32 %v3666_v10, %v9426_v12  ;;  %v10013_v30 = vld [vmem:[#allocation25_spill] sm:$0xff] }
 0x33c   :  { %4299 = vperm.xlu0 %5440, %v10004_v5   ;;  %v10008_v5 = vld [vmem:[#allocation85_spill] sm:$0xff]  ;;  %v3778_v46 = vadd.f32 %v7834_v37, %v9431_v59 }
 0x33d   :  { %v3690_v23 = vpop.permute.xlu1 %3689  ;;  %v3764_v18 = vadd.f32 %v3650_v48, %v10008_v5  ;;  %v3855_v21 = vmin.f32 %v3853_v61, %v3761_v44  ;;  %v3825_v54 = vmin.f32 %v3823_v22, %v3774_v13  ;;  %v3773_v48 = vadd.f32 %v3666_v10, %v9937_v20 }
 0x33e   :  { %v7886_v47 = vpop.permute.xlu0 %3725  ;;  %v3776_v22 = vadd.f32 %v3674_v49, %v9359_v38  ;;  %v3782_v10 = vadd.f32 %v7838_v9, %v9437_v25  ;;  %v3784_v9 = vadd.f32 %v3690_v23, %v9369_v6 }
 0x33f   :  { %4263 = vperm.xlu1 %5439, %v10007_v2   ;;  %v10011_v2 = vld [vmem:[#allocation23_spill] sm:$0xff]  ;;  %v3820_v34 = vmin.f32 %v3818_v27, %v3764_v18  ;;  %v3857_v17 = vmin.f32 %v3855_v21, %v3765_v33  ;;  %v3777_v18 = vadd.f32 %v3674_v49, %v9360_v53  ;;  %v3827_v27 = vmin.f32 %v3825_v54, %v3778_v46 }
 0x340   :  { %4307 = vperm.xlu0 %5440, %v10010_v7   ;;  %v3786_v49 = vadd.f32 %v7845_v43, %v9507_v56  ;;  %v10017_v7 = vld [vmem:[#allocation113_spill] sm:$0xff] }
 0x341   :  { %v3698_v39 = vpop.permute.xlu1 %3697  ;;  %v3822_v44 = vmin.f32 %v3820_v34, %v3768_v58  ;;  %v3859_v13 = vmin.f32 %v3857_v17, %v3769_v36  ;;  %v3780_v58 = vadd.f32 %v3682_v60, %v9434_v41  ;;  %v3781_v36 = vadd.f32 %v3682_v60, %v9505_v57  ;;  %v10014_v34 = vld [vmem:[#allocation43_spill] sm:$0xff] }
 0x342   :  { %v7898_v55 = vpop.permute.xlu0 %3733  ;;  %v3829_v1 = vmin.f32 %v3827_v27, %v3782_v10  ;;  %v3790_v60 = vadd.f32 %v7854_v31, %v9650_v32  ;;  %v3794_v27 = vadd.f32 %v7864_v45, %v9946_v15 }
 0x343   :  { %4271 = vperm.xlu1 %5439, %v10011_v2   ;;  %v3824_v37 = vmin.f32 %v3822_v44, %v3772_v62  ;;  %v3861_v21 = vmin.f32 %v3859_v13, %v3773_v48  ;;  %v3785_v62 = vadd.f32 %v3690_v23, %v9439_v28  ;;  %v3866_v44 = vmin.f32 %v3864_v16, %v3783_v29  ;;  %v10024_v2 = vld [vmem:[#allocation41_spill] sm:$0xff] }
 0x344   :  { %4315 = vperm.xlu0 %5440, %v10012_v19   ;;  %v3791_v13 = vadd.f32 %v7854_v31, %v9651_v3  ;;  %v3831_v23 = vmin.f32 %v3829_v1, %v3786_v49  ;;  %v3795_v16 = vadd.f32 %v7864_v45, %v9947_v14  ;;  %v10078_v14 = vld [vmem:[#allocation84_spill] sm:$0xff] }
 0x345   :  { %v3706_v61 = vpop.permute.xlu1 %3705  ;;  %v3826_v17 = vmin.f32 %v3824_v37, %v3776_v22  ;;  %v3863_v46 = vmin.f32 %v3861_v21, %v3777_v18  ;;  %v3788_v22 = vadd.f32 %v3698_v39, %v9795_v11  ;;  %v3789_v18 = vadd.f32 %v3698_v39, %v9796_v35  ;;  %v10016_v37 = vld [vmem:[#allocation38_spill] sm:$0xff] }
 0x346   :  { %v7910_v33 = vpop.permute.xlu0 %3741  ;;  %v3868_v21 = vmin.f32 %v3866_v44, %v3787_v50  ;;  %v3833_v39 = vmin.f32 %v3831_v23, %v3790_v60  ;;  %v10020_v50 = vld [vmem:[#allocation116_spill] sm:$0xff]  ;;  %v10021_v44 = vld [vmem:[#allocation29_spill] sm:$0xff]  ;;  %v3802_v60 = vadd.f32 %v7886_v47, %v9957_v40 }
 0x347   :  { %4279 = vperm.xlu1 %5439, %v10013_v30   ;;  %v3828_v43 = vmin.f32 %v3826_v17, %v3780_v58  ;;  %v3865_v19 = vmin.f32 %v3863_v46, %v3781_v36  ;;  %v3792_v58 = vadd.f32 %v3706_v61, %v10017_v7  ;;  %v10018_v36 = vld [vmem:[#allocation114_spill] sm:$0xff]  ;;  %v3799_v1 = vadd.f32 %v7872_v51, %v10020_v50  ;;  %v10072_v40 = vld [vmem:[#allocation80_spill] sm:$0xff] }
 0x348   :  { %4323 = vperm.xlu0 %5440, %v10014_v34   ;;  %v10015_v34 = vld [vmem:[#allocation27_spill] sm:$0xff]  ;;  %v3793_v17 = vadd.f32 %v3706_v61, %v10018_v36  ;;  %v3835_v61 = vmin.f32 %v3833_v39, %v3794_v27  ;;  %v3807_v27 = vadd.f32 %v7898_v55, %v9963_v26 }
 0x349   :  { %v3714_v54 = vpop.permute.xlu1 %3713  ;;  %v3830_v31 = vmin.f32 %v3828_v43, %v3784_v9  ;;  %v3867_v29 = vmin.f32 %v3865_v19, %v3785_v62  ;;  %v10022_v9 = vld [vmem:[#allocation117_spill] sm:$0xff]  ;;  %v10023_v62 = vld [vmem:[#allocation118_spill] sm:$0xff] }
 0x34a   :  { %v7926_v48 = vpop.permute.xlu0 %3749  ;;  %v3796_v19 = vadd.f32 %v3714_v54, %v10022_v9  ;;  %v3797_v43 = vadd.f32 %v3714_v54, %v10023_v62  ;;  %v10074_v9 = vld [vmem:[#allocation73_spill] sm:$0xff] }
 0x34b   :  { %4287 = vperm.xlu1 %5439, %v10015_v34   ;;  %v3870_v34 = vmin.f32 %v3868_v21, %v3791_v13  ;;  %v3832_v45 = vmin.f32 %v3830_v31, %v3788_v22  ;;  %v3869_v30 = vmin.f32 %v3867_v29, %v3789_v18  ;;  %v10025_v13 = vld [vmem:[#allocation120_spill] sm:$0xff]  ;;  %v10027_v18 = vld [vmem:[#allocation122_spill] sm:$0xff] }
 0x34c   :  { %4469 = vperm.xlu0 %5440, %v10016_v37   ;;  %v10019_v37 = vld [vmem:[#allocation115_spill] sm:$0xff]  ;;  %v3803_v23 = vadd.f32 %v7886_v47, %v10025_v13 }
 0x34d   :  { %v3722_v10 = vpop.permute.xlu1 %3721  ;;  %v3798_v49 = vadd.f32 %v7872_v51, %v10019_v37  ;;  %v3872_v36 = vmin.f32 %v3870_v34, %v3795_v16  ;;  %v3834_v51 = vmin.f32 %v3832_v45, %v3792_v58  ;;  %v3871_v50 = vmin.f32 %v3869_v30, %v3793_v17  ;;  %v10029_v16 = vld [vmem:[#allocation31_spill] sm:$0xff]  ;;  %v10030_v58 = vld [vmem:[#allocation125_spill] sm:$0xff]  ;;  %v10031_v17 = vld [vmem:[#allocation126_spill] sm:$0xff] }
 0x34e   :  { %v7942_v46 = vpop.permute.xlu0 %3895  ;;  %v3801_v31 = vadd.f32 %v3722_v10, %v10027_v18  ;;  %v10071_v13 = vld [vmem:[#allocation79_spill] sm:$0xff] }
 0x34f   :  { %4295 = vperm.xlu1 %5439, %v10021_v44   ;;  %v10026_v44 = vld [vmem:[#allocation121_spill] sm:$0xff]  ;;  %v3837_v54 = vmin.f32 %v3835_v61, %v3798_v49  ;;  %v3874_v62 = vmin.f32 %v3872_v36, %v3799_v1  ;;  %v3836_v47 = vmin.f32 %v3834_v51, %v3796_v19  ;;  %v3873_v39 = vmin.f32 %v3871_v50, %v3797_v43  ;;  %v10033_v49 = vld [vmem:[#allocation127_spill] sm:$0xff]  ;;  %v10034_v1 = vld [vmem:[#allocation128_spill] sm:$0xff] }
 0x350   :  { %4477 = vperm.xlu0 %5440, %v10024_v2   ;;  %v3800_v22 = vadd.f32 %v3722_v10, %v10026_v44  ;;  %v10028_v2 = vld [vmem:[#allocation123_spill] sm:$0xff]  ;;  %v10032_v44 = vld [vmem:[#allocation44_spill] sm:$0xff]  ;;  %v3810_v36 = vadd.f32 %v7910_v33, %v10033_v49  ;;  %v3811_v61 = vadd.f32 %v7910_v33, %v10034_v1  ;;  %v10036_v50 = vld [vmem:[#allocation130_spill] sm:$0xff] }
 0x351   :  { %v3730_v21 = vpop.permute.xlu1 %3729  ;;  %v3806_v34 = vadd.f32 %v7898_v55, %v10028_v2  ;;  %v3839_v10 = vmin.f32 %v3837_v54, %v3802_v60  ;;  %v3876_v18 = vmin.f32 %v3874_v62, %v3803_v23  ;;  %v3875_v26 = vmin.f32 %v3873_v39, %v3801_v31  ;;  %v10038_v62 = vld [vmem:[#allocation131_spill] sm:$0xff]  ;;  %v10039_v23 = vld [vmem:[#allocation132_spill] sm:$0xff] }
 0x352   :  { %v7958_v29 = vpop.permute.xlu0 %3903  ;;  %v3804_v30 = vadd.f32 %v3730_v21, %v10030_v58  ;;  %v3805_v45 = vadd.f32 %v3730_v21, %v10031_v17  ;;  %v3838_v55 = vmin.f32 %v3836_v47, %v3800_v22  ;;  %v3814_v60 = vadd.f32 %v7926_v48, %v10038_v62  ;;  %v10040_v22 = vld [vmem:[#allocation46_spill] sm:$0xff] }
 0x353   :  { %4303 = vperm.xlu1 %5439, %v10029_v16   ;;  %v10035_v16 = vld [vmem:[#allocation129_spill] sm:$0xff]  ;;  %v3841_v21 = vmin.f32 %v3839_v10, %v3806_v34  ;;  %v3878_v17 = vmin.f32 %v3876_v18, %v3807_v27  ;;  %v3815_v54 = vadd.f32 %v7926_v48, %v10039_v23  ;;  %v10042_v18 = vld [vmem:[#allocation134_spill] sm:$0xff] }
 0x354   :  { %4485 = vperm.xlu0 %5440, %v10032_v44   ;;  %v10037_v44 = vld [vmem:[#allocation33_spill] sm:$0xff]  ;;  %v3840_v33 = vmin.f32 %v3838_v55, %v3804_v30  ;;  %v3877_v1 = vmin.f32 %v3875_v26, %v3805_v45  ;;  %v10044_v26 = vld [vmem:[#allocation48_spill] sm:$0xff]  ;;  %v10070_v23 = vld [vmem:[#allocation78_spill] sm:$0xff] }
 0x355   :  { %v3738_v2 = vpop.permute.xlu1 %3737  ;;  %v3843_v31 = vmin.f32 %v3841_v21, %v3810_v36  ;;  %v3880_v47 = vmin.f32 %v3878_v17, %v3811_v61  ;;  %v4021_v58 = vadd.f32 %v7942_v46, %v10070_v23  ;;  %v10077_v23 = vld [vmem:[#allocation83_spill] sm:$0xff] }
 0x356   :  { %v3808_v19 = vadd.f32 %v3738_v2, %v10035_v16  ;;  %v3809_v43 = vadd.f32 %v3738_v2, %v10036_v50  ;;  %v7974_v51 = vpop.permute.xlu0 %3911  ;;  %v10041_v16 = vld [vmem:[#allocation133_spill] sm:$0xff] }
 0x357   :  { %4311 = vperm.xlu1 %5439, %v10037_v44   ;;  %v10043_v44 = vld [vmem:[#allocation35_spill] sm:$0xff]  ;;  %v3845_v62 = vmin.f32 %v3843_v31, %v3814_v60  ;;  %v3882_v49 = vmin.f32 %v3880_v47, %v3815_v54  ;;  %v10047_v54 = vld [vmem:[#allocation37_spill] sm:$0xff]  ;;  %v10048_v47 = vld [vmem:[#allocation52_spill] sm:$0xff] }
 0x358   :  { %4493 = vperm.xlu0 %5440, %v10040_v22   ;;  %v3842_v2 = vmin.f32 %v3840_v33, %v3808_v19  ;;  %v3879_v50 = vmin.f32 %v3877_v1, %v3809_v43  ;;  %v10045_v1 = vld [vmem:[#allocation40_spill] sm:$0xff]  ;;  %v10046_v43 = vld [vmem:[#allocation50_spill] sm:$0xff]  ;;  %v10054_v22 = vld [vmem:[#allocation45_spill] sm:$0xff] }
 0x359   :  { %v3746_v39 = vpop.permute.xlu1 %3745 }
 0x35a   :  { %v3812_v34 = vadd.f32 %v3746_v39, %v10041_v16  ;;  %v3813_v27 = vadd.f32 %v3746_v39, %v10042_v18  ;;  %v7984_v10 = vpop.permute.xlu0 %3919  ;;  %v10068_v16 = vld [vmem:[#allocation64_spill] sm:$0xff] }
 0x35b   :  { %4319 = vperm.xlu1 %5439, %v10043_v44   ;;  %v10051_v44 = vld [vmem:[#allocation42_spill] sm:$0xff] }
 0x35c   :  { %v3844_v48 = vmin.f32 %v3842_v2, %v3812_v34  ;;  %v3881_v30 = vmin.f32 %v3879_v50, %v3813_v27  ;;  %4501 = vperm.xlu0 %5440, %v10044_v26   ;;  %v10049_v27 = vld [vmem:[#allocation39_spill] sm:$0xff]  ;;  %v4157_v26 = vld [vmem:[#allocation2 + $0x5] ss:$8 sm:$0x3] }
 0x35d   :  { %v3892_v45 = vpop.permute.xlu1 %3891 }
 0x35e   :  { %v3846_v36 = vmin.f32 %v3844_v48, %v3845_v62  ;;  %v3883_v17 = vmin.f32 %v3881_v30, %v3882_v49  ;;  %v7988_v61 = vpop.permute.xlu0 %3927 }
 0x35f   :  { %4327 = vperm.xlu1 %5439, %v10045_v1   ;;  %v10050_v1 = vld [vmem:[#allocation54_spill] sm:$0xff] }
 0x360   :  { %v3847_v55 = vrot.slane %v3846_v36, 4  ;;  %v3884_v19 = vrot.slane %v3883_v17, 4  ;;  %4509 = vperm.xlu0 %5440, %v10046_v43  }
 0x361   :  { %v3900_v21 = vpop.permute.xlu1 %3899 }
 0x362   :  { %v3848_v33 = vmin.f32 %v3846_v36, %v3847_v55  ;;  %v3885_v39 = vmin.f32 %v3883_v17, %v3884_v19  ;;  %v7992_v60 = vpop.permute.xlu0 %3935 }
 0x363   :  { %4473 = vperm.xlu1 %5439, %v10047_v54  }
 0x364   :  { %v3849_v50 = vrot.slane %v3848_v33, 2  ;;  %v3886_v31 = vrot.slane %v3885_v39, 2  ;;  %4517 = vperm.xlu0 %5440, %v10048_v47   ;;  %v10052_v47 = vld [vmem:[#allocation56_spill] sm:$0xff] }
 0x365   :  { %v3908_v49 = vpop.permute.xlu1 %3907 }
 0x366   :  { %v3850_v62 = vmin.f32 %v3848_v33, %v3849_v50  ;;  %v3887_v2 = vmin.f32 %v3885_v39, %v3886_v31  ;;  %v7996_v34 = vpop.permute.xlu0 %3943  ;;  %v10053_v39 = vld [vmem:[#allocation135_spill] sm:$0xff] }
 0x367   :  { %4481 = vperm.xlu1 %5439, %v10049_v27   ;;  %v10055_v27 = vld [vmem:[#allocation58_spill] sm:$0xff] }
 0x368   :  { %v3851_v48 = vrot.slane %v3850_v62, 1  ;;  %v3888_v30 = vrot.slane %v3887_v2, 1  ;;  %4525 = vperm.xlu0 %5440, %v10050_v1  }
 0x369   :  { %v3916_v36 = vpop.permute.xlu1 %3915 }
 0x36a   :  { %v3852_v17 = vmin.f32 %v3850_v62, %v3851_v48  ;;  %v3889_v55 = vmin.f32 %v3887_v2, %v3888_v30  ;;  %v8000_v19 = vpop.permute.xlu0 %3951  ;;  %v10056_v30 = vld [vmem:[#allocation47_spill] sm:$0xff] }
 0x36b   :  { %4489 = vperm.xlu1 %5439, %v10051_v44   ;;  %v10060_v44 = vld [vmem:[#allocation49_spill] sm:$0xff] }
 0x36c   :  { %v4160_v43 = vcombine.low %v3852_v17, %v3889_v55  ;;  %4533 = vperm.xlu0 %5440, %v10052_v47   ;;  %v10058_v55 = vld [vmem:[#allocation60_spill] sm:$0xff] }
 0x36d   :  { %v3924_v33 = vpop.permute.xlu1 %3923 }
 0x36e   :  { %v4167_v50 = vrot.slane %v4160_v43, %v10053_v39  ;;  %v8005_v31 = vpop.permute.xlu0 %3959 }
 0x36f   :  { %4497 = vperm.xlu1 %5439, %v10054_v22   ;;  %v10061_v22 = vld [vmem:[#allocation62_spill] sm:$0xff] }
 0x370   :  { %v4174_v1 = vrot.slane %v4167_v50, %v10053_v39  ;;  %4541 = vperm.xlu0 %5440, %v10055_v27   ;;  %v10067_v39 = vld [vmem:[#allocation74_spill] sm:$0xff] }
 0x371   :  { %v3932_v62 = vpop.permute.xlu1 %3931  ;;  %v4023_v18 = vadd.f32 %v3900_v21, %v10067_v39  ;;  %v10075_v39 = vld [vmem:[#allocation81_spill] sm:$0xff] }
 0x372   :  { %v4176_v2 = vmin.f32 %v4157_v26, %v4174_v1  ;;  %v8010_v48 = vpop.permute.xlu0 %3967  ;;  %v10063_v26 = vld [vmem:[#allocation75_spill] sm:$0xff] }
 0x373   :  { %4505 = vperm.xlu1 %5439, %v10056_v30   ;;  %v4024_v1 = vadd.f32 %v7958_v29, %v10063_v26  ;;  %v10064_v30 = vld [vmem:[#allocation76_spill] sm:$0xff]  ;;  %v4028_v26 = vadd.f32 %v7974_v51, %v10071_v13  ;;  %v4032_v13 = vadd.f32 %v7984_v10, %v10077_v23 }
 0x374   :  { %4177 = vst.msk [vmem:[#allocation2 + $0x5] ss:$8 sm:$0x3] %vm6675_vm0, %v4176_v2  ;;  %4549 = vperm.xlu0 %5440, %v10058_v55   ;;  %v4025_v54 = vadd.f32 %v7958_v29, %v10064_v30  ;;  %v10065_v2 = vld [vmem:[#allocation51_spill] sm:$0xff]  ;;  %v10066_v55 = vld [vmem:[#allocation72_spill] sm:$0xff]  ;;  %v4029_v29 = vadd.f32 %v7974_v51, %v10072_v40  ;;  %v4033_v51 = vadd.f32 %v7984_v10, %v10078_v14  ;;  %v10079_v40 = vld [vmem:[#allocation53_spill] sm:$0xff] }
 0x375   :  { %v3940_v43 = vpop.permute.xlu1 %3939  ;;  %v4022_v17 = vadd.f32 %v3900_v21, %v10066_v55  ;;  %v4019_v21 = vadd.f32 %v3892_v45, %v10074_v9  ;;  %v10080_v9 = vld [vmem:[#allocation66_spill] sm:$0xff] }
 0x376   :  { %v8016_v47 = vpop.permute.xlu0 %3975 }
 0x377   :  { %10059 = vst [vmem:[#allocation104_spill] sm:$0xff] %v8016_v47  ;;  %4513 = vperm.xlu1 %5439, %v10060_v44   ;;  %v10069_v44 = vld [vmem:[#allocation77_spill] sm:$0xff] }
 0x378   :  { %4557 = vperm.xlu0 %5440, %v10061_v22   ;;  %v4020_v22 = vadd.f32 %v7942_v46, %v10069_v44  ;;  %v4120_v46 = vmin.f32 %v4021_v58, %v4025_v54  ;;  %v10082_v54 = vld [vmem:[#allocation88_spill] sm:$0xff] }
 0x379   :  { %v8020_v50 = vpop.permute.xlu1 %3947 }
 0x37a   :  { %v8022_v27 = vpop.permute.xlu0 %3983  ;;  %v4083_v7 = vmin.f32 %v4020_v22, %v4024_v1  ;;  %v10081_v22 = vld [vmem:[#allocation87_spill] sm:$0xff]  ;;  %v4037_v1 = vadd.f32 %v7988_v61, %v10082_v54 }
 0x37b   :  { %10062 = vst [vmem:[#allocation96_spill] sm:$0xff] %v8022_v27  ;;  %4521 = vperm.xlu1 %5439, %v10065_v2   ;;  %v10073_v2 = vld [vmem:[#allocation71_spill] sm:$0xff]  ;;  %v10076_v27 = vld [vmem:[#allocation82_spill] sm:$0xff]  ;;  %v4036_v58 = vadd.f32 %v7988_v61, %v10081_v22 }
 0x37c   :  { %4565 = vperm.xlu0 %5440, %v10068_v16   ;;  %v4018_v55 = vadd.f32 %v3892_v45, %v10073_v2  ;;  %v4026_v16 = vadd.f32 %v3908_v49, %v10075_v39  ;;  %v4027_v37 = vadd.f32 %v3908_v49, %v10076_v27  ;;  %v4119_v2 = vmin.f32 %v4019_v21, %v4023_v18 }
 0x37d   :  { %v8040_v30 = vpop.permute.xlu1 %3955  ;;  %v4030_v45 = vadd.f32 %v3916_v36, %v10008_v5  ;;  %v4031_v39 = vadd.f32 %v3916_v36, %v10009_v42  ;;  %v4085_v49 = vmin.f32 %v4083_v7, %v4028_v26  ;;  %v4122_v27 = vmin.f32 %v4120_v46, %v4029_v29  ;;  %v10083_v26 = vld [vmem:[#allocation92_spill] sm:$0xff]  ;;  %v10084_v46 = vld [vmem:[#allocation55_spill] sm:$0xff] }
 0x37e   :  { %v8046_v44 = vpop.permute.xlu0 %3991  ;;  %v4082_v47 = vmin.f32 %v4018_v55, %v4022_v17  ;;  %v4121_v14 = vmin.f32 %v4119_v2, %v4027_v37  ;;  %v4034_v17 = vadd.f32 %v3924_v33, %v9935_v52  ;;  %v4035_v18 = vadd.f32 %v3924_v33, %v9936_v24 }
 0x37f   :  { %4529 = vperm.xlu1 %5439, %v10079_v40   ;;  %v4087_v36 = vmin.f32 %v4085_v49, %v4032_v13  ;;  %v4124_v21 = vmin.f32 %v4122_v27, %v4033_v51  ;;  %v4040_v7 = vadd.f32 %v7992_v60, %v9429_v8  ;;  %v4041_v29 = vadd.f32 %v7992_v60, %v10083_v26 }
 0x380   :  { %4573 = vperm.xlu0 %5440, %v10080_v9   ;;  %v4084_v10 = vmin.f32 %v4082_v47, %v4026_v16  ;;  %v4123_v9 = vmin.f32 %v4121_v14, %v4031_v39  ;;  %v4038_v37 = vadd.f32 %v3932_v62, %v9426_v12  ;;  %v4039_v16 = vadd.f32 %v3932_v62, %v9937_v20  ;;  %v10085_v47 = vld [vmem:[#allocation68_spill] sm:$0xff] }
 0x381   :  { %v3964_v23 = vpop.permute.xlu1 %3963  ;;  %v4089_v33 = vmin.f32 %v4087_v36, %v4036_v58  ;;  %v4126_v2 = vmin.f32 %v4124_v21, %v4037_v1  ;;  %v4044_v13 = vadd.f32 %v7996_v34, %v9431_v59  ;;  %v4045_v27 = vadd.f32 %v7996_v34, %v9503_v63  ;;  %v10086_v36 = vld [vmem:[#allocation57_spill] sm:$0xff] }
 0x382   :  { %v8062_v55 = vpop.permute.xlu0 %3999  ;;  %v4086_v61 = vmin.f32 %v4084_v10, %v4030_v45  ;;  %v4125_v49 = vmin.f32 %v4123_v9, %v4035_v18  ;;  %v4042_v45 = vadd.f32 %v3940_v43, %v9359_v38  ;;  %v4043_v14 = vadd.f32 %v3940_v43, %v9360_v53 }
 0x383   :  { %4537 = vperm.xlu1 %5439, %v10084_v46   ;;  %v4091_v62 = vmin.f32 %v4089_v33, %v4040_v7  ;;  %v4128_v10 = vmin.f32 %v4126_v2, %v4041_v29  ;;  %v4048_v58 = vadd.f32 %v8000_v19, %v9437_v25  ;;  %v4049_v1 = vadd.f32 %v8000_v19, %v9438_v0 }
 0x384   :  { %4581 = vperm.xlu0 %5440, %v10085_v47   ;;  %v4088_v60 = vmin.f32 %v4086_v61, %v4034_v17  ;;  %v4127_v21 = vmin.f32 %v4125_v49, %v4039_v16  ;;  %v4046_v9 = vadd.f32 %v8020_v50, %v9434_v41  ;;  %v4047_v43 = vadd.f32 %v8020_v50, %v9505_v57  ;;  %v10087_v17 = vld [vmem:[#allocation70_spill] sm:$0xff] }
 0x385   :  { %v3972_v51 = vpop.permute.xlu1 %3971  ;;  %v4093_v18 = vmin.f32 %v4091_v62, %v4044_v13  ;;  %v4130_v7 = vmin.f32 %v4128_v10, %v4045_v27  ;;  %v4052_v29 = vadd.f32 %v8005_v31, %v9507_v56  ;;  %v4053_v19 = vadd.f32 %v8005_v31, %v9441_v4  ;;  %v10088_v31 = vld [vmem:[#allocation59_spill] sm:$0xff]  ;;  %v10093_v47 = vld [vmem:[#allocation114_spill] sm:$0xff] }
 0x386   :  { %v8078_v39 = vpop.permute.xlu0 %4007  ;;  %v4090_v34 = vmin.f32 %v4088_v60, %v4038_v37  ;;  %v4129_v37 = vmin.f32 %v4127_v21, %v4043_v14  ;;  %v4050_v16 = vadd.f32 %v8040_v30, %v9369_v6  ;;  %v4051_v2 = vadd.f32 %v8040_v30, %v9439_v28 }
 0x387   :  { %4545 = vperm.xlu1 %5439, %v10086_v36   ;;  %v4095_v60 = vmin.f32 %v4093_v18, %v4048_v58  ;;  %v4132_v13 = vmin.f32 %v4130_v7, %v4049_v1  ;;  %v4056_v27 = vadd.f32 %v8010_v48, %v9650_v32  ;;  %v4057_v49 = vadd.f32 %v8010_v48, %v9651_v3  ;;  %v10089_v1 = vld [vmem:[#allocation104_spill] sm:$0xff] }
 0x388   :  { %4589 = vperm.xlu0 %5440, %v10087_v17   ;;  %v4092_v33 = vmin.f32 %v4090_v34, %v4042_v45  ;;  %v4131_v14 = vmin.f32 %v4129_v37, %v4047_v43  ;;  %v4054_v62 = vadd.f32 %v3964_v23, %v9795_v11  ;;  %v4055_v10 = vadd.f32 %v3964_v23, %v9796_v35  ;;  %v10090_v18 = vld [vmem:[#allocation112_spill] sm:$0xff] }
 0x389   :  { %v3980_v61 = vpop.permute.xlu1 %3979  ;;  %v9016_v34 = vmov 7   ;;  %v4097_v30 = vmin.f32 %v4095_v60, %v4052_v29  ;;  %v4134_v58 = vmin.f32 %v4132_v13, %v4053_v19  ;;  %v4060_v21 = vadd.f32 %v10089_v1, %v9946_v15  ;;  %v10091_v48 = vld [vmem:[#allocation8_spill] sm:$0xff] }
 0x38a   :  { %v8098_v50 = vpop.permute.xlu0 %4015  ;;  %v4094_v45 = vmin.f32 %v4092_v33, %v4046_v9  ;;  %v4061_v7 = vadd.f32 %v10089_v1, %v10090_v18  ;;  %v4133_v43 = vmin.f32 %v4131_v14, %v4051_v2  ;;  %v10092_v33 = vld [vmem:[#allocation113_spill] sm:$0xff]  ;;  %v4059_v23 = vadd.f32 %v3972_v51, %v10093_v47  ;;  %v10095_v29 = vld [vmem:[#allocation96_spill] sm:$0xff] }
 0x38b   :  { %4553 = vperm.xlu1 %5439, %v10088_v31   ;;  %v4058_v37 = vadd.f32 %v3972_v51, %v10092_v33  ;;  %v4099_v31 = vmin.f32 %v4097_v30, %v4056_v27  ;;  %v4136_v36 = vmin.f32 %v4134_v58, %v4057_v49  ;;  %v10096_v60 = vld [vmem:[#allocation116_spill] sm:$0xff]  ;;  %v10097_v1 = vld [vmem:[#allocation61_spill] sm:$0xff]  ;;  %v10100_v27 = vld [vmem:[#allocation119_spill] sm:$0xff] }
 0x38c   :  { %5441 = vset.pattern.permute.xlu0 %v9016_v34  ;;  %v4096_v9 = vmin.f32 %v4094_v45, %v4050_v16  ;;  %v10094_v34 = vld [vmem:[#allocation115_spill] sm:$0xff]  ;;  %v4065_v13 = vadd.f32 %v10095_v29, %v10096_v60  ;;  %v4135_v40 = vmin.f32 %v4133_v43, %v4055_v10  ;;  %v10098_v16 = vld [vmem:[#allocation117_spill] sm:$0xff]  ;;  %v10099_v45 = vld [vmem:[#allocation118_spill] sm:$0xff]  ;;  %v4068_v49 = vadd.f32 %v8046_v44, %v10100_v27 }
 0x38d   :  { %4781 = vperm.xlu0 %5441, %v10091_v48   ;;  %v3988_v17 = vpop.permute.xlu1 %3987  ;;  %v4064_v19 = vadd.f32 %v10095_v29, %v10094_v34  ;;  %v4062_v2 = vadd.f32 %v3980_v61, %v10098_v16  ;;  %v4063_v14 = vadd.f32 %v3980_v61, %v10099_v45  ;;  %v4101_v18 = vmin.f32 %v4099_v31, %v4060_v21  ;;  %v10101_v30 = vld [vmem:[#allocation120_spill] sm:$0xff]  ;;  %v10102_v34 = vld [vmem:[#allocation9_spill] sm:$0xff]  ;;  %v10104_v10 = vld [vmem:[#allocation122_spill] sm:$0xff] }
 0x38e   :  { %v4098_v48 = vmin.f32 %v4096_v9, %v4054_v62  ;;  %v4138_v51 = vmin.f32 %v4136_v36, %v4061_v7  ;;  %v4069_v58 = vadd.f32 %v8046_v44, %v10101_v30  ;;  %v4137_v15 = vmin.f32 %v4135_v40, %v4059_v23  ;;  %v10105_v61 = vld [vmem:[#allocation123_spill] sm:$0xff]  ;;  %v10106_v31 = vld [vmem:[#allocation124_spill] sm:$0xff]  ;;  %v10109_v23 = vld [vmem:[#allocation126_spill] sm:$0xff] }
 0x38f   :  { %v8119_v46 = vpop.permute.xlu0 %4207  ;;  %4561 = vperm.xlu1 %5439, %v10097_v1   ;;  %v10103_v1 = vld [vmem:[#allocation121_spill] sm:$0xff]  ;;  %v4067_v9 = vadd.f32 %v3988_v17, %v10104_v10  ;;  %v4103_v43 = vmin.f32 %v4101_v18, %v4064_v19  ;;  %v4072_v36 = vadd.f32 %v8062_v55, %v10105_v61  ;;  %v4073_v21 = vadd.f32 %v8062_v55, %v10106_v31  ;;  %v10107_v44 = vld [vmem:[#allocation63_spill] sm:$0xff] }
 0x390   :  { %v4100_v60 = vmin.f32 %v4098_v48, %v4058_v37  ;;  %v4066_v62 = vadd.f32 %v3988_v17, %v10103_v1  ;;  %v4140_v16 = vmin.f32 %v4138_v51, %v4065_v13  ;;  %v4139_v30 = vmin.f32 %v4137_v15, %v4063_v14  ;;  %v10108_v37 = vld [vmem:[#allocation125_spill] sm:$0xff]  ;;  %v10110_v18 = vld [vmem:[#allocation127_spill] sm:$0xff]  ;;  %v10111_v13 = vld [vmem:[#allocation128_spill] sm:$0xff] }
 0x391   :  { %4793 = vperm.xlu0 %5441, %v10102_v34   ;;  %v3996_v29 = vpop.permute.xlu1 %3995  ;;  %v4105_v27 = vmin.f32 %v4103_v43, %v4068_v49  ;;  %v4076_v19 = vadd.f32 %v8078_v39, %v10110_v18  ;;  %v4077_v51 = vadd.f32 %v8078_v39, %v10111_v13  ;;  %v10112_v61 = vld [vmem:[#allocation11_spill] sm:$0xff]  ;;  %v10114_v15 = vld [vmem:[#allocation130_spill] sm:$0xff]  ;;  %v10117_v43 = vld [vmem:[#allocation132_spill] sm:$0xff] }
 0x392   :  { %v4102_v34 = vmin.f32 %v4100_v60, %v4062_v2  ;;  %v4070_v40 = vadd.f32 %v3996_v29, %v10108_v37  ;;  %v4071_v48 = vadd.f32 %v3996_v29, %v10109_v23  ;;  %v4142_v17 = vmin.f32 %v4140_v16, %v4069_v58  ;;  %v10115_v16 = vld [vmem:[#allocation65_spill] sm:$0xff]  ;;  %v10116_v49 = vld [vmem:[#allocation131_spill] sm:$0xff] }
 0x393   :  { %v8135_v7 = vpop.permute.xlu0 %4219  ;;  %4569 = vperm.xlu1 %5439, %v10107_v44   ;;  %v4141_v10 = vmin.f32 %v4139_v30, %v4067_v9  ;;  %v10113_v44 = vld [vmem:[#allocation129_spill] sm:$0xff]  ;;  %v4107_v14 = vmin.f32 %v4105_v27, %v4072_v36  ;;  %v4080_v58 = vadd.f32 %v8098_v50, %v10116_v49  ;;  %v4081_v39 = vadd.f32 %v8098_v50, %v10117_v43 }
 0x394   :  { %v4104_v31 = vmin.f32 %v4102_v34, %v4066_v62  ;;  %v4144_v37 = vmin.f32 %v4142_v17, %v4073_v21  ;;  %v10118_v9 = vld [vmem:[#allocation13_spill] sm:$0xff]  ;;  %v10120_v17 = vld [vmem:[#allocation134_spill] sm:$0xff] }
 0x395   :  { %4801 = vperm.xlu0 %5441, %v10112_v61   ;;  %v4004_v55 = vpop.permute.xlu1 %4003  ;;  %v4143_v13 = vmin.f32 %v4141_v10, %v4071_v48  ;;  %v4109_v62 = vmin.f32 %v4107_v14, %v4076_v19  ;;  %v10119_v36 = vld [vmem:[#allocation133_spill] sm:$0xff]  ;;  %v10122_v10 = vld [vmem:[#allocation15_spill] sm:$0xff] }
 0x396   :  { %v4074_v60 = vadd.f32 %v4004_v55, %v10113_v44  ;;  %v4075_v2 = vadd.f32 %v4004_v55, %v10114_v15  ;;  %v4106_v61 = vmin.f32 %v4104_v31, %v4070_v40  ;;  %v4146_v30 = vmin.f32 %v4144_v37, %v4077_v51  ;;  %v10121_v15 = vld [vmem:[#allocation67_spill] sm:$0xff]  ;;  %v10136_v43 = vld [vmem:[#allocation73_spill] sm:$0xff] }
 0x397   :  { %v8147_v29 = vpop.permute.xlu0 %4227  ;;  %4577 = vperm.xlu1 %5439, %v10115_v16   ;;  %v4111_v49 = vmin.f32 %v4109_v62, %v4080_v58 }
 0x398   :  { %v4108_v55 = vmin.f32 %v4106_v61, %v4074_v60  ;;  %v4145_v27 = vmin.f32 %v4143_v13, %v4075_v2  ;;  %v4148_v44 = vmin.f32 %v4146_v30, %v4081_v39  ;;  %v10123_v13 = vld [vmem:[#allocation69_spill] sm:$0xff]  ;;  %v10125_v39 = vmov 7  }
 0x399   :  { %4809 = vperm.xlu0 %5441, %v10118_v9   ;;  %v4012_v34 = vpop.permute.xlu1 %4011  ;;  %v10124_v2 = vld [vmem:[#allocation17_spill] sm:$0xff] }
 0x39a   :  { %v4078_v21 = vadd.f32 %v4012_v34, %v10119_v36  ;;  %v4079_v18 = vadd.f32 %v4012_v34, %v10120_v17  ;;  %v4343_v17 = vadd.f32 %v8147_v29, %v10009_v42 }
 0x39b   :  { %v8157_v16 = vpop.permute.xlu0 %4235  ;;  %4585 = vperm.xlu1 %5439, %v10121_v15   ;;  %v10135_v15 = vld [vmem:[#allocation71_spill] sm:$0xff] }
 0x39c   :  { %v4110_v50 = vmin.f32 %v4108_v55, %v4078_v21  ;;  %v4147_v31 = vmin.f32 %v4145_v27, %v4079_v18 }
 0x39d   :  { %4817 = vperm.xlu0 %5441, %v10122_v10   ;;  %v10129_v10 = vld [vmem:[#allocation21_spill] sm:$0xff] }
 0x39e   :  { %v4112_v37 = vmin.f32 %v4110_v50, %v4111_v49  ;;  %v4149_v40 = vmin.f32 %v4147_v31, %v4148_v44  ;;  %v4204_v48 = vpop.permute.xlu1 %4203  ;;  %v10126_v49 = vld [vmem:[#allocation10_spill] sm:$0xff]  ;;  %v10127_v44 = vld [vmem:[#allocation19_spill] sm:$0xff] }
 0x39f   :  { %v8161_v19 = vpop.permute.xlu0 %4243  ;;  %4593 = vperm.xlu1 %5439, %v10123_v13   ;;  %v10128_v31 = vld [vmem:[#allocation7_spill] sm:$0xff] }
 0x3a0   :  { %v4113_v51 = vrot.slane %v4112_v37, 4  ;;  %v4150_v60 = vrot.slane %v4149_v40, 4 }
 0x3a1   :  { %4825 = vperm.xlu0 %5441, %v10124_v2  }
 0x3a2   :  { %v4114_v14 = vmin.f32 %v4112_v37, %v4113_v51  ;;  %v4151_v61 = vmin.f32 %v4149_v40, %v4150_v60  ;;  %v4212_v9 = vpop.permute.xlu1 %4211 }
 0x3a3   :  { %v8165_v58 = vpop.permute.xlu0 %4251  ;;  %5442 = vset.pattern.permute.xlu1 %v10125_v39  ;;  %v10130_v39 = vld [vmem:[#allocation72_spill] sm:$0xff] }
 0x3a4   :  { %v4115_v18 = vrot.slane %v4114_v14, 2  ;;  %v4152_v62 = vrot.slane %v4151_v61, 2  ;;  %4785 = vperm.xlu1 %5442, %v10126_v49   ;;  %v4334_v49 = vadd.f32 %v4212_v9, %v10130_v39  ;;  %v10139_v39 = vld [vmem:[#allocation14_spill] sm:$0xff] }
 0x3a5   :  { %4833 = vperm.xlu0 %5441, %v10127_v44   ;;  %v10131_v44 = vld [vmem:[#allocation74_spill] sm:$0xff] }
 0x3a6   :  { %v4116_v30 = vmin.f32 %v4114_v14, %v4115_v18  ;;  %v4153_v34 = vmin.f32 %v4151_v61, %v4152_v62  ;;  %v4216_v55 = vpop.permute.xlu1 %4215  ;;  %v4335_v14 = vadd.f32 %v4212_v9, %v10131_v44  ;;  %v10132_v61 = vld [vmem:[#allocation12_spill] sm:$0xff]  ;;  %v10133_v18 = vld [vmem:[#allocation23_spill] sm:$0xff] }
 0x3a7   :  { %v8170_v27 = vpop.permute.xlu0 %4259  ;;  %v10134_v62 = vld [vmem:[#allocation135_spill] sm:$0xff] }
 0x3a8   :  { %v4117_v21 = vrot.slane %v4116_v30, 1  ;;  %v4154_v50 = vrot.slane %v4153_v34, 1  ;;  %4789 = vperm.xlu1 %5442, %v10128_v31   ;;  %v4330_v31 = vadd.f32 %v4204_v48, %v10135_v15 }
 0x3a9   :  { %4841 = vperm.xlu0 %5441, %v10129_v10   ;;  %v4331_v10 = vadd.f32 %v4204_v48, %v10136_v43 }
 0x3aa   :  { %v4118_v37 = vmin.f32 %v4116_v30, %v4117_v21  ;;  %v4155_v40 = vmin.f32 %v4153_v34, %v4154_v50  ;;  %v4224_v51 = vpop.permute.xlu1 %4223  ;;  %v10137_v34 = vld [vmem:[#allocation81_spill] sm:$0xff]  ;;  %v4180_v50 = vld [vmem:[#allocation3 + $0x5] ss:$8 sm:$0x3]  ;;  %v4394_v44 = vmin.f32 %v4330_v31, %v4334_v49 }
 0x3ab   :  { %v8174_v60 = vpop.permute.xlu0 %4267  ;;  %v4338_v21 = vadd.f32 %v8135_v7, %v10137_v34  ;;  %v4342_v34 = vadd.f32 %v8147_v29, %v10008_v5  ;;  %v10142_v49 = vld [vmem:[#allocation16_spill] sm:$0xff]  ;;  %v4346_v29 = vadd.f32 %v8157_v16, %v9935_v52  ;;  %v10153_v52 = vld [vmem:[#allocation33_spill] sm:$0xff] }
 0x3ac   :  { %v4183_v2 = vcombine.low %v4118_v37, %v4155_v40  ;;  %4797 = vperm.xlu1 %5442, %v10132_v61   ;;  %v10138_v40 = vld [vmem:[#allocation82_spill] sm:$0xff] }
 0x3ad   :  { %4849 = vperm.xlu0 %5441, %v10133_v18   ;;  %v4339_v9 = vadd.f32 %v8135_v7, %v10138_v40  ;;  %v4431_v18 = vmin.f32 %v4331_v10, %v4335_v14  ;;  %v4396_v7 = vmin.f32 %v4394_v44, %v4338_v21 }
 0x3ae   :  { %v4190_v13 = vrot.slane %v4183_v2, %v10134_v62  ;;  %v4232_v30 = vpop.permute.xlu1 %4231  ;;  %v10140_v2 = vld [vmem:[#allocation25_spill] sm:$0xff] }
 0x3af   :  { %v8185_v37 = vpop.permute.xlu0 %4275  ;;  %v4398_v10 = vmin.f32 %v4396_v7, %v4342_v34  ;;  %v4351_v34 = vadd.f32 %v8161_v19, %v9937_v20 }
 0x3b0   :  { %v4197_v61 = vrot.slane %v4190_v13, %v10134_v62  ;;  %4805 = vperm.xlu1 %5442, %v10139_v39   ;;  %v4433_v13 = vmin.f32 %v4431_v18, %v4339_v9  ;;  %v10143_v39 = vld [vmem:[#allocation27_spill] sm:$0xff] }
 0x3b1   :  { %4857 = vperm.xlu0 %5441, %v10140_v2   ;;  %v10145_v2 = vld [vmem:[#allocation29_spill] sm:$0xff]  ;;  %v4400_v9 = vmin.f32 %v4398_v10, %v4346_v29 }
 0x3b2   :  { %v4199_v15 = vmin.f32 %v4180_v50, %v4197_v61  ;;  %v4240_v48 = vpop.permute.xlu1 %4239  ;;  %v4435_v50 = vmin.f32 %v4433_v13, %v4343_v17  ;;  %v10144_v61 = vld [vmem:[#allocation18_spill] sm:$0xff]  ;;  %v4350_v17 = vadd.f32 %v8161_v19, %v9426_v12  ;;  %v4354_v19 = vadd.f32 %v8165_v58, %v9359_v38 }
 0x3b3   :  { %v8192_v43 = vpop.permute.xlu0 %4283 }
 0x3b4   :  { %4200 = vst.msk [vmem:[#allocation3 + $0x5] ss:$8 sm:$0x3] %vm6675_vm0, %v4199_v15  ;;  %4813 = vperm.xlu1 %5442, %v10142_v49   ;;  %v4347_v15 = vadd.f32 %v8157_v16, %v9936_v24  ;;  %v10146_v49 = vld [vmem:[#allocation20_spill] sm:$0xff]  ;;  %v10149_v24 = vld [vmem:[#allocation77_spill] sm:$0xff] }
 0x3b5   :  { %4865 = vperm.xlu0 %5441, %v10143_v39   ;;  %v10147_v39 = vld [vmem:[#allocation31_spill] sm:$0xff]  ;;  %v4332_v10 = vadd.f32 %v8119_v46, %v10149_v24 }
 0x3b6   :  { %v4248_v14 = vpop.permute.xlu1 %4247  ;;  %v4437_v18 = vmin.f32 %v4435_v50, %v4347_v15  ;;  %v10150_v50 = vld [vmem:[#allocation78_spill] sm:$0xff]  ;;  %v10151_v15 = vld [vmem:[#allocation75_spill] sm:$0xff] }
 0x3b7   :  { %v8202_v31 = vpop.permute.xlu0 %4291  ;;  %v4333_v29 = vadd.f32 %v8119_v46, %v10150_v50  ;;  %v10156_v50 = vld [vmem:[#allocation24_spill] sm:$0xff] }
 0x3b8   :  { %4821 = vperm.xlu1 %5442, %v10144_v61   ;;  %v4402_v61 = vmin.f32 %v4400_v9, %v4350_v17  ;;  %v4439_v16 = vmin.f32 %v4437_v18, %v4351_v34  ;;  %v4355_v9 = vadd.f32 %v8165_v58, %v9360_v53  ;;  %v10154_v17 = vld [vmem:[#allocation79_spill] sm:$0xff]  ;;  %v4358_v58 = vadd.f32 %v8170_v27, %v9434_v41 }
 0x3b9   :  { %4873 = vperm.xlu0 %5441, %v10145_v2   ;;  %v10148_v2 = vld [vmem:[#allocation22_spill] sm:$0xff]  ;;  %v4340_v34 = vadd.f32 %v4224_v51, %v10154_v17 }
 0x3ba   :  { %v4256_v44 = vpop.permute.xlu1 %4255  ;;  %v4404_v46 = vmin.f32 %v4402_v61, %v4354_v19  ;;  %v4441_v5 = vmin.f32 %v4439_v16, %v4355_v9  ;;  %v4348_v16 = vadd.f32 %v4240_v48, %v10081_v22  ;;  %v4352_v19 = vadd.f32 %v4248_v14, %v9429_v8 }
 0x3bb   :  { %v8210_v21 = vpop.permute.xlu0 %4299  ;;  %v4353_v9 = vadd.f32 %v4248_v14, %v10083_v26  ;;  %v10162_v14 = vld [vmem:[#allocation28_spill] sm:$0xff] }
 0x3bc   :  { %4829 = vperm.xlu1 %5442, %v10146_v49   ;;  %v4336_v49 = vadd.f32 %v4216_v55, %v10151_v15  ;;  %v10159_v15 = vld [vmem:[#allocation37_spill] sm:$0xff] }
 0x3bd   :  { %4881 = vperm.xlu0 %5441, %v10147_v39   ;;  %v10152_v39 = vld [vmem:[#allocation76_spill] sm:$0xff] }
 0x3be   :  { %v4264_v7 = vpop.permute.xlu1 %4263  ;;  %v4337_v12 = vadd.f32 %v4216_v55, %v10152_v39  ;;  %v4395_v55 = vmin.f32 %v4332_v10, %v4336_v49  ;;  %v10158_v39 = vld [vmem:[#allocation84_spill] sm:$0xff]  ;;  %v4349_v10 = vadd.f32 %v4240_v48, %v10082_v54 }
 0x3bf   :  { %v8218_v13 = vpop.permute.xlu0 %4307  ;;  %v4345_v38 = vadd.f32 %v4232_v30, %v10158_v39 }
 0x3c0   :  { %4837 = vperm.xlu1 %5442, %v10148_v2   ;;  %v10155_v2 = vld [vmem:[#allocation80_spill] sm:$0xff]  ;;  %v4432_v24 = vmin.f32 %v4333_v29, %v4337_v12 }
 0x3c1   :  { %4889 = vperm.xlu0 %5441, %v10153_v52   ;;  %v4341_v20 = vadd.f32 %v4224_v51, %v10155_v2  ;;  %v10157_v52 = vld [vmem:[#allocation83_spill] sm:$0xff]  ;;  %v4359_v51 = vadd.f32 %v8170_v27, %v9505_v57  ;;  %v4397_v2 = vmin.f32 %v4395_v55, %v4340_v34 }
 0x3c2   :  { %v4272_v18 = vpop.permute.xlu1 %4271  ;;  %v4344_v40 = vadd.f32 %v4232_v30, %v10157_v52  ;;  %v10160_v30 = vld [vmem:[#allocation26_spill] sm:$0xff]  ;;  %v10161_v27 = vld [vmem:[#allocation39_spill] sm:$0xff] }
 0x3c3   :  { %v8234_v42 = vpop.permute.xlu0 %4315  ;;  %v4434_v61 = vmin.f32 %v4432_v24, %v4341_v20  ;;  %v4443_v29 = vmin.f32 %v4441_v5, %v4359_v51  ;;  %v4362_v24 = vadd.f32 %v8174_v60, %v9369_v6  ;;  %v4363_v20 = vadd.f32 %v8174_v60, %v9439_v28  ;;  %v10163_v60 = vld [vmem:[#allocation42_spill] sm:$0xff] }
 0x3c4   :  { %4845 = vperm.xlu1 %5442, %v10156_v50   ;;  %v4406_v50 = vmin.f32 %v4404_v46, %v4358_v58  ;;  %v4356_v5 = vadd.f32 %v4256_v44, %v9431_v59 }
 0x3c5   :  { %5051 = vperm.xlu0 %5441, %v10159_v15   ;;  %v4399_v15 = vmin.f32 %v4397_v2, %v4344_v40  ;;  %v4436_v49 = vmin.f32 %v4434_v61, %v4345_v38  ;;  %v4357_v40 = vadd.f32 %v4256_v44, %v9503_v63  ;;  %v4445_v55 = vmin.f32 %v4443_v29, %v4363_v20 }
 0x3c6   :  { %v4280_v53 = vpop.permute.xlu1 %4279  ;;  %v4408_v2 = vmin.f32 %v4406_v50, %v4362_v24  ;;  %v4360_v61 = vadd.f32 %v4264_v7, %v9437_v25  ;;  %v4367_v44 = vadd.f32 %v8185_v37, %v9796_v35  ;;  %v4364_v29 = vadd.f32 %v4272_v18, %v9507_v56 }
 0x3c7   :  { %v8246_v12 = vpop.permute.xlu0 %4323  ;;  %v4401_v34 = vmin.f32 %v4399_v15, %v4348_v16  ;;  %v4438_v46 = vmin.f32 %v4436_v49, %v4349_v10  ;;  %v4366_v16 = vadd.f32 %v8185_v37, %v9795_v11  ;;  %v4365_v49 = vadd.f32 %v4272_v18, %v9441_v4  ;;  %v10165_v37 = vld [vmem:[#allocation45_spill] sm:$0xff] }
 0x3c8   :  { %4853 = vperm.xlu1 %5442, %v10160_v30   ;;  %v4361_v30 = vadd.f32 %v4264_v7, %v9438_v0  ;;  %v10164_v7 = vld [vmem:[#allocation30_spill] sm:$0xff]  ;;  %v4371_v18 = vadd.f32 %v8192_v43, %v10093_v47 }
 0x3c9   :  { %5059 = vperm.xlu0 %5441, %v10161_v27   ;;  %v4403_v58 = vmin.f32 %v4401_v34, %v4352_v19  ;;  %v4440_v51 = vmin.f32 %v4438_v46, %v4353_v9  ;;  %v4410_v9 = vmin.f32 %v4408_v2, %v4366_v16  ;;  %v4447_v27 = vmin.f32 %v4445_v55, %v4367_v44  ;;  %v10166_v55 = vld [vmem:[#allocation111_spill] sm:$0xff] }
 0x3ca   :  { %v4288_v48 = vpop.permute.xlu1 %4287  ;;  %v4368_v34 = vadd.f32 %v4280_v53, %v9650_v32  ;;  %v4369_v46 = vadd.f32 %v4280_v53, %v9651_v3  ;;  %v10168_v53 = vld [vmem:[#allocation117_spill] sm:$0xff] }
 0x3cb   :  { %v8258_v38 = vpop.permute.xlu0 %4469  ;;  %v4405_v15 = vmin.f32 %v4403_v58, %v4356_v5  ;;  %v4442_v50 = vmin.f32 %v4440_v51, %v4357_v40  ;;  %v4370_v5 = vadd.f32 %v8192_v43, %v10092_v33  ;;  %v4372_v58 = vadd.f32 %v4288_v48, %v10166_v55  ;;  %v10167_v51 = vld [vmem:[#allocation112_spill] sm:$0xff] }
 0x3cc   :  { %4861 = vperm.xlu1 %5442, %v10162_v14   ;;  %v4449_v16 = vmin.f32 %v4447_v27, %v4371_v18  ;;  %v4374_v44 = vadd.f32 %v8202_v31, %v10168_v53 }
 0x3cd   :  { %5067 = vperm.xlu0 %5441, %v10163_v60   ;;  %v4407_v24 = vmin.f32 %v4405_v15, %v4360_v61  ;;  %v4444_v20 = vmin.f32 %v4442_v50, %v4361_v30  ;;  %v4373_v61 = vadd.f32 %v4288_v48, %v10167_v51  ;;  %v4412_v60 = vmin.f32 %v4410_v9, %v4370_v5  ;;  %v10169_v50 = vld [vmem:[#allocation32_spill] sm:$0xff]  ;;  %v10173_v9 = vld [vmem:[#allocation122_spill] sm:$0xff] }
 0x3ce   :  { %v4296_v10 = vpop.permute.xlu1 %4295  ;;  %v4375_v15 = vadd.f32 %v8202_v31, %v10099_v45  ;;  %v4378_v48 = vadd.f32 %v8210_v21, %v10103_v1  ;;  %v4379_v27 = vadd.f32 %v8210_v21, %v10173_v9  ;;  %v10174_v31 = vld [vmem:[#allocation119_spill] sm:$0xff]  ;;  %v4383_v1 = vadd.f32 %v8218_v13, %v10109_v23 }
 0x3cf   :  { %v8270_v19 = vpop.permute.xlu0 %4477  ;;  %v4409_v14 = vmin.f32 %v4407_v24, %v4364_v29  ;;  %v4446_v2 = vmin.f32 %v4444_v20, %v4365_v49  ;;  %v10170_v29 = vld [vmem:[#allocation115_spill] sm:$0xff]  ;;  %v10171_v24 = vld [vmem:[#allocation116_spill] sm:$0xff] }
 0x3d0   :  { %4869 = vperm.xlu1 %5442, %v10164_v7   ;;  %v4376_v49 = vadd.f32 %v4296_v10, %v10170_v29  ;;  %v4377_v20 = vadd.f32 %v4296_v10, %v10171_v24  ;;  %v10176_v10 = vld [vmem:[#allocation125_spill] sm:$0xff]  ;;  %v10177_v24 = vld [vmem:[#allocation34_spill] sm:$0xff] }
 0x3d1   :  { %5075 = vperm.xlu0 %5441, %v10165_v37   ;;  %v4411_v43 = vmin.f32 %v4409_v14, %v4368_v34  ;;  %v4448_v7 = vmin.f32 %v4446_v2, %v4369_v46  ;;  %v10172_v37 = vld [vmem:[#allocation47_spill] sm:$0xff]  ;;  %v4414_v14 = vmin.f32 %v4412_v60, %v4374_v44  ;;  %v4451_v2 = vmin.f32 %v4449_v16, %v4375_v15  ;;  %v10181_v60 = vld [vmem:[#allocation129_spill] sm:$0xff]  ;;  %v10182_v44 = vld [vmem:[#allocation130_spill] sm:$0xff] }
 0x3d2   :  { %v4304_v40 = vpop.permute.xlu1 %4303  ;;  %v4386_v16 = vadd.f32 %v8234_v42, %v10181_v60  ;;  %v4387_v15 = vadd.f32 %v8234_v42, %v10182_v44 }
 0x3d3   :  { %v8282_v30 = vpop.permute.xlu0 %4485  ;;  %v4413_v18 = vmin.f32 %v4411_v43, %v4372_v58  ;;  %v4450_v53 = vmin.f32 %v4448_v7, %v4373_v61  ;;  %v4380_v45 = vadd.f32 %v4304_v40, %v10174_v31  ;;  %v10178_v58 = vld [vmem:[#allocation123_spill] sm:$0xff]  ;;  %v10179_v43 = vld [vmem:[#allocation124_spill] sm:$0xff]  ;;  %v10180_v31 = vld [vmem:[#allocation49_spill] sm:$0xff] }
 0x3d4   :  { %4877 = vperm.xlu1 %5442, %v10169_v50   ;;  %v10175_v50 = vld [vmem:[#allocation120_spill] sm:$0xff] }
 0x3d5   :  { %5083 = vperm.xlu0 %5441, %v10172_v37   ;;  %v4381_v34 = vadd.f32 %v4304_v40, %v10175_v50  ;;  %v4382_v37 = vadd.f32 %v8218_v13, %v10176_v10  ;;  %v4415_v21 = vmin.f32 %v4413_v18, %v4376_v49  ;;  %v4452_v9 = vmin.f32 %v4450_v53, %v4377_v20  ;;  %v10184_v53 = vld [vmem:[#allocation128_spill] sm:$0xff] }
 0x3d6   :  { %v4312_v5 = vpop.permute.xlu1 %4311  ;;  %v4416_v40 = vmin.f32 %v4414_v14, %v4378_v48  ;;  %v4453_v50 = vmin.f32 %v4451_v2, %v4379_v27  ;;  %v10186_v48 = vld [vmem:[#allocation133_spill] sm:$0xff]  ;;  %v10187_v14 = vld [vmem:[#allocation134_spill] sm:$0xff] }
 0x3d7   :  { %v8298_v46 = vpop.permute.xlu0 %4493  ;;  %v4384_v61 = vadd.f32 %v4312_v5, %v10178_v58  ;;  %v4385_v7 = vadd.f32 %v4312_v5, %v10179_v43  ;;  %v4417_v13 = vmin.f32 %v4415_v21, %v4380_v45  ;;  %v4454_v23 = vmin.f32 %v4452_v9, %v4381_v34  ;;  %v10188_v45 = vld [vmem:[#allocation51_spill] sm:$0xff]  ;;  %v10219_v58 = vld [vmem:[#allocation82_spill] sm:$0xff] }
 0x3d8   :  { %4885 = vperm.xlu1 %5442, %v10177_v24   ;;  %v10183_v24 = vld [vmem:[#allocation127_spill] sm:$0xff]  ;;  %v4418_v5 = vmin.f32 %v4416_v40, %v4382_v37  ;;  %v4455_v43 = vmin.f32 %v4453_v50, %v4383_v1  ;;  %v4390_v27 = vadd.f32 %v8246_v12, %v10186_v48  ;;  %v4391_v2 = vadd.f32 %v8246_v12, %v10187_v14  ;;  %v10190_v1 = vld [vmem:[#allocation132_spill] sm:$0xff]  ;;  %v10218_v14 = vld [vmem:[#allocation81_spill] sm:$0xff] }
 0x3d9   :  { %5091 = vperm.xlu0 %5441, %v10180_v31   ;;  %v10185_v31 = vld [vmem:[#allocation38_spill] sm:$0xff]  ;;  %v4419_v42 = vmin.f32 %v4417_v13, %v4384_v61  ;;  %v4456_v44 = vmin.f32 %v4454_v23, %v4385_v7  ;;  %v10192_v23 = vld [vmem:[#allocation53_spill] sm:$0xff] }
 0x3da   :  { %v4320_v10 = vpop.permute.xlu1 %4319  ;;  %v4420_v9 = vmin.f32 %v4418_v5, %v4386_v16  ;;  %v4457_v34 = vmin.f32 %v4455_v43, %v4387_v15 }
 0x3db   :  { %v4388_v49 = vadd.f32 %v4320_v10, %v10183_v24  ;;  %v4389_v20 = vadd.f32 %v4320_v10, %v10184_v53  ;;  %v8314_v18 = vpop.permute.xlu0 %4501  ;;  %v10189_v24 = vld [vmem:[#allocation131_spill] sm:$0xff] }
 0x3dc   :  { %5047 = vperm.xlu1 %5442, %v10185_v31   ;;  %v10191_v31 = vld [vmem:[#allocation41_spill] sm:$0xff]  ;;  %v4422_v48 = vmin.f32 %v4420_v9, %v4390_v27  ;;  %v4459_v60 = vmin.f32 %v4457_v34, %v4391_v2  ;;  %v10195_v2 = vld [vmem:[#allocation46_spill] sm:$0xff] }
 0x3dd   :  { %5099 = vperm.xlu0 %5441, %v10188_v45   ;;  %v4421_v10 = vmin.f32 %v4419_v42, %v4388_v49  ;;  %v4458_v53 = vmin.f32 %v4456_v44, %v4389_v20  ;;  %v10193_v44 = vld [vmem:[#allocation44_spill] sm:$0xff]  ;;  %v10194_v20 = vld [vmem:[#allocation55_spill] sm:$0xff]  ;;  %v10196_v34 = vld [vmem:[#allocation57_spill] sm:$0xff] }
 0x3de   :  { %v4328_v21 = vpop.permute.xlu1 %4327 }
 0x3df   :  { %v4392_v37 = vadd.f32 %v4328_v21, %v10189_v24  ;;  %v4393_v50 = vadd.f32 %v4328_v21, %v10190_v1  ;;  %v8324_v40 = vpop.permute.xlu0 %4509  ;;  %v10217_v1 = vld [vmem:[#allocation73_spill] sm:$0xff] }
 0x3e0   :  { %5055 = vperm.xlu1 %5442, %v10191_v31   ;;  %v4597_v24 = vadd.f32 %v8258_v38, %v10217_v1  ;;  %v10223_v1 = vld [vmem:[#allocation85_spill] sm:$0xff] }
 0x3e1   :  { %v4423_v12 = vmin.f32 %v4421_v10, %v4392_v37  ;;  %v4460_v61 = vmin.f32 %v4458_v53, %v4393_v50  ;;  %5107 = vperm.xlu0 %5441, %v10192_v23   ;;  %v10197_v37 = vld [vmem:[#allocation48_spill] sm:$0xff] }
 0x3e2   :  { %v4474_v7 = vpop.permute.xlu1 %4473 }
 0x3e3   :  { %v4424_v16 = vmin.f32 %v4422_v48, %v4423_v12  ;;  %v4461_v43 = vmin.f32 %v4459_v60, %v4460_v61  ;;  %v8328_v15 = vpop.permute.xlu0 %4517  ;;  %v10198_v12 = vld [vmem:[#allocation59_spill] sm:$0xff] }
 0x3e4   :  { %5063 = vperm.xlu1 %5442, %v10193_v44   ;;  %v10199_v44 = vld [vmem:[#allocation50_spill] sm:$0xff] }
 0x3e5   :  { %v4425_v13 = vrot.slane %v4424_v16, 4  ;;  %v4462_v49 = vrot.slane %v4461_v43, 4  ;;  %5115 = vperm.xlu0 %5441, %v10194_v20  }
 0x3e6   :  { %v4482_v5 = vpop.permute.xlu1 %4481 }
 0x3e7   :  { %v4426_v42 = vmin.f32 %v4424_v16, %v4425_v13  ;;  %v4463_v45 = vmin.f32 %v4461_v43, %v4462_v49  ;;  %v8332_v27 = vpop.permute.xlu0 %4525  ;;  %v10200_v49 = vld [vmem:[#allocation61_spill] sm:$0xff] }
 0x3e8   :  { %5071 = vperm.xlu1 %5442, %v10195_v2   ;;  %v4735_v2 = vld [vmem:[#allocation2 + $0x6] ss:$8 sm:$0x3] }
 0x3e9   :  { %v4427_v53 = vrot.slane %v4426_v42, 2  ;;  %v4464_v9 = vrot.slane %v4463_v45, 2  ;;  %5123 = vperm.xlu0 %5441, %v10196_v34   ;;  %v10202_v34 = vld [vmem:[#allocation63_spill] sm:$0xff] }
 0x3ea   :  { %v4490_v60 = vpop.permute.xlu1 %4489 }
 0x3eb   :  { %v4428_v48 = vmin.f32 %v4426_v42, %v4427_v53  ;;  %v4465_v21 = vmin.f32 %v4463_v45, %v4464_v9  ;;  %v8336_v10 = vpop.permute.xlu0 %4533  ;;  %v10201_v53 = vld [vmem:[#allocation52_spill] sm:$0xff] }
 0x3ec   :  { %5079 = vperm.xlu1 %5442, %v10197_v37  }
 0x3ed   :  { %v4429_v50 = vrot.slane %v4428_v48, 1  ;;  %v4466_v31 = vrot.slane %v4465_v21, 1  ;;  %5131 = vperm.xlu0 %5441, %v10198_v12  }
 0x3ee   :  { %v4498_v61 = vpop.permute.xlu1 %4497 }
 0x3ef   :  { %v4430_v23 = vmin.f32 %v4428_v48, %v4429_v50  ;;  %v4467_v16 = vmin.f32 %v4465_v21, %v4466_v31  ;;  %v8340_v43 = vpop.permute.xlu0 %4541  ;;  %v10204_v50 = vld [vmem:[#allocation54_spill] sm:$0xff]  ;;  %v10205_v31 = vld [vmem:[#allocation65_spill] sm:$0xff] }
 0x3f0   :  { %5087 = vperm.xlu1 %5442, %v10199_v44   ;;  %v10208_v44 = vld [vmem:[#allocation35_spill] sm:$0xff] }
 0x3f1   :  { %v4738_v13 = vcombine.low %v4430_v23, %v4467_v16  ;;  %5139 = vperm.xlu0 %5441, %v10200_v49   ;;  %v10207_v16 = vld [vmem:[#allocation56_spill] sm:$0xff] }
 0x3f2   :  { %v4506_v20 = vpop.permute.xlu1 %4505 }
 0x3f3   :  { %v4745_v42 = vrot.slane %v4738_v13, %v10134_v62  ;;  %v8345_v45 = vpop.permute.xlu0 %4549 }
 0x3f4   :  { %5095 = vperm.xlu1 %5442, %v10201_v53   ;;  %v10211_v53 = vld [vmem:[#allocation74_spill] sm:$0xff] }
 0x3f5   :  { %v4752_v9 = vrot.slane %v4745_v42, %v10134_v62  ;;  %5147 = vperm.xlu0 %5441, %v10202_v34   ;;  %v10210_v42 = vld [vmem:[#allocation72_spill] sm:$0xff]  ;;  %v10212_v34 = vld [vmem:[#allocation58_spill] sm:$0xff]  ;;  %v10215_v62 = vld [vmem:[#allocation67_spill] sm:$0xff] }
 0x3f6   :  { %v4514_v48 = vpop.permute.xlu1 %4513 }
 0x3f7   :  { %v4754_v21 = vmin.f32 %v4735_v2, %v4752_v9  ;;  %v8350_v37 = vpop.permute.xlu0 %4557  ;;  %v4600_v2 = vadd.f32 %v8270_v19, %v10210_v42  ;;  %v4601_v9 = vadd.f32 %v8270_v19, %v10211_v53  ;;  %v4604_v42 = vadd.f32 %v8282_v30, %v10218_v14 }
 0x3f8   :  { %10203 = vst [vmem:[#allocation102_spill] sm:$0xff] %v8350_v37  ;;  %5103 = vperm.xlu1 %5442, %v10204_v50   ;;  %v4605_v19 = vadd.f32 %v8282_v30, %v10219_v58  ;;  %v4608_v14 = vadd.f32 %v8298_v46, %v10223_v1  ;;  %v10224_v37 = vld [vmem:[#allocation86_spill] sm:$0xff]  ;;  %v10225_v58 = vld [vmem:[#allocation60_spill] sm:$0xff] }
 0x3f9   :  { %4755 = vst.msk [vmem:[#allocation2 + $0x6] ss:$8 sm:$0x3] %vm6675_vm0, %v4754_v21  ;;  %5155 = vperm.xlu0 %5441, %v10205_v31   ;;  %v10213_v21 = vld [vmem:[#allocation75_spill] sm:$0xff]  ;;  %v10214_v31 = vld [vmem:[#allocation76_spill] sm:$0xff]  ;;  %v4609_v30 = vadd.f32 %v8298_v46, %v10224_v37 }
 0x3fa   :  { %v4522_v12 = vpop.permute.xlu1 %4521  ;;  %v4602_v50 = vadd.f32 %v4482_v5, %v10213_v21  ;;  %v4603_v36 = vadd.f32 %v4482_v5, %v10214_v31  ;;  %v10222_v31 = vld [vmem:[#allocation80_spill] sm:$0xff] }
 0x3fb   :  { %v8356_v23 = vpop.permute.xlu0 %4565 }
 0x3fc   :  { %10206 = vst [vmem:[#allocation103_spill] sm:$0xff] %v8356_v23  ;;  %5111 = vperm.xlu1 %5442, %v10207_v16   ;;  %v10216_v16 = vld [vmem:[#allocation71_spill] sm:$0xff]  ;;  %v4607_v23 = vadd.f32 %v4490_v60, %v10222_v31 }
 0x3fd   :  { %4897 = vperm.xlu0 %5441, %v10208_v44   ;;  %v4596_v44 = vadd.f32 %v8258_v38, %v10216_v16  ;;  %v4697_v38 = vmin.f32 %v4597_v24, %v4601_v9  ;;  %v10228_v9 = vld [vmem:[#allocation90_spill] sm:$0xff] }
 0x3fe   :  { %v8360_v13 = vpop.permute.xlu1 %4529 }
 0x3ff   :  { %v8362_v49 = vpop.permute.xlu0 %4573  ;;  %v4660_v29 = vmin.f32 %v4596_v44, %v4600_v2  ;;  %v4699_v31 = vmin.f32 %v4697_v38, %v4605_v19  ;;  %v10227_v2 = vld [vmem:[#allocation89_spill] sm:$0xff]  ;;  %v4613_v44 = vadd.f32 %v8314_v18, %v10228_v9 }
 0x400   :  { %10209 = vst [vmem:[#allocation107_spill] sm:$0xff] %v8362_v49  ;;  %5119 = vperm.xlu1 %5442, %v10212_v34   ;;  %v10220_v34 = vld [vmem:[#allocation77_spill] sm:$0xff]  ;;  %v10221_v49 = vld [vmem:[#allocation78_spill] sm:$0xff]  ;;  %v4612_v24 = vadd.f32 %v8314_v18, %v10227_v2 }
 0x401   :  { %5163 = vperm.xlu0 %5441, %v10215_v62   ;;  %v4598_v21 = vadd.f32 %v4474_v7, %v10220_v34  ;;  %v4599_v5 = vadd.f32 %v4474_v7, %v10221_v49  ;;  %v4606_v62 = vadd.f32 %v4490_v60, %v10154_v17  ;;  %v4610_v7 = vadd.f32 %v4498_v61, %v10157_v52  ;;  %v10226_v49 = vld [vmem:[#allocation40_spill] sm:$0xff] }
 0x402   :  { %v8380_v53 = vpop.permute.xlu1 %4537  ;;  %v4611_v17 = vadd.f32 %v4498_v61, %v10158_v39  ;;  %v4662_v60 = vmin.f32 %v4660_v29, %v4604_v42  ;;  %v10230_v42 = vld [vmem:[#allocation94_spill] sm:$0xff] }
 0x403   :  { %v8386_v16 = vpop.permute.xlu0 %4581  ;;  %v4661_v51 = vmin.f32 %v4598_v21, %v4602_v50  ;;  %v4698_v34 = vmin.f32 %v4599_v5, %v4603_v36  ;;  %v4615_v36 = vadd.f32 %v4506_v20, %v10082_v54  ;;  %v4701_v50 = vmin.f32 %v4699_v31, %v4609_v30  ;;  %v10231_v5 = vld [vmem:[#allocation62_spill] sm:$0xff] }
 0x404   :  { %5127 = vperm.xlu1 %5442, %v10225_v58   ;;  %v4614_v58 = vadd.f32 %v4506_v20, %v10081_v22  ;;  %v4664_v61 = vmin.f32 %v4662_v60, %v4608_v14  ;;  %v4617_v19 = vadd.f32 %v8324_v40, %v10230_v42  ;;  %v10233_v14 = vld [vmem:[#allocation97_spill] sm:$0xff]  ;;  %v10234_v30 = vld [vmem:[#allocation98_spill] sm:$0xff] }
 0x405   :  { %4905 = vperm.xlu0 %5441, %v10226_v49   ;;  %v4663_v46 = vmin.f32 %v4661_v51, %v4606_v62  ;;  %v4700_v37 = vmin.f32 %v4698_v34, %v4607_v23  ;;  %v10229_v49 = vld [vmem:[#allocation93_spill] sm:$0xff]  ;;  %v4618_v51 = vadd.f32 %v4514_v48, %v9429_v8  ;;  %v4619_v23 = vadd.f32 %v4514_v48, %v10083_v26 }
 0x406   :  { %v4546_v1 = vpop.permute.xlu1 %4545  ;;  %v4616_v29 = vadd.f32 %v8324_v40, %v10229_v49  ;;  %v10232_v34 = vld [vmem:[#allocation69_spill] sm:$0xff]  ;;  %v4666_v20 = vmin.f32 %v4664_v61, %v4612_v24  ;;  %v4703_v62 = vmin.f32 %v4701_v50, %v4613_v44  ;;  %v4620_v31 = vadd.f32 %v8328_v15, %v10233_v14  ;;  %v10235_v61 = vld [vmem:[#allocation64_spill] sm:$0xff] }
 0x407   :  { %v8402_v21 = vpop.permute.xlu0 %4589  ;;  %v4665_v18 = vmin.f32 %v4663_v46, %v4610_v7  ;;  %v4702_v38 = vmin.f32 %v4700_v37, %v4611_v17  ;;  %v4621_v60 = vadd.f32 %v8328_v15, %v10234_v30  ;;  %v4622_v7 = vadd.f32 %v4522_v12, %v9431_v59 }
 0x408   :  { %5135 = vperm.xlu1 %5442, %v10231_v5   ;;  %v4623_v17 = vadd.f32 %v4522_v12, %v9503_v63  ;;  %v4668_v37 = vmin.f32 %v4666_v20, %v4616_v29  ;;  %v4705_v46 = vmin.f32 %v4703_v62, %v4617_v19  ;;  %v4624_v48 = vadd.f32 %v8332_v27, %v9434_v41 }
 0x409   :  { %5171 = vperm.xlu0 %5441, %v10232_v34   ;;  %v4667_v40 = vmin.f32 %v4665_v18, %v4614_v58  ;;  %v4704_v42 = vmin.f32 %v4702_v38, %v4615_v36  ;;  %v4625_v24 = vadd.f32 %v8332_v27, %v9505_v57  ;;  %v4626_v58 = vadd.f32 %v8360_v13, %v9437_v25 }
 0x40a   :  { %v4554_v49 = vpop.permute.xlu1 %4553  ;;  %v4627_v12 = vadd.f32 %v8360_v13, %v9438_v0  ;;  %v4670_v36 = vmin.f32 %v4668_v37, %v4620_v31  ;;  %v4707_v29 = vmin.f32 %v4705_v46, %v4621_v60  ;;  %v4628_v19 = vadd.f32 %v8336_v10, %v9369_v6  ;;  %v10259_v6 = vld [vmem:[#allocation43_spill] sm:$0xff] }
 0x40b   :  { %v4669_v15 = vmin.f32 %v4667_v40, %v4618_v51  ;;  %v4706_v50 = vmin.f32 %v4704_v42, %v4619_v23  ;;  %v4629_v27 = vadd.f32 %v8336_v10, %v9439_v28  ;;  %v4630_v42 = vadd.f32 %v8380_v53, %v9507_v56  ;;  %v10236_v10 = vld [vmem:[#allocation66_spill] sm:$0xff] }
 0x40c   :  { %v8422_v44 = vpop.permute.xlu0 %4781  ;;  %5143 = vperm.xlu1 %5442, %v10235_v61   ;;  %v4631_v51 = vadd.f32 %v8380_v53, %v9441_v4  ;;  %v4672_v23 = vmin.f32 %v4670_v36, %v4624_v48  ;;  %v4709_v34 = vmin.f32 %v4707_v29, %v4625_v24  ;;  %v4632_v13 = vadd.f32 %v8340_v43, %v9795_v11  ;;  %v10238_v36 = vld [vmem:[#allocation117_spill] sm:$0xff]  ;;  %v10239_v29 = vld [vmem:[#allocation102_spill] sm:$0xff] }
 0x40d   :  { %v4671_v18 = vmin.f32 %v4669_v15, %v4622_v7  ;;  %v4708_v38 = vmin.f32 %v4706_v50, %v4623_v17  ;;  %v4633_v20 = vadd.f32 %v8340_v43, %v9796_v35  ;;  %v4634_v40 = vadd.f32 %v4546_v1, %v9650_v32  ;;  %v10237_v15 = vld [vmem:[#allocation112_spill] sm:$0xff]  ;;  %v10250_v35 = vld [vmem:[#allocation107_spill] sm:$0xff] }
 0x40e   :  { %v4562_v5 = vpop.permute.xlu1 %4561  ;;  %v4635_v7 = vadd.f32 %v4546_v1, %v9651_v3  ;;  %v4674_v17 = vmin.f32 %v4672_v23, %v4628_v19  ;;  %v4711_v53 = vmin.f32 %v4709_v34, %v4629_v27  ;;  %v4636_v37 = vadd.f32 %v8345_v45, %v10092_v33  ;;  %v10240_v19 = vld [vmem:[#allocation118_spill] sm:$0xff]  ;;  %v10243_v34 = vld [vmem:[#allocation116_spill] sm:$0xff] }
 0x40f   :  { %v4673_v31 = vmin.f32 %v4671_v18, %v4626_v58  ;;  %v4710_v60 = vmin.f32 %v4708_v38, %v4627_v12  ;;  %v4637_v46 = vadd.f32 %v8345_v45, %v10093_v47  ;;  %v4638_v61 = vadd.f32 %v4554_v49, %v10166_v55  ;;  %v10241_v38 = vld [vmem:[#allocation36_spill] sm:$0xff]  ;;  %v10247_v47 = vld [vmem:[#allocation119_spill] sm:$0xff] }
 0x410   :  { %v8441_v62 = vpop.permute.xlu0 %4793  ;;  %5151 = vperm.xlu1 %5442, %v10236_v10   ;;  %v4639_v50 = vadd.f32 %v4554_v49, %v10237_v15  ;;  %v4676_v58 = vmin.f32 %v4674_v17, %v4632_v13  ;;  %v4713_v12 = vmin.f32 %v4711_v53, %v4633_v20  ;;  %v4640_v1 = vadd.f32 %v10239_v29, %v10238_v36  ;;  %v10244_v13 = vld [vmem:[#allocation121_spill] sm:$0xff]  ;;  %v10245_v20 = vld [vmem:[#allocation103_spill] sm:$0xff]  ;;  %v10246_v17 = vld [vmem:[#allocation122_spill] sm:$0xff] }
 0x411   :  { %v4675_v43 = vmin.f32 %v4673_v31, %v4630_v42  ;;  %v4712_v24 = vmin.f32 %v4710_v60, %v4631_v51  ;;  %v4641_v27 = vadd.f32 %v10239_v29, %v10240_v19  ;;  %v10242_v42 = vld [vmem:[#allocation115_spill] sm:$0xff]  ;;  %v4643_v10 = vadd.f32 %v4562_v5, %v10243_v34 }
 0x412   :  { %v4570_v48 = vpop.permute.xlu1 %4569  ;;  %v4642_v51 = vadd.f32 %v4562_v5, %v10242_v42  ;;  %v4678_v31 = vmin.f32 %v4676_v58, %v4636_v37  ;;  %v4715_v49 = vmin.f32 %v4713_v12, %v4637_v46  ;;  %v4644_v60 = vadd.f32 %v10245_v20, %v10244_v13  ;;  %v10251_v37 = vld [vmem:[#allocation126_spill] sm:$0xff]  ;;  %v10252_v12 = vld [vmem:[#allocation68_spill] sm:$0xff] }
 0x413   :  { %v4677_v45 = vmin.f32 %v4675_v43, %v4634_v40  ;;  %v4714_v23 = vmin.f32 %v4712_v24, %v4635_v7  ;;  %v4645_v53 = vadd.f32 %v10245_v20, %v10246_v17  ;;  %v4646_v33 = vadd.f32 %v4570_v48, %v10247_v47  ;;  %v10249_v24 = vld [vmem:[#allocation125_spill] sm:$0xff]  ;;  %v10253_v17 = vld [vmem:[#allocation123_spill] sm:$0xff] }
 0x414   :  { %v8456_v18 = vpop.permute.xlu0 %4801  ;;  %4893 = vperm.xlu1 %5442, %v10241_v38   ;;  %v10248_v38 = vld [vmem:[#allocation120_spill] sm:$0xff]  ;;  %v4680_v7 = vmin.f32 %v4678_v31, %v4640_v1  ;;  %v4717_v43 = vmin.f32 %v4715_v49, %v4641_v27  ;;  %v4648_v5 = vadd.f32 %v10250_v35, %v10249_v24  ;;  %v4649_v46 = vadd.f32 %v10250_v35, %v10251_v37  ;;  %v10256_v27 = vld [vmem:[#allocation130_spill] sm:$0xff]  ;;  %v10257_v37 = vld [vmem:[#allocation127_spill] sm:$0xff] }
 0x415   :  { %v4679_v29 = vmin.f32 %v4677_v45, %v4638_v61  ;;  %v4716_v19 = vmin.f32 %v4714_v23, %v4639_v50  ;;  %v4647_v40 = vadd.f32 %v4570_v48, %v10248_v38  ;;  %v10254_v50 = vld [vmem:[#allocation124_spill] sm:$0xff]  ;;  %v10255_v48 = vld [vmem:[#allocation129_spill] sm:$0xff]  ;;  %v4653_v31 = vadd.f32 %v8386_v16, %v10256_v27 }
 0x416   :  { %v4578_v36 = vpop.permute.xlu1 %4577  ;;  %v4682_v23 = vmin.f32 %v4680_v7, %v4644_v60  ;;  %v4719_v11 = vmin.f32 %v4717_v43, %v4645_v53  ;;  %v4652_v1 = vadd.f32 %v8386_v16, %v10255_v48  ;;  %v10261_v53 = vld [vmem:[#allocation134_spill] sm:$0xff]  ;;  %v10262_v48 = vld [vmem:[#allocation131_spill] sm:$0xff] }
 0x417   :  { %v4681_v13 = vmin.f32 %v4679_v29, %v4642_v51  ;;  %v4718_v20 = vmin.f32 %v4716_v19, %v4643_v10  ;;  %v4650_v61 = vadd.f32 %v4578_v36, %v10253_v17  ;;  %v4651_v45 = vadd.f32 %v4578_v36, %v10254_v50  ;;  %v10260_v36 = vld [vmem:[#allocation133_spill] sm:$0xff]  ;;  %v10265_v50 = vld [vmem:[#allocation75_spill] sm:$0xff] }
 0x418   :  { %v4810_v58 = vpop.permute.xlu0 %4809  ;;  %5159 = vperm.xlu1 %5442, %v10252_v12   ;;  %v10258_v12 = vld [vmem:[#allocation128_spill] sm:$0xff]  ;;  %v4684_v19 = vmin.f32 %v4682_v23, %v4648_v5  ;;  %v4721_v10 = vmin.f32 %v4719_v11, %v4649_v46  ;;  %v4656_v60 = vadd.f32 %v8402_v21, %v10260_v36  ;;  %v4657_v7 = vadd.f32 %v8402_v21, %v10261_v53  ;;  %v10264_v23 = vld [vmem:[#allocation70_spill] sm:$0xff] }
 0x419   :  { %v4683_v24 = vmin.f32 %v4681_v13, %v4646_v33  ;;  %v4720_v35 = vmin.f32 %v4718_v20, %v4647_v40  ;;  %v10263_v5 = vld [vmem:[#allocation132_spill] sm:$0xff]  ;;  %v4914_v21 = vadd.f32 %v8441_v62, %v10265_v50 }
 0x41a   :  { %v4586_v49 = vpop.permute.xlu1 %4585  ;;  %v4686_v27 = vmin.f32 %v4684_v19, %v4652_v1  ;;  %v4723_v33 = vmin.f32 %v4721_v10, %v4653_v31  ;;  %v10267_v31 = vld [vmem:[#allocation77_spill] sm:$0xff] }
 0x41b   :  { %v4654_v28 = vadd.f32 %v4586_v49, %v10257_v37  ;;  %v4655_v51 = vadd.f32 %v4586_v49, %v10258_v12  ;;  %v4685_v43 = vmin.f32 %v4683_v24, %v4650_v61  ;;  %v4722_v16 = vmin.f32 %v4720_v35, %v4651_v45  ;;  %v10266_v24 = vld [vmem:[#allocation76_spill] sm:$0xff] }
 0x41c   :  { %v4818_v29 = vpop.permute.xlu0 %4817  ;;  %4901 = vperm.xlu1 %5442, %v10259_v6   ;;  %v4688_v6 = vmin.f32 %v4686_v27, %v4656_v60  ;;  %v4725_v12 = vmin.f32 %v4723_v33, %v4657_v7  ;;  %v4915_v61 = vadd.f32 %v8441_v62, %v10266_v24  ;;  %v10270_v60 = vld [vmem:[#allocation73_spill] sm:$0xff]  ;;  %v10272_v62 = vld [vmem:[#allocation80_spill] sm:$0xff] }
 0x41d   :  { %v4687_v40 = vmin.f32 %v4685_v43, %v4654_v28  ;;  %v4724_v20 = vmin.f32 %v4722_v16, %v4655_v51  ;;  %v10268_v51 = vld [vmem:[#allocation78_spill] sm:$0xff]  ;;  %v10269_v43 = vld [vmem:[#allocation71_spill] sm:$0xff]  ;;  %v4909_v7 = vadd.f32 %v8422_v44, %v10270_v60 }
 0x41e   :  { %v4594_v13 = vpop.permute.xlu1 %4593  ;;  %v4908_v27 = vadd.f32 %v8422_v44, %v10269_v43  ;;  %v10273_v44 = vld [vmem:[#allocation72_spill] sm:$0xff] }
 0x41f   :  { %v4658_v49 = vadd.f32 %v4594_v13, %v10262_v48  ;;  %v4659_v11 = vadd.f32 %v4594_v13, %v10263_v5  ;;  %v10271_v13 = vld [vmem:[#allocation79_spill] sm:$0xff]  ;;  %v10274_v48 = vld [vmem:[#allocation74_spill] sm:$0xff] }
 0x420   :  { %v4826_v46 = vpop.permute.xlu0 %4825  ;;  %5167 = vperm.xlu1 %5442, %v10264_v23  }
 0x421   :  { %v4689_v36 = vmin.f32 %v4687_v40, %v4658_v49  ;;  %v4726_v37 = vmin.f32 %v4724_v20, %v4659_v11  ;;  %v4918_v40 = vadd.f32 %v8456_v18, %v10271_v13  ;;  %v4922_v20 = vadd.f32 %v4810_v58, %v10157_v52 }
 0x422   :  { %v4923_v49 = vadd.f32 %v4810_v58, %v10158_v39  ;;  %v4926_v13 = vadd.f32 %v4818_v29, %v10081_v22 }
 0x423   :  { %v4690_v45 = vmin.f32 %v4688_v6, %v4689_v36  ;;  %v4727_v28 = vmin.f32 %v4725_v12, %v4726_v37  ;;  %v4786_v1 = vpop.permute.xlu1 %4785  ;;  %v4919_v37 = vadd.f32 %v8456_v18, %v10272_v62  ;;  %v4927_v18 = vadd.f32 %v4818_v29, %v10082_v54 }
 0x424   :  { %v4910_v35 = vadd.f32 %v4786_v1, %v10267_v31  ;;  %v4911_v19 = vadd.f32 %v4786_v1, %v10268_v51  ;;  %v4834_v10 = vpop.permute.xlu0 %4833 }
 0x425   :  { %v4691_v16 = vrot.slane %v4690_v45, 4  ;;  %v4728_v33 = vrot.slane %v4727_v28, 4 }
 0x426   :  { %v4973_v12 = vmin.f32 %v4910_v35, %v4914_v21  ;;  %v5010_v36 = vmin.f32 %v4911_v19, %v4915_v61 }
 0x427   :  { %v4692_v11 = vmin.f32 %v4690_v45, %v4691_v16  ;;  %v4729_v23 = vmin.f32 %v4727_v28, %v4728_v33  ;;  %v4790_v6 = vpop.permute.xlu1 %4789  ;;  %v4930_v16 = vadd.f32 %v4826_v46, %v9429_v8  ;;  %v4931_v33 = vadd.f32 %v4826_v46, %v10083_v26 }
 0x428   :  { %v4975_v1 = vmin.f32 %v4973_v12, %v4918_v40  ;;  %v5012_v53 = vmin.f32 %v5010_v36, %v4919_v37  ;;  %v4912_v5 = vadd.f32 %v4790_v6, %v10273_v44  ;;  %v4913_v60 = vadd.f32 %v4790_v6, %v10274_v48  ;;  %v4842_v43 = vpop.permute.xlu0 %4841  ;;  %v10275_v36 = vld [vmem:[#allocation81_spill] sm:$0xff]  ;;  %v10276_v48 = vld [vmem:[#allocation82_spill] sm:$0xff] }
 0x429   :  { %v4693_v21 = vrot.slane %v4692_v11, 2  ;;  %v4730_v61 = vrot.slane %v4729_v23, 2 }
 0x42a   :  { %v4977_v35 = vmin.f32 %v4975_v1, %v4922_v20  ;;  %v5014_v19 = vmin.f32 %v5012_v53, %v4923_v49  ;;  %v4972_v52 = vmin.f32 %v4908_v27, %v4912_v5  ;;  %v5009_v58 = vmin.f32 %v4909_v7, %v4913_v60 }
 0x42b   :  { %v4694_v45 = vmin.f32 %v4692_v11, %v4693_v21  ;;  %v4731_v28 = vmin.f32 %v4729_v23, %v4730_v61  ;;  %v4798_v40 = vpop.permute.xlu1 %4797  ;;  %v4934_v53 = vadd.f32 %v4834_v10, %v9431_v59  ;;  %v4935_v5 = vadd.f32 %v4834_v10, %v9503_v63  ;;  %v10277_v21 = vld [vmem:[#allocation85_spill] sm:$0xff] }
 0x42c   :  { %v4979_v37 = vmin.f32 %v4977_v35, %v4926_v13  ;;  %v5016_v12 = vmin.f32 %v5014_v19, %v4927_v18  ;;  %v4916_v6 = vadd.f32 %v4798_v40, %v10275_v36  ;;  %v4917_v44 = vadd.f32 %v4798_v40, %v10276_v48  ;;  %v4850_v29 = vpop.permute.xlu0 %4849  ;;  %v10278_v35 = vld [vmem:[#allocation86_spill] sm:$0xff] }
 0x42d   :  { %v4695_v54 = vrot.slane %v4694_v45, 1  ;;  %v4732_v22 = vrot.slane %v4731_v28, 1  ;;  %v4938_v13 = vadd.f32 %v4842_v43, %v9437_v25  ;;  %v4939_v11 = vadd.f32 %v4842_v43, %v9438_v0 }
 0x42e   :  { %v4981_v27 = vmin.f32 %v4979_v37, %v4930_v16  ;;  %v5018_v60 = vmin.f32 %v5016_v12, %v4931_v33  ;;  %v4974_v7 = vmin.f32 %v4972_v52, %v4916_v6  ;;  %v5011_v20 = vmin.f32 %v5009_v58, %v4917_v44  ;;  %v4758_v37 = vld [vmem:[#allocation3 + $0x6] ss:$8 sm:$0x3] }
 0x42f   :  { %v4696_v49 = vmin.f32 %v4694_v45, %v4695_v54  ;;  %v4733_v46 = vmin.f32 %v4731_v28, %v4732_v22  ;;  %v4806_v23 = vpop.permute.xlu1 %4805  ;;  %v4942_v10 = vadd.f32 %v4850_v29, %v9507_v56  ;;  %v4943_v52 = vadd.f32 %v4850_v29, %v9441_v4  ;;  %v10279_v45 = vld [vmem:[#allocation135_spill] sm:$0xff] }
 0x430   :  { %v4983_v1 = vmin.f32 %v4981_v27, %v4934_v53  ;;  %v5020_v18 = vmin.f32 %v5018_v60, %v4935_v5  ;;  %v4920_v61 = vadd.f32 %v4806_v23, %v10277_v21  ;;  %v4921_v19 = vadd.f32 %v4806_v23, %v10278_v35  ;;  %v4858_v40 = vpop.permute.xlu0 %4857 }
 0x431   :  { %v4761_v59 = vcombine.low %v4696_v49, %v4733_v46  ;;  %v4946_v43 = vadd.f32 %v4858_v40, %v9650_v32  ;;  %v4947_v16 = vadd.f32 %v4858_v40, %v9651_v3 }
 0x432   :  { %v4985_v44 = vmin.f32 %v4983_v1, %v4938_v13  ;;  %v5022_v54 = vmin.f32 %v5020_v18, %v4939_v11  ;;  %v4976_v22 = vmin.f32 %v4974_v7, %v4920_v61  ;;  %v5013_v58 = vmin.f32 %v5011_v20, %v4921_v19  ;;  %v10280_v18 = vld [vmem:[#allocation93_spill] sm:$0xff]  ;;  %v10281_v19 = vld [vmem:[#allocation94_spill] sm:$0xff] }
 0x433   :  { %v4768_v28 = vrot.slane %v4761_v59, %v10279_v45  ;;  %v4814_v33 = vpop.permute.xlu1 %4813 }
 0x434   :  { %v4987_v12 = vmin.f32 %v4985_v44, %v4942_v10  ;;  %v5024_v6 = vmin.f32 %v5022_v54, %v4943_v52  ;;  %v4924_v53 = vadd.f32 %v4814_v33, %v10227_v2  ;;  %v4925_v5 = vadd.f32 %v4814_v33, %v10228_v9  ;;  %v4866_v27 = vpop.permute.xlu0 %4865 }
 0x435   :  { %v4775_v29 = vrot.slane %v4768_v28, %v10279_v45  ;;  %v4950_v60 = vadd.f32 %v4866_v27, %v10166_v55  ;;  %v4951_v7 = vadd.f32 %v4866_v27, %v10237_v15 }
 0x436   :  { %v4989_v59 = vmin.f32 %v4987_v12, %v4946_v43  ;;  %v5026_v20 = vmin.f32 %v5024_v6, %v4947_v16  ;;  %v4978_v49 = vmin.f32 %v4976_v22, %v4924_v53  ;;  %v5015_v46 = vmin.f32 %v5013_v58, %v4925_v5 }
 0x437   :  { %v4777_v13 = vmin.f32 %v4758_v37, %v4775_v29  ;;  %v4822_v11 = vpop.permute.xlu1 %4821 }
 0x438   :  { %v4991_v23 = vmin.f32 %v4989_v59, %v4950_v60  ;;  %v5028_v1 = vmin.f32 %v5026_v20, %v4951_v7  ;;  %v4928_v61 = vadd.f32 %v4822_v11, %v10280_v18  ;;  %v4929_v40 = vadd.f32 %v4822_v11, %v10281_v19  ;;  %v4874_v10 = vpop.permute.xlu0 %4873 }
 0x439   :  { %4778 = vst.msk [vmem:[#allocation3 + $0x6] ss:$8 sm:$0x3] %vm6675_vm0, %v4777_v13  ;;  %v4954_v44 = vadd.f32 %v4874_v10, %v10242_v42  ;;  %v4955_v54 = vadd.f32 %v4874_v10, %v10243_v34  ;;  %v10286_v13 = vld [vmem:[#allocation124_spill] sm:$0xff]  ;;  %v10312_v42 = vld [vmem:[#allocation74_spill] sm:$0xff] }
 0x43a   :  { %v4980_v28 = vmin.f32 %v4978_v49, %v4928_v61  ;;  %v5017_v43 = vmin.f32 %v5015_v46, %v4929_v40  ;;  %v10293_v40 = vld [vmem:[#allocation114_spill] sm:$0xff] }
 0x43b   :  { %v4993_v22 = vmin.f32 %v4991_v23, %v4954_v44  ;;  %v5030_v58 = vmin.f32 %v5028_v1, %v4955_v54  ;;  %v4830_v16 = vpop.permute.xlu1 %4829  ;;  %v10288_v44 = vld [vmem:[#allocation105_spill] sm:$0xff] }
 0x43c   :  { %v4932_v33 = vadd.f32 %v4830_v16, %v10233_v14  ;;  %v4933_v37 = vadd.f32 %v4830_v16, %v10234_v30  ;;  %v4882_v12 = vpop.permute.xlu0 %4881 }
 0x43d   :  { %v4958_v6 = vadd.f32 %v4882_v12, %v10247_v47  ;;  %v4959_v53 = vadd.f32 %v4882_v12, %v10248_v38 }
 0x43e   :  { %v4982_v5 = vmin.f32 %v4980_v28, %v4932_v33  ;;  %v5019_v27 = vmin.f32 %v5017_v43, %v4933_v37  ;;  %v10289_v28 = vld [vmem:[#allocation106_spill] sm:$0xff]  ;;  %v10290_v37 = vld [vmem:[#allocation109_spill] sm:$0xff] }
 0x43f   :  { %v8538_v29 = vmin.f32 %v4993_v22, %v4958_v6  ;;  %v8540_v60 = vmin.f32 %v5030_v58, %v4959_v53  ;;  %v4838_v7 = vpop.permute.xlu1 %4837  ;;  %v10291_v6 = vld [vmem:[#allocation110_spill] sm:$0xff] }
 0x440   :  { %v4936_v59 = vadd.f32 %v4838_v7, %v9434_v41  ;;  %v4937_v20 = vadd.f32 %v4838_v7, %v9505_v57  ;;  %v4890_v49 = vpop.permute.xlu0 %4889 }
 0x441   :  { %10283 = vst [vmem:[#allocation108_spill] sm:$0xff] %v8538_v29  ;;  %10284 = vst [vmem:[#allocation91_spill] sm:$0xff] %v8540_v60  ;;  %v8545_v46 = vadd.f32 %v4890_v49, %v10253_v17  ;;  %v8548_v11 = vadd.f32 %v4890_v49, %v10286_v13  ;;  %v10294_v60 = vld [vmem:[#allocation117_spill] sm:$0xff] }
 0x442   :  { %v4984_v23 = vmin.f32 %v4982_v5, %v4936_v59  ;;  %v5021_v1 = vmin.f32 %v5019_v27, %v4937_v20  ;;  %v10292_v20 = vld [vmem:[#allocation113_spill] sm:$0xff] }
 0x443   :  { %10285 = vst [vmem:[#allocation101_spill] sm:$0xff] %v8545_v46  ;;  %10287 = vst [vmem:[#allocation99_spill] sm:$0xff] %v8548_v11  ;;  %v4846_v10 = vpop.permute.xlu1 %4845  ;;  %v10296_v13 = vld [vmem:[#allocation121_spill] sm:$0xff] }
 0x444   :  { %v4940_v54 = vadd.f32 %v4846_v10, %v10288_v44  ;;  %v4941_v43 = vadd.f32 %v4846_v10, %v10289_v28  ;;  %v5052_v22 = vpop.permute.xlu0 %5051  ;;  %v10308_v28 = vld [vmem:[#allocation83_spill] sm:$0xff] }
 0x446   :  { %v4986_v58 = vmin.f32 %v4984_v23, %v4940_v54  ;;  %v5023_v16 = vmin.f32 %v5021_v1, %v4941_v43  ;;  %v10295_v1 = vld [vmem:[#allocation118_spill] sm:$0xff] }
 0x447   :  { %v4854_v33 = vpop.permute.xlu1 %4853 }
 0x448   :  { %v4944_v12 = vadd.f32 %v4854_v33, %v10290_v37  ;;  %v4945_v53 = vadd.f32 %v4854_v33, %v10291_v6  ;;  %v5060_v5 = vpop.permute.xlu0 %5059 }
 0x44a   :  { %v4988_v27 = vmin.f32 %v4986_v58, %v4944_v12  ;;  %v5025_v7 = vmin.f32 %v5023_v16, %v4945_v53  ;;  %v10297_v16 = vld [vmem:[#allocation122_spill] sm:$0xff] }
 0x44b   :  { %v4862_v59 = vpop.permute.xlu1 %4861 }
 0x44c   :  { %v4948_v49 = vadd.f32 %v4862_v59, %v10292_v20  ;;  %v4949_v61 = vadd.f32 %v4862_v59, %v10293_v40  ;;  %v5068_v52 = vpop.permute.xlu0 %5067  ;;  %v10306_v40 = vld [vmem:[#allocation79_spill] sm:$0xff] }
 0x44d   :  { %v5184_v17 = vadd.f32 %v5068_v52, %v10306_v40  ;;  %v5185_v6 = vadd.f32 %v5068_v52, %v10272_v62 }
 0x44e   :  { %v4990_v45 = vmin.f32 %v4988_v27, %v4948_v49  ;;  %v5027_v11 = vmin.f32 %v5025_v7, %v4949_v61  ;;  %v10300_v61 = vld [vmem:[#allocation125_spill] sm:$0xff]  ;;  %v10302_v49 = vld [vmem:[#allocation126_spill] sm:$0xff] }
 0x44f   :  { %v4870_v10 = vpop.permute.xlu1 %4869 }
 0x450   :  { %v4952_v23 = vadd.f32 %v4870_v10, %v10294_v60  ;;  %v4953_v54 = vadd.f32 %v4870_v10, %v10295_v1  ;;  %v5076_v43 = vpop.permute.xlu0 %5075 }
 0x451   :  { %v5188_v44 = vadd.f32 %v5076_v43, %v10308_v28 }
 0x452   :  { %v4992_v46 = vmin.f32 %v4990_v45, %v4952_v23  ;;  %v5029_v29 = vmin.f32 %v5027_v11, %v4953_v54  ;;  %v5180_v11 = vadd.f32 %v5060_v5, %v10265_v50  ;;  %v5189_v50 = vadd.f32 %v5076_v43, %v10158_v39  ;;  %v10313_v39 = vld [vmem:[#allocation71_spill] sm:$0xff] }
 0x453   :  { %v4878_v33 = vpop.permute.xlu1 %4877 }
 0x454   :  { %v4956_v58 = vadd.f32 %v4878_v33, %v10296_v13  ;;  %v4957_v12 = vadd.f32 %v4878_v33, %v10297_v16  ;;  %v5084_v53 = vpop.permute.xlu0 %5083 }
 0x456   :  { %v8564_v20 = vmin.f32 %v4992_v46, %v4956_v58  ;;  %v8566_v59 = vmin.f32 %v5029_v29, %v4957_v12 }
 0x457   :  { %v4886_v27 = vpop.permute.xlu1 %4885 }
 0x458   :  { %10298 = vst [vmem:[#allocation100_spill] sm:$0xff] %v8564_v20  ;;  %10299 = vst [vmem:[#allocation92_spill] sm:$0xff] %v8566_v59  ;;  %v8569_v7 = vadd.f32 %v4886_v27, %v10300_v61  ;;  %v8572_v60 = vadd.f32 %v4886_v27, %v10302_v49  ;;  %v5092_v10 = vpop.permute.xlu0 %5091  ;;  %v5177_v20 = vadd.f32 %v5052_v22, %v10268_v51 }
 0x459   :  { %v5197_v28 = vadd.f32 %v5092_v10, %v10083_v26 }
 0x45a   :  { %10301 = vst [vmem:[#allocation104_spill] sm:$0xff] %v8569_v7  ;;  %10303 = vst [vmem:[#allocation8_spill] sm:$0xff] %v8572_v60  ;;  %v5181_v60 = vadd.f32 %v5060_v5, %v10266_v24  ;;  %v5176_v7 = vadd.f32 %v5052_v22, %v10267_v31  ;;  %v10311_v22 = vld [vmem:[#allocation72_spill] sm:$0xff] }
 0x45b   :  { %v5048_v23 = vpop.permute.xlu1 %5047 }
 0x45c   :  { %v5100_v54 = vpop.permute.xlu0 %5099  ;;  %v5239_v38 = vmin.f32 %v5176_v7, %v5180_v11  ;;  %v5276_v47 = vmin.f32 %v5177_v20, %v5181_v60  ;;  %v5196_v60 = vadd.f32 %v5092_v10, %v9429_v8  ;;  %v5174_v43 = vadd.f32 %v5048_v23, %v10313_v39  ;;  %v10318_v39 = vld [vmem:[#allocation116_spill] sm:$0xff] }
 0x45d   :  { %v5201_v8 = vadd.f32 %v5100_v54, %v9503_v63 }
 0x45e   :  { %v5241_v24 = vmin.f32 %v5239_v38, %v5184_v17  ;;  %v5278_v5 = vmin.f32 %v5276_v47, %v5185_v6  ;;  %v10314_v17 = vld [vmem:[#allocation73_spill] sm:$0xff] }
 0x45f   :  { %v5056_v46 = vpop.permute.xlu1 %5055  ;;  %v5175_v47 = vadd.f32 %v5048_v23, %v10314_v17 }
 0x460   :  { %v5108_v33 = vpop.permute.xlu0 %5107  ;;  %v5178_v40 = vadd.f32 %v5056_v46, %v10311_v22  ;;  %v5179_v62 = vadd.f32 %v5056_v46, %v10312_v42  ;;  %v5243_v52 = vmin.f32 %v5241_v24, %v5188_v44  ;;  %v10315_v44 = vld [vmem:[#allocation95_spill] sm:$0xff] }
 0x462   :  { %v5238_v7 = vmin.f32 %v5174_v43, %v5178_v40  ;;  %v5275_v26 = vmin.f32 %v5175_v47, %v5179_v62 }
 0x463   :  { %v5064_v29 = vpop.permute.xlu1 %5063 }
 0x464   :  { %v5116_v58 = vpop.permute.xlu0 %5115  ;;  %v5182_v38 = vadd.f32 %v5064_v29, %v10275_v36  ;;  %v5183_v6 = vadd.f32 %v5064_v29, %v10276_v48  ;;  %v5204_v36 = vadd.f32 %v5108_v33, %v9437_v25  ;;  %v5205_v48 = vadd.f32 %v5108_v33, %v9438_v0 }
 0x466   :  { %v5240_v29 = vmin.f32 %v5238_v7, %v5182_v38 }
 0x467   :  { %v5072_v12 = vpop.permute.xlu1 %5071 }
 0x468   :  { %v8578_v16 = vpop.permute.xlu0 %5123  ;;  %v5186_v10 = vadd.f32 %v5072_v12, %v10277_v21  ;;  %v5187_v11 = vadd.f32 %v5072_v12, %v10278_v35  ;;  %v5209_v21 = vadd.f32 %v5116_v58, %v9441_v4 }
 0x46a   :  { %v5242_v12 = vmin.f32 %v5240_v29, %v5186_v10 }
 0x46b   :  { %v5080_v61 = vpop.permute.xlu1 %5079 }
 0x46c   :  { %v8580_v27 = vpop.permute.xlu0 %5131  ;;  %v5191_v24 = vadd.f32 %v5080_v61, %v10228_v9  ;;  %v5213_v9 = vadd.f32 %v8578_v16, %v9651_v3 }
 0x46f   :  { %v5088_v13 = vpop.permute.xlu1 %5087 }
 0x470   :  { %v8584_v1 = vpop.permute.xlu0 %5139  ;;  %v5194_v25 = vadd.f32 %v5088_v13, %v10280_v18  ;;  %v5195_v0 = vadd.f32 %v5088_v13, %v10281_v19  ;;  %v5216_v19 = vadd.f32 %v8580_v27, %v10166_v55 }
 0x471   :  { %10304 = vst [vmem:[#allocation96_spill] sm:$0xff] %v8584_v1  ;;  %v10310_v1 = vld [vmem:[#allocation88_spill] sm:$0xff] }
 0x472   :  { %v5193_v51 = vadd.f32 %v5084_v53, %v10310_v1 }
 0x473   :  { %v8582_v49 = vpop.permute.xlu1 %5095 }
 0x474   :  { %v8596_v37 = vpop.permute.xlu0 %5147  ;;  %v5198_v4 = vadd.f32 %v8582_v49, %v10233_v14 }
 0x475   :  { %10307 = vst [vmem:[#allocation11_spill] sm:$0xff] %v8596_v37  ;;  %v5280_v37 = vmin.f32 %v5278_v5, %v5189_v50  ;;  %v5277_v50 = vmin.f32 %v5275_v26, %v5183_v6  ;;  %v10321_v6 = vld [vmem:[#allocation106_spill] sm:$0xff] }
 0x477   :  { %v8586_v45 = vpop.permute.xlu1 %5103  ;;  %v5282_v42 = vmin.f32 %v5280_v37, %v5193_v51  ;;  %v5190_v37 = vadd.f32 %v5080_v61, %v10227_v2  ;;  %v5279_v51 = vmin.f32 %v5277_v50, %v5187_v11  ;;  %v5212_v2 = vadd.f32 %v8578_v16, %v9650_v32  ;;  %v10325_v11 = vld [vmem:[#allocation109_spill] sm:$0xff]  ;;  %v10327_v50 = vld [vmem:[#allocation123_spill] sm:$0xff] }
 0x478   :  { %v8608_v20 = vpop.permute.xlu0 %5155  ;;  %v5217_v32 = vadd.f32 %v8580_v27, %v10237_v15  ;;  %v5202_v3 = vadd.f32 %v8586_v45, %v9434_v41  ;;  %v5203_v14 = vadd.f32 %v8586_v45, %v9505_v57  ;;  %v10319_v15 = vld [vmem:[#allocation105_spill] sm:$0xff]  ;;  %v10322_v45 = vld [vmem:[#allocation119_spill] sm:$0xff] }
 0x479   :  { %v5284_v23 = vmin.f32 %v5282_v42, %v5197_v28  ;;  %v5244_v61 = vmin.f32 %v5242_v12, %v5190_v37  ;;  %v5281_v40 = vmin.f32 %v5279_v51, %v5191_v24  ;;  %v5228_v37 = vadd.f32 %v8608_v20, %v10327_v50  ;;  %v10328_v24 = vld [vmem:[#allocation124_spill] sm:$0xff]  ;;  %v10330_v51 = vld [vmem:[#allocation114_spill] sm:$0xff] }
 0x47b   :  { %v8590_v59 = vpop.permute.xlu1 %5111  ;;  %v5246_v13 = vmin.f32 %v5244_v61, %v5194_v25 }
 0x47c   :  { %10305 = vst [vmem:[#allocation9_spill] sm:$0xff] %v8590_v59  ;;  %v10309_v59 = vld [vmem:[#allocation87_spill] sm:$0xff]  ;;  %v4898_v35 = vpop.permute.xlu0 %4897 }
 0x47d   :  { %v5192_v31 = vadd.f32 %v5084_v53, %v10309_v59  ;;  %v5200_v59 = vadd.f32 %v5100_v54, %v10315_v44  ;;  %v5286_v54 = vmin.f32 %v5284_v23, %v5201_v8  ;;  %v5248_v17 = vmin.f32 %v5246_v13, %v5198_v4  ;;  %v10323_v44 = vld [vmem:[#allocation11_spill] sm:$0xff]  ;;  %v10324_v8 = vld [vmem:[#allocation120_spill] sm:$0xff]  ;;  %v10326_v23 = vld [vmem:[#allocation110_spill] sm:$0xff] }
 0x47e   :  { %v5225_v7 = vadd.f32 %v10323_v44, %v10324_v8 }
 0x47f   :  { %v8600_v34 = vpop.permute.xlu1 %5119  ;;  %v5245_v53 = vmin.f32 %v5243_v52, %v5192_v31  ;;  %v5208_v31 = vadd.f32 %v5116_v58, %v9507_v56  ;;  %v5288_v22 = vmin.f32 %v5286_v54, %v5205_v48  ;;  %v5199_v56 = vadd.f32 %v8582_v49, %v10234_v30  ;;  %v10316_v30 = vld [vmem:[#allocation115_spill] sm:$0xff]  ;;  %v10317_v49 = vld [vmem:[#allocation96_spill] sm:$0xff] }
 0x480   :  { %v5283_v52 = vmin.f32 %v5281_v40, %v5195_v0  ;;  %v5220_v28 = vadd.f32 %v10317_v49, %v10316_v30  ;;  %v5221_v43 = vadd.f32 %v10317_v49, %v10318_v39  ;;  %v5164_v55 = vpop.permute.xlu0 %5163  ;;  %v5250_v26 = vmin.f32 %v5248_v17, %v5202_v3  ;;  %v10337_v49 = vld [vmem:[#allocation108_spill] sm:$0xff]  ;;  %v10341_v17 = vld [vmem:[#allocation99_spill] sm:$0xff] }
 0x481   :  { %v5247_v46 = vmin.f32 %v5245_v53, %v5196_v60  ;;  %v5290_v62 = vmin.f32 %v5288_v22, %v5209_v21  ;;  %v10329_v21 = vld [vmem:[#allocation113_spill] sm:$0xff] }
 0x482   :  { %v5285_v47 = vmin.f32 %v5283_v52, %v5199_v56 }
 0x483   :  { %v8614_v1 = vpop.permute.xlu1 %5127  ;;  %v5249_v63 = vmin.f32 %v5247_v46, %v5200_v59  ;;  %v5292_v60 = vmin.f32 %v5290_v62, %v5213_v9  ;;  %v10320_v27 = vld [vmem:[#allocation9_spill] sm:$0xff]  ;;  %v5224_v59 = vadd.f32 %v10323_v44, %v10322_v45  ;;  %v5210_v46 = vadd.f32 %v8600_v34, %v10325_v11  ;;  %v10332_v9 = vld [vmem:[#allocation128_spill] sm:$0xff]  ;;  %v10334_v62 = vld [vmem:[#allocation118_spill] sm:$0xff] }
 0x484   :  { %v5206_v38 = vadd.f32 %v10320_v27, %v10319_v15  ;;  %v5207_v41 = vadd.f32 %v10320_v27, %v10321_v6  ;;  %v5287_v10 = vmin.f32 %v5285_v47, %v5203_v14  ;;  %v5214_v12 = vadd.f32 %v8614_v1, %v10329_v21  ;;  %v4906_v40 = vpop.permute.xlu0 %4905  ;;  %v10335_v14 = vld [vmem:[#allocation121_spill] sm:$0xff]  ;;  %v10346_v44 = vld [vmem:[#allocation126_spill] sm:$0xff] }
 0x485   :  { %v5251_v33 = vmin.f32 %v5249_v63, %v5204_v36  ;;  %v5294_v57 = vmin.f32 %v5292_v60, %v5217_v32  ;;  %v5211_v36 = vadd.f32 %v8600_v34, %v10326_v23  ;;  %v5229_v63 = vadd.f32 %v8608_v20, %v10328_v24  ;;  %v10331_v34 = vld [vmem:[#allocation127_spill] sm:$0xff]  ;;  %v10343_v27 = vld [vmem:[#allocation129_spill] sm:$0xff]  ;;  %v10350_v24 = vld [vmem:[#allocation104_spill] sm:$0xff] }
 0x486   :  { %v5252_v54 = vmin.f32 %v5250_v26, %v5206_v38  ;;  %v5215_v25 = vadd.f32 %v8614_v1, %v10330_v51  ;;  %v4967_v61 = vadd.f32 %v4898_v35, %v10332_v9  ;;  %v5233_v8 = vadd.f32 %v5164_v55, %v10332_v9 }
 0x487   :  { %v5136_v5 = vpop.permute.xlu1 %5135  ;;  %v5253_v18 = vmin.f32 %v5251_v33, %v5208_v31  ;;  %v5296_v29 = vmin.f32 %v5294_v57, %v5221_v43  ;;  %v5289_v31 = vmin.f32 %v5287_v10, %v5207_v41  ;;  %v10340_v43 = vld [vmem:[#allocation91_spill] sm:$0xff]  ;;  %v10345_v57 = vld [vmem:[#allocation125_spill] sm:$0xff]  ;;  %v10348_v10 = vld [vmem:[#allocation132_spill] sm:$0xff] }
 0x488   :  { %v5254_v4 = vmin.f32 %v5252_v54, %v5210_v46  ;;  %v10342_v47 = vmin.f32 %v10340_v43, %v10341_v17  ;;  %v4971_v11 = vadd.f32 %v4906_v40, %v10348_v10  ;;  %v5172_v46 = vpop.permute.xlu0 %5171  ;;  %v10352_v54 = vld [vmem:[#allocation92_spill] sm:$0xff] }
 0x489   :  { %v5255_v16 = vmin.f32 %v5253_v18, %v5212_v2  ;;  %v5298_v22 = vmin.f32 %v5296_v29, %v5225_v7  ;;  %v4966_v2 = vadd.f32 %v4898_v35, %v10331_v34  ;;  %v5291_v56 = vmin.f32 %v5289_v31, %v5211_v36  ;;  %v10333_v18 = vld [vmem:[#allocation117_spill] sm:$0xff]  ;;  %v10347_v7 = vld [vmem:[#allocation131_spill] sm:$0xff]  ;;  %v10353_v31 = vld [vmem:[#allocation8_spill] sm:$0xff] }
 0x48a   :  { %v5218_v20 = vadd.f32 %v5136_v5, %v10333_v18  ;;  %v5256_v52 = vmin.f32 %v5254_v4, %v5214_v12  ;;  %v5036_v15 = vmin.f32 %v10342_v47, %v4967_v61  ;;  %v4970_v26 = vadd.f32 %v4906_v40, %v10347_v7  ;;  %v10355_v12 = vld [vmem:[#allocation133_spill] sm:$0xff] }
 0x48b   :  { %v5144_v58 = vpop.permute.xlu1 %5143  ;;  %v5257_v42 = vmin.f32 %v5255_v16, %v5216_v19  ;;  %v5219_v19 = vadd.f32 %v5136_v5, %v10334_v62  ;;  %v5300_v13 = vmin.f32 %v5298_v22, %v5229_v63  ;;  %v5293_v3 = vmin.f32 %v5291_v56, %v5215_v25  ;;  %v10336_v16 = vld [vmem:[#allocation122_spill] sm:$0xff] }
 0x48c   :  { %v5222_v1 = vadd.f32 %v5144_v58, %v10335_v14  ;;  %v5223_v60 = vadd.f32 %v5144_v58, %v10336_v16  ;;  %v10344_v5 = vld [vmem:[#allocation130_spill] sm:$0xff]  ;;  %v5258_v41 = vmin.f32 %v5256_v52, %v5218_v20  ;;  %v5232_v58 = vadd.f32 %v5164_v55, %v10331_v34 }
 0x48d   :  { %v5259_v48 = vmin.f32 %v5257_v42, %v5220_v28  ;;  %v10338_v28 = vld [vmem:[#allocation101_spill] sm:$0xff]  ;;  %v5295_v42 = vmin.f32 %v5293_v3, %v5219_v19  ;;  %v10354_v21 = vmin.f32 %v10352_v54, %v10353_v31  ;;  %v10356_v25 = vld [vmem:[#allocation134_spill] sm:$0xff]  ;;  %v5237_v22 = vadd.f32 %v5172_v46, %v10348_v10 }
 0x48e   :  { %v10339_v39 = vmin.f32 %v10337_v49, %v10338_v28  ;;  %v5260_v23 = vmin.f32 %v5258_v41, %v5222_v1  ;;  %v5038_v61 = vmin.f32 %v5036_v15, %v4971_v11  ;;  %v5302_v18 = vmin.f32 %v5300_v13, %v5233_v8 }
 0x48f   :  { %v5152_v53 = vpop.permute.xlu1 %5151  ;;  %v5261_v33 = vmin.f32 %v5259_v48, %v5224_v59  ;;  %v5297_v36 = vmin.f32 %v5295_v42, %v5223_v60 }
 0x490   :  { %v4999_v35 = vmin.f32 %v10339_v39, %v4966_v2  ;;  %v5226_v45 = vadd.f32 %v5152_v53, %v10345_v57  ;;  %v5227_v59 = vadd.f32 %v5152_v53, %v10346_v44  ;;  %v5304_v60 = vmin.f32 %v5302_v18, %v5237_v22 }
 0x491   :  { %v5263_v32 = vmin.f32 %v5261_v33, %v5228_v37  ;;  %v10349_v37 = vld [vmem:[#allocation100_spill] sm:$0xff]  ;;  %v5236_v33 = vadd.f32 %v5172_v46, %v10347_v7  ;;  %v10357_v46 = vld [vmem:[#allocation135_spill] sm:$0xff] }
 0x492   :  { %v10351_v63 = vmin.f32 %v10349_v37, %v10350_v24  ;;  %v5262_v34 = vmin.f32 %v5260_v23, %v5226_v45  ;;  %v5299_v2 = vmin.f32 %v5297_v36, %v5227_v59  ;;  %v5001_v9 = vmin.f32 %v4999_v35, %v4970_v26 }
 0x493   :  { %v4894_v0 = vpop.permute.xlu1 %4893  ;;  %v5265_v56 = vmin.f32 %v5263_v32, %v5232_v58 }
 0x494   :  { %v4964_v38 = vadd.f32 %v4894_v0, %v10343_v27  ;;  %v4965_v6 = vadd.f32 %v4894_v0, %v10344_v5 }
 0x495   :  { %v5267_v16 = vmin.f32 %v5265_v56, %v5236_v33 }
 0x496   :  { %v4998_v53 = vmin.f32 %v10351_v63, %v4964_v38  ;;  %v5035_v55 = vmin.f32 %v10354_v21, %v4965_v6 }
 0x497   :  { %v5160_v30 = vpop.permute.xlu1 %5159 }
 0x498   :  { %v5230_v48 = vadd.f32 %v5160_v30, %v10343_v27  ;;  %v5231_v29 = vadd.f32 %v5160_v30, %v10344_v5 }
 0x49a   :  { %v5264_v20 = vmin.f32 %v5262_v34, %v5230_v48  ;;  %v5301_v62 = vmin.f32 %v5299_v2, %v5231_v29  ;;  %v5313_v29 = vld [vmem:[#allocation2 + $0x7] ss:$8 sm:$0x3] }
 0x49b   :  { %v4902_v50 = vpop.permute.xlu1 %4901 }
 0x49c   :  { %v4968_v51 = vadd.f32 %v4902_v50, %v10355_v12  ;;  %v4969_v0 = vadd.f32 %v4902_v50, %v10356_v25 }
 0x49e   :  { %v5000_v40 = vmin.f32 %v4998_v53, %v4968_v51  ;;  %v5037_v4 = vmin.f32 %v5035_v55, %v4969_v0  ;;  %v5336_v53 = vld [vmem:[#allocation3 + $0x7] ss:$8 sm:$0x3] }
 0x49f   :  { %v5168_v19 = vpop.permute.xlu1 %5167 }
 0x4a0   :  { %v5002_v52 = vmin.f32 %v5000_v40, %v5001_v9  ;;  %v5039_v3 = vmin.f32 %v5037_v4, %v5038_v61  ;;  %v5234_v14 = vadd.f32 %v5168_v19, %v10355_v12  ;;  %v5235_v1 = vadd.f32 %v5168_v19, %v10356_v25 }
 0x4a2   :  { %v5003_v30 = vrot.slane %v5002_v52, 4  ;;  %v5040_v49 = vrot.slane %v5039_v3, 4  ;;  %v5266_v28 = vmin.f32 %v5264_v20, %v5234_v14  ;;  %v5303_v39 = vmin.f32 %v5301_v62, %v5235_v1 }
 0x4a4   :  { %v5004_v35 = vmin.f32 %v5002_v52, %v5003_v30  ;;  %v5041_v43 = vmin.f32 %v5039_v3, %v5040_v49  ;;  %v5268_v17 = vmin.f32 %v5266_v28, %v5267_v16  ;;  %v5305_v32 = vmin.f32 %v5303_v39, %v5304_v60 }
 0x4a6   :  { %v5005_v13 = vrot.slane %v5004_v35, 2  ;;  %v5042_v47 = vrot.slane %v5041_v43, 2  ;;  %v5269_v15 = vrot.slane %v5268_v17, 4  ;;  %v5306_v27 = vrot.slane %v5305_v32, 4 }
 0x4a8   :  { %v5006_v38 = vmin.f32 %v5004_v35, %v5005_v13  ;;  %v5043_v5 = vmin.f32 %v5041_v43, %v5042_v47  ;;  %v5270_v6 = vmin.f32 %v5268_v17, %v5269_v15  ;;  %v5307_v41 = vmin.f32 %v5305_v32, %v5306_v27 }
 0x4aa   :  { %v5007_v42 = vrot.slane %v5006_v38, 1  ;;  %v5044_v57 = vrot.slane %v5043_v5, 1  ;;  %v5271_v45 = vrot.slane %v5270_v6, 2  ;;  %v5308_v44 = vrot.slane %v5307_v41, 2 }
 0x4ac   :  { %v5008_v59 = vmin.f32 %v5006_v38, %v5007_v42  ;;  %v5045_v58 = vmin.f32 %v5043_v5, %v5044_v57  ;;  %v5272_v8 = vmin.f32 %v5270_v6, %v5271_v45  ;;  %v5309_v7 = vmin.f32 %v5307_v41, %v5308_v44 }
 0x4ae   :  { %v5316_v26 = vcombine.low %v5008_v59, %v5045_v58  ;;  %v5273_v10 = vrot.slane %v5272_v8, 1  ;;  %v5310_v11 = vrot.slane %v5309_v7, 1 }
 0x4b0   :  { %v5323_v23 = vrot.slane %v5316_v26, %v10357_v46  ;;  %v5274_v36 = vmin.f32 %v5272_v8, %v5273_v10  ;;  %v5311_v48 = vmin.f32 %v5309_v7, %v5310_v11 }
 0x4b2   :  { %v5330_v50 = vrot.slane %v5323_v23, %v10357_v46  ;;  %v5339_v37 = vcombine.low %v5274_v36, %v5311_v48 }
 0x4b4   :  { %v5332_v24 = vmin.f32 %v5313_v29, %v5330_v50  ;;  %v5346_v63 = vrot.slane %v5339_v37, %v10357_v46 }
 0x4b6   :  { %5333 = vst.msk [vmem:[#allocation2 + $0x7] ss:$8 sm:$0x3] %vm6675_vm0, %v5332_v24  ;;  %v5353_v31 = vrot.slane %v5346_v63, %v10357_v46 }
 0x4b8   :  { %v5355_v21 = vmin.f32 %v5336_v53, %v5353_v31 }
 0x4ba   :  { %5356 = vst.msk [vmem:[#allocation3 + $0x7] ss:$8 sm:$0x3] %vm6675_vm0, %v5355_v21 }
 0x4bd   :  { %v5358_v55 = vld [vmem:[#allocation2] sm:$0xff]  ;;  %v5359_v12 = vld [vmem:[#allocation2 + $0x8] sm:$0xff] }
 0x4be   :  { %5443 = vrsqrt.f32 %v5358_v55  ;;  %vm5366_vm1 = vcmp.eq.f32.partialorder %v5358_v55, inf  ;;  %vm5362_vm2 = vcmp.lt.f32.partialorder %v5358_v55, 1e+20  ;;  %vm5373_vm3 = vcmp.eq.f32.partialorder %v5359_v12, inf }
 0x4bf   :  { %5445 = vrsqrt.f32 %v5359_v12  ;;  %vm5363_vm4 = vcmp.lt.f32.partialorder %v5359_v12, 1e+20  ;;  %vm5368_vm5 = vcmp.eq.f32.partialorder %v5358_v55, 0.0  ;;  %v5369_v61 = vand.u32 2147483648, %v5358_v55 }
 0x4c0   :  { %vm5375_vm6 = vcmp.eq.f32.partialorder %v5359_v12, 0.0  ;;  %v5376_v56 = vand.u32 2147483648, %v5359_v12 }
 0x4c1   :  { %v5360_v51 = vld [vmem:[#allocation3] sm:$0xff]  ;;  %v5361_v25 = vld [vmem:[#allocation3 + $0x8] sm:$0xff] }
 0x4c2   :  { %5447 = vrsqrt.f32 %v5360_v51  ;;  %vm5384_vm7 = vcmp.eq.f32.partialorder %v5360_v51, inf  ;;  %vm5386_vm8 = vcmp.eq.f32.partialorder %v5360_v51, 0.0  ;;  %v5387_v62 = vand.u32 2147483648, %v5360_v51 }
 0x4c3   :  { %5449 = vrsqrt.f32 %v5361_v25  ;;  %vm5391_vm9 = vcmp.eq.f32.partialorder %v5361_v25, inf  ;;  %v5394_v14 = vand.u32 2147483648, %v5361_v25  ;;  %vm5380_vm10 = vcmp.lt.f32.partialorder %v5360_v51, 1e+20 }
 0x4c4   :  { %vm5393_vm11 = vcmp.eq.f32.partialorder %v5361_v25, 0.0  ;;  %vm5381_vm12 = vcmp.lt.f32.partialorder %v5361_v25, 1e+20 }
 0x4c8   :  { %v5444_v0 = vpop.eup %5443 }
 0x4c9   :  { %v5446_v33 = vpop.eup %5445  ;;  %v5365_v22 = vmul.f32 %v5444_v0, %v5358_v55 }
 0x4ca   :  { %v5372_v34 = vmul.f32 %v5446_v33, %v5359_v12 }
 0x4cb   :  { %v5367_v2 = vsel %vm5366_vm1, %v5358_v55, %v5365_v22 }
 0x4cc   :  { %v5448_v9 = vpop.eup %5447  ;;  %v5374_v40 = vsel %vm5373_vm3, %v5359_v12, %v5372_v34  ;;  %v5370_v20 = vsel %vm5368_vm5, %v5369_v61, %v5367_v2 }
 0x4cd   :  { %v5450_v4 = vpop.eup %5449  ;;  %v5383_v18 = vmul.f32 %v5448_v9, %v5360_v51  ;;  %v5377_v52 = vsel %vm5375_vm6, %v5376_v56, %v5374_v40  ;;  %v5378_v60 = vsel %vm5362_vm2, %v5370_v20, 0.0 }
 0x4ce   :  { %v5390_v19 = vmul.f32 %v5450_v4, %v5361_v25  ;;  %v5379_v28 = vsel %vm5363_vm4, %v5377_v52, 0.0 }
 0x4cf   :  { %v5385_v3 = vsel %vm5384_vm7, %v5360_v51, %v5383_v18 }
 0x4d0   :  { %v5388_v1 = vsel %vm5386_vm8, %v5387_v62, %v5385_v3  ;;  %v5392_v16 = vsel %vm5391_vm9, %v5361_v25, %v5390_v19 }
 0x4d1   :  { %v5395_v30 = vsel %vm5393_vm11, %v5394_v14, %v5392_v16  ;;  %v5396_v49 = vsel %vm5380_vm10, %v5388_v1, 0.0 }
 0x4d2   :  { %v5397_v39 = vsel %vm5381_vm12, %v5395_v30, 0.0  ;;  %v5398_v35 = vadd.f32 %v5396_v49, %v5378_v60 }
 0x4d3   :  { %v5399_v43 = vadd.f32 %v5397_v39, %v5379_v28 }
 0x4d4   :  { %5400 = vst [vmem:[#allocation4] sm:$0xff] %v5398_v35 }
 0x4d5   :  { %5401 = vst [vmem:[#allocation4 + $0x8] sm:$0xff] %v5399_v43 }
 0x4d6   :  { %5462 = shalt.err (!%p5459_p4)
}
 0x4d7   :  { %s5463_s16 = scalar_lea.hbm %s8725_s1, 256 }
 0x4d8   :  { %p5464_p5 = scmp.ne.s32.totalorder %s8725_s1, %s5463_s16  ;;  %p5467_p6 = scmp.lt.u32.totalorder %s5463_s16, %s8725_s1 }
 0x4da   :  { %p5469_p7 = pnand %p5467_p6, %p5464_p5 }
 0x4dc   :  { %5472 = shalt.err (!%p5469_p7)
}
 0x4dd   :  { %5411 = dma.vmem_to_hbm [thread:$0]  %s5409_s12, 256, %s8725_s1, [#allocation5]  }
 0x4de   :  { %5473 = dma.done.wait [#allocation5], 256  }
 0x4df   :  { %5474 = vsyncadd [#allocation5], 4294967040 }
 0x4e0   :  { %5415 = vsyncpa [#allocation5], 1 }

</bundles_post_ra>
